<compile_context>
chip_gen: v7x
topology: tpu7x:2x2x1
jax: 0.10.0
libtpu: 0.0.40
codegen_flags: <defaults>
</compile_context>

<pallas_src>
import functools

import jax
import jax.numpy as jnp
from jax import lax
from jax.experimental import pallas as pl
from jax.experimental.pallas import tpu as pltpu


# --------------------------------------------------------------------------
# Kernel
# --------------------------------------------------------------------------
def _bn_kernel(x_ref, wb_ref, o_ref, *, eps, inv_m, c_chunk, n_chunks):
    """Per grid step: one channel block.  Streamed in channel sub-chunks so
    vreg pressure stays bounded (no full-tile live value / spills)."""

    def chunk_body(ci, carry):
        c0 = pl.multiple_of(ci * c_chunk, c_chunk)
        cs = pl.ds(c0, c_chunk)

        x = x_ref[:, cs, :].astype(jnp.float32)                  # (N, cc, HW)
        # Two-pass moments (mean, then centered second moment) — better
        # precision than E[x^2]-E[x]^2 and the tile is already in VMEM.
        mean = jnp.sum(x, axis=(0, 2), keepdims=True) * inv_m    # (1, cc, 1)
        d = x - mean
        var = jnp.sum(d * d, axis=(0, 2), keepdims=True) * inv_m
        inv_std = lax.rsqrt(var + eps)

        w = wb_ref[0, cs, :][None]                               # (1, cc, 1)
        b = wb_ref[1, cs, :][None]
        o_ref[:, cs, :] = (d * (w * inv_std) + b).astype(o_ref.dtype)
        return carry

    lax.fori_loop(0, n_chunks, chunk_body, 0, unroll=True)


# --------------------------------------------------------------------------
# Tile / chunk selection helpers
# --------------------------------------------------------------------------
def _padded_block_bytes(n, ct, hw, itemsize):
    """VMEM footprint of one (n, ct, hw) block with sublane/lane padding."""
    ct_p = -(-ct // 8) * 8
    hw_p = -(-hw // 128) * 128
    return n * ct_p * hw_p * itemsize


def _vmem_cap_bytes(default=48 * 1024 * 1024):
    try:
        cap = int(pltpu.get_tpu_info().vmem_capacity_bytes)
        if cap > 0:
            return int(cap * 0.9)
    except Exception:
        pass
    return default


def _num_tensorcores():
    """2 TensorCores per chip on v7x (and megacore v4/v5p); 1 on v5e/v6e.
    Over/under-counting only affects grid-step count, never correctness."""
    try:
        kind = jax.devices()[0].device_kind.lower()
    except Exception:
        return 1
    if "v7" in kind or "v4" in kind or "v5p" in kind:
        return 2
    return 1


def _pick_c_tile(C, N, HW, num_tc, itemsize, budget_bytes):
    """One block per TensorCore when it fits; otherwise the largest divisor
    of C (multiple of 8) whose padded double-buffered in+out fits the budget."""
    if C % 8 != 0:
        return C  # full-array block (allowed when equal to the full dim)

    def fits(ct):
        return 4 * _padded_block_bytes(N, ct, HW, itemsize) <= budget_bytes

    if C % num_tc == 0:
        target = C // num_tc
        if target % 8 == 0 and fits(target):
            return target

    divs = [d for d in range(8, C + 1, 8) if C % d == 0]
    fitting = [d for d in divs if fits(d)]
    if fitting:
        return max(fitting)
    return min(divs) if divs else C


def _pick_c_chunk(c_tile, N, HW, max_vregs=16):
    """Largest channel sub-chunk (divisor of c_tile, multiple of 8, <=256)
    whose loaded value stays within ~max_vregs vregs."""
    if c_tile % 8 != 0 or c_tile <= 8:
        return c_tile
    lane_cols = max(1, -(-HW // 128))
    best = 8
    for d in range(8, min(c_tile, 256) + 1, 8):
        if c_tile % d != 0:
            continue
        if N * (d // 8) * lane_cols <= max_vregs:
            best = d
    return best


# --------------------------------------------------------------------------
# Wrapper
# --------------------------------------------------------------------------
def batchnorm2d_pallas(x, weight, bias, *, eps=1e-3):
    """x: (N, C, H, W); weight/bias: (C,). Returns (N, C, H, W)."""
    N, C, H, W = x.shape
    HW = H * W
    inv_m = 1.0 / float(N * HW)
    itemsize = jnp.dtype(x.dtype).itemsize

    # Pure contiguous reshapes — no HBM transpose passes.
    x3 = x.reshape(N, C, HW)
    wb = jnp.stack(
        [weight.astype(jnp.float32), bias.astype(jnp.float32)]
    ).reshape(2, C, 1)

    num_tc = _num_tensorcores()
    vmem_cap = _vmem_cap_bytes()
    budget = int(min(40 * 1024 * 1024, 0.75 * vmem_cap))

    c_tile = _pick_c_tile(C, N, HW, num_tc, itemsize, budget)
    c_chunk = _pick_c_chunk(c_tile, N, HW)
    if c_tile % c_chunk != 0:
        c_chunk, n_chunks = c_tile, 1
    else:
        n_chunks = c_tile // c_chunk

    grid = (C // c_tile,)

    # Explicit scoped-VMEM limit sized from the padded footprint.
    padded = _padded_block_bytes(N, c_tile, HW, itemsize)
    needed = 4 * padded + 64 * 1024  # double-buffered (in + out) + params
    vmem_limit = int(min(max(32 * 1024 * 1024, int(needed * 1.25)), vmem_cap))

    cost = pl.CostEstimate(
        flops=int(7 * N * C * HW),
        transcendentals=int(C),
        bytes_accessed=int(2 * N * C * HW * itemsize + 2 * C * 4),
    )

    out3 = pl.pallas_call(
        functools.partial(
            _bn_kernel, eps=float(eps), inv_m=inv_m,
            c_chunk=c_chunk, n_chunks=n_chunks,
        ),
        out_shape=jax.ShapeDtypeStruct((N, C, HW), x.dtype),
        grid=grid,
        in_specs=[
            pl.BlockSpec((N, c_tile, HW), lambda i: (0, i, 0)),
            pl.BlockSpec((2, c_tile, 1), lambda i: (0, i, 0)),
        ],
        out_specs=pl.BlockSpec((N, c_tile, HW), lambda i: (0, i, 0)),
        compiler_params=pltpu.CompilerParams(
            dimension_semantics=("parallel",),
            vmem_limit_bytes=vmem_limit,
        ),
        cost_estimate=cost,
    )(x3, wb)

    return out3.reshape(N, C, H, W)


def _reference_bn(x, weight, bias, eps=1e-3):
    xf = x.astype(jnp.float32)
    mean = jnp.mean(xf, axis=(0, 2, 3), keepdims=True)
    var = jnp.mean((xf - mean) ** 2, axis=(0, 2, 3), keepdims=True)
    y = (xf - mean) / jnp.sqrt(var + eps) * weight.reshape(1, -1, 1, 1) \
        + bias.reshape(1, -1, 1, 1)
    return y.astype(x.dtype)


if __name__ == "__main__":
    # Shape from the module's forward: x593 ~ [1, 1344, 7, 7]
    N, C, H, W = 1, 1344, 7, 7
    key = jax.random.PRNGKey(0)
    kx, kw, kb = jax.random.split(key, 3)

    x = jax.random.normal(kx, (N, C, H, W), dtype=jnp.float32)
    # deterministic synthetic affine params (PyTorch default would be 1s/0s)
    weight = 1.0 + 0.1 * jax.random.normal(kw, (C,), dtype=jnp.float32)
    bias = 0.1 * jax.random.normal(kb, (C,), dtype=jnp.float32)

    out = jax.block_until_ready(batchnorm2d_pallas(x, weight, bias, eps=1e-3))

    ref = _reference_bn(x, weight, bias, eps=1e-3)
    assert out.shape == (N, C, H, W)
    assert jnp.allclose(out, ref, atol=1e-4, rtol=1e-4), "mismatch vs reference"

    print("KERNEL_OK")
</pallas_src>

<mosaic_0001>
module attributes {stable_mosaic.version = 11 : i64} {
  func.func @_bn_kernel(%arg0: i32, %arg1: memref<1x1344x49xf32, #tpu.memory_space<vmem>>, %arg2: memref<2x1344x1xf32, #tpu.memory_space<vmem>>, %arg3: memref<1x1344x49xf32, #tpu.memory_space<vmem>>) attributes {dimension_semantics = [#tpu.dimension_semantics<parallel>], iteration_bounds = array<i64: 1>, scalar_prefetch = 0 : i64, scratch_operands = 0 : i64, tpu.core_type = #tpu.core_type<tc>, window_params = [{transform_indices = @transform_0, window_bounds = array<i64: 1, 1344, 49>}, {transform_indices = @transform_1, window_bounds = array<i64: 2, 1344, 1>}, {transform_indices = @transform_2, window_bounds = array<i64: 1, 1344, 49>}]} {
    %c0_i32 = arith.constant 0 : i32
    %c112_i32 = arith.constant 112 : i32
    %0 = arith.muli %c0_i32, %c112_i32 : i32
    %1 = tpu.assume_multiple %0, 112 : i32
    %c0 = arith.constant 0 : index
    %2 = arith.index_cast %1 : i32 to index
    %c0_0 = arith.constant 0 : index
    %3 = vector.load %arg1[%c0, %2, %c0_0] : memref<1x1344x49xf32, #tpu.memory_space<vmem>>, vector<1x112x49xf32>
    %cst = arith.constant dense<0.000000e+00> : vector<112xf32>
    %4 = vector.multi_reduction <add>, %3, %cst [0, 2] : vector<1x112x49xf32> to vector<112xf32>
    %5 = vector.shape_cast %4 : vector<112xf32> to vector<1x112x1xf32>
    %cst_1 = arith.constant 0.0204081628 : f32
    %6 = vector.broadcast %cst_1 : f32 to vector<1x112x1xf32>
    %7 = arith.mulf %5, %6 : vector<1x112x1xf32>
    %8 = vector.broadcast %7 : vector<1x112x1xf32> to vector<1x112x49xf32>
    %9 = arith.subf %3, %8 : vector<1x112x49xf32>
    %10 = arith.mulf %9, %9 : vector<1x112x49xf32>
    %cst_2 = arith.constant dense<0.000000e+00> : vector<112xf32>
    %11 = vector.multi_reduction <add>, %10, %cst_2 [0, 2] : vector<1x112x49xf32> to vector<112xf32>
    %12 = vector.shape_cast %11 : vector<112xf32> to vector<1x112x1xf32>
    %cst_3 = arith.constant 0.0204081628 : f32
    %13 = vector.broadcast %cst_3 : f32 to vector<1x112x1xf32>
    %14 = arith.mulf %12, %13 : vector<1x112x1xf32>
    %cst_4 = arith.constant 1.000000e-03 : f32
    %15 = vector.broadcast %cst_4 : f32 to vector<1x112x1xf32>
    %16 = arith.addf %14, %15 : vector<1x112x1xf32>
    %17 = math.rsqrt %16 : vector<1x112x1xf32>
    %c0_5 = arith.constant 0 : index
    %18 = arith.index_cast %1 : i32 to index
    %c0_6 = arith.constant 0 : index
    %19 = vector.load %arg2[%c0_5, %18, %c0_6] : memref<2x1344x1xf32, #tpu.memory_space<vmem>>, vector<1x112x1xf32>
    %20 = vector.shape_cast %19 : vector<1x112x1xf32> to vector<112x1xf32>
    %21 = vector.shape_cast %20 : vector<112x1xf32> to vector<1x112x1xf32>
    %c1 = arith.constant 1 : index
    %22 = arith.index_cast %1 : i32 to index
    %c0_7 = arith.constant 0 : index
    %23 = vector.load %arg2[%c1, %22, %c0_7] : memref<2x1344x1xf32, #tpu.memory_space<vmem>>, vector<1x112x1xf32>
    %24 = vector.shape_cast %23 : vector<1x112x1xf32> to vector<112x1xf32>
    %25 = vector.shape_cast %24 : vector<112x1xf32> to vector<1x112x1xf32>
    %26 = arith.mulf %21, %17 : vector<1x112x1xf32>
    %27 = vector.broadcast %26 : vector<1x112x1xf32> to vector<1x112x49xf32>
    %28 = arith.mulf %9, %27 : vector<1x112x49xf32>
    %29 = vector.broadcast %25 : vector<1x112x1xf32> to vector<1x112x49xf32>
    %30 = arith.addf %28, %29 : vector<1x112x49xf32>
    %c0_8 = arith.constant 0 : index
    %31 = arith.index_cast %1 : i32 to index
    %c0_9 = arith.constant 0 : index
    %32 = vector.load %arg3[%c0_8, %31, %c0_9] : memref<1x1344x49xf32, #tpu.memory_space<vmem>>, vector<1x112x49xf32>
    tpu.vector_store %arg3[%c0_8, %31, %c0_9], %30 {strides = array<i32>} : memref<1x1344x49xf32, #tpu.memory_space<vmem>>, vector<1x112x49xf32>,
    %c1_i32 = arith.constant 1 : i32
    %c112_i32_10 = arith.constant 112 : i32
    %33 = arith.muli %c1_i32, %c112_i32_10 : i32
    %34 = tpu.assume_multiple %33, 112 : i32
    %c0_11 = arith.constant 0 : index
    %35 = arith.index_cast %34 : i32 to index
    %c0_12 = arith.constant 0 : index
    %36 = vector.load %arg1[%c0_11, %35, %c0_12] : memref<1x1344x49xf32, #tpu.memory_space<vmem>>, vector<1x112x49xf32>
    %cst_13 = arith.constant dense<0.000000e+00> : vector<112xf32>
    %37 = vector.multi_reduction <add>, %36, %cst_13 [0, 2] : vector<1x112x49xf32> to vector<112xf32>
    %38 = vector.shape_cast %37 : vector<112xf32> to vector<1x112x1xf32>
    %cst_14 = arith.constant 0.0204081628 : f32
    %39 = vector.broadcast %cst_14 : f32 to vector<1x112x1xf32>
    %40 = arith.mulf %38, %39 : vector<1x112x1xf32>
    %41 = vector.broadcast %40 : vector<1x112x1xf32> to vector<1x112x49xf32>
    %42 = arith.subf %36, %41 : vector<1x112x49xf32>
    %43 = arith.mulf %42, %42 : vector<1x112x49xf32>
    %cst_15 = arith.constant dense<0.000000e+00> : vector<112xf32>
    %44 = vector.multi_reduction <add>, %43, %cst_15 [0, 2] : vector<1x112x49xf32> to vector<112xf32>
    %45 = vector.shape_cast %44 : vector<112xf32> to vector<1x112x1xf32>
    %cst_16 = arith.constant 0.0204081628 : f32
    %46 = vector.broadcast %cst_16 : f32 to vector<1x112x1xf32>
    %47 = arith.mulf %45, %46 : vector<1x112x1xf32>
    %cst_17 = arith.constant 1.000000e-03 : f32
    %48 = vector.broadcast %cst_17 : f32 to vector<1x112x1xf32>
    %49 = arith.addf %47, %48 : vector<1x112x1xf32>
    %50 = math.rsqrt %49 : vector<1x112x1xf32>
    %c0_18 = arith.constant 0 : index
    %51 = arith.index_cast %34 : i32 to index
    %c0_19 = arith.constant 0 : index
    %52 = vector.load %arg2[%c0_18, %51, %c0_19] : memref<2x1344x1xf32, #tpu.memory_space<vmem>>, vector<1x112x1xf32>
    %53 = vector.shape_cast %52 : vector<1x112x1xf32> to vector<112x1xf32>
    %54 = vector.shape_cast %53 : vector<112x1xf32> to vector<1x112x1xf32>
    %c1_20 = arith.constant 1 : index
    %55 = arith.index_cast %34 : i32 to index
    %c0_21 = arith.constant 0 : index
    %56 = vector.load %arg2[%c1_20, %55, %c0_21] : memref<2x1344x1xf32, #tpu.memory_space<vmem>>, vector<1x112x1xf32>
    %57 = vector.shape_cast %56 : vector<1x112x1xf32> to vector<112x1xf32>
    %58 = vector.shape_cast %57 : vector<112x1xf32> to vector<1x112x1xf32>
    %59 = arith.mulf %54, %50 : vector<1x112x1xf32>
    %60 = vector.broadcast %59 : vector<1x112x1xf32> to vector<1x112x49xf32>
    %61 = arith.mulf %42, %60 : vector<1x112x49xf32>
    %62 = vector.broadcast %58 : vector<1x112x1xf32> to vector<1x112x49xf32>
    %63 = arith.addf %61, %62 : vector<1x112x49xf32>
    %c0_22 = arith.constant 0 : index
    %64 = arith.index_cast %34 : i32 to index
    %c0_23 = arith.constant 0 : index
    %65 = vector.load %arg3[%c0_22, %64, %c0_23] : memref<1x1344x49xf32, #tpu.memory_space<vmem>>, vector<1x112x49xf32>
    tpu.vector_store %arg3[%c0_22, %64, %c0_23], %63 {strides = array<i32>} : memref<1x1344x49xf32, #tpu.memory_space<vmem>>, vector<1x112x49xf32>,
    %c2_i32 = arith.constant 2 : i32
    %c112_i32_24 = arith.constant 112 : i32
    %66 = arith.muli %c2_i32, %c112_i32_24 : i32
    %67 = tpu.assume_multiple %66, 112 : i32
    %c0_25 = arith.constant 0 : index
    %68 = arith.index_cast %67 : i32 to index
    %c0_26 = arith.constant 0 : index
    %69 = vector.load %arg1[%c0_25, %68, %c0_26] : memref<1x1344x49xf32, #tpu.memory_space<vmem>>, vector<1x112x49xf32>
    %cst_27 = arith.constant dense<0.000000e+00> : vector<112xf32>
    %70 = vector.multi_reduction <add>, %69, %cst_27 [0, 2] : vector<1x112x49xf32> to vector<112xf32>
    %71 = vector.shape_cast %70 : vector<112xf32> to vector<1x112x1xf32>
    %cst_28 = arith.constant 0.0204081628 : f32
    %72 = vector.broadcast %cst_28 : f32 to vector<1x112x1xf32>
    %73 = arith.mulf %71, %72 : vector<1x112x1xf32>
    %74 = vector.broadcast %73 : vector<1x112x1xf32> to vector<1x112x49xf32>
    %75 = arith.subf %69, %74 : vector<1x112x49xf32>
    %76 = arith.mulf %75, %75 : vector<1x112x49xf32>
    %cst_29 = arith.constant dense<0.000000e+00> : vector<112xf32>
    %77 = vector.multi_reduction <add>, %76, %cst_29 [0, 2] : vector<1x112x49xf32> to vector<112xf32>
    %78 = vector.shape_cast %77 : vector<112xf32> to vector<1x112x1xf32>
    %cst_30 = arith.constant 0.0204081628 : f32
    %79 = vector.broadcast %cst_30 : f32 to vector<1x112x1xf32>
    %80 = arith.mulf %78, %79 : vector<1x112x1xf32>
    %cst_31 = arith.constant 1.000000e-03 : f32
    %81 = vector.broadcast %cst_31 : f32 to vector<1x112x1xf32>
    %82 = arith.addf %80, %81 : vector<1x112x1xf32>
    %83 = math.rsqrt %82 : vector<1x112x1xf32>
    %c0_32 = arith.constant 0 : index
    %84 = arith.index_cast %67 : i32 to index
    %c0_33 = arith.constant 0 : index
    %85 = vector.load %arg2[%c0_32, %84, %c0_33] : memref<2x1344x1xf32, #tpu.memory_space<vmem>>, vector<1x112x1xf32>
    %86 = vector.shape_cast %85 : vector<1x112x1xf32> to vector<112x1xf32>
    %87 = vector.shape_cast %86 : vector<112x1xf32> to vector<1x112x1xf32>
    %c1_34 = arith.constant 1 : index
    %88 = arith.index_cast %67 : i32 to index
    %c0_35 = arith.constant 0 : index
    %89 = vector.load %arg2[%c1_34, %88, %c0_35] : memref<2x1344x1xf32, #tpu.memory_space<vmem>>, vector<1x112x1xf32>
    %90 = vector.shape_cast %89 : vector<1x112x1xf32> to vector<112x1xf32>
    %91 = vector.shape_cast %90 : vector<112x1xf32> to vector<1x112x1xf32>
    %92 = arith.mulf %87, %83 : vector<1x112x1xf32>
    %93 = vector.broadcast %92 : vector<1x112x1xf32> to vector<1x112x49xf32>
    %94 = arith.mulf %75, %93 : vector<1x112x49xf32>
    %95 = vector.broadcast %91 : vector<1x112x1xf32> to vector<1x112x49xf32>
    %96 = arith.addf %94, %95 : vector<1x112x49xf32>
    %c0_36 = arith.constant 0 : index
    %97 = arith.index_cast %67 : i32 to index
    %c0_37 = arith.constant 0 : index
    %98 = vector.load %arg3[%c0_36, %97, %c0_37] : memref<1x1344x49xf32, #tpu.memory_space<vmem>>, vector<1x112x49xf32>
    tpu.vector_store %arg3[%c0_36, %97, %c0_37], %96 {strides = array<i32>} : memref<1x1344x49xf32, #tpu.memory_space<vmem>>, vector<1x112x49xf32>,
    %c3_i32 = arith.constant 3 : i32
    %c112_i32_38 = arith.constant 112 : i32
    %99 = arith.muli %c3_i32, %c112_i32_38 : i32
    %100 = tpu.assume_multiple %99, 112 : i32
    %c0_39 = arith.constant 0 : index
    %101 = arith.index_cast %100 : i32 to index
    %c0_40 = arith.constant 0 : index
    %102 = vector.load %arg1[%c0_39, %101, %c0_40] : memref<1x1344x49xf32, #tpu.memory_space<vmem>>, vector<1x112x49xf32>
    %cst_41 = arith.constant dense<0.000000e+00> : vector<112xf32>
    %103 = vector.multi_reduction <add>, %102, %cst_41 [0, 2] : vector<1x112x49xf32> to vector<112xf32>
    %104 = vector.shape_cast %103 : vector<112xf32> to vector<1x112x1xf32>
    %cst_42 = arith.constant 0.0204081628 : f32
    %105 = vector.broadcast %cst_42 : f32 to vector<1x112x1xf32>
    %106 = arith.mulf %104, %105 : vector<1x112x1xf32>
    %107 = vector.broadcast %106 : vector<1x112x1xf32> to vector<1x112x49xf32>
    %108 = arith.subf %102, %107 : vector<1x112x49xf32>
    %109 = arith.mulf %108, %108 : vector<1x112x49xf32>
    %cst_43 = arith.constant dense<0.000000e+00> : vector<112xf32>
    %110 = vector.multi_reduction <add>, %109, %cst_43 [0, 2] : vector<1x112x49xf32> to vector<112xf32>
    %111 = vector.shape_cast %110 : vector<112xf32> to vector<1x112x1xf32>
    %cst_44 = arith.constant 0.0204081628 : f32
    %112 = vector.broadcast %cst_44 : f32 to vector<1x112x1xf32>
    %113 = arith.mulf %111, %112 : vector<1x112x1xf32>
    %cst_45 = arith.constant 1.000000e-03 : f32
    %114 = vector.broadcast %cst_45 : f32 to vector<1x112x1xf32>
    %115 = arith.addf %113, %114 : vector<1x112x1xf32>
    %116 = math.rsqrt %115 : vector<1x112x1xf32>
    %c0_46 = arith.constant 0 : index
    %117 = arith.index_cast %100 : i32 to index
    %c0_47 = arith.constant 0 : index
    %118 = vector.load %arg2[%c0_46, %117, %c0_47] : memref<2x1344x1xf32, #tpu.memory_space<vmem>>, vector<1x112x1xf32>
    %119 = vector.shape_cast %118 : vector<1x112x1xf32> to vector<112x1xf32>
    %120 = vector.shape_cast %119 : vector<112x1xf32> to vector<1x112x1xf32>
    %c1_48 = arith.constant 1 : index
    %121 = arith.index_cast %100 : i32 to index
    %c0_49 = arith.constant 0 : index
    %122 = vector.load %arg2[%c1_48, %121, %c0_49] : memref<2x1344x1xf32, #tpu.memory_space<vmem>>, vector<1x112x1xf32>
    %123 = vector.shape_cast %122 : vector<1x112x1xf32> to vector<112x1xf32>
    %124 = vector.shape_cast %123 : vector<112x1xf32> to vector<1x112x1xf32>
    %125 = arith.mulf %120, %116 : vector<1x112x1xf32>
    %126 = vector.broadcast %125 : vector<1x112x1xf32> to vector<1x112x49xf32>
    %127 = arith.mulf %108, %126 : vector<1x112x49xf32>
    %128 = vector.broadcast %124 : vector<1x112x1xf32> to vector<1x112x49xf32>
    %129 = arith.addf %127, %128 : vector<1x112x49xf32>
    %c0_50 = arith.constant 0 : index
    %130 = arith.index_cast %100 : i32 to index
    %c0_51 = arith.constant 0 : index
    %131 = vector.load %arg3[%c0_50, %130, %c0_51] : memref<1x1344x49xf32, #tpu.memory_space<vmem>>, vector<1x112x49xf32>
    tpu.vector_store %arg3[%c0_50, %130, %c0_51], %129 {strides = array<i32>} : memref<1x1344x49xf32, #tpu.memory_space<vmem>>, vector<1x112x49xf32>,
    %c4_i32 = arith.constant 4 : i32
    %c112_i32_52 = arith.constant 112 : i32
    %132 = arith.muli %c4_i32, %c112_i32_52 : i32
    %133 = tpu.assume_multiple %132, 112 : i32
    %c0_53 = arith.constant 0 : index
    %134 = arith.index_cast %133 : i32 to index
    %c0_54 = arith.constant 0 : index
    %135 = vector.load %arg1[%c0_53, %134, %c0_54] : memref<1x1344x49xf32, #tpu.memory_space<vmem>>, vector<1x112x49xf32>
    %cst_55 = arith.constant dense<0.000000e+00> : vector<112xf32>
    %136 = vector.multi_reduction <add>, %135, %cst_55 [0, 2] : vector<1x112x49xf32> to vector<112xf32>
    %137 = vector.shape_cast %136 : vector<112xf32> to vector<1x112x1xf32>
    %cst_56 = arith.constant 0.0204081628 : f32
    %138 = vector.broadcast %cst_56 : f32 to vector<1x112x1xf32>
    %139 = arith.mulf %137, %138 : vector<1x112x1xf32>
    %140 = vector.broadcast %139 : vector<1x112x1xf32> to vector<1x112x49xf32>
    %141 = arith.subf %135, %140 : vector<1x112x49xf32>
    %142 = arith.mulf %141, %141 : vector<1x112x49xf32>
    %cst_57 = arith.constant dense<0.000000e+00> : vector<112xf32>
    %143 = vector.multi_reduction <add>, %142, %cst_57 [0, 2] : vector<1x112x49xf32> to vector<112xf32>
    %144 = vector.shape_cast %143 : vector<112xf32> to vector<1x112x1xf32>
    %cst_58 = arith.constant 0.0204081628 : f32
    %145 = vector.broadcast %cst_58 : f32 to vector<1x112x1xf32>
    %146 = arith.mulf %144, %145 : vector<1x112x1xf32>
    %cst_59 = arith.constant 1.000000e-03 : f32
    %147 = vector.broadcast %cst_59 : f32 to vector<1x112x1xf32>
    %148 = arith.addf %146, %147 : vector<1x112x1xf32>
    %149 = math.rsqrt %148 : vector<1x112x1xf32>
    %c0_60 = arith.constant 0 : index
    %150 = arith.index_cast %133 : i32 to index
    %c0_61 = arith.constant 0 : index
    %151 = vector.load %arg2[%c0_60, %150, %c0_61] : memref<2x1344x1xf32, #tpu.memory_space<vmem>>, vector<1x112x1xf32>
    %152 = vector.shape_cast %151 : vector<1x112x1xf32> to vector<112x1xf32>
    %153 = vector.shape_cast %152 : vector<112x1xf32> to vector<1x112x1xf32>
    %c1_62 = arith.constant 1 : index
    %154 = arith.index_cast %133 : i32 to index
    %c0_63 = arith.constant 0 : index
    %155 = vector.load %arg2[%c1_62, %154, %c0_63] : memref<2x1344x1xf32, #tpu.memory_space<vmem>>, vector<1x112x1xf32>
    %156 = vector.shape_cast %155 : vector<1x112x1xf32> to vector<112x1xf32>
    %157 = vector.shape_cast %156 : vector<112x1xf32> to vector<1x112x1xf32>
    %158 = arith.mulf %153, %149 : vector<1x112x1xf32>
    %159 = vector.broadcast %158 : vector<1x112x1xf32> to vector<1x112x49xf32>
    %160 = arith.mulf %141, %159 : vector<1x112x49xf32>
    %161 = vector.broadcast %157 : vector<1x112x1xf32> to vector<1x112x49xf32>
    %162 = arith.addf %160, %161 : vector<1x112x49xf32>
    %c0_64 = arith.constant 0 : index
    %163 = arith.index_cast %133 : i32 to index
    %c0_65 = arith.constant 0 : index
    %164 = vector.load %arg3[%c0_64, %163, %c0_65] : memref<1x1344x49xf32, #tpu.memory_space<vmem>>, vector<1x112x49xf32>
    tpu.vector_store %arg3[%c0_64, %163, %c0_65], %162 {strides = array<i32>} : memref<1x1344x49xf32, #tpu.memory_space<vmem>>, vector<1x112x49xf32>,
    %c5_i32 = arith.constant 5 : i32
    %c112_i32_66 = arith.constant 112 : i32
    %165 = arith.muli %c5_i32, %c112_i32_66 : i32
    %166 = tpu.assume_multiple %165, 112 : i32
    %c0_67 = arith.constant 0 : index
    %167 = arith.index_cast %166 : i32 to index
    %c0_68 = arith.constant 0 : index
    %168 = vector.load %arg1[%c0_67, %167, %c0_68] : memref<1x1344x49xf32, #tpu.memory_space<vmem>>, vector<1x112x49xf32>
    %cst_69 = arith.constant dense<0.000000e+00> : vector<112xf32>
    %169 = vector.multi_reduction <add>, %168, %cst_69 [0, 2] : vector<1x112x49xf32> to vector<112xf32>
    %170 = vector.shape_cast %169 : vector<112xf32> to vector<1x112x1xf32>
    %cst_70 = arith.constant 0.0204081628 : f32
    %171 = vector.broadcast %cst_70 : f32 to vector<1x112x1xf32>
    %172 = arith.mulf %170, %171 : vector<1x112x1xf32>
    %173 = vector.broadcast %172 : vector<1x112x1xf32> to vector<1x112x49xf32>
    %174 = arith.subf %168, %173 : vector<1x112x49xf32>
    %175 = arith.mulf %174, %174 : vector<1x112x49xf32>
    %cst_71 = arith.constant dense<0.000000e+00> : vector<112xf32>
    %176 = vector.multi_reduction <add>, %175, %cst_71 [0, 2] : vector<1x112x49xf32> to vector<112xf32>
    %177 = vector.shape_cast %176 : vector<112xf32> to vector<1x112x1xf32>
    %cst_72 = arith.constant 0.0204081628 : f32
    %178 = vector.broadcast %cst_72 : f32 to vector<1x112x1xf32>
    %179 = arith.mulf %177, %178 : vector<1x112x1xf32>
    %cst_73 = arith.constant 1.000000e-03 : f32
    %180 = vector.broadcast %cst_73 : f32 to vector<1x112x1xf32>
    %181 = arith.addf %179, %180 : vector<1x112x1xf32>
    %182 = math.rsqrt %181 : vector<1x112x1xf32>
    %c0_74 = arith.constant 0 : index
    %183 = arith.index_cast %166 : i32 to index
    %c0_75 = arith.constant 0 : index
    %184 = vector.load %arg2[%c0_74, %183, %c0_75] : memref<2x1344x1xf32, #tpu.memory_space<vmem>>, vector<1x112x1xf32>
    %185 = vector.shape_cast %184 : vector<1x112x1xf32> to vector<112x1xf32>
    %186 = vector.shape_cast %185 : vector<112x1xf32> to vector<1x112x1xf32>
    %c1_76 = arith.constant 1 : index
    %187 = arith.index_cast %166 : i32 to index
    %c0_77 = arith.constant 0 : index
    %188 = vector.load %arg2[%c1_76, %187, %c0_77] : memref<2x1344x1xf32, #tpu.memory_space<vmem>>, vector<1x112x1xf32>
    %189 = vector.shape_cast %188 : vector<1x112x1xf32> to vector<112x1xf32>
    %190 = vector.shape_cast %189 : vector<112x1xf32> to vector<1x112x1xf32>
    %191 = arith.mulf %186, %182 : vector<1x112x1xf32>
    %192 = vector.broadcast %191 : vector<1x112x1xf32> to vector<1x112x49xf32>
    %193 = arith.mulf %174, %192 : vector<1x112x49xf32>
    %194 = vector.broadcast %190 : vector<1x112x1xf32> to vector<1x112x49xf32>
    %195 = arith.addf %193, %194 : vector<1x112x49xf32>
    %c0_78 = arith.constant 0 : index
    %196 = arith.index_cast %166 : i32 to index
    %c0_79 = arith.constant 0 : index
    %197 = vector.load %arg3[%c0_78, %196, %c0_79] : memref<1x1344x49xf32, #tpu.memory_space<vmem>>, vector<1x112x49xf32>
    tpu.vector_store %arg3[%c0_78, %196, %c0_79], %195 {strides = array<i32>} : memref<1x1344x49xf32, #tpu.memory_space<vmem>>, vector<1x112x49xf32>,
    %c6_i32 = arith.constant 6 : i32
    %c112_i32_80 = arith.constant 112 : i32
    %198 = arith.muli %c6_i32, %c112_i32_80 : i32
    %199 = tpu.assume_multiple %198, 112 : i32
    %c0_81 = arith.constant 0 : index
    %200 = arith.index_cast %199 : i32 to index
    %c0_82 = arith.constant 0 : index
    %201 = vector.load %arg1[%c0_81, %200, %c0_82] : memref<1x1344x49xf32, #tpu.memory_space<vmem>>, vector<1x112x49xf32>
    %cst_83 = arith.constant dense<0.000000e+00> : vector<112xf32>
    %202 = vector.multi_reduction <add>, %201, %cst_83 [0, 2] : vector<1x112x49xf32> to vector<112xf32>
    %203 = vector.shape_cast %202 : vector<112xf32> to vector<1x112x1xf32>
    %cst_84 = arith.constant 0.0204081628 : f32
    %204 = vector.broadcast %cst_84 : f32 to vector<1x112x1xf32>
    %205 = arith.mulf %203, %204 : vector<1x112x1xf32>
    %206 = vector.broadcast %205 : vector<1x112x1xf32> to vector<1x112x49xf32>
    %207 = arith.subf %201, %206 : vector<1x112x49xf32>
    %208 = arith.mulf %207, %207 : vector<1x112x49xf32>
    %cst_85 = arith.constant dense<0.000000e+00> : vector<112xf32>
    %209 = vector.multi_reduction <add>, %208, %cst_85 [0, 2] : vector<1x112x49xf32> to vector<112xf32>
    %210 = vector.shape_cast %209 : vector<112xf32> to vector<1x112x1xf32>
    %cst_86 = arith.constant 0.0204081628 : f32
    %211 = vector.broadcast %cst_86 : f32 to vector<1x112x1xf32>
    %212 = arith.mulf %210, %211 : vector<1x112x1xf32>
    %cst_87 = arith.constant 1.000000e-03 : f32
    %213 = vector.broadcast %cst_87 : f32 to vector<1x112x1xf32>
    %214 = arith.addf %212, %213 : vector<1x112x1xf32>
    %215 = math.rsqrt %214 : vector<1x112x1xf32>
    %c0_88 = arith.constant 0 : index
    %216 = arith.index_cast %199 : i32 to index
    %c0_89 = arith.constant 0 : index
    %217 = vector.load %arg2[%c0_88, %216, %c0_89] : memref<2x1344x1xf32, #tpu.memory_space<vmem>>, vector<1x112x1xf32>
    %218 = vector.shape_cast %217 : vector<1x112x1xf32> to vector<112x1xf32>
    %219 = vector.shape_cast %218 : vector<112x1xf32> to vector<1x112x1xf32>
    %c1_90 = arith.constant 1 : index
    %220 = arith.index_cast %199 : i32 to index
    %c0_91 = arith.constant 0 : index
    %221 = vector.load %arg2[%c1_90, %220, %c0_91] : memref<2x1344x1xf32, #tpu.memory_space<vmem>>, vector<1x112x1xf32>
    %222 = vector.shape_cast %221 : vector<1x112x1xf32> to vector<112x1xf32>
    %223 = vector.shape_cast %222 : vector<112x1xf32> to vector<1x112x1xf32>
    %224 = arith.mulf %219, %215 : vector<1x112x1xf32>
    %225 = vector.broadcast %224 : vector<1x112x1xf32> to vector<1x112x49xf32>
    %226 = arith.mulf %207, %225 : vector<1x112x49xf32>
    %227 = vector.broadcast %223 : vector<1x112x1xf32> to vector<1x112x49xf32>
    %228 = arith.addf %226, %227 : vector<1x112x49xf32>
    %c0_92 = arith.constant 0 : index
    %229 = arith.index_cast %199 : i32 to index
    %c0_93 = arith.constant 0 : index
    %230 = vector.load %arg3[%c0_92, %229, %c0_93] : memref<1x1344x49xf32, #tpu.memory_space<vmem>>, vector<1x112x49xf32>
    tpu.vector_store %arg3[%c0_92, %229, %c0_93], %228 {strides = array<i32>} : memref<1x1344x49xf32, #tpu.memory_space<vmem>>, vector<1x112x49xf32>,
    %c7_i32 = arith.constant 7 : i32
    %c112_i32_94 = arith.constant 112 : i32
    %231 = arith.muli %c7_i32, %c112_i32_94 : i32
    %232 = tpu.assume_multiple %231, 112 : i32
    %c0_95 = arith.constant 0 : index
    %233 = arith.index_cast %232 : i32 to index
    %c0_96 = arith.constant 0 : index
    %234 = vector.load %arg1[%c0_95, %233, %c0_96] : memref<1x1344x49xf32, #tpu.memory_space<vmem>>, vector<1x112x49xf32>
    %cst_97 = arith.constant dense<0.000000e+00> : vector<112xf32>
    %235 = vector.multi_reduction <add>, %234, %cst_97 [0, 2] : vector<1x112x49xf32> to vector<112xf32>
    %236 = vector.shape_cast %235 : vector<112xf32> to vector<1x112x1xf32>
    %cst_98 = arith.constant 0.0204081628 : f32
    %237 = vector.broadcast %cst_98 : f32 to vector<1x112x1xf32>
    %238 = arith.mulf %236, %237 : vector<1x112x1xf32>
    %239 = vector.broadcast %238 : vector<1x112x1xf32> to vector<1x112x49xf32>
    %240 = arith.subf %234, %239 : vector<1x112x49xf32>
    %241 = arith.mulf %240, %240 : vector<1x112x49xf32>
    %cst_99 = arith.constant dense<0.000000e+00> : vector<112xf32>
    %242 = vector.multi_reduction <add>, %241, %cst_99 [0, 2] : vector<1x112x49xf32> to vector<112xf32>
    %243 = vector.shape_cast %242 : vector<112xf32> to vector<1x112x1xf32>
    %cst_100 = arith.constant 0.0204081628 : f32
    %244 = vector.broadcast %cst_100 : f32 to vector<1x112x1xf32>
    %245 = arith.mulf %243, %244 : vector<1x112x1xf32>
    %cst_101 = arith.constant 1.000000e-03 : f32
    %246 = vector.broadcast %cst_101 : f32 to vector<1x112x1xf32>
    %247 = arith.addf %245, %246 : vector<1x112x1xf32>
    %248 = math.rsqrt %247 : vector<1x112x1xf32>
    %c0_102 = arith.constant 0 : index
    %249 = arith.index_cast %232 : i32 to index
    %c0_103 = arith.constant 0 : index
    %250 = vector.load %arg2[%c0_102, %249, %c0_103] : memref<2x1344x1xf32, #tpu.memory_space<vmem>>, vector<1x112x1xf32>
    %251 = vector.shape_cast %250 : vector<1x112x1xf32> to vector<112x1xf32>
    %252 = vector.shape_cast %251 : vector<112x1xf32> to vector<1x112x1xf32>
    %c1_104 = arith.constant 1 : index
    %253 = arith.index_cast %232 : i32 to index
    %c0_105 = arith.constant 0 : index
    %254 = vector.load %arg2[%c1_104, %253, %c0_105] : memref<2x1344x1xf32, #tpu.memory_space<vmem>>, vector<1x112x1xf32>
    %255 = vector.shape_cast %254 : vector<1x112x1xf32> to vector<112x1xf32>
    %256 = vector.shape_cast %255 : vector<112x1xf32> to vector<1x112x1xf32>
    %257 = arith.mulf %252, %248 : vector<1x112x1xf32>
    %258 = vector.broadcast %257 : vector<1x112x1xf32> to vector<1x112x49xf32>
    %259 = arith.mulf %240, %258 : vector<1x112x49xf32>
    %260 = vector.broadcast %256 : vector<1x112x1xf32> to vector<1x112x49xf32>
    %261 = arith.addf %259, %260 : vector<1x112x49xf32>
    %c0_106 = arith.constant 0 : index
    %262 = arith.index_cast %232 : i32 to index
    %c0_107 = arith.constant 0 : index
    %263 = vector.load %arg3[%c0_106, %262, %c0_107] : memref<1x1344x49xf32, #tpu.memory_space<vmem>>, vector<1x112x49xf32>
    tpu.vector_store %arg3[%c0_106, %262, %c0_107], %261 {strides = array<i32>} : memref<1x1344x49xf32, #tpu.memory_space<vmem>>, vector<1x112x49xf32>,
    %c8_i32 = arith.constant 8 : i32
    %c112_i32_108 = arith.constant 112 : i32
    %264 = arith.muli %c8_i32, %c112_i32_108 : i32
    %265 = tpu.assume_multiple %264, 112 : i32
    %c0_109 = arith.constant 0 : index
    %266 = arith.index_cast %265 : i32 to index
    %c0_110 = arith.constant 0 : index
    %267 = vector.load %arg1[%c0_109, %266, %c0_110] : memref<1x1344x49xf32, #tpu.memory_space<vmem>>, vector<1x112x49xf32>
    %cst_111 = arith.constant dense<0.000000e+00> : vector<112xf32>
    %268 = vector.multi_reduction <add>, %267, %cst_111 [0, 2] : vector<1x112x49xf32> to vector<112xf32>
    %269 = vector.shape_cast %268 : vector<112xf32> to vector<1x112x1xf32>
    %cst_112 = arith.constant 0.0204081628 : f32
    %270 = vector.broadcast %cst_112 : f32 to vector<1x112x1xf32>
    %271 = arith.mulf %269, %270 : vector<1x112x1xf32>
    %272 = vector.broadcast %271 : vector<1x112x1xf32> to vector<1x112x49xf32>
    %273 = arith.subf %267, %272 : vector<1x112x49xf32>
    %274 = arith.mulf %273, %273 : vector<1x112x49xf32>
    %cst_113 = arith.constant dense<0.000000e+00> : vector<112xf32>
    %275 = vector.multi_reduction <add>, %274, %cst_113 [0, 2] : vector<1x112x49xf32> to vector<112xf32>
    %276 = vector.shape_cast %275 : vector<112xf32> to vector<1x112x1xf32>
    %cst_114 = arith.constant 0.0204081628 : f32
    %277 = vector.broadcast %cst_114 : f32 to vector<1x112x1xf32>
    %278 = arith.mulf %276, %277 : vector<1x112x1xf32>
    %cst_115 = arith.constant 1.000000e-03 : f32
    %279 = vector.broadcast %cst_115 : f32 to vector<1x112x1xf32>
    %280 = arith.addf %278, %279 : vector<1x112x1xf32>
    %281 = math.rsqrt %280 : vector<1x112x1xf32>
    %c0_116 = arith.constant 0 : index
    %282 = arith.index_cast %265 : i32 to index
    %c0_117 = arith.constant 0 : index
    %283 = vector.load %arg2[%c0_116, %282, %c0_117] : memref<2x1344x1xf32, #tpu.memory_space<vmem>>, vector<1x112x1xf32>
    %284 = vector.shape_cast %283 : vector<1x112x1xf32> to vector<112x1xf32>
    %285 = vector.shape_cast %284 : vector<112x1xf32> to vector<1x112x1xf32>
    %c1_118 = arith.constant 1 : index
    %286 = arith.index_cast %265 : i32 to index
    %c0_119 = arith.constant 0 : index
    %287 = vector.load %arg2[%c1_118, %286, %c0_119] : memref<2x1344x1xf32, #tpu.memory_space<vmem>>, vector<1x112x1xf32>
    %288 = vector.shape_cast %287 : vector<1x112x1xf32> to vector<112x1xf32>
    %289 = vector.shape_cast %288 : vector<112x1xf32> to vector<1x112x1xf32>
    %290 = arith.mulf %285, %281 : vector<1x112x1xf32>
    %291 = vector.broadcast %290 : vector<1x112x1xf32> to vector<1x112x49xf32>
    %292 = arith.mulf %273, %291 : vector<1x112x49xf32>
    %293 = vector.broadcast %289 : vector<1x112x1xf32> to vector<1x112x49xf32>
    %294 = arith.addf %292, %293 : vector<1x112x49xf32>
    %c0_120 = arith.constant 0 : index
    %295 = arith.index_cast %265 : i32 to index
    %c0_121 = arith.constant 0 : index
    %296 = vector.load %arg3[%c0_120, %295, %c0_121] : memref<1x1344x49xf32, #tpu.memory_space<vmem>>, vector<1x112x49xf32>
    tpu.vector_store %arg3[%c0_120, %295, %c0_121], %294 {strides = array<i32>} : memref<1x1344x49xf32, #tpu.memory_space<vmem>>, vector<1x112x49xf32>,
    %c9_i32 = arith.constant 9 : i32
    %c112_i32_122 = arith.constant 112 : i32
    %297 = arith.muli %c9_i32, %c112_i32_122 : i32
    %298 = tpu.assume_multiple %297, 112 : i32
    %c0_123 = arith.constant 0 : index
    %299 = arith.index_cast %298 : i32 to index
    %c0_124 = arith.constant 0 : index
    %300 = vector.load %arg1[%c0_123, %299, %c0_124] : memref<1x1344x49xf32, #tpu.memory_space<vmem>>, vector<1x112x49xf32>
    %cst_125 = arith.constant dense<0.000000e+00> : vector<112xf32>
    %301 = vector.multi_reduction <add>, %300, %cst_125 [0, 2] : vector<1x112x49xf32> to vector<112xf32>
    %302 = vector.shape_cast %301 : vector<112xf32> to vector<1x112x1xf32>
    %cst_126 = arith.constant 0.0204081628 : f32
    %303 = vector.broadcast %cst_126 : f32 to vector<1x112x1xf32>
    %304 = arith.mulf %302, %303 : vector<1x112x1xf32>
    %305 = vector.broadcast %304 : vector<1x112x1xf32> to vector<1x112x49xf32>
    %306 = arith.subf %300, %305 : vector<1x112x49xf32>
    %307 = arith.mulf %306, %306 : vector<1x112x49xf32>
    %cst_127 = arith.constant dense<0.000000e+00> : vector<112xf32>
    %308 = vector.multi_reduction <add>, %307, %cst_127 [0, 2] : vector<1x112x49xf32> to vector<112xf32>
    %309 = vector.shape_cast %308 : vector<112xf32> to vector<1x112x1xf32>
    %cst_128 = arith.constant 0.0204081628 : f32
    %310 = vector.broadcast %cst_128 : f32 to vector<1x112x1xf32>
    %311 = arith.mulf %309, %310 : vector<1x112x1xf32>
    %cst_129 = arith.constant 1.000000e-03 : f32
    %312 = vector.broadcast %cst_129 : f32 to vector<1x112x1xf32>
    %313 = arith.addf %311, %312 : vector<1x112x1xf32>
    %314 = math.rsqrt %313 : vector<1x112x1xf32>
    %c0_130 = arith.constant 0 : index
    %315 = arith.index_cast %298 : i32 to index
    %c0_131 = arith.constant 0 : index
    %316 = vector.load %arg2[%c0_130, %315, %c0_131] : memref<2x1344x1xf32, #tpu.memory_space<vmem>>, vector<1x112x1xf32>
    %317 = vector.shape_cast %316 : vector<1x112x1xf32> to vector<112x1xf32>
    %318 = vector.shape_cast %317 : vector<112x1xf32> to vector<1x112x1xf32>
    %c1_132 = arith.constant 1 : index
    %319 = arith.index_cast %298 : i32 to index
    %c0_133 = arith.constant 0 : index
    %320 = vector.load %arg2[%c1_132, %319, %c0_133] : memref<2x1344x1xf32, #tpu.memory_space<vmem>>, vector<1x112x1xf32>
    %321 = vector.shape_cast %320 : vector<1x112x1xf32> to vector<112x1xf32>
    %322 = vector.shape_cast %321 : vector<112x1xf32> to vector<1x112x1xf32>
    %323 = arith.mulf %318, %314 : vector<1x112x1xf32>
    %324 = vector.broadcast %323 : vector<1x112x1xf32> to vector<1x112x49xf32>
    %325 = arith.mulf %306, %324 : vector<1x112x49xf32>
    %326 = vector.broadcast %322 : vector<1x112x1xf32> to vector<1x112x49xf32>
    %327 = arith.addf %325, %326 : vector<1x112x49xf32>
    %c0_134 = arith.constant 0 : index
    %328 = arith.index_cast %298 : i32 to index
    %c0_135 = arith.constant 0 : index
    %329 = vector.load %arg3[%c0_134, %328, %c0_135] : memref<1x1344x49xf32, #tpu.memory_space<vmem>>, vector<1x112x49xf32>
    tpu.vector_store %arg3[%c0_134, %328, %c0_135], %327 {strides = array<i32>} : memref<1x1344x49xf32, #tpu.memory_space<vmem>>, vector<1x112x49xf32>,
    %c10_i32 = arith.constant 10 : i32
    %c112_i32_136 = arith.constant 112 : i32
    %330 = arith.muli %c10_i32, %c112_i32_136 : i32
    %331 = tpu.assume_multiple %330, 112 : i32
    %c0_137 = arith.constant 0 : index
    %332 = arith.index_cast %331 : i32 to index
    %c0_138 = arith.constant 0 : index
    %333 = vector.load %arg1[%c0_137, %332, %c0_138] : memref<1x1344x49xf32, #tpu.memory_space<vmem>>, vector<1x112x49xf32>
    %cst_139 = arith.constant dense<0.000000e+00> : vector<112xf32>
    %334 = vector.multi_reduction <add>, %333, %cst_139 [0, 2] : vector<1x112x49xf32> to vector<112xf32>
    %335 = vector.shape_cast %334 : vector<112xf32> to vector<1x112x1xf32>
    %cst_140 = arith.constant 0.0204081628 : f32
    %336 = vector.broadcast %cst_140 : f32 to vector<1x112x1xf32>
    %337 = arith.mulf %335, %336 : vector<1x112x1xf32>
    %338 = vector.broadcast %337 : vector<1x112x1xf32> to vector<1x112x49xf32>
    %339 = arith.subf %333, %338 : vector<1x112x49xf32>
    %340 = arith.mulf %339, %339 : vector<1x112x49xf32>
    %cst_141 = arith.constant dense<0.000000e+00> : vector<112xf32>
    %341 = vector.multi_reduction <add>, %340, %cst_141 [0, 2] : vector<1x112x49xf32> to vector<112xf32>
    %342 = vector.shape_cast %341 : vector<112xf32> to vector<1x112x1xf32>
    %cst_142 = arith.constant 0.0204081628 : f32
    %343 = vector.broadcast %cst_142 : f32 to vector<1x112x1xf32>
    %344 = arith.mulf %342, %343 : vector<1x112x1xf32>
    %cst_143 = arith.constant 1.000000e-03 : f32
    %345 = vector.broadcast %cst_143 : f32 to vector<1x112x1xf32>
    %346 = arith.addf %344, %345 : vector<1x112x1xf32>
    %347 = math.rsqrt %346 : vector<1x112x1xf32>
    %c0_144 = arith.constant 0 : index
    %348 = arith.index_cast %331 : i32 to index
    %c0_145 = arith.constant 0 : index
    %349 = vector.load %arg2[%c0_144, %348, %c0_145] : memref<2x1344x1xf32, #tpu.memory_space<vmem>>, vector<1x112x1xf32>
    %350 = vector.shape_cast %349 : vector<1x112x1xf32> to vector<112x1xf32>
    %351 = vector.shape_cast %350 : vector<112x1xf32> to vector<1x112x1xf32>
    %c1_146 = arith.constant 1 : index
    %352 = arith.index_cast %331 : i32 to index
    %c0_147 = arith.constant 0 : index
    %353 = vector.load %arg2[%c1_146, %352, %c0_147] : memref<2x1344x1xf32, #tpu.memory_space<vmem>>, vector<1x112x1xf32>
    %354 = vector.shape_cast %353 : vector<1x112x1xf32> to vector<112x1xf32>
    %355 = vector.shape_cast %354 : vector<112x1xf32> to vector<1x112x1xf32>
    %356 = arith.mulf %351, %347 : vector<1x112x1xf32>
    %357 = vector.broadcast %356 : vector<1x112x1xf32> to vector<1x112x49xf32>
    %358 = arith.mulf %339, %357 : vector<1x112x49xf32>
    %359 = vector.broadcast %355 : vector<1x112x1xf32> to vector<1x112x49xf32>
    %360 = arith.addf %358, %359 : vector<1x112x49xf32>
    %c0_148 = arith.constant 0 : index
    %361 = arith.index_cast %331 : i32 to index
    %c0_149 = arith.constant 0 : index
    %362 = vector.load %arg3[%c0_148, %361, %c0_149] : memref<1x1344x49xf32, #tpu.memory_space<vmem>>, vector<1x112x49xf32>
    tpu.vector_store %arg3[%c0_148, %361, %c0_149], %360 {strides = array<i32>} : memref<1x1344x49xf32, #tpu.memory_space<vmem>>, vector<1x112x49xf32>,
    %c11_i32 = arith.constant 11 : i32
    %c112_i32_150 = arith.constant 112 : i32
    %363 = arith.muli %c11_i32, %c112_i32_150 : i32
    %364 = tpu.assume_multiple %363, 112 : i32
    %c0_151 = arith.constant 0 : index
    %365 = arith.index_cast %364 : i32 to index
    %c0_152 = arith.constant 0 : index
    %366 = vector.load %arg1[%c0_151, %365, %c0_152] : memref<1x1344x49xf32, #tpu.memory_space<vmem>>, vector<1x112x49xf32>
    %cst_153 = arith.constant dense<0.000000e+00> : vector<112xf32>
    %367 = vector.multi_reduction <add>, %366, %cst_153 [0, 2] : vector<1x112x49xf32> to vector<112xf32>
    %368 = vector.shape_cast %367 : vector<112xf32> to vector<1x112x1xf32>
    %cst_154 = arith.constant 0.0204081628 : f32
    %369 = vector.broadcast %cst_154 : f32 to vector<1x112x1xf32>
    %370 = arith.mulf %368, %369 : vector<1x112x1xf32>
    %371 = vector.broadcast %370 : vector<1x112x1xf32> to vector<1x112x49xf32>
    %372 = arith.subf %366, %371 : vector<1x112x49xf32>
    %373 = arith.mulf %372, %372 : vector<1x112x49xf32>
    %cst_155 = arith.constant dense<0.000000e+00> : vector<112xf32>
    %374 = vector.multi_reduction <add>, %373, %cst_155 [0, 2] : vector<1x112x49xf32> to vector<112xf32>
    %375 = vector.shape_cast %374 : vector<112xf32> to vector<1x112x1xf32>
    %cst_156 = arith.constant 0.0204081628 : f32
    %376 = vector.broadcast %cst_156 : f32 to vector<1x112x1xf32>
    %377 = arith.mulf %375, %376 : vector<1x112x1xf32>
    %cst_157 = arith.constant 1.000000e-03 : f32
    %378 = vector.broadcast %cst_157 : f32 to vector<1x112x1xf32>
    %379 = arith.addf %377, %378 : vector<1x112x1xf32>
    %380 = math.rsqrt %379 : vector<1x112x1xf32>
    %c0_158 = arith.constant 0 : index
    %381 = arith.index_cast %364 : i32 to index
    %c0_159 = arith.constant 0 : index
    %382 = vector.load %arg2[%c0_158, %381, %c0_159] : memref<2x1344x1xf32, #tpu.memory_space<vmem>>, vector<1x112x1xf32>
    %383 = vector.shape_cast %382 : vector<1x112x1xf32> to vector<112x1xf32>
    %384 = vector.shape_cast %383 : vector<112x1xf32> to vector<1x112x1xf32>
    %c1_160 = arith.constant 1 : index
    %385 = arith.index_cast %364 : i32 to index
    %c0_161 = arith.constant 0 : index
    %386 = vector.load %arg2[%c1_160, %385, %c0_161] : memref<2x1344x1xf32, #tpu.memory_space<vmem>>, vector<1x112x1xf32>
    %387 = vector.shape_cast %386 : vector<1x112x1xf32> to vector<112x1xf32>
    %388 = vector.shape_cast %387 : vector<112x1xf32> to vector<1x112x1xf32>
    %389 = arith.mulf %384, %380 : vector<1x112x1xf32>
    %390 = vector.broadcast %389 : vector<1x112x1xf32> to vector<1x112x49xf32>
    %391 = arith.mulf %372, %390 : vector<1x112x49xf32>
    %392 = vector.broadcast %388 : vector<1x112x1xf32> to vector<1x112x49xf32>
    %393 = arith.addf %391, %392 : vector<1x112x49xf32>
    %c0_162 = arith.constant 0 : index
    %394 = arith.index_cast %364 : i32 to index
    %c0_163 = arith.constant 0 : index
    %395 = vector.load %arg3[%c0_162, %394, %c0_163] : memref<1x1344x49xf32, #tpu.memory_space<vmem>>, vector<1x112x49xf32>
    tpu.vector_store %arg3[%c0_162, %394, %c0_163], %393 {strides = array<i32>} : memref<1x1344x49xf32, #tpu.memory_space<vmem>>, vector<1x112x49xf32>,
    %c12_i32 = arith.constant 12 : i32
    return
  }
  func.func @transform_0(%arg0: i32) -> (i32, i32, i32) {
    %c0_i32 = arith.constant 0 : i32
    %c0_i32_0 = arith.constant 0 : i32
    %c0_i32_1 = arith.constant 0 : i32
    return %c0_i32, %arg0, %c0_i32_0 : i32, i32, i32
  }
  func.func @transform_1(%arg0: i32) -> (i32, i32, i32) {
    %c0_i32 = arith.constant 0 : i32
    %c0_i32_0 = arith.constant 0 : i32
    %c0_i32_1 = arith.constant 0 : i32
    return %c0_i32, %arg0, %c0_i32_0 : i32, i32, i32
  }
  func.func @transform_2(%arg0: i32) -> (i32, i32, i32) {
    %c0_i32 = arith.constant 0 : i32
    %c0_i32_0 = arith.constant 0 : i32
    %c0_i32_1 = arith.constant 0 : i32
    return %c0_i32, %arg0, %c0_i32_0 : i32, i32, i32
  }
}

</mosaic_0001>

<bundles_post_ra>
// kernel: tpu_custom_call.1
= control target key start
LH: loop header
LB: loop body
LE: loop exit
PB: predicated region body
PF: predicated region fallthrough
CT: control target
= control target key end

     0   :  { %vm25_vm0 = vcmask 400384   ;;  %s10844_s0 = inlined_call_operand.vmem [shape: f32[1,1344,49], index: 0, kind: input, shape index: {}]   ;;  %s10845_s1 = inlined_call_operand.vmem [shape: f32[2,1344,1], index: 1, kind: input, shape index: {}]   ;;  %s10846_s2 = inlined_call_operand.vmem [shape: f32[1,1344,49], index: 2, kind: output, shape index: {}]  }
   0x1   :  { %v5945_v0 = vld [vmem:[%s10844_s0] sm:$0xff]  ;;  %v5950_v1 = vld [vmem:[%s10844_s0 + $0x10] sm:$0xff]  ;;  %v5955_v2 = vld [vmem:[%s10844_s0 + $0x8] sm:$0xff] }
   0x2   :  { %v26_v3 = vsel %vm25_vm0, %v5945_v0, 0.0  ;;  %v32_v4 = vsel %vm25_vm0, %v5950_v1, 0.0  ;;  %v5964_v5 = vld [vmem:[%s10844_s0 + $0x18] sm:$0xff]  ;;  %v29_v6 = vsel %vm25_vm0, %v5955_v2, 0.0  ;;  %v5973_v8 = vld [vmem:[%s10844_s0 + $0x28] sm:$0xff]  ;;  %v5978_v9 = vld [vmem:[%s10844_s0 + $0x20] sm:$0xff] }
   0x3   :  { %27 = vadd.xlane.f32.xlu0 %v26_v3  ;;  %33 = vadd.xlane.f32.xlu1 %v32_v4  ;;  %v35_v7 = vsel %vm25_vm0, %v5964_v5, 0.0  ;;  %v41_v10 = vsel %vm25_vm0, %v5973_v8, 0.0  ;;  %v38_v11 = vsel %vm25_vm0, %v5978_v9, 0.0  ;;  %v5987_v12 = vld [vmem:[%s10844_s0 + $0x38] sm:$0xff]  ;;  %v5992_v13 = vld [vmem:[%s10844_s0 + $0x30] sm:$0xff]  ;;  %v6001_v16 = vld [vmem:[%s10844_s0 + $0x48] sm:$0xff] }
   0x4   :  { %v47_v14 = vsel %vm25_vm0, %v5987_v12, 0.0  ;;  %v44_v15 = vsel %vm25_vm0, %v5992_v13, 0.0  ;;  %v6006_v17 = vld [vmem:[%s10844_s0 + $0x40] sm:$0xff]  ;;  %v53_v18 = vsel %vm25_vm0, %v6001_v16, 0.0  ;;  %v6015_v20 = vld [vmem:[%s10844_s0 + $0x58] sm:$0xff]  ;;  %v6020_v21 = vld [vmem:[%s10844_s0 + $0x50] sm:$0xff] }
   0x5   :  { %v50_v19 = vsel %vm25_vm0, %v6006_v17, 0.0  ;;  %v59_v22 = vsel %vm25_vm0, %v6015_v20, 0.0  ;;  %v56_v23 = vsel %vm25_vm0, %v6020_v21, 0.0  ;;  %v6029_v24 = vld [vmem:[%s10844_s0 + $0x68] sm:$0xff]  ;;  %v6034_v25 = vld [vmem:[%s10844_s0 + $0x60] sm:$0xff]  ;;  %v6043_v28 = vld [vmem:[%s10844_s0 + $0x70] sm:$0xff] }
   0x6   :  { %v65_v26 = vsel %vm25_vm0, %v6029_v24, 0.0  ;;  %v62_v27 = vsel %vm25_vm0, %v6034_v25, 0.0  ;;  %v6048_v29 = vld [vmem:[%s10844_s0 + $0x78] sm:$0xff]  ;;  %v435_v30 = vsel %vm25_vm0, %v6043_v28, 0.0  ;;  %v6057_v32 = vld [vmem:[%s10844_s0 + $0x88] sm:$0xff]  ;;  %v6062_v33 = vld [vmem:[%s10844_s0 + $0x80] sm:$0xff] }
   0x7   :  { %30 = vadd.xlane.f32.xlu0 %v29_v6  ;;  %36 = vadd.xlane.f32.xlu1 %v35_v7  ;;  %v438_v31 = vsel %vm25_vm0, %v6048_v29, 0.0  ;;  %v444_v34 = vsel %vm25_vm0, %v6057_v32, 0.0  ;;  %v441_v35 = vsel %vm25_vm0, %v6062_v33, 0.0  ;;  %v6071_v36 = vld [vmem:[%s10844_s0 + $0x98] sm:$0xff]  ;;  %v6076_v37 = vld [vmem:[%s10844_s0 + $0x90] sm:$0xff]  ;;  %v6085_v40 = vld [vmem:[%s10844_s0 + $0xa8] sm:$0xff] }
   0x8   :  { %v450_v38 = vsel %vm25_vm0, %v6071_v36, 0.0  ;;  %v447_v39 = vsel %vm25_vm0, %v6076_v37, 0.0  ;;  %v6090_v41 = vld [vmem:[%s10844_s0 + $0xa0] sm:$0xff]  ;;  %v456_v42 = vsel %vm25_vm0, %v6085_v40, 0.0  ;;  %v6099_v44 = vld [vmem:[%s10844_s0 + $0xb8] sm:$0xff]  ;;  %v6104_v45 = vld [vmem:[%s10844_s0 + $0xb0] sm:$0xff] }
   0x9   :  { %v453_v43 = vsel %vm25_vm0, %v6090_v41, 0.0  ;;  %v462_v46 = vsel %vm25_vm0, %v6099_v44, 0.0  ;;  %v459_v47 = vsel %vm25_vm0, %v6104_v45, 0.0  ;;  %v6113_v48 = vld [vmem:[%s10844_s0 + $0xc8] sm:$0xff]  ;;  %v6118_v49 = vld [vmem:[%s10844_s0 + $0xc0] sm:$0xff]  ;;  %v6127_v52 = vld [vmem:[%s10844_s0 + $0xd8] sm:$0xff] }
   0xa   :  { %v468_v50 = vsel %vm25_vm0, %v6113_v48, 0.0  ;;  %v465_v51 = vsel %vm25_vm0, %v6118_v49, 0.0  ;;  %v6132_v53 = vld [vmem:[%s10844_s0 + $0xd0] sm:$0xff]  ;;  %v474_v54 = vsel %vm25_vm0, %v6127_v52, 0.0 }
   0xb   :  { %42 = vadd.xlane.f32.xlu1 %v41_v10  ;;  %39 = vadd.xlane.f32.xlu0 %v38_v11  ;;  %v471_v55 = vsel %vm25_vm0, %v6132_v53, 0.0 }
   0xf   :  { %48 = vadd.xlane.f32.xlu1 %v47_v14  ;;  %45 = vadd.xlane.f32.xlu0 %v44_v15 }
  0x13   :  { %54 = vadd.xlane.f32.xlu1 %v53_v18  ;;  %51 = vadd.xlane.f32.xlu0 %v50_v19 }
  0x17   :  { %60 = vadd.xlane.f32.xlu1 %v59_v22  ;;  %57 = vadd.xlane.f32.xlu0 %v56_v23 }
  0x1b   :  { %66 = vadd.xlane.f32.xlu1 %v65_v26  ;;  %63 = vadd.xlane.f32.xlu0 %v62_v27 }
  0x1f   :  { %436 = vadd.xlane.f32.xlu1 %v435_v30  ;;  %439 = vadd.xlane.f32.xlu0 %v438_v31 }
  0x23   :  { %445 = vadd.xlane.f32.xlu1 %v444_v34  ;;  %442 = vadd.xlane.f32.xlu0 %v441_v35 }
  0x27   :  { %451 = vadd.xlane.f32.xlu1 %v450_v38  ;;  %448 = vadd.xlane.f32.xlu0 %v447_v39 }
  0x2b   :  { %457 = vadd.xlane.f32.xlu1 %v456_v42  ;;  %454 = vadd.xlane.f32.xlu0 %v453_v43 }
  0x2f   :  { %463 = vadd.xlane.f32.xlu1 %v462_v46  ;;  %460 = vadd.xlane.f32.xlu0 %v459_v47 }
  0x33   :  { %469 = vadd.xlane.f32.xlu1 %v468_v50  ;;  %466 = vadd.xlane.f32.xlu0 %v465_v51 }
  0x37   :  { %475 = vadd.xlane.f32.xlu1 %v474_v54  ;;  %472 = vadd.xlane.f32.xlu0 %v471_v55 }
  0x90   :  { %v28_v56 = vpop.xlane.xlu0 %27  ;;  %v34_v57 = vpop.xlane.xlu1 %33 }
  0x91   :  { %v68_v58 = vmul.f32 0.020408163, %v28_v56  ;;  %v70_v59 = vmul.f32 0.020408163, %v34_v57 }
  0x93   :  { %v6139_v60 = vsub.f32 %v5945_v0, %v68_v58  ;;  %v6142_v61 = vsub.f32 %v5950_v1, %v70_v59 }
  0x94   :  { %v31_v62 = vpop.xlane.xlu0 %30  ;;  %v37_v63 = vpop.xlane.xlu1 %36 }
  0x95   :  { %11002 = vst [vmem:[#allocation2_spill] sm:$0xff] %v6139_v60  ;;  %11003 = vst [vmem:[#allocation3_spill] sm:$0xff] %v6142_v61  ;;  %v69_v3 = vmul.f32 0.020408163, %v31_v62  ;;  %v71_v4 = vmul.f32 0.020408163, %v37_v63  ;;  %v96_v6 = vmul.f32 %v6139_v60, %v6139_v60  ;;  %v98_v7 = vmul.f32 %v6142_v61, %v6142_v61 }
  0x97   :  { %v6149_v10 = vsub.f32 %v5955_v2, %v69_v3  ;;  %v6152_v11 = vsub.f32 %v5964_v5, %v71_v4  ;;  %v110_v0 = vsel %vm25_vm0, %v96_v6, 0.0  ;;  %v116_v14 = vsel %vm25_vm0, %v98_v7, 0.0 }
  0x98   :  { %111 = vadd.xlane.f32.xlu0 %v110_v0  ;;  %v43_v1 = vpop.xlane.xlu1 %42  ;;  %v40_v15 = vpop.xlane.xlu0 %39 }
  0x99   :  { %11004 = vst [vmem:[#allocation4_spill] sm:$0xff] %v6149_v10  ;;  %11005 = vst [vmem:[#allocation5_spill] sm:$0xff] %v6152_v11  ;;  %v73_v18 = vmul.f32 0.020408163, %v43_v1  ;;  %v97_v19 = vmul.f32 %v6149_v10, %v6149_v10  ;;  %v72_v22 = vmul.f32 0.020408163, %v40_v15  ;;  %v99_v23 = vmul.f32 %v6152_v11, %v6152_v11 }
  0x9b   :  { %v6161_v2 = vsub.f32 %v5973_v8, %v73_v18  ;;  %v113_v5 = vsel %vm25_vm0, %v97_v19, 0.0  ;;  %v6165_v26 = vsub.f32 %v5978_v9, %v72_v22  ;;  %v119_v30 = vsel %vm25_vm0, %v99_v23, 0.0 }
  0x9c   :  { %117 = vadd.xlane.f32.xlu0 %v116_v14  ;;  %114 = vadd.xlane.f32.xlu1 %v113_v5  ;;  %v49_v27 = vpop.xlane.xlu1 %48  ;;  %v46_v31 = vpop.xlane.xlu0 %45 }
  0x9d   :  { %11006 = vst [vmem:[#allocation6_spill] sm:$0xff] %v6161_v2  ;;  %11007 = vst [vmem:[#allocation7_spill] sm:$0xff] %v6165_v26  ;;  %v75_v34 = vmul.f32 0.020408163, %v49_v27  ;;  %v74_v35 = vmul.f32 0.020408163, %v46_v31  ;;  %v101_v38 = vmul.f32 %v6161_v2, %v6161_v2  ;;  %v100_v8 = vmul.f32 %v6165_v26, %v6165_v26 }
  0x9f   :  { %v6173_v39 = vsub.f32 %v5987_v12, %v75_v34  ;;  %v6176_v9 = vsub.f32 %v5992_v13, %v74_v35  ;;  %v122_v42 = vsel %vm25_vm0, %v100_v8, 0.0  ;;  %v125_v46 = vsel %vm25_vm0, %v101_v38, 0.0 }
  0xa0   :  { %120 = vadd.xlane.f32.xlu1 %v119_v30  ;;  %v55_v43 = vpop.xlane.xlu1 %54  ;;  %123 = vadd.xlane.f32.xlu0 %v122_v42  ;;  %v52_v47 = vpop.xlane.xlu0 %51 }
  0xa1   :  { %11008 = vst [vmem:[#allocation8_spill] sm:$0xff] %v6173_v39  ;;  %11009 = vst [vmem:[#allocation9_spill] sm:$0xff] %v6176_v9  ;;  %v77_v50 = vmul.f32 0.020408163, %v55_v43  ;;  %v76_v51 = vmul.f32 0.020408163, %v52_v47  ;;  %v103_v54 = vmul.f32 %v6173_v39, %v6173_v39  ;;  %v102_v12 = vmul.f32 %v6176_v9, %v6176_v9 }
  0xa3   :  { %v6185_v55 = vsub.f32 %v6001_v16, %v77_v50  ;;  %v6188_v13 = vsub.f32 %v6006_v17, %v76_v51  ;;  %v128_v56 = vsel %vm25_vm0, %v102_v12, 0.0  ;;  %v131_v58 = vsel %vm25_vm0, %v103_v54, 0.0 }
  0xa4   :  { %126 = vadd.xlane.f32.xlu1 %v125_v46  ;;  %v61_v57 = vpop.xlane.xlu1 %60  ;;  %129 = vadd.xlane.f32.xlu0 %v128_v56  ;;  %v58_v59 = vpop.xlane.xlu0 %57 }
  0xa5   :  { %11010 = vst [vmem:[#allocation10_spill] sm:$0xff] %v6185_v55  ;;  %11011 = vst [vmem:[#allocation11_spill] sm:$0xff] %v6188_v13  ;;  %v79_v62 = vmul.f32 0.020408163, %v61_v57  ;;  %v78_v63 = vmul.f32 0.020408163, %v58_v59  ;;  %v105_v3 = vmul.f32 %v6185_v55, %v6185_v55  ;;  %v104_v16 = vmul.f32 %v6188_v13, %v6188_v13 }
  0xa7   :  { %v6197_v4 = vsub.f32 %v6015_v20, %v79_v62  ;;  %v6200_v17 = vsub.f32 %v6020_v21, %v78_v63  ;;  %v134_v6 = vsel %vm25_vm0, %v104_v16, 0.0  ;;  %v137_v0 = vsel %vm25_vm0, %v105_v3, 0.0 }
  0xa8   :  { %132 = vadd.xlane.f32.xlu1 %v131_v58  ;;  %v67_v7 = vpop.xlane.xlu1 %66  ;;  %135 = vadd.xlane.f32.xlu0 %v134_v6  ;;  %v64_v1 = vpop.xlane.xlu0 %63 }
  0xa9   :  { %11012 = vst [vmem:[#allocation12_spill] sm:$0xff] %v6197_v4  ;;  %11013 = vst [vmem:[#allocation13_spill] sm:$0xff] %v6200_v17  ;;  %v81_v14 = vmul.f32 0.020408163, %v67_v7  ;;  %v80_v15 = vmul.f32 0.020408163, %v64_v1  ;;  %v107_v18 = vmul.f32 %v6197_v4, %v6197_v4  ;;  %v106_v20 = vmul.f32 %v6200_v17, %v6200_v17 }
  0xab   :  { %v6209_v19 = vsub.f32 %v6029_v24, %v81_v14  ;;  %v6212_v21 = vsub.f32 %v6034_v25, %v80_v15  ;;  %v140_v22 = vsel %vm25_vm0, %v106_v20, 0.0  ;;  %v143_v5 = vsel %vm25_vm0, %v107_v18, 0.0 }
  0xac   :  { %138 = vadd.xlane.f32.xlu1 %v137_v0  ;;  %v437_v23 = vpop.xlane.xlu1 %436  ;;  %141 = vadd.xlane.f32.xlu0 %v140_v22  ;;  %v440_v27 = vpop.xlane.xlu0 %439 }
  0xad   :  { %11014 = vst [vmem:[#allocation14_spill] sm:$0xff] %v6209_v19  ;;  %11015 = vst [vmem:[#allocation15_spill] sm:$0xff] %v6212_v21  ;;  %v477_v30 = vmul.f32 0.020408163, %v437_v23  ;;  %v478_v31 = vmul.f32 0.020408163, %v440_v27  ;;  %v109_v34 = vmul.f32 %v6209_v19, %v6209_v19  ;;  %v108_v24 = vmul.f32 %v6212_v21, %v6212_v21 }
  0xaf   :  { %v6221_v35 = vsub.f32 %v6043_v28, %v477_v30  ;;  %v6224_v25 = vsub.f32 %v6048_v29, %v478_v31  ;;  %v146_v38 = vsel %vm25_vm0, %v108_v24, 0.0  ;;  %v149_v42 = vsel %vm25_vm0, %v109_v34, 0.0 }
  0xb0   :  { %144 = vadd.xlane.f32.xlu1 %v143_v5  ;;  %v446_v8 = vpop.xlane.xlu1 %445  ;;  %147 = vadd.xlane.f32.xlu0 %v146_v38  ;;  %v443_v43 = vpop.xlane.xlu0 %442 }
  0xb1   :  { %11016 = vst [vmem:[#allocation16_spill] sm:$0xff] %v6221_v35  ;;  %11017 = vst [vmem:[#allocation17_spill] sm:$0xff] %v6224_v25  ;;  %v480_v46 = vmul.f32 0.020408163, %v446_v8  ;;  %v479_v47 = vmul.f32 0.020408163, %v443_v43  ;;  %v505_v50 = vmul.f32 %v6221_v35, %v6221_v35  ;;  %v506_v28 = vmul.f32 %v6224_v25, %v6224_v25 }
  0xb3   :  { %v6233_v51 = vsub.f32 %v6057_v32, %v480_v46  ;;  %v6236_v29 = vsub.f32 %v6062_v33, %v479_v47  ;;  %v519_v54 = vsel %vm25_vm0, %v505_v50, 0.0  ;;  %v522_v56 = vsel %vm25_vm0, %v506_v28, 0.0 }
  0xb4   :  { %150 = vadd.xlane.f32.xlu1 %v149_v42  ;;  %v452_v12 = vpop.xlane.xlu1 %451  ;;  %520 = vadd.xlane.f32.xlu0 %v519_v54  ;;  %v449_v57 = vpop.xlane.xlu0 %448 }
  0xb5   :  { %11018 = vst [vmem:[#allocation18_spill] sm:$0xff] %v6233_v51  ;;  %11019 = vst [vmem:[#allocation19_spill] sm:$0xff] %v6236_v29  ;;  %v482_v58 = vmul.f32 0.020408163, %v452_v12  ;;  %v481_v59 = vmul.f32 0.020408163, %v449_v57  ;;  %v508_v62 = vmul.f32 %v6233_v51, %v6233_v51  ;;  %v507_v32 = vmul.f32 %v6236_v29, %v6236_v29 }
  0xb7   :  { %v6245_v63 = vsub.f32 %v6071_v36, %v482_v58  ;;  %v6248_v33 = vsub.f32 %v6076_v37, %v481_v59  ;;  %v525_v3 = vsel %vm25_vm0, %v507_v32, 0.0  ;;  %v528_v6 = vsel %vm25_vm0, %v508_v62, 0.0 }
  0xb8   :  { %523 = vadd.xlane.f32.xlu1 %v522_v56  ;;  %v458_v16 = vpop.xlane.xlu1 %457  ;;  %526 = vadd.xlane.f32.xlu0 %v525_v3  ;;  %v455_v7 = vpop.xlane.xlu0 %454 }
  0xb9   :  { %11020 = vst [vmem:[#allocation20_spill] sm:$0xff] %v6245_v63  ;;  %11021 = vst [vmem:[#allocation21_spill] sm:$0xff] %v6248_v33  ;;  %v484_v0 = vmul.f32 0.020408163, %v458_v16  ;;  %v483_v1 = vmul.f32 0.020408163, %v455_v7  ;;  %v510_v14 = vmul.f32 %v6245_v63, %v6245_v63  ;;  %v509_v36 = vmul.f32 %v6248_v33, %v6248_v33 }
  0xbb   :  { %v6257_v15 = vsub.f32 %v6085_v40, %v484_v0  ;;  %v6260_v37 = vsub.f32 %v6090_v41, %v483_v1  ;;  %v531_v18 = vsel %vm25_vm0, %v509_v36, 0.0  ;;  %v534_v22 = vsel %vm25_vm0, %v510_v14, 0.0  ;;  %v6316_v0 = vld [vmem:[%s10844_s0 + $0xe0] sm:$0xff]  ;;  %v6321_v1 = vld [vmem:[%s10844_s0 + $0xf0] sm:$0xff] }
  0xbc   :  { %529 = vadd.xlane.f32.xlu1 %v528_v6  ;;  %v464_v20 = vpop.xlane.xlu1 %463  ;;  %532 = vadd.xlane.f32.xlu0 %v531_v18  ;;  %v461_v23 = vpop.xlane.xlu0 %460  ;;  %v846_v14 = vsel %vm25_vm0, %v6316_v0, 0.0  ;;  %v852_v36 = vsel %vm25_vm0, %v6321_v1, 0.0  ;;  %v6330_v18 = vld [vmem:[%s10844_s0 + $0xf8] sm:$0xff] }
  0xbd   :  { %11022 = vst [vmem:[#allocation22_spill] sm:$0xff] %v6257_v15  ;;  %11023 = vst [vmem:[#allocation23_spill] sm:$0xff] %v6260_v37  ;;  %v486_v5 = vmul.f32 0.020408163, %v464_v20  ;;  %v485_v27 = vmul.f32 0.020408163, %v461_v23  ;;  %v512_v30 = vmul.f32 %v6257_v15, %v6257_v15  ;;  %v511_v40 = vmul.f32 %v6260_v37, %v6260_v37 }
  0xbe   :  { %v6335_v20 = vld [vmem:[%s10844_s0 + $0x100] sm:$0xff] }
  0xbf   :  { %v6269_v31 = vsub.f32 %v6099_v44, %v486_v5  ;;  %v6272_v41 = vsub.f32 %v6104_v45, %v485_v27  ;;  %v537_v34 = vsel %vm25_vm0, %v511_v40, 0.0  ;;  %v540_v38 = vsel %vm25_vm0, %v512_v30, 0.0  ;;  %v6344_v5 = vld [vmem:[%s10844_s0 + $0x108] sm:$0xff]  ;;  %v6349_v27 = vld [vmem:[%s10844_s0 + $0x110] sm:$0xff] }
  0xc0   :  { %535 = vadd.xlane.f32.xlu1 %v534_v22  ;;  %v470_v24 = vpop.xlane.xlu1 %469  ;;  %538 = vadd.xlane.f32.xlu0 %v537_v34  ;;  %v467_v8 = vpop.xlane.xlu0 %466  ;;  %v855_v22 = vsel %vm25_vm0, %v6330_v18, 0.0  ;;  %v858_v23 = vsel %vm25_vm0, %v6335_v20, 0.0  ;;  %v861_v30 = vsel %vm25_vm0, %v6344_v5, 0.0  ;;  %v864_v40 = vsel %vm25_vm0, %v6349_v27, 0.0  ;;  %v6358_v34 = vld [vmem:[%s10844_s0 + $0x118] sm:$0xff] }
  0xc1   :  { %11024 = vst [vmem:[#allocation24_spill] sm:$0xff] %v6269_v31  ;;  %11025 = vst [vmem:[#allocation25_spill] sm:$0xff] %v6272_v41  ;;  %v488_v42 = vmul.f32 0.020408163, %v470_v24  ;;  %v487_v43 = vmul.f32 0.020408163, %v467_v8  ;;  %v514_v46 = vmul.f32 %v6269_v31, %v6269_v31  ;;  %v513_v44 = vmul.f32 %v6272_v41, %v6272_v41 }
  0xc2   :  { %v6363_v24 = vld [vmem:[%s10844_s0 + $0x120] sm:$0xff] }
  0xc3   :  { %v6281_v47 = vsub.f32 %v6113_v48, %v488_v42  ;;  %v6284_v45 = vsub.f32 %v6118_v49, %v487_v43  ;;  %v543_v50 = vsel %vm25_vm0, %v513_v44, 0.0  ;;  %v546_v54 = vsel %vm25_vm0, %v514_v46, 0.0  ;;  %v6372_v42 = vld [vmem:[%s10844_s0 + $0x128] sm:$0xff]  ;;  %v6377_v43 = vld [vmem:[%s10844_s0 + $0x130] sm:$0xff] }
  0xc4   :  { %541 = vadd.xlane.f32.xlu1 %v540_v38  ;;  %v476_v28 = vpop.xlane.xlu1 %475  ;;  %544 = vadd.xlane.f32.xlu0 %v543_v50  ;;  %v473_v12 = vpop.xlane.xlu0 %472  ;;  %v867_v38 = vsel %vm25_vm0, %v6358_v34, 0.0  ;;  %v870_v8 = vsel %vm25_vm0, %v6363_v24, 0.0  ;;  %v873_v46 = vsel %vm25_vm0, %v6372_v42, 0.0  ;;  %v876_v44 = vsel %vm25_vm0, %v6377_v43, 0.0  ;;  %v6386_v50 = vld [vmem:[%s10844_s0 + $0x138] sm:$0xff] }
  0xc5   :  { %11026 = vst [vmem:[#allocation26_spill] sm:$0xff] %v6281_v47  ;;  %11027 = vst [vmem:[#allocation27_spill] sm:$0xff] %v6284_v45  ;;  %v490_v56 = vmul.f32 0.020408163, %v476_v28  ;;  %v489_v57 = vmul.f32 0.020408163, %v473_v12  ;;  %v516_v58 = vmul.f32 %v6281_v47, %v6281_v47  ;;  %v515_v48 = vmul.f32 %v6284_v45, %v6284_v45 }
  0xc6   :  { %v6391_v28 = vld [vmem:[%s10844_s0 + $0x140] sm:$0xff] }
  0xc7   :  { %v6293_v59 = vsub.f32 %v6127_v52, %v490_v56  ;;  %v6296_v49 = vsub.f32 %v6132_v53, %v489_v57  ;;  %v549_v62 = vsel %vm25_vm0, %v515_v48, 0.0  ;;  %v552_v32 = vsel %vm25_vm0, %v516_v58, 0.0  ;;  %v6307_v52 = vld [vmem:[%s10844_s0 + $0xe8] sm:$0xff] }
  0xc8   :  { %547 = vadd.xlane.f32.xlu1 %v546_v54  ;;  %550 = vadd.xlane.f32.xlu0 %v549_v62  ;;  %v849_v7 = vsel %vm25_vm0, %v6307_v52, 0.0  ;;  %v879_v54 = vsel %vm25_vm0, %v6386_v50, 0.0  ;;  %v882_v12 = vsel %vm25_vm0, %v6391_v28, 0.0  ;;  %v6400_v56 = vld [vmem:[%s10844_s0 + $0x148] sm:$0xff] }
  0xc9   :  { %11028 = vst [vmem:[#allocation28_spill] sm:$0xff] %v6293_v59  ;;  %11029 = vst [vmem:[#allocation29_spill] sm:$0xff] %v6296_v49  ;;  %v518_v3 = vmul.f32 %v6293_v59, %v6293_v59  ;;  %v517_v16 = vmul.f32 %v6296_v49, %v6296_v49  ;;  %v885_v57 = vsel %vm25_vm0, %v6400_v56, 0.0 }
  0xcb   :  { %v555_v53 = vsel %vm25_vm0, %v517_v16, 0.0  ;;  %v558_v6 = vsel %vm25_vm0, %v518_v3, 0.0 }
  0xcc   :  { %553 = vadd.xlane.f32.xlu1 %v552_v32  ;;  %556 = vadd.xlane.f32.xlu0 %v555_v53 }
  0xd0   :  { %559 = vadd.xlane.f32.xlu1 %v558_v6  ;;  %850 = vadd.xlane.f32.xlu0 %v849_v7 }
  0xd4   :  { %847 = vadd.xlane.f32.xlu1 %v846_v14  ;;  %853 = vadd.xlane.f32.xlu0 %v852_v36 }
  0xd8   :  { %856 = vadd.xlane.f32.xlu1 %v855_v22  ;;  %859 = vadd.xlane.f32.xlu0 %v858_v23 }
  0xdc   :  { %862 = vadd.xlane.f32.xlu1 %v861_v30  ;;  %865 = vadd.xlane.f32.xlu0 %v864_v40 }
  0xe0   :  { %868 = vadd.xlane.f32.xlu1 %v867_v38  ;;  %871 = vadd.xlane.f32.xlu0 %v870_v8 }
  0xe4   :  { %874 = vadd.xlane.f32.xlu1 %v873_v46  ;;  %877 = vadd.xlane.f32.xlu0 %v876_v44 }
  0xe8   :  { %880 = vadd.xlane.f32.xlu1 %v879_v54  ;;  %883 = vadd.xlane.f32.xlu0 %v882_v12 }
  0xec   :  { %886 = vadd.xlane.f32.xlu1 %v885_v57 }
 0x125   :  { %v6404_v58 = vpop.xlane.xlu0 %111 }
 0x129   :  { %v6406_v48 = vpop.xlane.xlu1 %114  ;;  %v6408_v62 = vpop.xlane.xlu0 %117 }
 0x12d   :  { %v6410_v32 = vpop.xlane.xlu1 %120  ;;  %v6412_v3 = vpop.xlane.xlu0 %123 }
 0x131   :  { %v6414_v16 = vpop.xlane.xlu1 %126  ;;  %v6416_v53 = vpop.xlane.xlu0 %129 }
 0x135   :  { %v6418_v6 = vpop.xlane.xlu1 %132  ;;  %v6420_v7 = vpop.xlane.xlu0 %135 }
 0x139   :  { %v6422_v14 = vpop.xlane.xlu1 %138  ;;  %v6424_v36 = vpop.xlane.xlu0 %141 }
 0x13d   :  { %v6426_v22 = vpop.xlane.xlu1 %144  ;;  %v6428_v23 = vpop.xlane.xlu0 %147 }
 0x141   :  { %v6430_v30 = vpop.xlane.xlu1 %150  ;;  %v6432_v40 = vpop.xlane.xlu0 %520 }
 0x145   :  { %v6434_v38 = vpop.xlane.xlu1 %523  ;;  %v6436_v8 = vpop.xlane.xlu0 %526 }
 0x149   :  { %v6438_v46 = vpop.xlane.xlu1 %529  ;;  %v6440_v44 = vpop.xlane.xlu0 %532 }
 0x14d   :  { %v6442_v54 = vpop.xlane.xlu1 %535  ;;  %v6444_v12 = vpop.xlane.xlu0 %538 }
 0x151   :  { %v6446_v57 = vpop.xlane.xlu1 %541  ;;  %v6448_v49 = vpop.xlane.xlu0 %544 }
 0x155   :  { %v6450_v45 = vpop.xlane.xlu1 %547  ;;  %v6452_v41 = vpop.xlane.xlu0 %550 }
 0x159   :  { %v6454_v37 = vpop.xlane.xlu1 %553  ;;  %v6456_v33 = vpop.xlane.xlu0 %556 }
 0x15d   :  { %v6458_v29 = vpop.xlane.xlu1 %559  ;;  %v851_v59 = vpop.xlane.xlu0 %850 }
 0x15e   :  { %v889_v35 = vmul.f32 0.020408163, %v851_v59 }
 0x160   :  { %v6461_v47 = vsub.f32 %v6307_v52, %v889_v35 }
 0x161   :  { %v848_v31 = vpop.xlane.xlu1 %847  ;;  %v854_v15 = vpop.xlane.xlu0 %853 }
 0x162   :  { %11030 = vst [vmem:[#allocation30_spill] sm:$0xff] %v6461_v47  ;;  %v888_v63 = vmul.f32 0.020408163, %v848_v31  ;;  %v890_v51 = vmul.f32 0.020408163, %v854_v15  ;;  %v917_v25 = vmul.f32 %v6461_v47, %v6461_v47 }
 0x164   :  { %v6466_v21 = vsub.f32 %v6316_v0, %v888_v63  ;;  %v6469_v17 = vsub.f32 %v6321_v1, %v890_v51  ;;  %v933_v13 = vsel %vm25_vm0, %v917_v25, 0.0 }
 0x165   :  { %v857_v9 = vpop.xlane.xlu1 %856  ;;  %934 = vadd.xlane.f32.xlu1 %v933_v13  ;;  %v860_v59 = vpop.xlane.xlu0 %859 }
 0x166   :  { %11031 = vst [vmem:[#allocation31_spill] sm:$0xff] %v6466_v21  ;;  %11032 = vst [vmem:[#allocation32_spill] sm:$0xff] %v6469_v17  ;;  %v891_v35 = vmul.f32 0.020408163, %v857_v9  ;;  %v916_v52 = vmul.f32 %v6466_v21, %v6466_v21  ;;  %v892_v31 = vmul.f32 0.020408163, %v860_v59  ;;  %v918_v15 = vmul.f32 %v6469_v17, %v6469_v17 }
 0x168   :  { %v6477_v47 = vsub.f32 %v6330_v18, %v891_v35  ;;  %v930_v63 = vsel %vm25_vm0, %v916_v52, 0.0  ;;  %v6481_v51 = vsub.f32 %v6335_v20, %v892_v31  ;;  %v936_v13 = vsel %vm25_vm0, %v918_v15, 0.0 }
 0x169   :  { %v863_v25 = vpop.xlane.xlu1 %862  ;;  %931 = vadd.xlane.f32.xlu0 %v930_v63  ;;  %v866_v9 = vpop.xlane.xlu0 %865 }
 0x16a   :  { %11033 = vst [vmem:[#allocation33_spill] sm:$0xff] %v6477_v47  ;;  %11034 = vst [vmem:[#allocation34_spill] sm:$0xff] %v6481_v51  ;;  %v893_v0 = vmul.f32 0.020408163, %v863_v25  ;;  %v919_v1 = vmul.f32 %v6477_v47, %v6477_v47  ;;  %v894_v59 = vmul.f32 0.020408163, %v866_v9  ;;  %v920_v17 = vmul.f32 %v6481_v51, %v6481_v51 }
 0x16c   :  { %v6489_v18 = vsub.f32 %v6344_v5, %v893_v0  ;;  %v939_v35 = vsel %vm25_vm0, %v919_v1, 0.0  ;;  %v6493_v20 = vsub.f32 %v6349_v27, %v894_v59  ;;  %v942_v31 = vsel %vm25_vm0, %v920_v17, 0.0 }
 0x16d   :  { %v869_v52 = vpop.xlane.xlu1 %868  ;;  %940 = vadd.xlane.f32.xlu1 %v939_v35  ;;  %937 = vadd.xlane.f32.xlu0 %v936_v13  ;;  %v872_v15 = vpop.xlane.xlu0 %871 }
 0x16e   :  { %11035 = vst [vmem:[#allocation35_spill] sm:$0xff] %v6489_v18  ;;  %11036 = vst [vmem:[#allocation36_spill] sm:$0xff] %v6493_v20  ;;  %v895_v63 = vmul.f32 0.020408163, %v869_v52  ;;  %v921_v25 = vmul.f32 %v6489_v18, %v6489_v18  ;;  %v896_v9 = vmul.f32 0.020408163, %v872_v15  ;;  %v922_v5 = vmul.f32 %v6493_v20, %v6493_v20 }
 0x16f   :  { %v6636_v20 = vld [vmem:[%s10844_s0 + $0x1b0] sm:$0xff] }
 0x170   :  { %v6501_v0 = vsub.f32 %v6358_v34, %v895_v63  ;;  %v945_v27 = vsel %vm25_vm0, %v921_v25, 0.0  ;;  %v6505_v1 = vsub.f32 %v6363_v24, %v896_v9  ;;  %v948_v17 = vsel %vm25_vm0, %v922_v5, 0.0 }
 0x171   :  { %v875_v13 = vpop.xlane.xlu1 %874  ;;  %946 = vadd.xlane.f32.xlu1 %v945_v27  ;;  %943 = vadd.xlane.f32.xlu0 %v942_v31  ;;  %v878_v59 = vpop.xlane.xlu0 %877 }
 0x172   :  { %11037 = vst [vmem:[#allocation37_spill] sm:$0xff] %v6501_v0  ;;  %11038 = vst [vmem:[#allocation38_spill] sm:$0xff] %v6505_v1  ;;  %v897_v35 = vmul.f32 0.020408163, %v875_v13  ;;  %v923_v52 = vmul.f32 %v6501_v0, %v6501_v0  ;;  %v898_v15 = vmul.f32 0.020408163, %v878_v59  ;;  %v924_v34 = vmul.f32 %v6505_v1, %v6505_v1 }
 0x173   :  { %v6631_v1 = vld [vmem:[%s10844_s0 + $0x1b8] sm:$0xff] }
 0x174   :  { %v6513_v63 = vsub.f32 %v6372_v42, %v897_v35  ;;  %v951_v24 = vsel %vm25_vm0, %v923_v52, 0.0  ;;  %v6517_v25 = vsub.f32 %v6377_v43, %v898_v15  ;;  %v954_v9 = vsel %vm25_vm0, %v924_v34, 0.0 }
 0x175   :  { %v881_v31 = vpop.xlane.xlu1 %880  ;;  %952 = vadd.xlane.f32.xlu1 %v951_v24  ;;  %949 = vadd.xlane.f32.xlu0 %v948_v17  ;;  %v884_v5 = vpop.xlane.xlu0 %883 }
 0x176   :  { %11039 = vst [vmem:[#allocation39_spill] sm:$0xff] %v6513_v63  ;;  %11040 = vst [vmem:[#allocation40_spill] sm:$0xff] %v6517_v25  ;;  %v899_v27 = vmul.f32 0.020408163, %v881_v31  ;;  %v925_v13 = vmul.f32 %v6513_v63, %v6513_v63  ;;  %v900_v59 = vmul.f32 0.020408163, %v884_v5  ;;  %v926_v42 = vmul.f32 %v6517_v25, %v6517_v25 }
 0x177   :  { %v6622_v25 = vld [vmem:[%s10844_s0 + $0x1a0] sm:$0xff] }
 0x178   :  { %v6525_v35 = vsub.f32 %v6386_v50, %v899_v27  ;;  %v957_v43 = vsel %vm25_vm0, %v925_v13, 0.0  ;;  %v6529_v52 = vsub.f32 %v6391_v28, %v900_v59  ;;  %v960_v24 = vsel %vm25_vm0, %v926_v42, 0.0  ;;  %v6546_v27 = vld [vmem:[%s10844_s0 + $0x150] sm:$0xff]  ;;  %v6551_v13 = vld [vmem:[%s10844_s0 + $0x158] sm:$0xff] }
 0x179   :  { %v887_v17 = vpop.xlane.xlu1 %886  ;;  %958 = vadd.xlane.f32.xlu1 %v957_v43  ;;  %955 = vadd.xlane.f32.xlu0 %v954_v9  ;;  %v1257_v59 = vsel %vm25_vm0, %v6546_v27, 0.0  ;;  %v1260_v42 = vsel %vm25_vm0, %v6551_v13, 0.0  ;;  %v6561_v43 = vld [vmem:[%s10844_s0 + $0x168] sm:$0xff] }
 0x17a   :  { %11041 = vst [vmem:[#allocation41_spill] sm:$0xff] %v6525_v35  ;;  %11042 = vst [vmem:[#allocation42_spill] sm:$0xff] %v6529_v52  ;;  %v901_v15 = vmul.f32 0.020408163, %v887_v17  ;;  %v927_v34 = vmul.f32 %v6525_v35, %v6525_v35  ;;  %v928_v31 = vmul.f32 %v6529_v52, %v6529_v52  ;;  %v6566_v17 = vld [vmem:[%s10844_s0 + $0x160] sm:$0xff]  ;;  %v6617_v52 = vld [vmem:[%s10844_s0 + $0x1a8] sm:$0xff] }
 0x17c   :  { %v6537_v50 = vsub.f32 %v6400_v56, %v901_v15  ;;  %v963_v5 = vsel %vm25_vm0, %v927_v34, 0.0  ;;  %v966_v9 = vsel %vm25_vm0, %v928_v31, 0.0  ;;  %v1266_v15 = vsel %vm25_vm0, %v6561_v43, 0.0  ;;  %v6580_v31 = vld [vmem:[%s10844_s0 + $0x170] sm:$0xff] }
 0x17d   :  { %964 = vadd.xlane.f32.xlu1 %v963_v5  ;;  %961 = vadd.xlane.f32.xlu0 %v960_v24  ;;  %v1263_v34 = vsel %vm25_vm0, %v6566_v17, 0.0  ;;  %v6575_v24 = vld [vmem:[%s10844_s0 + $0x178] sm:$0xff] }
 0x17e   :  { %11043 = vst [vmem:[#allocation43_spill] sm:$0xff] %v6537_v50  ;;  %v929_v28 = vmul.f32 %v6537_v50, %v6537_v50  ;;  %v1272_v5 = vsel %vm25_vm0, %v6575_v24, 0.0 }
 0x180   :  { %v969_v56 = vsel %vm25_vm0, %v929_v28, 0.0  ;;  %v1269_v28 = vsel %vm25_vm0, %v6580_v31, 0.0 }
 0x181   :  { %970 = vadd.xlane.f32.xlu1 %v969_v56  ;;  %967 = vadd.xlane.f32.xlu0 %v966_v9  ;;  %v6589_v9 = vld [vmem:[%s10844_s0 + $0x188] sm:$0xff]  ;;  %v6594_v56 = vld [vmem:[%s10844_s0 + $0x180] sm:$0xff] }
 0x185   :  { %1258 = vadd.xlane.f32.xlu1 %v1257_v59  ;;  %1261 = vadd.xlane.f32.xlu0 %v1260_v42  ;;  %v1278_v59 = vsel %vm25_vm0, %v6589_v9, 0.0  ;;  %v1275_v42 = vsel %vm25_vm0, %v6594_v56, 0.0 }
 0x189   :  { %1267 = vadd.xlane.f32.xlu1 %v1266_v15  ;;  %1264 = vadd.xlane.f32.xlu0 %v1263_v34  ;;  %v6603_v15 = vld [vmem:[%s10844_s0 + $0x198] sm:$0xff]  ;;  %v6608_v34 = vld [vmem:[%s10844_s0 + $0x190] sm:$0xff] }
 0x18d   :  { %1273 = vadd.xlane.f32.xlu1 %v1272_v5  ;;  %1270 = vadd.xlane.f32.xlu0 %v1269_v28  ;;  %v1284_v5 = vsel %vm25_vm0, %v6603_v15, 0.0  ;;  %v1281_v28 = vsel %vm25_vm0, %v6608_v34, 0.0 }
 0x191   :  { %1279 = vadd.xlane.f32.xlu1 %v1278_v59  ;;  %1276 = vadd.xlane.f32.xlu0 %v1275_v42  ;;  %v1290_v59 = vsel %vm25_vm0, %v6617_v52, 0.0  ;;  %v1287_v42 = vsel %vm25_vm0, %v6622_v25, 0.0 }
 0x195   :  { %1285 = vadd.xlane.f32.xlu1 %v1284_v5  ;;  %1282 = vadd.xlane.f32.xlu0 %v1281_v28  ;;  %v1296_v5 = vsel %vm25_vm0, %v6631_v1, 0.0  ;;  %v1293_v28 = vsel %vm25_vm0, %v6636_v20, 0.0 }
 0x199   :  { %1291 = vadd.xlane.f32.xlu1 %v1290_v59  ;;  %1288 = vadd.xlane.f32.xlu0 %v1287_v42 }
 0x19d   :  { %1297 = vadd.xlane.f32.xlu1 %v1296_v5  ;;  %1294 = vadd.xlane.f32.xlu0 %v1293_v28 }
 0x1f2   :  { %v6642_v51 = vpop.xlane.xlu1 %934 }
 0x1f6   :  { %v6644_v50 = vpop.xlane.xlu0 %931 }
 0x1fa   :  { %v6646_v21 = vpop.xlane.xlu1 %940  ;;  %v6648_v35 = vpop.xlane.xlu0 %937 }
 0x1fe   :  { %v6650_v63 = vpop.xlane.xlu1 %946  ;;  %v6652_v59 = vpop.xlane.xlu0 %943 }
 0x1ff   :  { %11044 = vst [vmem:[#allocation44_spill] sm:$0xff] %v6652_v59 }
 0x202   :  { %v6654_v42 = vpop.xlane.xlu1 %952  ;;  %v6656_v0 = vpop.xlane.xlu0 %949 }
 0x203   :  { %11045 = vst [vmem:[#allocation45_spill] sm:$0xff] %v6656_v0 }
 0x206   :  { %v6658_v18 = vpop.xlane.xlu1 %958  ;;  %v6660_v5 = vpop.xlane.xlu0 %955 }
 0x207   :  { %11046 = vst [vmem:[#allocation46_spill] sm:$0xff] %v6660_v5 }
 0x20a   :  { %v6662_v28 = vpop.xlane.xlu1 %964  ;;  %v6664_v47 = vpop.xlane.xlu0 %961 }
 0x20b   :  { %11047 = vst [vmem:[#allocation47_spill] sm:$0xff] %v6664_v47 }
 0x20e   :  { %v6666_v26 = vpop.xlane.xlu1 %970  ;;  %v6668_v61 = vpop.xlane.xlu0 %967 }
 0x20f   :  { %11048 = vst [vmem:[#allocation48_spill] sm:$0xff] %v6668_v61 }
 0x212   :  { %v1259_v19 = vpop.xlane.xlu1 %1258  ;;  %v1262_v60 = vpop.xlane.xlu0 %1261 }
 0x213   :  { %v1299_v4 = vmul.f32 0.020408163, %v1259_v19  ;;  %v1300_v55 = vmul.f32 0.020408163, %v1262_v60 }
 0x215   :  { %v6671_v39 = vsub.f32 %v6546_v27, %v1299_v4  ;;  %v6674_v2 = vsub.f32 %v6551_v13, %v1300_v55 }
 0x216   :  { %v1268_v11 = vpop.xlane.xlu1 %1267  ;;  %v1265_v10 = vpop.xlane.xlu0 %1264 }
 0x217   :  { %11049 = vst [vmem:[#allocation49_spill] sm:$0xff] %v6671_v39  ;;  %11050 = vst [vmem:[#allocation50_spill] sm:$0xff] %v6674_v2  ;;  %v1302_v5 = vmul.f32 0.020408163, %v1268_v11  ;;  %v1301_v0 = vmul.f32 0.020408163, %v1265_v10  ;;  %v1327_v47 = vmul.f32 %v6671_v39, %v6671_v39  ;;  %v1328_v61 = vmul.f32 %v6674_v2, %v6674_v2 }
 0x219   :  { %v6681_v59 = vsub.f32 %v6561_v43, %v1302_v5  ;;  %v6684_v60 = vsub.f32 %v6566_v17, %v1301_v0  ;;  %v1341_v4 = vsel %vm25_vm0, %v1327_v47, 0.0  ;;  %v1344_v55 = vsel %vm25_vm0, %v1328_v61, 0.0 }
 0x21a   :  { %v1274_v19 = vpop.xlane.xlu1 %1273  ;;  %1342 = vadd.xlane.f32.xlu0 %v1341_v4  ;;  %1345 = vadd.xlane.f32.xlu1 %v1344_v55  ;;  %v1271_v10 = vpop.xlane.xlu0 %1270 }
 0x21b   :  { %11051 = vst [vmem:[#allocation51_spill] sm:$0xff] %v6681_v59  ;;  %11052 = vst [vmem:[#allocation52_spill] sm:$0xff] %v6684_v60  ;;  %v1304_v11 = vmul.f32 0.020408163, %v1274_v19  ;;  %v1303_v27 = vmul.f32 0.020408163, %v1271_v10  ;;  %v1330_v13 = vmul.f32 %v6681_v59, %v6681_v59  ;;  %v1329_v43 = vmul.f32 %v6684_v60, %v6684_v60 }
 0x21d   :  { %v6693_v5 = vsub.f32 %v6575_v24, %v1304_v11  ;;  %v6696_v0 = vsub.f32 %v6580_v31, %v1303_v27  ;;  %v1350_v61 = vsel %vm25_vm0, %v1330_v13, 0.0  ;;  %v1347_v47 = vsel %vm25_vm0, %v1329_v43, 0.0 }
 0x21e   :  { %v1280_v17 = vpop.xlane.xlu1 %1279  ;;  %1351 = vadd.xlane.f32.xlu1 %v1350_v61  ;;  %1348 = vadd.xlane.f32.xlu0 %v1347_v47  ;;  %v1277_v4 = vpop.xlane.xlu0 %1276 }
 0x21f   :  { %11053 = vst [vmem:[#allocation53_spill] sm:$0xff] %v6693_v5  ;;  %11054 = vst [vmem:[#allocation54_spill] sm:$0xff] %v6696_v0  ;;  %v1306_v55 = vmul.f32 0.020408163, %v1280_v17  ;;  %v1305_v19 = vmul.f32 0.020408163, %v1277_v4  ;;  %v1332_v10 = vmul.f32 %v6693_v5, %v6693_v5  ;;  %v1331_v24 = vmul.f32 %v6696_v0, %v6696_v0 }
 0x220   :  { %v6846_v0 = vld [vmem:[%s10844_s0 + $0x220] sm:$0xff] }
 0x221   :  { %v6705_v11 = vsub.f32 %v6589_v9, %v1306_v55  ;;  %v6708_v31 = vsub.f32 %v6594_v56, %v1305_v19  ;;  %v1356_v27 = vsel %vm25_vm0, %v1332_v10, 0.0  ;;  %v1353_v13 = vsel %vm25_vm0, %v1331_v24, 0.0 }
 0x222   :  { %v1286_v43 = vpop.xlane.xlu1 %1285  ;;  %1357 = vadd.xlane.f32.xlu1 %v1356_v27  ;;  %1354 = vadd.xlane.f32.xlu0 %v1353_v13  ;;  %v1283_v61 = vpop.xlane.xlu0 %1282 }
 0x223   :  { %11055 = vst [vmem:[#allocation55_spill] sm:$0xff] %v6705_v11  ;;  %11056 = vst [vmem:[#allocation56_spill] sm:$0xff] %v6708_v31  ;;  %v1308_v47 = vmul.f32 0.020408163, %v1286_v43  ;;  %v1307_v17 = vmul.f32 0.020408163, %v1283_v61  ;;  %v1334_v4 = vmul.f32 %v6705_v11, %v6705_v11  ;;  %v1333_v9 = vmul.f32 %v6708_v31, %v6708_v31 }
 0x224   :  { %v6841_v31 = vld [vmem:[%s10844_s0 + $0x228] sm:$0xff] }
 0x225   :  { %v6717_v55 = vsub.f32 %v6603_v15, %v1308_v47  ;;  %v6720_v56 = vsub.f32 %v6608_v34, %v1307_v17  ;;  %v1362_v19 = vsel %vm25_vm0, %v1334_v4, 0.0  ;;  %v1359_v10 = vsel %vm25_vm0, %v1333_v9, 0.0 }
 0x226   :  { %v1292_v24 = vpop.xlane.xlu1 %1291  ;;  %1363 = vadd.xlane.f32.xlu1 %v1362_v19  ;;  %1360 = vadd.xlane.f32.xlu0 %v1359_v10  ;;  %v1289_v27 = vpop.xlane.xlu0 %1288 }
 0x227   :  { %11057 = vst [vmem:[#allocation57_spill] sm:$0xff] %v6717_v55  ;;  %11058 = vst [vmem:[#allocation58_spill] sm:$0xff] %v6720_v56  ;;  %v1310_v13 = vmul.f32 0.020408163, %v1292_v24  ;;  %v1309_v43 = vmul.f32 0.020408163, %v1289_v27  ;;  %v1336_v61 = vmul.f32 %v6717_v55, %v6717_v55  ;;  %v1335_v15 = vmul.f32 %v6720_v56, %v6720_v56 }
 0x228   :  { %v6832_v56 = vld [vmem:[%s10844_s0 + $0x210] sm:$0xff] }
 0x229   :  { %v6729_v47 = vsub.f32 %v6617_v52, %v1310_v13  ;;  %v6732_v34 = vsub.f32 %v6622_v25, %v1309_v43  ;;  %v1368_v17 = vsel %vm25_vm0, %v1336_v61, 0.0  ;;  %v1365_v4 = vsel %vm25_vm0, %v1335_v15, 0.0 }
 0x22a   :  { %v1298_v9 = vpop.xlane.xlu1 %1297  ;;  %1369 = vadd.xlane.f32.xlu1 %v1368_v17  ;;  %1366 = vadd.xlane.f32.xlu0 %v1365_v4  ;;  %v1295_v19 = vpop.xlane.xlu0 %1294 }
 0x22b   :  { %11059 = vst [vmem:[#allocation59_spill] sm:$0xff] %v6729_v47  ;;  %11060 = vst [vmem:[#allocation60_spill] sm:$0xff] %v6732_v34  ;;  %v1312_v10 = vmul.f32 0.020408163, %v1298_v9  ;;  %v1311_v24 = vmul.f32 0.020408163, %v1295_v19  ;;  %v1338_v27 = vmul.f32 %v6729_v47, %v6729_v47  ;;  %v1337_v52 = vmul.f32 %v6732_v34, %v6732_v34 }
 0x22c   :  { %v6827_v34 = vld [vmem:[%s10844_s0 + $0x218] sm:$0xff] }
 0x22d   :  { %v6741_v13 = vsub.f32 %v6631_v1, %v1312_v10  ;;  %v6744_v25 = vsub.f32 %v6636_v20, %v1311_v24  ;;  %v1374_v43 = vsel %vm25_vm0, %v1338_v27, 0.0  ;;  %v1371_v61 = vsel %vm25_vm0, %v1337_v52, 0.0  ;;  %v6755_v1 = vld [vmem:[%s10844_s0 + $0x1c0] sm:$0xff]  ;;  %v6760_v20 = vld [vmem:[%s10844_s0 + $0x1c8] sm:$0xff]  ;;  %v6771_v24 = vld [vmem:[%s10844_s0 + $0x1d8] sm:$0xff] }
 0x22e   :  { %1375 = vadd.xlane.f32.xlu1 %v1374_v43  ;;  %1372 = vadd.xlane.f32.xlu0 %v1371_v61  ;;  %v1668_v19 = vsel %vm25_vm0, %v6755_v1, 0.0  ;;  %v1671_v10 = vsel %vm25_vm0, %v6760_v20, 0.0  ;;  %v6776_v27 = vld [vmem:[%s10844_s0 + $0x1d0] sm:$0xff]  ;;  %v1677_v52 = vsel %vm25_vm0, %v6771_v24, 0.0  ;;  %v6785_v61 = vld [vmem:[%s10844_s0 + $0x1e8] sm:$0xff] }
 0x22f   :  { %11061 = vst [vmem:[#allocation61_spill] sm:$0xff] %v6741_v13  ;;  %11062 = vst [vmem:[#allocation62_spill] sm:$0xff] %v6744_v25  ;;  %v1340_v15 = vmul.f32 %v6741_v13, %v6741_v13  ;;  %v1339_v17 = vmul.f32 %v6744_v25, %v6744_v25  ;;  %v1674_v43 = vsel %vm25_vm0, %v6776_v27, 0.0  ;;  %v6818_v25 = vld [vmem:[%s10844_s0 + $0x200] sm:$0xff] }
 0x231   :  { %v1380_v4 = vsel %vm25_vm0, %v1340_v15, 0.0  ;;  %v1377_v9 = vsel %vm25_vm0, %v1339_v17, 0.0  ;;  %v6790_v15 = vld [vmem:[%s10844_s0 + $0x1e0] sm:$0xff]  ;;  %v1683_v17 = vsel %vm25_vm0, %v6785_v61, 0.0 }
 0x232   :  { %1381 = vadd.xlane.f32.xlu1 %v1380_v4  ;;  %1378 = vadd.xlane.f32.xlu0 %v1377_v9  ;;  %v1680_v4 = vsel %vm25_vm0, %v6790_v15, 0.0  ;;  %v6799_v9 = vld [vmem:[%s10844_s0 + $0x1f8] sm:$0xff] }
 0x236   :  { %1669 = vadd.xlane.f32.xlu1 %v1668_v19  ;;  %1672 = vadd.xlane.f32.xlu0 %v1671_v10  ;;  %v6804_v19 = vld [vmem:[%s10844_s0 + $0x1f0] sm:$0xff]  ;;  %v1689_v10 = vsel %vm25_vm0, %v6799_v9, 0.0 }
 0x23a   :  { %1678 = vadd.xlane.f32.xlu1 %v1677_v52  ;;  %1675 = vadd.xlane.f32.xlu0 %v1674_v43  ;;  %v1686_v52 = vsel %vm25_vm0, %v6804_v19, 0.0  ;;  %v6813_v43 = vld [vmem:[%s10844_s0 + $0x208] sm:$0xff] }
 0x23e   :  { %1684 = vadd.xlane.f32.xlu1 %v1683_v17  ;;  %1681 = vadd.xlane.f32.xlu0 %v1680_v4  ;;  %v1695_v17 = vsel %vm25_vm0, %v6813_v43, 0.0  ;;  %v1692_v4 = vsel %vm25_vm0, %v6818_v25, 0.0 }
 0x242   :  { %1690 = vadd.xlane.f32.xlu1 %v1689_v10  ;;  %1687 = vadd.xlane.f32.xlu0 %v1686_v52  ;;  %v1701_v10 = vsel %vm25_vm0, %v6827_v34, 0.0  ;;  %v1698_v52 = vsel %vm25_vm0, %v6832_v56, 0.0 }
 0x246   :  { %1696 = vadd.xlane.f32.xlu1 %v1695_v17  ;;  %1693 = vadd.xlane.f32.xlu0 %v1692_v4  ;;  %v1707_v17 = vsel %vm25_vm0, %v6841_v31, 0.0  ;;  %v1704_v4 = vsel %vm25_vm0, %v6846_v0, 0.0 }
 0x24a   :  { %1702 = vadd.xlane.f32.xlu1 %v1701_v10  ;;  %1699 = vadd.xlane.f32.xlu0 %v1698_v52 }
 0x24e   :  { %1708 = vadd.xlane.f32.xlu1 %v1707_v17  ;;  %1705 = vadd.xlane.f32.xlu0 %v1704_v4 }
 0x2a7   :  { %v6852_v60 = vpop.xlane.xlu1 %1345  ;;  %v6854_v13 = vpop.xlane.xlu0 %1342 }
 0x2a8   :  { %11063 = vst [vmem:[#allocation63_spill] sm:$0xff] %v6852_v60  ;;  %11064 = vst [vmem:[#allocation64_spill] sm:$0xff] %v6854_v13 }
 0x2ab   :  { %v6856_v39 = vpop.xlane.xlu1 %1351  ;;  %v6858_v47 = vpop.xlane.xlu0 %1348 }
 0x2ac   :  { %11065 = vst [vmem:[#allocation65_spill] sm:$0xff] %v6856_v39  ;;  %11066 = vst [vmem:[#allocation66_spill] sm:$0xff] %v6858_v47 }
 0x2af   :  { %v6860_v55 = vpop.xlane.xlu1 %1357  ;;  %v6862_v10 = vpop.xlane.xlu0 %1354 }
 0x2b0   :  { %11067 = vst [vmem:[#allocation67_spill] sm:$0xff] %v6860_v55  ;;  %11068 = vst [vmem:[#allocation68_spill] sm:$0xff] %v6862_v10 }
 0x2b3   :  { %v6864_v52 = vpop.xlane.xlu1 %1363  ;;  %v6866_v11 = vpop.xlane.xlu0 %1360 }
 0x2b4   :  { %11069 = vst [vmem:[#allocation69_spill] sm:$0xff] %v6864_v52  ;;  %11070 = vst [vmem:[#allocation70_spill] sm:$0xff] %v6866_v11 }
 0x2b7   :  { %v6868_v5 = vpop.xlane.xlu1 %1369  ;;  %v6870_v17 = vpop.xlane.xlu0 %1366 }
 0x2b8   :  { %11071 = vst [vmem:[#allocation71_spill] sm:$0xff] %v6868_v5  ;;  %11072 = vst [vmem:[#allocation72_spill] sm:$0xff] %v6870_v17 }
 0x2bb   :  { %v6872_v4 = vpop.xlane.xlu1 %1375  ;;  %v6874_v59 = vpop.xlane.xlu0 %1372 }
 0x2bc   :  { %11073 = vst [vmem:[#allocation73_spill] sm:$0xff] %v6872_v4  ;;  %11074 = vst [vmem:[#allocation74_spill] sm:$0xff] %v6874_v59 }
 0x2bf   :  { %v6876_v2 = vpop.xlane.xlu1 %1381  ;;  %v6878_v60 = vpop.xlane.xlu0 %1378 }
 0x2c0   :  { %11075 = vst [vmem:[#allocation75_spill] sm:$0xff] %v6876_v2  ;;  %11076 = vst [vmem:[#allocation76_spill] sm:$0xff] %v6878_v60 }
 0x2c3   :  { %v1670_v47 = vpop.xlane.xlu1 %1669  ;;  %v1673_v55 = vpop.xlane.xlu0 %1672 }
 0x2c4   :  { %v1710_v39 = vmul.f32 0.020408163, %v1670_v47  ;;  %v1711_v10 = vmul.f32 0.020408163, %v1673_v55 }
 0x2c6   :  { %v6881_v52 = vsub.f32 %v6755_v1, %v1710_v39  ;;  %v6884_v11 = vsub.f32 %v6760_v20, %v1711_v10 }
 0x2c7   :  { %v1679_v5 = vpop.xlane.xlu1 %1678  ;;  %v1676_v17 = vpop.xlane.xlu0 %1675 }
 0x2c8   :  { %11077 = vst [vmem:[#allocation77_spill] sm:$0xff] %v6881_v52  ;;  %11078 = vst [vmem:[#allocation78_spill] sm:$0xff] %v6884_v11  ;;  %v1713_v13 = vmul.f32 0.020408163, %v1679_v5  ;;  %v1712_v4 = vmul.f32 0.020408163, %v1676_v17  ;;  %v1738_v59 = vmul.f32 %v6881_v52, %v6881_v52  ;;  %v1739_v60 = vmul.f32 %v6884_v11, %v6884_v11 }
 0x2ca   :  { %v6891_v2 = vsub.f32 %v6771_v24, %v1713_v13  ;;  %v6894_v55 = vsub.f32 %v6776_v27, %v1712_v4  ;;  %v1752_v39 = vsel %vm25_vm0, %v1738_v59, 0.0  ;;  %v1755_v47 = vsel %vm25_vm0, %v1739_v60, 0.0 }
 0x2cb   :  { %v1685_v1 = vpop.xlane.xlu1 %1684  ;;  %1753 = vadd.xlane.f32.xlu0 %v1752_v39  ;;  %1756 = vadd.xlane.f32.xlu1 %v1755_v47  ;;  %v1682_v5 = vpop.xlane.xlu0 %1681 }
 0x2cc   :  { %11079 = vst [vmem:[#allocation79_spill] sm:$0xff] %v6891_v2  ;;  %11080 = vst [vmem:[#allocation80_spill] sm:$0xff] %v6894_v55  ;;  %v1715_v20 = vmul.f32 0.020408163, %v1685_v1  ;;  %v1714_v10 = vmul.f32 0.020408163, %v1682_v5  ;;  %v1741_v17 = vmul.f32 %v6891_v2, %v6891_v2  ;;  %v1740_v13 = vmul.f32 %v6894_v55, %v6894_v55 }
 0x2ce   :  { %v6903_v24 = vsub.f32 %v6785_v61, %v1715_v20  ;;  %v6906_v27 = vsub.f32 %v6790_v15, %v1714_v10  ;;  %v1761_v59 = vsel %vm25_vm0, %v1741_v17, 0.0  ;;  %v1758_v60 = vsel %vm25_vm0, %v1740_v13, 0.0 }
 0x2cf   :  { %v1691_v4 = vpop.xlane.xlu1 %1690  ;;  %1762 = vadd.xlane.f32.xlu1 %v1761_v59  ;;  %1759 = vadd.xlane.f32.xlu0 %v1758_v60  ;;  %v1688_v39 = vpop.xlane.xlu0 %1687 }
 0x2d0   :  { %11081 = vst [vmem:[#allocation81_spill] sm:$0xff] %v6903_v24  ;;  %11082 = vst [vmem:[#allocation82_spill] sm:$0xff] %v6906_v27  ;;  %v1717_v47 = vmul.f32 0.020408163, %v1691_v4  ;;  %v1716_v1 = vmul.f32 0.020408163, %v1688_v39  ;;  %v1743_v5 = vmul.f32 %v6903_v24, %v6903_v24  ;;  %v1742_v61 = vmul.f32 %v6906_v27, %v6906_v27 }
 0x2d1   :  { %v7056_v27 = vld [vmem:[%s10844_s0 + $0x290] sm:$0xff] }
 0x2d2   :  { %v6915_v20 = vsub.f32 %v6799_v9, %v1717_v47  ;;  %v6918_v15 = vsub.f32 %v6804_v19, %v1716_v1  ;;  %v1767_v10 = vsel %vm25_vm0, %v1743_v5, 0.0  ;;  %v1764_v17 = vsel %vm25_vm0, %v1742_v61, 0.0 }
 0x2d3   :  { %v1697_v13 = vpop.xlane.xlu1 %1696  ;;  %1768 = vadd.xlane.f32.xlu1 %v1767_v10  ;;  %1765 = vadd.xlane.f32.xlu0 %v1764_v17  ;;  %v1694_v59 = vpop.xlane.xlu0 %1693 }
 0x2d4   :  { %11083 = vst [vmem:[#allocation83_spill] sm:$0xff] %v6915_v20  ;;  %11084 = vst [vmem:[#allocation84_spill] sm:$0xff] %v6918_v15  ;;  %v1719_v60 = vmul.f32 0.020408163, %v1697_v13  ;;  %v1718_v4 = vmul.f32 0.020408163, %v1694_v59  ;;  %v1745_v39 = vmul.f32 %v6915_v20, %v6915_v20  ;;  %v1744_v9 = vmul.f32 %v6918_v15, %v6918_v15 }
 0x2d5   :  { %v7051_v15 = vld [vmem:[%s10844_s0 + $0x298] sm:$0xff] }
 0x2d6   :  { %v6927_v47 = vsub.f32 %v6813_v43, %v1719_v60  ;;  %v6930_v19 = vsub.f32 %v6818_v25, %v1718_v4  ;;  %v1773_v1 = vsel %vm25_vm0, %v1745_v39, 0.0  ;;  %v1770_v5 = vsel %vm25_vm0, %v1744_v9, 0.0 }
 0x2d7   :  { %v1703_v61 = vpop.xlane.xlu1 %1702  ;;  %1774 = vadd.xlane.f32.xlu1 %v1773_v1  ;;  %1771 = vadd.xlane.f32.xlu0 %v1770_v5  ;;  %v1700_v10 = vpop.xlane.xlu0 %1699 }
 0x2d8   :  { %11085 = vst [vmem:[#allocation85_spill] sm:$0xff] %v6927_v47  ;;  %11086 = vst [vmem:[#allocation86_spill] sm:$0xff] %v6930_v19  ;;  %v1721_v17 = vmul.f32 0.020408163, %v1703_v61  ;;  %v1720_v13 = vmul.f32 0.020408163, %v1700_v10  ;;  %v1747_v59 = vmul.f32 %v6927_v47, %v6927_v47  ;;  %v1746_v43 = vmul.f32 %v6930_v19, %v6930_v19 }
 0x2d9   :  { %v7042_v19 = vld [vmem:[%s10844_s0 + $0x280] sm:$0xff] }
 0x2da   :  { %v6939_v60 = vsub.f32 %v6827_v34, %v1721_v17  ;;  %v6942_v25 = vsub.f32 %v6832_v56, %v1720_v13  ;;  %v1779_v4 = vsel %vm25_vm0, %v1747_v59, 0.0  ;;  %v1776_v39 = vsel %vm25_vm0, %v1746_v43, 0.0 }
 0x2db   :  { %v1709_v9 = vpop.xlane.xlu1 %1708  ;;  %1780 = vadd.xlane.f32.xlu1 %v1779_v4  ;;  %1777 = vadd.xlane.f32.xlu0 %v1776_v39  ;;  %v1706_v1 = vpop.xlane.xlu0 %1705 }
 0x2dc   :  { %11087 = vst [vmem:[#allocation87_spill] sm:$0xff] %v6939_v60  ;;  %11088 = vst [vmem:[#allocation88_spill] sm:$0xff] %v6942_v25  ;;  %v1723_v5 = vmul.f32 0.020408163, %v1709_v9  ;;  %v1722_v61 = vmul.f32 0.020408163, %v1706_v1  ;;  %v1749_v10 = vmul.f32 %v6939_v60, %v6939_v60  ;;  %v1748_v34 = vmul.f32 %v6942_v25, %v6942_v25 }
 0x2dd   :  { %v7037_v25 = vld [vmem:[%s10844_s0 + $0x288] sm:$0xff] }
 0x2de   :  { %v6951_v17 = vsub.f32 %v6841_v31, %v1723_v5  ;;  %v6954_v56 = vsub.f32 %v6846_v0, %v1722_v61  ;;  %v1785_v13 = vsel %vm25_vm0, %v1749_v10, 0.0  ;;  %v1782_v59 = vsel %vm25_vm0, %v1748_v34, 0.0  ;;  %v6965_v31 = vld [vmem:[%s10844_s0 + $0x230] sm:$0xff]  ;;  %v6970_v0 = vld [vmem:[%s10844_s0 + $0x238] sm:$0xff]  ;;  %v6981_v61 = vld [vmem:[%s10844_s0 + $0x248] sm:$0xff] }
 0x2df   :  { %1786 = vadd.xlane.f32.xlu1 %v1785_v13  ;;  %1783 = vadd.xlane.f32.xlu0 %v1782_v59  ;;  %v2079_v1 = vsel %vm25_vm0, %v6965_v31, 0.0  ;;  %v2082_v5 = vsel %vm25_vm0, %v6970_v0, 0.0  ;;  %v6986_v10 = vld [vmem:[%s10844_s0 + $0x240] sm:$0xff]  ;;  %v2088_v34 = vsel %vm25_vm0, %v6981_v61, 0.0  ;;  %v6995_v59 = vld [vmem:[%s10844_s0 + $0x258] sm:$0xff] }
 0x2e0   :  { %11089 = vst [vmem:[#allocation89_spill] sm:$0xff] %v6951_v17  ;;  %11090 = vst [vmem:[#allocation90_spill] sm:$0xff] %v6954_v56  ;;  %v1751_v43 = vmul.f32 %v6951_v17, %v6951_v17  ;;  %v1750_v4 = vmul.f32 %v6954_v56, %v6954_v56  ;;  %v2085_v13 = vsel %vm25_vm0, %v6986_v10, 0.0  ;;  %v7028_v56 = vld [vmem:[%s10844_s0 + $0x270] sm:$0xff] }
 0x2e2   :  { %v1791_v39 = vsel %vm25_vm0, %v1751_v43, 0.0  ;;  %v1788_v9 = vsel %vm25_vm0, %v1750_v4, 0.0  ;;  %v7000_v43 = vld [vmem:[%s10844_s0 + $0x250] sm:$0xff]  ;;  %v2094_v4 = vsel %vm25_vm0, %v6995_v59, 0.0 }
 0x2e3   :  { %1792 = vadd.xlane.f32.xlu1 %v1791_v39  ;;  %1789 = vadd.xlane.f32.xlu0 %v1788_v9  ;;  %v2091_v39 = vsel %vm25_vm0, %v7000_v43, 0.0  ;;  %v7009_v9 = vld [vmem:[%s10844_s0 + $0x268] sm:$0xff] }
 0x2e7   :  { %2080 = vadd.xlane.f32.xlu1 %v2079_v1  ;;  %2083 = vadd.xlane.f32.xlu0 %v2082_v5  ;;  %v7014_v1 = vld [vmem:[%s10844_s0 + $0x260] sm:$0xff]  ;;  %v2100_v5 = vsel %vm25_vm0, %v7009_v9, 0.0 }
 0x2eb   :  { %2089 = vadd.xlane.f32.xlu1 %v2088_v34  ;;  %2086 = vadd.xlane.f32.xlu0 %v2085_v13  ;;  %v2097_v34 = vsel %vm25_vm0, %v7014_v1, 0.0  ;;  %v7023_v13 = vld [vmem:[%s10844_s0 + $0x278] sm:$0xff] }
 0x2ef   :  { %2095 = vadd.xlane.f32.xlu1 %v2094_v4  ;;  %2092 = vadd.xlane.f32.xlu0 %v2091_v39  ;;  %v2106_v4 = vsel %vm25_vm0, %v7023_v13, 0.0  ;;  %v2103_v39 = vsel %vm25_vm0, %v7028_v56, 0.0 }
 0x2f3   :  { %2101 = vadd.xlane.f32.xlu1 %v2100_v5  ;;  %2098 = vadd.xlane.f32.xlu0 %v2097_v34  ;;  %v2112_v5 = vsel %vm25_vm0, %v7037_v25, 0.0  ;;  %v2109_v34 = vsel %vm25_vm0, %v7042_v19, 0.0 }
 0x2f7   :  { %2107 = vadd.xlane.f32.xlu1 %v2106_v4  ;;  %2104 = vadd.xlane.f32.xlu0 %v2103_v39  ;;  %v2118_v4 = vsel %vm25_vm0, %v7051_v15, 0.0  ;;  %v2115_v39 = vsel %vm25_vm0, %v7056_v27, 0.0 }
 0x2fb   :  { %2113 = vadd.xlane.f32.xlu1 %v2112_v5  ;;  %2110 = vadd.xlane.f32.xlu0 %v2109_v34 }
 0x2ff   :  { %2119 = vadd.xlane.f32.xlu1 %v2118_v4  ;;  %2116 = vadd.xlane.f32.xlu0 %v2115_v39 }
 0x358   :  { %v7062_v55 = vpop.xlane.xlu1 %1756  ;;  %v7064_v17 = vpop.xlane.xlu0 %1753 }
 0x359   :  { %11091 = vst [vmem:[#allocation91_spill] sm:$0xff] %v7062_v55  ;;  %11092 = vst [vmem:[#allocation92_spill] sm:$0xff] %v7064_v17 }
 0x35c   :  { %v7066_v52 = vpop.xlane.xlu1 %1762  ;;  %v7068_v60 = vpop.xlane.xlu0 %1759 }
 0x35d   :  { %11093 = vst [vmem:[#allocation93_spill] sm:$0xff] %v7066_v52  ;;  %11094 = vst [vmem:[#allocation94_spill] sm:$0xff] %v7068_v60 }
 0x360   :  { %v7070_v47 = vpop.xlane.xlu1 %1768  ;;  %v7072_v5 = vpop.xlane.xlu0 %1765 }
 0x361   :  { %11095 = vst [vmem:[#allocation95_spill] sm:$0xff] %v7070_v47  ;;  %11096 = vst [vmem:[#allocation96_spill] sm:$0xff] %v7072_v5 }
 0x364   :  { %v7074_v34 = vpop.xlane.xlu1 %1774  ;;  %v7076_v20 = vpop.xlane.xlu0 %1771 }
 0x365   :  { %11097 = vst [vmem:[#allocation97_spill] sm:$0xff] %v7074_v34  ;;  %11098 = vst [vmem:[#allocation98_spill] sm:$0xff] %v7076_v20 }
 0x368   :  { %v7078_v24 = vpop.xlane.xlu1 %1780  ;;  %v7080_v4 = vpop.xlane.xlu0 %1777 }
 0x369   :  { %11099 = vst [vmem:[#allocation99_spill] sm:$0xff] %v7078_v24  ;;  %11100 = vst [vmem:[#allocation100_spill] sm:$0xff] %v7080_v4 }
 0x36c   :  { %v7082_v39 = vpop.xlane.xlu1 %1786  ;;  %v7084_v2 = vpop.xlane.xlu0 %1783 }
 0x36d   :  { %11101 = vst [vmem:[#allocation101_spill] sm:$0xff] %v7082_v39  ;;  %11102 = vst [vmem:[#allocation102_spill] sm:$0xff] %v7084_v2 }
 0x370   :  { %v7086_v11 = vpop.xlane.xlu1 %1792  ;;  %v7088_v55 = vpop.xlane.xlu0 %1789 }
 0x371   :  { %11103 = vst [vmem:[#allocation103_spill] sm:$0xff] %v7086_v11  ;;  %11104 = vst [vmem:[#allocation104_spill] sm:$0xff] %v7088_v55 }
 0x374   :  { %v2081_v60 = vpop.xlane.xlu1 %2080  ;;  %v2084_v47 = vpop.xlane.xlu0 %2083 }
 0x375   :  { %v2121_v52 = vmul.f32 0.020408163, %v2081_v60  ;;  %v2122_v5 = vmul.f32 0.020408163, %v2084_v47 }
 0x377   :  { %v7091_v34 = vsub.f32 %v6965_v31, %v2121_v52  ;;  %v7094_v20 = vsub.f32 %v6970_v0, %v2122_v5 }
 0x378   :  { %v2090_v24 = vpop.xlane.xlu1 %2089  ;;  %v2087_v4 = vpop.xlane.xlu0 %2086 }
 0x379   :  { %11105 = vst [vmem:[#allocation105_spill] sm:$0xff] %v7091_v34  ;;  %11106 = vst [vmem:[#allocation106_spill] sm:$0xff] %v7094_v20  ;;  %v2124_v17 = vmul.f32 0.020408163, %v2090_v24  ;;  %v2123_v39 = vmul.f32 0.020408163, %v2087_v4  ;;  %v2149_v2 = vmul.f32 %v7091_v34, %v7091_v34  ;;  %v2150_v55 = vmul.f32 %v7094_v20, %v7094_v20 }
 0x37b   :  { %v7101_v11 = vsub.f32 %v6981_v61, %v2124_v17  ;;  %v7104_v47 = vsub.f32 %v6986_v10, %v2123_v39  ;;  %v2163_v52 = vsel %vm25_vm0, %v2149_v2, 0.0  ;;  %v2166_v60 = vsel %vm25_vm0, %v2150_v55, 0.0 }
 0x37c   :  { %v2096_v31 = vpop.xlane.xlu1 %2095  ;;  %2164 = vadd.xlane.f32.xlu0 %v2163_v52  ;;  %2167 = vadd.xlane.f32.xlu1 %v2166_v60  ;;  %v2093_v24 = vpop.xlane.xlu0 %2092 }
 0x37d   :  { %11107 = vst [vmem:[#allocation107_spill] sm:$0xff] %v7101_v11  ;;  %11108 = vst [vmem:[#allocation108_spill] sm:$0xff] %v7104_v47  ;;  %v2126_v0 = vmul.f32 0.020408163, %v2096_v31  ;;  %v2125_v5 = vmul.f32 0.020408163, %v2093_v24  ;;  %v2152_v4 = vmul.f32 %v7101_v11, %v7101_v11  ;;  %v2151_v17 = vmul.f32 %v7104_v47, %v7104_v47 }
 0x37f   :  { %v7113_v61 = vsub.f32 %v6995_v59, %v2126_v0  ;;  %v7116_v10 = vsub.f32 %v7000_v43, %v2125_v5  ;;  %v2172_v2 = vsel %vm25_vm0, %v2152_v4, 0.0  ;;  %v2169_v55 = vsel %vm25_vm0, %v2151_v17, 0.0 }
 0x380   :  { %v2102_v39 = vpop.xlane.xlu1 %2101  ;;  %2173 = vadd.xlane.f32.xlu1 %v2172_v2  ;;  %2170 = vadd.xlane.f32.xlu0 %v2169_v55  ;;  %v2099_v52 = vpop.xlane.xlu0 %2098 }
 0x381   :  { %11109 = vst [vmem:[#allocation109_spill] sm:$0xff] %v7113_v61  ;;  %11110 = vst [vmem:[#allocation110_spill] sm:$0xff] %v7116_v10  ;;  %v2128_v60 = vmul.f32 0.020408163, %v2102_v39  ;;  %v2127_v31 = vmul.f32 0.020408163, %v2099_v52  ;;  %v2154_v24 = vmul.f32 %v7113_v61, %v7113_v61  ;;  %v2153_v59 = vmul.f32 %v7116_v10, %v7116_v10 }
 0x382   :  { %v7266_v10 = vld [vmem:[%s10844_s0 + $0x300] sm:$0xff] }
 0x383   :  { %v7125_v0 = vsub.f32 %v7009_v9, %v2128_v60  ;;  %v7128_v43 = vsub.f32 %v7014_v1, %v2127_v31  ;;  %v2178_v5 = vsel %vm25_vm0, %v2154_v24, 0.0  ;;  %v2175_v4 = vsel %vm25_vm0, %v2153_v59, 0.0 }
 0x384   :  { %v2108_v17 = vpop.xlane.xlu1 %2107  ;;  %2179 = vadd.xlane.f32.xlu1 %v2178_v5  ;;  %2176 = vadd.xlane.f32.xlu0 %v2175_v4  ;;  %v2105_v2 = vpop.xlane.xlu0 %2104 }
 0x385   :  { %11111 = vst [vmem:[#allocation111_spill] sm:$0xff] %v7125_v0  ;;  %11112 = vst [vmem:[#allocation112_spill] sm:$0xff] %v7128_v43  ;;  %v2130_v55 = vmul.f32 0.020408163, %v2108_v17  ;;  %v2129_v39 = vmul.f32 0.020408163, %v2105_v2  ;;  %v2156_v52 = vmul.f32 %v7125_v0, %v7125_v0  ;;  %v2155_v9 = vmul.f32 %v7128_v43, %v7128_v43 }
 0x386   :  { %v7261_v43 = vld [vmem:[%s10844_s0 + $0x308] sm:$0xff] }
 0x387   :  { %v7137_v60 = vsub.f32 %v7023_v13, %v2130_v55  ;;  %v7140_v1 = vsub.f32 %v7028_v56, %v2129_v39  ;;  %v2184_v31 = vsel %vm25_vm0, %v2156_v52, 0.0  ;;  %v2181_v24 = vsel %vm25_vm0, %v2155_v9, 0.0 }
 0x388   :  { %v2114_v59 = vpop.xlane.xlu1 %2113  ;;  %2185 = vadd.xlane.f32.xlu1 %v2184_v31  ;;  %2182 = vadd.xlane.f32.xlu0 %v2181_v24  ;;  %v2111_v5 = vpop.xlane.xlu0 %2110 }
 0x389   :  { %11113 = vst [vmem:[#allocation113_spill] sm:$0xff] %v7137_v60  ;;  %11114 = vst [vmem:[#allocation114_spill] sm:$0xff] %v7140_v1  ;;  %v2132_v4 = vmul.f32 0.020408163, %v2114_v59  ;;  %v2131_v17 = vmul.f32 0.020408163, %v2111_v5  ;;  %v2158_v2 = vmul.f32 %v7137_v60, %v7137_v60  ;;  %v2157_v13 = vmul.f32 %v7140_v1, %v7140_v1 }
 0x38a   :  { %v7252_v1 = vld [vmem:[%s10844_s0 + $0x2f0] sm:$0xff] }
 0x38b   :  { %v7149_v55 = vsub.f32 %v7037_v25, %v2132_v4  ;;  %v7152_v56 = vsub.f32 %v7042_v19, %v2131_v17  ;;  %v2190_v39 = vsel %vm25_vm0, %v2158_v2, 0.0  ;;  %v2187_v52 = vsel %vm25_vm0, %v2157_v13, 0.0 }
 0x38c   :  { %v2120_v9 = vpop.xlane.xlu1 %2119  ;;  %2191 = vadd.xlane.f32.xlu1 %v2190_v39  ;;  %2188 = vadd.xlane.f32.xlu0 %v2187_v52  ;;  %v2117_v31 = vpop.xlane.xlu0 %2116 }
 0x38d   :  { %11115 = vst [vmem:[#allocation115_spill] sm:$0xff] %v7149_v55  ;;  %11116 = vst [vmem:[#allocation116_spill] sm:$0xff] %v7152_v56  ;;  %v2134_v24 = vmul.f32 0.020408163, %v2120_v9  ;;  %v2133_v59 = vmul.f32 0.020408163, %v2117_v31  ;;  %v2160_v5 = vmul.f32 %v7149_v55, %v7149_v55  ;;  %v2159_v25 = vmul.f32 %v7152_v56, %v7152_v56 }
 0x38e   :  { %v7247_v56 = vld [vmem:[%s10844_s0 + $0x2f8] sm:$0xff] }
 0x38f   :  { %v7161_v4 = vsub.f32 %v7051_v15, %v2134_v24  ;;  %v7164_v19 = vsub.f32 %v7056_v27, %v2133_v59  ;;  %v2196_v17 = vsel %vm25_vm0, %v2160_v5, 0.0  ;;  %v2193_v2 = vsel %vm25_vm0, %v2159_v25, 0.0  ;;  %v7175_v15 = vld [vmem:[%s10844_s0 + $0x2a0] sm:$0xff]  ;;  %v7180_v27 = vld [vmem:[%s10844_s0 + $0x2a8] sm:$0xff]  ;;  %v7191_v59 = vld [vmem:[%s10844_s0 + $0x2b8] sm:$0xff] }
 0x390   :  { %2197 = vadd.xlane.f32.xlu1 %v2196_v17  ;;  %2194 = vadd.xlane.f32.xlu0 %v2193_v2  ;;  %v2490_v31 = vsel %vm25_vm0, %v7175_v15, 0.0  ;;  %v2493_v24 = vsel %vm25_vm0, %v7180_v27, 0.0  ;;  %v7196_v5 = vld [vmem:[%s10844_s0 + $0x2b0] sm:$0xff]  ;;  %v2499_v25 = vsel %vm25_vm0, %v7191_v59, 0.0  ;;  %v7205_v2 = vld [vmem:[%s10844_s0 + $0x2c8] sm:$0xff] }
 0x391   :  { %11117 = vst [vmem:[#allocation117_spill] sm:$0xff] %v7161_v4  ;;  %11118 = vst [vmem:[#allocation118_spill] sm:$0xff] %v7164_v19  ;;  %v2162_v13 = vmul.f32 %v7161_v4, %v7161_v4  ;;  %v2161_v39 = vmul.f32 %v7164_v19, %v7164_v19  ;;  %v2496_v17 = vsel %vm25_vm0, %v7196_v5, 0.0  ;;  %v7238_v19 = vld [vmem:[%s10844_s0 + $0x2e0] sm:$0xff] }
 0x393   :  { %v2202_v52 = vsel %vm25_vm0, %v2162_v13, 0.0  ;;  %v2199_v9 = vsel %vm25_vm0, %v2161_v39, 0.0  ;;  %v7210_v13 = vld [vmem:[%s10844_s0 + $0x2c0] sm:$0xff]  ;;  %v2505_v39 = vsel %vm25_vm0, %v7205_v2, 0.0 }
 0x394   :  { %2203 = vadd.xlane.f32.xlu1 %v2202_v52  ;;  %2200 = vadd.xlane.f32.xlu0 %v2199_v9  ;;  %v2502_v52 = vsel %vm25_vm0, %v7210_v13, 0.0  ;;  %v7219_v9 = vld [vmem:[%s10844_s0 + $0x2d8] sm:$0xff] }
 0x398   :  { %2491 = vadd.xlane.f32.xlu1 %v2490_v31  ;;  %2494 = vadd.xlane.f32.xlu0 %v2493_v24  ;;  %v7224_v31 = vld [vmem:[%s10844_s0 + $0x2d0] sm:$0xff]  ;;  %v2511_v24 = vsel %vm25_vm0, %v7219_v9, 0.0 }
 0x39c   :  { %2500 = vadd.xlane.f32.xlu1 %v2499_v25  ;;  %2497 = vadd.xlane.f32.xlu0 %v2496_v17  ;;  %v2508_v25 = vsel %vm25_vm0, %v7224_v31, 0.0  ;;  %v7233_v17 = vld [vmem:[%s10844_s0 + $0x2e8] sm:$0xff] }
 0x3a0   :  { %2506 = vadd.xlane.f32.xlu1 %v2505_v39  ;;  %2503 = vadd.xlane.f32.xlu0 %v2502_v52  ;;  %v2517_v39 = vsel %vm25_vm0, %v7233_v17, 0.0  ;;  %v2514_v52 = vsel %vm25_vm0, %v7238_v19, 0.0 }
 0x3a4   :  { %2512 = vadd.xlane.f32.xlu1 %v2511_v24  ;;  %2509 = vadd.xlane.f32.xlu0 %v2508_v25  ;;  %v2523_v24 = vsel %vm25_vm0, %v7247_v56, 0.0  ;;  %v2520_v25 = vsel %vm25_vm0, %v7252_v1, 0.0 }
 0x3a8   :  { %2518 = vadd.xlane.f32.xlu1 %v2517_v39  ;;  %2515 = vadd.xlane.f32.xlu0 %v2514_v52  ;;  %v2529_v39 = vsel %vm25_vm0, %v7261_v43, 0.0  ;;  %v2526_v52 = vsel %vm25_vm0, %v7266_v10, 0.0 }
 0x3ac   :  { %2524 = vadd.xlane.f32.xlu1 %v2523_v24  ;;  %2521 = vadd.xlane.f32.xlu0 %v2520_v25 }
 0x3b0   :  { %2530 = vadd.xlane.f32.xlu1 %v2529_v39  ;;  %2527 = vadd.xlane.f32.xlu0 %v2526_v52 }
 0x409   :  { %v7272_v47 = vpop.xlane.xlu1 %2167  ;;  %v7274_v4 = vpop.xlane.xlu0 %2164 }
 0x40a   :  { %11119 = vst [vmem:[#allocation119_spill] sm:$0xff] %v7272_v47  ;;  %11120 = vst [vmem:[#allocation120_spill] sm:$0xff] %v7274_v4 }
 0x40d   :  { %v7276_v34 = vpop.xlane.xlu1 %2173  ;;  %v7278_v55 = vpop.xlane.xlu0 %2170 }
 0x40e   :  { %11121 = vst [vmem:[#allocation121_spill] sm:$0xff] %v7276_v34  ;;  %11122 = vst [vmem:[#allocation122_spill] sm:$0xff] %v7278_v55 }
 0x411   :  { %v7280_v60 = vpop.xlane.xlu1 %2179  ;;  %v7282_v24 = vpop.xlane.xlu0 %2176 }
 0x412   :  { %11123 = vst [vmem:[#allocation123_spill] sm:$0xff] %v7280_v60  ;;  %11124 = vst [vmem:[#allocation124_spill] sm:$0xff] %v7282_v24 }
 0x415   :  { %v7284_v25 = vpop.xlane.xlu1 %2185  ;;  %v7286_v0 = vpop.xlane.xlu0 %2182 }
 0x416   :  { %11125 = vst [vmem:[#allocation125_spill] sm:$0xff] %v7284_v25  ;;  %11126 = vst [vmem:[#allocation126_spill] sm:$0xff] %v7286_v0 }
 0x419   :  { %v7288_v61 = vpop.xlane.xlu1 %2191  ;;  %v7290_v39 = vpop.xlane.xlu0 %2188 }
 0x41a   :  { %11127 = vst [vmem:[#allocation127_spill] sm:$0xff] %v7288_v61  ;;  %11128 = vst [vmem:[#allocation128_spill] sm:$0xff] %v7290_v39 }
 0x41d   :  { %v7292_v52 = vpop.xlane.xlu1 %2197  ;;  %v7294_v11 = vpop.xlane.xlu0 %2194 }
 0x41e   :  { %11129 = vst [vmem:[#allocation129_spill] sm:$0xff] %v7292_v52  ;;  %11130 = vst [vmem:[#allocation130_spill] sm:$0xff] %v7294_v11 }
 0x421   :  { %v7296_v20 = vpop.xlane.xlu1 %2203  ;;  %v7298_v47 = vpop.xlane.xlu0 %2200 }
 0x422   :  { %11131 = vst [vmem:[#allocation131_spill] sm:$0xff] %v7296_v20  ;;  %11132 = vst [vmem:[#allocation132_spill] sm:$0xff] %v7298_v47 }
 0x425   :  { %v2492_v55 = vpop.xlane.xlu1 %2491  ;;  %v2495_v60 = vpop.xlane.xlu0 %2494 }
 0x426   :  { %v2532_v34 = vmul.f32 0.020408163, %v2492_v55  ;;  %v2533_v24 = vmul.f32 0.020408163, %v2495_v60 }
 0x428   :  { %v7301_v25 = vsub.f32 %v7175_v15, %v2532_v34  ;;  %v7304_v0 = vsub.f32 %v7180_v27, %v2533_v24 }
 0x429   :  { %v2501_v61 = vpop.xlane.xlu1 %2500  ;;  %v2498_v39 = vpop.xlane.xlu0 %2497 }
 0x42a   :  { %11133 = vst [vmem:[#allocation133_spill] sm:$0xff] %v7301_v25  ;;  %11134 = vst [vmem:[#allocation134_spill] sm:$0xff] %v7304_v0  ;;  %v2535_v4 = vmul.f32 0.020408163, %v2501_v61  ;;  %v2534_v52 = vmul.f32 0.020408163, %v2498_v39  ;;  %v2560_v11 = vmul.f32 %v7301_v25, %v7301_v25  ;;  %v2561_v47 = vmul.f32 %v7304_v0, %v7304_v0 }
 0x42c   :  { %v7311_v20 = vsub.f32 %v7191_v59, %v2535_v4  ;;  %v7314_v60 = vsub.f32 %v7196_v5, %v2534_v52  ;;  %v2574_v34 = vsel %vm25_vm0, %v2560_v11, 0.0  ;;  %v2577_v55 = vsel %vm25_vm0, %v2561_v47, 0.0 }
 0x42d   :  { %v2507_v15 = vpop.xlane.xlu1 %2506  ;;  %2575 = vadd.xlane.f32.xlu0 %v2574_v34  ;;  %2578 = vadd.xlane.f32.xlu1 %v2577_v55  ;;  %v2504_v61 = vpop.xlane.xlu0 %2503 }
 0x42e   :  { %11135 = vst [vmem:[#allocation135_spill] sm:$0xff] %v7311_v20  ;;  %11136 = vst [vmem:[#allocation136_spill] sm:$0xff] %v7314_v60  ;;  %v2537_v27 = vmul.f32 0.020408163, %v2507_v15  ;;  %v2536_v24 = vmul.f32 0.020408163, %v2504_v61  ;;  %v2563_v39 = vmul.f32 %v7311_v20, %v7311_v20  ;;  %v2562_v4 = vmul.f32 %v7314_v60, %v7314_v60 }
 0x430   :  { %v7323_v59 = vsub.f32 %v7205_v2, %v2537_v27  ;;  %v7326_v5 = vsub.f32 %v7210_v13, %v2536_v24  ;;  %v2583_v11 = vsel %vm25_vm0, %v2563_v39, 0.0  ;;  %v2580_v47 = vsel %vm25_vm0, %v2562_v4, 0.0 }
 0x431   :  { %v2513_v52 = vpop.xlane.xlu1 %2512  ;;  %2584 = vadd.xlane.f32.xlu1 %v2583_v11  ;;  %2581 = vadd.xlane.f32.xlu0 %v2580_v47  ;;  %v2510_v34 = vpop.xlane.xlu0 %2509 }
 0x432   :  { %11137 = vst [vmem:[#allocation137_spill] sm:$0xff] %v7323_v59  ;;  %11138 = vst [vmem:[#allocation138_spill] sm:$0xff] %v7326_v5  ;;  %v2539_v55 = vmul.f32 0.020408163, %v2513_v52  ;;  %v2538_v15 = vmul.f32 0.020408163, %v2510_v34  ;;  %v2565_v61 = vmul.f32 %v7323_v59, %v7323_v59  ;;  %v2564_v2 = vmul.f32 %v7326_v5, %v7326_v5 }
 0x433   :  { %v7476_v5 = vld [vmem:[%s10844_s0 + $0x370] sm:$0xff] }
 0x434   :  { %v7335_v27 = vsub.f32 %v7219_v9, %v2539_v55  ;;  %v7338_v13 = vsub.f32 %v7224_v31, %v2538_v15  ;;  %v2589_v24 = vsel %vm25_vm0, %v2565_v61, 0.0  ;;  %v2586_v39 = vsel %vm25_vm0, %v2564_v2, 0.0 }
 0x435   :  { %v2519_v4 = vpop.xlane.xlu1 %2518  ;;  %2590 = vadd.xlane.f32.xlu1 %v2589_v24  ;;  %2587 = vadd.xlane.f32.xlu0 %v2586_v39  ;;  %v2516_v11 = vpop.xlane.xlu0 %2515 }
 0x436   :  { %11139 = vst [vmem:[#allocation139_spill] sm:$0xff] %v7335_v27  ;;  %11140 = vst [vmem:[#allocation140_spill] sm:$0xff] %v7338_v13  ;;  %v2541_v47 = vmul.f32 0.020408163, %v2519_v4  ;;  %v2540_v52 = vmul.f32 0.020408163, %v2516_v11  ;;  %v2567_v34 = vmul.f32 %v7335_v27, %v7335_v27  ;;  %v2566_v9 = vmul.f32 %v7338_v13, %v7338_v13 }
 0x437   :  { %v7471_v13 = vld [vmem:[%s10844_s0 + $0x378] sm:$0xff] }
 0x438   :  { %v7347_v55 = vsub.f32 %v7233_v17, %v2541_v47  ;;  %v7350_v31 = vsub.f32 %v7238_v19, %v2540_v52  ;;  %v2595_v15 = vsel %vm25_vm0, %v2567_v34, 0.0  ;;  %v2592_v61 = vsel %vm25_vm0, %v2566_v9, 0.0 }
 0x439   :  { %v2525_v2 = vpop.xlane.xlu1 %2524  ;;  %2596 = vadd.xlane.f32.xlu1 %v2595_v15  ;;  %2593 = vadd.xlane.f32.xlu0 %v2592_v61  ;;  %v2522_v24 = vpop.xlane.xlu0 %2521 }
 0x43a   :  { %11141 = vst [vmem:[#allocation141_spill] sm:$0xff] %v7347_v55  ;;  %11142 = vst [vmem:[#allocation142_spill] sm:$0xff] %v7350_v31  ;;  %v2543_v39 = vmul.f32 0.020408163, %v2525_v2  ;;  %v2542_v4 = vmul.f32 0.020408163, %v2522_v24  ;;  %v2569_v11 = vmul.f32 %v7347_v55, %v7347_v55  ;;  %v2568_v17 = vmul.f32 %v7350_v31, %v7350_v31 }
 0x43b   :  { %v7462_v31 = vld [vmem:[%s10844_s0 + $0x360] sm:$0xff] }
 0x43c   :  { %v7359_v47 = vsub.f32 %v7247_v56, %v2543_v39  ;;  %v7362_v19 = vsub.f32 %v7252_v1, %v2542_v4  ;;  %v2601_v52 = vsel %vm25_vm0, %v2569_v11, 0.0  ;;  %v2598_v34 = vsel %vm25_vm0, %v2568_v17, 0.0 }
 0x43d   :  { %v2531_v9 = vpop.xlane.xlu1 %2530  ;;  %2602 = vadd.xlane.f32.xlu1 %v2601_v52  ;;  %2599 = vadd.xlane.f32.xlu0 %v2598_v34  ;;  %v2528_v15 = vpop.xlane.xlu0 %2527 }
 0x43e   :  { %11143 = vst [vmem:[#allocation143_spill] sm:$0xff] %v7359_v47  ;;  %11144 = vst [vmem:[#allocation144_spill] sm:$0xff] %v7362_v19  ;;  %v2545_v61 = vmul.f32 0.020408163, %v2531_v9  ;;  %v2544_v2 = vmul.f32 0.020408163, %v2528_v15  ;;  %v2571_v24 = vmul.f32 %v7359_v47, %v7359_v47  ;;  %v2570_v56 = vmul.f32 %v7362_v19, %v7362_v19 }
 0x43f   :  { %v7457_v19 = vld [vmem:[%s10844_s0 + $0x368] sm:$0xff] }
 0x440   :  { %v7371_v39 = vsub.f32 %v7261_v43, %v2545_v61  ;;  %v7374_v1 = vsub.f32 %v7266_v10, %v2544_v2  ;;  %v2607_v4 = vsel %vm25_vm0, %v2571_v24, 0.0  ;;  %v2604_v11 = vsel %vm25_vm0, %v2570_v56, 0.0  ;;  %v7385_v43 = vld [vmem:[%s10844_s0 + $0x310] sm:$0xff]  ;;  %v7390_v10 = vld [vmem:[%s10844_s0 + $0x318] sm:$0xff]  ;;  %v7401_v2 = vld [vmem:[%s10844_s0 + $0x328] sm:$0xff] }
 0x441   :  { %2608 = vadd.xlane.f32.xlu1 %v2607_v4  ;;  %2605 = vadd.xlane.f32.xlu0 %v2604_v11  ;;  %v2901_v15 = vsel %vm25_vm0, %v7385_v43, 0.0  ;;  %v2904_v61 = vsel %vm25_vm0, %v7390_v10, 0.0  ;;  %v7406_v24 = vld [vmem:[%s10844_s0 + $0x320] sm:$0xff]  ;;  %v2910_v56 = vsel %vm25_vm0, %v7401_v2, 0.0  ;;  %v7415_v11 = vld [vmem:[%s10844_s0 + $0x338] sm:$0xff] }
 0x442   :  { %11145 = vst [vmem:[#allocation145_spill] sm:$0xff] %v7371_v39  ;;  %11146 = vst [vmem:[#allocation146_spill] sm:$0xff] %v7374_v1  ;;  %v2573_v17 = vmul.f32 %v7371_v39, %v7371_v39  ;;  %v2572_v52 = vmul.f32 %v7374_v1, %v7374_v1  ;;  %v2907_v4 = vsel %vm25_vm0, %v7406_v24, 0.0  ;;  %v7448_v1 = vld [vmem:[%s10844_s0 + $0x350] sm:$0xff] }
 0x444   :  { %v2613_v34 = vsel %vm25_vm0, %v2573_v17, 0.0  ;;  %v2610_v9 = vsel %vm25_vm0, %v2572_v52, 0.0  ;;  %v7420_v17 = vld [vmem:[%s10844_s0 + $0x330] sm:$0xff]  ;;  %v2916_v52 = vsel %vm25_vm0, %v7415_v11, 0.0 }
 0x445   :  { %2614 = vadd.xlane.f32.xlu1 %v2613_v34  ;;  %2611 = vadd.xlane.f32.xlu0 %v2610_v9  ;;  %v2913_v34 = vsel %vm25_vm0, %v7420_v17, 0.0  ;;  %v7429_v9 = vld [vmem:[%s10844_s0 + $0x348] sm:$0xff] }
 0x449   :  { %2902 = vadd.xlane.f32.xlu1 %v2901_v15  ;;  %2905 = vadd.xlane.f32.xlu0 %v2904_v61  ;;  %v7434_v15 = vld [vmem:[%s10844_s0 + $0x340] sm:$0xff]  ;;  %v2922_v61 = vsel %vm25_vm0, %v7429_v9, 0.0 }
 0x44d   :  { %2911 = vadd.xlane.f32.xlu1 %v2910_v56  ;;  %2908 = vadd.xlane.f32.xlu0 %v2907_v4  ;;  %v2919_v56 = vsel %vm25_vm0, %v7434_v15, 0.0  ;;  %v7443_v4 = vld [vmem:[%s10844_s0 + $0x358] sm:$0xff] }
 0x451   :  { %2917 = vadd.xlane.f32.xlu1 %v2916_v52  ;;  %2914 = vadd.xlane.f32.xlu0 %v2913_v34  ;;  %v2928_v52 = vsel %vm25_vm0, %v7443_v4, 0.0  ;;  %v2925_v34 = vsel %vm25_vm0, %v7448_v1, 0.0 }
 0x455   :  { %2923 = vadd.xlane.f32.xlu1 %v2922_v61  ;;  %2920 = vadd.xlane.f32.xlu0 %v2919_v56  ;;  %v2934_v61 = vsel %vm25_vm0, %v7457_v19, 0.0  ;;  %v2931_v56 = vsel %vm25_vm0, %v7462_v31, 0.0 }
 0x459   :  { %2929 = vadd.xlane.f32.xlu1 %v2928_v52  ;;  %2926 = vadd.xlane.f32.xlu0 %v2925_v34  ;;  %v2940_v52 = vsel %vm25_vm0, %v7471_v13, 0.0  ;;  %v2937_v34 = vsel %vm25_vm0, %v7476_v5, 0.0 }
 0x45d   :  { %2935 = vadd.xlane.f32.xlu1 %v2934_v61  ;;  %2932 = vadd.xlane.f32.xlu0 %v2931_v56 }
 0x461   :  { %2941 = vadd.xlane.f32.xlu1 %v2940_v52  ;;  %2938 = vadd.xlane.f32.xlu0 %v2937_v34 }
 0x4ba   :  { %v7482_v60 = vpop.xlane.xlu1 %2578  ;;  %v7484_v39 = vpop.xlane.xlu0 %2575 }
 0x4bb   :  { %11147 = vst [vmem:[#allocation147_spill] sm:$0xff] %v7482_v60  ;;  %11148 = vst [vmem:[#allocation148_spill] sm:$0xff] %v7484_v39 }
 0x4be   :  { %v7486_v25 = vpop.xlane.xlu1 %2584  ;;  %v7488_v47 = vpop.xlane.xlu0 %2581 }
 0x4bf   :  { %11149 = vst [vmem:[#allocation149_spill] sm:$0xff] %v7486_v25  ;;  %11150 = vst [vmem:[#allocation150_spill] sm:$0xff] %v7488_v47 }
 0x4c2   :  { %v7490_v55 = vpop.xlane.xlu1 %2590  ;;  %v7492_v61 = vpop.xlane.xlu0 %2587 }
 0x4c3   :  { %11151 = vst [vmem:[#allocation151_spill] sm:$0xff] %v7490_v55  ;;  %11152 = vst [vmem:[#allocation152_spill] sm:$0xff] %v7492_v61 }
 0x4c6   :  { %v7494_v56 = vpop.xlane.xlu1 %2596  ;;  %v7496_v27 = vpop.xlane.xlu0 %2593 }
 0x4c7   :  { %11153 = vst [vmem:[#allocation153_spill] sm:$0xff] %v7494_v56  ;;  %11154 = vst [vmem:[#allocation154_spill] sm:$0xff] %v7496_v27 }
 0x4ca   :  { %v7498_v59 = vpop.xlane.xlu1 %2602  ;;  %v7500_v52 = vpop.xlane.xlu0 %2599 }
 0x4cb   :  { %11155 = vst [vmem:[#allocation155_spill] sm:$0xff] %v7498_v59  ;;  %11156 = vst [vmem:[#allocation156_spill] sm:$0xff] %v7500_v52 }
 0x4ce   :  { %v7502_v34 = vpop.xlane.xlu1 %2608  ;;  %v7504_v20 = vpop.xlane.xlu0 %2605 }
 0x4cf   :  { %11157 = vst [vmem:[#allocation157_spill] sm:$0xff] %v7502_v34  ;;  %11158 = vst [vmem:[#allocation158_spill] sm:$0xff] %v7504_v20 }
 0x4d2   :  { %v7506_v0 = vpop.xlane.xlu1 %2614  ;;  %v7508_v60 = vpop.xlane.xlu0 %2611 }
 0x4d3   :  { %11159 = vst [vmem:[#allocation159_spill] sm:$0xff] %v7506_v0  ;;  %11160 = vst [vmem:[#allocation160_spill] sm:$0xff] %v7508_v60 }
 0x4d6   :  { %v2903_v47 = vpop.xlane.xlu1 %2902  ;;  %v2906_v55 = vpop.xlane.xlu0 %2905 }
 0x4d7   :  { %v2943_v25 = vmul.f32 0.020408163, %v2903_v47  ;;  %v2944_v61 = vmul.f32 0.020408163, %v2906_v55 }
 0x4d9   :  { %v7511_v56 = vsub.f32 %v7385_v43, %v2943_v25  ;;  %v7514_v27 = vsub.f32 %v7390_v10, %v2944_v61 }
 0x4da   :  { %v2912_v59 = vpop.xlane.xlu1 %2911  ;;  %v2909_v52 = vpop.xlane.xlu0 %2908 }
 0x4db   :  { %11161 = vst [vmem:[#allocation161_spill] sm:$0xff] %v7511_v56  ;;  %11162 = vst [vmem:[#allocation162_spill] sm:$0xff] %v7514_v27  ;;  %v2946_v39 = vmul.f32 0.020408163, %v2912_v59  ;;  %v2945_v34 = vmul.f32 0.020408163, %v2909_v52  ;;  %v2971_v20 = vmul.f32 %v7511_v56, %v7511_v56  ;;  %v2972_v60 = vmul.f32 %v7514_v27, %v7514_v27 }
 0x4dd   :  { %v7521_v0 = vsub.f32 %v7401_v2, %v2946_v39  ;;  %v7524_v55 = vsub.f32 %v7406_v24, %v2945_v34  ;;  %v2985_v25 = vsel %vm25_vm0, %v2971_v20, 0.0  ;;  %v2988_v47 = vsel %vm25_vm0, %v2972_v60, 0.0 }
 0x4de   :  { %v2918_v43 = vpop.xlane.xlu1 %2917  ;;  %2986 = vadd.xlane.f32.xlu0 %v2985_v25  ;;  %2989 = vadd.xlane.f32.xlu1 %v2988_v47  ;;  %v2915_v59 = vpop.xlane.xlu0 %2914 }
 0x4df   :  { %11163 = vst [vmem:[#allocation163_spill] sm:$0xff] %v7521_v0  ;;  %11164 = vst [vmem:[#allocation164_spill] sm:$0xff] %v7524_v55  ;;  %v2948_v10 = vmul.f32 0.020408163, %v2918_v43  ;;  %v2947_v61 = vmul.f32 0.020408163, %v2915_v59  ;;  %v2974_v52 = vmul.f32 %v7521_v0, %v7521_v0  ;;  %v2973_v39 = vmul.f32 %v7524_v55, %v7524_v55 }
 0x4e1   :  { %v7533_v2 = vsub.f32 %v7415_v11, %v2948_v10  ;;  %v7536_v24 = vsub.f32 %v7420_v17, %v2947_v61  ;;  %v2994_v20 = vsel %vm25_vm0, %v2974_v52, 0.0  ;;  %v2991_v60 = vsel %vm25_vm0, %v2973_v39, 0.0 }
 0x4e2   :  { %v2924_v34 = vpop.xlane.xlu1 %2923  ;;  %2995 = vadd.xlane.f32.xlu1 %v2994_v20  ;;  %2992 = vadd.xlane.f32.xlu0 %v2991_v60  ;;  %v2921_v25 = vpop.xlane.xlu0 %2920 }
 0x4e3   :  { %11165 = vst [vmem:[#allocation165_spill] sm:$0xff] %v7533_v2  ;;  %11166 = vst [vmem:[#allocation166_spill] sm:$0xff] %v7536_v24  ;;  %v2950_v47 = vmul.f32 0.020408163, %v2924_v34  ;;  %v2949_v43 = vmul.f32 0.020408163, %v2921_v25  ;;  %v2976_v59 = vmul.f32 %v7533_v2, %v7533_v2  ;;  %v2975_v11 = vmul.f32 %v7536_v24, %v7536_v24 }
 0x4e4   :  { %v7686_v24 = vld [vmem:[%s10844_s0 + $0x3e0] sm:$0xff] }
 0x4e5   :  { %v7545_v10 = vsub.f32 %v7429_v9, %v2950_v47  ;;  %v7548_v17 = vsub.f32 %v7434_v15, %v2949_v43  ;;  %v3000_v61 = vsel %vm25_vm0, %v2976_v59, 0.0  ;;  %v2997_v52 = vsel %vm25_vm0, %v2975_v11, 0.0 }
 0x4e6   :  { %v2930_v39 = vpop.xlane.xlu1 %2929  ;;  %3001 = vadd.xlane.f32.xlu1 %v3000_v61  ;;  %2998 = vadd.xlane.f32.xlu0 %v2997_v52  ;;  %v2927_v20 = vpop.xlane.xlu0 %2926 }
 0x4e7   :  { %11167 = vst [vmem:[#allocation167_spill] sm:$0xff] %v7545_v10  ;;  %11168 = vst [vmem:[#allocation168_spill] sm:$0xff] %v7548_v17  ;;  %v2952_v60 = vmul.f32 0.020408163, %v2930_v39  ;;  %v2951_v34 = vmul.f32 0.020408163, %v2927_v20  ;;  %v2978_v25 = vmul.f32 %v7545_v10, %v7545_v10  ;;  %v2977_v9 = vmul.f32 %v7548_v17, %v7548_v17 }
 0x4e8   :  { %v7681_v17 = vld [vmem:[%s10844_s0 + $0x3e8] sm:$0xff] }
 0x4e9   :  { %v7557_v47 = vsub.f32 %v7443_v4, %v2952_v60  ;;  %v7560_v15 = vsub.f32 %v7448_v1, %v2951_v34  ;;  %v3006_v43 = vsel %vm25_vm0, %v2978_v25, 0.0  ;;  %v3003_v59 = vsel %vm25_vm0, %v2977_v9, 0.0 }
 0x4ea   :  { %v2936_v11 = vpop.xlane.xlu1 %2935  ;;  %3007 = vadd.xlane.f32.xlu1 %v3006_v43  ;;  %3004 = vadd.xlane.f32.xlu0 %v3003_v59  ;;  %v2933_v61 = vpop.xlane.xlu0 %2932 }
 0x4eb   :  { %11169 = vst [vmem:[#allocation169_spill] sm:$0xff] %v7557_v47  ;;  %11170 = vst [vmem:[#allocation170_spill] sm:$0xff] %v7560_v15  ;;  %v2954_v52 = vmul.f32 0.020408163, %v2936_v11  ;;  %v2953_v39 = vmul.f32 0.020408163, %v2933_v61  ;;  %v2980_v20 = vmul.f32 %v7557_v47, %v7557_v47  ;;  %v2979_v4 = vmul.f32 %v7560_v15, %v7560_v15 }
 0x4ec   :  { %v7672_v15 = vld [vmem:[%s10844_s0 + $0x3d0] sm:$0xff] }
 0x4ed   :  { %v7569_v60 = vsub.f32 %v7457_v19, %v2954_v52  ;;  %v7572_v1 = vsub.f32 %v7462_v31, %v2953_v39  ;;  %v3012_v34 = vsel %vm25_vm0, %v2980_v20, 0.0  ;;  %v3009_v25 = vsel %vm25_vm0, %v2979_v4, 0.0 }
 0x4ee   :  { %v2942_v9 = vpop.xlane.xlu1 %2941  ;;  %3013 = vadd.xlane.f32.xlu1 %v3012_v34  ;;  %3010 = vadd.xlane.f32.xlu0 %v3009_v25  ;;  %v2939_v43 = vpop.xlane.xlu0 %2938 }
 0x4ef   :  { %11171 = vst [vmem:[#allocation171_spill] sm:$0xff] %v7569_v60  ;;  %11172 = vst [vmem:[#allocation172_spill] sm:$0xff] %v7572_v1  ;;  %v2956_v59 = vmul.f32 0.020408163, %v2942_v9  ;;  %v2955_v11 = vmul.f32 0.020408163, %v2939_v43  ;;  %v2982_v61 = vmul.f32 %v7569_v60, %v7569_v60  ;;  %v2981_v19 = vmul.f32 %v7572_v1, %v7572_v1 }
 0x4f0   :  { %v7667_v1 = vld [vmem:[%s10844_s0 + $0x3d8] sm:$0xff] }
 0x4f1   :  { %v7581_v52 = vsub.f32 %v7471_v13, %v2956_v59  ;;  %v7584_v31 = vsub.f32 %v7476_v5, %v2955_v11  ;;  %v3018_v39 = vsel %vm25_vm0, %v2982_v61, 0.0  ;;  %v3015_v20 = vsel %vm25_vm0, %v2981_v19, 0.0  ;;  %v7595_v13 = vld [vmem:[%s10844_s0 + $0x380] sm:$0xff]  ;;  %v7600_v5 = vld [vmem:[%s10844_s0 + $0x388] sm:$0xff]  ;;  %v7611_v11 = vld [vmem:[%s10844_s0 + $0x398] sm:$0xff] }
 0x4f2   :  { %3019 = vadd.xlane.f32.xlu1 %v3018_v39  ;;  %3016 = vadd.xlane.f32.xlu0 %v3015_v20  ;;  %v3312_v43 = vsel %vm25_vm0, %v7595_v13, 0.0  ;;  %v3315_v59 = vsel %vm25_vm0, %v7600_v5, 0.0  ;;  %v7616_v61 = vld [vmem:[%s10844_s0 + $0x390] sm:$0xff]  ;;  %v3321_v19 = vsel %vm25_vm0, %v7611_v11, 0.0  ;;  %v7625_v20 = vld [vmem:[%s10844_s0 + $0x3a8] sm:$0xff] }
 0x4f3   :  { %11173 = vst [vmem:[#allocation173_spill] sm:$0xff] %v7581_v52  ;;  %11174 = vst [vmem:[#allocation174_spill] sm:$0xff] %v7584_v31  ;;  %v2984_v4 = vmul.f32 %v7581_v52, %v7581_v52  ;;  %v2983_v34 = vmul.f32 %v7584_v31, %v7584_v31  ;;  %v3318_v39 = vsel %vm25_vm0, %v7616_v61, 0.0  ;;  %v7658_v31 = vld [vmem:[%s10844_s0 + $0x3c0] sm:$0xff] }
 0x4f5   :  { %v3024_v25 = vsel %vm25_vm0, %v2984_v4, 0.0  ;;  %v3021_v9 = vsel %vm25_vm0, %v2983_v34, 0.0  ;;  %v7630_v4 = vld [vmem:[%s10844_s0 + $0x3a0] sm:$0xff]  ;;  %v3327_v34 = vsel %vm25_vm0, %v7625_v20, 0.0 }
 0x4f6   :  { %3025 = vadd.xlane.f32.xlu1 %v3024_v25  ;;  %3022 = vadd.xlane.f32.xlu0 %v3021_v9  ;;  %v3324_v25 = vsel %vm25_vm0, %v7630_v4, 0.0  ;;  %v7639_v9 = vld [vmem:[%s10844_s0 + $0x3b8] sm:$0xff] }
 0x4fa   :  { %3313 = vadd.xlane.f32.xlu1 %v3312_v43  ;;  %3316 = vadd.xlane.f32.xlu0 %v3315_v59  ;;  %v7644_v43 = vld [vmem:[%s10844_s0 + $0x3b0] sm:$0xff]  ;;  %v3333_v59 = vsel %vm25_vm0, %v7639_v9, 0.0 }
 0x4fe   :  { %3322 = vadd.xlane.f32.xlu1 %v3321_v19  ;;  %3319 = vadd.xlane.f32.xlu0 %v3318_v39  ;;  %v3330_v19 = vsel %vm25_vm0, %v7644_v43, 0.0  ;;  %v7653_v39 = vld [vmem:[%s10844_s0 + $0x3c8] sm:$0xff] }
 0x502   :  { %3328 = vadd.xlane.f32.xlu1 %v3327_v34  ;;  %3325 = vadd.xlane.f32.xlu0 %v3324_v25  ;;  %v3339_v34 = vsel %vm25_vm0, %v7653_v39, 0.0  ;;  %v3336_v25 = vsel %vm25_vm0, %v7658_v31, 0.0 }
 0x506   :  { %3334 = vadd.xlane.f32.xlu1 %v3333_v59  ;;  %3331 = vadd.xlane.f32.xlu0 %v3330_v19  ;;  %v3345_v59 = vsel %vm25_vm0, %v7667_v1, 0.0  ;;  %v3342_v19 = vsel %vm25_vm0, %v7672_v15, 0.0 }
 0x50a   :  { %3340 = vadd.xlane.f32.xlu1 %v3339_v34  ;;  %3337 = vadd.xlane.f32.xlu0 %v3336_v25  ;;  %v3351_v34 = vsel %vm25_vm0, %v7681_v17, 0.0  ;;  %v3348_v25 = vsel %vm25_vm0, %v7686_v24, 0.0 }
 0x50e   :  { %3346 = vadd.xlane.f32.xlu1 %v3345_v59  ;;  %3343 = vadd.xlane.f32.xlu0 %v3342_v19 }
 0x512   :  { %3352 = vadd.xlane.f32.xlu1 %v3351_v34  ;;  %3349 = vadd.xlane.f32.xlu0 %v3348_v25 }
 0x56b   :  { %v7692_v55 = vpop.xlane.xlu1 %2989  ;;  %v7694_v52 = vpop.xlane.xlu0 %2986 }
 0x56c   :  { %11175 = vst [vmem:[#allocation175_spill] sm:$0xff] %v7692_v55  ;;  %11176 = vst [vmem:[#allocation176_spill] sm:$0xff] %v7694_v52 }
 0x56f   :  { %v7696_v56 = vpop.xlane.xlu1 %2995  ;;  %v7698_v60 = vpop.xlane.xlu0 %2992 }
 0x570   :  { %11177 = vst [vmem:[#allocation177_spill] sm:$0xff] %v7696_v56  ;;  %11178 = vst [vmem:[#allocation178_spill] sm:$0xff] %v7698_v60 }
 0x573   :  { %v7700_v47 = vpop.xlane.xlu1 %3001  ;;  %v7702_v59 = vpop.xlane.xlu0 %2998 }
 0x574   :  { %11179 = vst [vmem:[#allocation179_spill] sm:$0xff] %v7700_v47  ;;  %11180 = vst [vmem:[#allocation180_spill] sm:$0xff] %v7702_v59 }
 0x577   :  { %v7704_v19 = vpop.xlane.xlu1 %3007  ;;  %v7706_v10 = vpop.xlane.xlu0 %3004 }
 0x578   :  { %11181 = vst [vmem:[#allocation181_spill] sm:$0xff] %v7704_v19  ;;  %11182 = vst [vmem:[#allocation182_spill] sm:$0xff] %v7706_v10 }
 0x57b   :  { %v7708_v2 = vpop.xlane.xlu1 %3013  ;;  %v7710_v34 = vpop.xlane.xlu0 %3010 }
 0x57c   :  { %11183 = vst [vmem:[#allocation183_spill] sm:$0xff] %v7708_v2  ;;  %11184 = vst [vmem:[#allocation184_spill] sm:$0xff] %v7710_v34 }
 0x57f   :  { %v7712_v25 = vpop.xlane.xlu1 %3019  ;;  %v7714_v0 = vpop.xlane.xlu0 %3016 }
 0x580   :  { %11185 = vst [vmem:[#allocation185_spill] sm:$0xff] %v7712_v25  ;;  %11186 = vst [vmem:[#allocation186_spill] sm:$0xff] %v7714_v0 }
 0x583   :  { %v7716_v27 = vpop.xlane.xlu1 %3025  ;;  %v7718_v55 = vpop.xlane.xlu0 %3022 }
 0x584   :  { %11187 = vst [vmem:[#allocation187_spill] sm:$0xff] %v7716_v27  ;;  %11188 = vst [vmem:[#allocation188_spill] sm:$0xff] %v7718_v55 }
 0x587   :  { %v3314_v60 = vpop.xlane.xlu1 %3313  ;;  %v3317_v47 = vpop.xlane.xlu0 %3316 }
 0x588   :  { %v3354_v56 = vmul.f32 0.020408163, %v3314_v60  ;;  %v3355_v59 = vmul.f32 0.020408163, %v3317_v47 }
 0x58a   :  { %v7721_v19 = vsub.f32 %v7595_v13, %v3354_v56  ;;  %v7724_v10 = vsub.f32 %v7600_v5, %v3355_v59 }
 0x58b   :  { %v3323_v2 = vpop.xlane.xlu1 %3322  ;;  %v3320_v34 = vpop.xlane.xlu0 %3319 }
 0x58c   :  { %11189 = vst [vmem:[#allocation189_spill] sm:$0xff] %v7721_v19  ;;  %11190 = vst [vmem:[#allocation190_spill] sm:$0xff] %v7724_v10  ;;  %v3357_v52 = vmul.f32 0.020408163, %v3323_v2  ;;  %v3356_v25 = vmul.f32 0.020408163, %v3320_v34  ;;  %v3382_v0 = vmul.f32 %v7721_v19, %v7721_v19  ;;  %v3383_v55 = vmul.f32 %v7724_v10, %v7724_v10 }
 0x58e   :  { %v7731_v27 = vsub.f32 %v7611_v11, %v3357_v52  ;;  %v7734_v47 = vsub.f32 %v7616_v61, %v3356_v25  ;;  %v3396_v56 = vsel %vm25_vm0, %v3382_v0, 0.0  ;;  %v3399_v60 = vsel %vm25_vm0, %v3383_v55, 0.0 }
 0x58f   :  { %v3329_v13 = vpop.xlane.xlu1 %3328  ;;  %3397 = vadd.xlane.f32.xlu0 %v3396_v56  ;;  %3400 = vadd.xlane.f32.xlu1 %v3399_v60  ;;  %v3326_v2 = vpop.xlane.xlu0 %3325 }
 0x590   :  { %11191 = vst [vmem:[#allocation191_spill] sm:$0xff] %v7731_v27  ;;  %11192 = vst [vmem:[#allocation192_spill] sm:$0xff] %v7734_v47  ;;  %v3359_v5 = vmul.f32 0.020408163, %v3329_v13  ;;  %v3358_v59 = vmul.f32 0.020408163, %v3326_v2  ;;  %v3385_v34 = vmul.f32 %v7731_v27, %v7731_v27  ;;  %v3384_v52 = vmul.f32 %v7734_v47, %v7734_v47 }
 0x592   :  { %v7743_v11 = vsub.f32 %v7625_v20, %v3359_v5  ;;  %v7746_v61 = vsub.f32 %v7630_v4, %v3358_v59  ;;  %v3405_v0 = vsel %vm25_vm0, %v3385_v34, 0.0  ;;  %v3402_v55 = vsel %vm25_vm0, %v3384_v52, 0.0 }
 0x593   :  { %v3335_v25 = vpop.xlane.xlu1 %3334  ;;  %3406 = vadd.xlane.f32.xlu1 %v3405_v0  ;;  %3403 = vadd.xlane.f32.xlu0 %v3402_v55  ;;  %v3332_v56 = vpop.xlane.xlu0 %3331 }
 0x594   :  { %11193 = vst [vmem:[#allocation193_spill] sm:$0xff] %v7743_v11  ;;  %11194 = vst [vmem:[#allocation194_spill] sm:$0xff] %v7746_v61  ;;  %v3361_v60 = vmul.f32 0.020408163, %v3335_v25  ;;  %v3360_v13 = vmul.f32 0.020408163, %v3332_v56  ;;  %v3387_v2 = vmul.f32 %v7743_v11, %v7743_v11  ;;  %v3386_v20 = vmul.f32 %v7746_v61, %v7746_v61 }
 0x595   :  { %v7896_v61 = vld [vmem:[%s10844_s0 + $0x450] sm:$0xff] }
 0x596   :  { %v7755_v5 = vsub.f32 %v7639_v9, %v3361_v60  ;;  %v7758_v4 = vsub.f32 %v7644_v43, %v3360_v13  ;;  %v3411_v59 = vsel %vm25_vm0, %v3387_v2, 0.0  ;;  %v3408_v34 = vsel %vm25_vm0, %v3386_v20, 0.0 }
 0x597   :  { %v3341_v52 = vpop.xlane.xlu1 %3340  ;;  %3412 = vadd.xlane.f32.xlu1 %v3411_v59  ;;  %3409 = vadd.xlane.f32.xlu0 %v3408_v34  ;;  %v3338_v0 = vpop.xlane.xlu0 %3337 }
 0x598   :  { %11195 = vst [vmem:[#allocation195_spill] sm:$0xff] %v7755_v5  ;;  %11196 = vst [vmem:[#allocation196_spill] sm:$0xff] %v7758_v4  ;;  %v3363_v55 = vmul.f32 0.020408163, %v3341_v52  ;;  %v3362_v25 = vmul.f32 0.020408163, %v3338_v0  ;;  %v3389_v56 = vmul.f32 %v7755_v5, %v7755_v5  ;;  %v3388_v9 = vmul.f32 %v7758_v4, %v7758_v4 }
 0x599   :  { %v7891_v4 = vld [vmem:[%s10844_s0 + $0x458] sm:$0xff] }
 0x59a   :  { %v7767_v60 = vsub.f32 %v7653_v39, %v3363_v55  ;;  %v7770_v43 = vsub.f32 %v7658_v31, %v3362_v25  ;;  %v3417_v13 = vsel %vm25_vm0, %v3389_v56, 0.0  ;;  %v3414_v2 = vsel %vm25_vm0, %v3388_v9, 0.0 }
 0x59b   :  { %v3347_v20 = vpop.xlane.xlu1 %3346  ;;  %3418 = vadd.xlane.f32.xlu1 %v3417_v13  ;;  %3415 = vadd.xlane.f32.xlu0 %v3414_v2  ;;  %v3344_v59 = vpop.xlane.xlu0 %3343 }
 0x59c   :  { %11197 = vst [vmem:[#allocation197_spill] sm:$0xff] %v7767_v60  ;;  %11198 = vst [vmem:[#allocation198_spill] sm:$0xff] %v7770_v43  ;;  %v3365_v34 = vmul.f32 0.020408163, %v3347_v20  ;;  %v3364_v52 = vmul.f32 0.020408163, %v3344_v59  ;;  %v3391_v0 = vmul.f32 %v7767_v60, %v7767_v60  ;;  %v3390_v39 = vmul.f32 %v7770_v43, %v7770_v43 }
 0x59d   :  { %v7882_v43 = vld [vmem:[%s10844_s0 + $0x440] sm:$0xff] }
 0x59e   :  { %v7779_v55 = vsub.f32 %v7667_v1, %v3365_v34  ;;  %v7782_v31 = vsub.f32 %v7672_v15, %v3364_v52  ;;  %v3423_v25 = vsel %vm25_vm0, %v3391_v0, 0.0  ;;  %v3420_v56 = vsel %vm25_vm0, %v3390_v39, 0.0 }
 0x59f   :  { %v3353_v9 = vpop.xlane.xlu1 %3352  ;;  %3424 = vadd.xlane.f32.xlu1 %v3423_v25  ;;  %3421 = vadd.xlane.f32.xlu0 %v3420_v56  ;;  %v3350_v13 = vpop.xlane.xlu0 %3349 }
 0x5a0   :  { %11199 = vst [vmem:[#allocation199_spill] sm:$0xff] %v7779_v55  ;;  %11200 = vst [vmem:[#allocation200_spill] sm:$0xff] %v7782_v31  ;;  %v3367_v2 = vmul.f32 0.020408163, %v3353_v9  ;;  %v3366_v20 = vmul.f32 0.020408163, %v3350_v13  ;;  %v3393_v59 = vmul.f32 %v7779_v55, %v7779_v55  ;;  %v3392_v1 = vmul.f32 %v7782_v31, %v7782_v31 }
 0x5a1   :  { %v7877_v31 = vld [vmem:[%s10844_s0 + $0x448] sm:$0xff] }
 0x5a2   :  { %v7791_v34 = vsub.f32 %v7681_v17, %v3367_v2  ;;  %v7794_v15 = vsub.f32 %v7686_v24, %v3366_v20  ;;  %v3429_v52 = vsel %vm25_vm0, %v3393_v59, 0.0  ;;  %v3426_v0 = vsel %vm25_vm0, %v3392_v1, 0.0  ;;  %v7805_v17 = vld [vmem:[%s10844_s0 + $0x3f0] sm:$0xff]  ;;  %v7810_v24 = vld [vmem:[%s10844_s0 + $0x3f8] sm:$0xff]  ;;  %v7821_v20 = vld [vmem:[%s10844_s0 + $0x408] sm:$0xff] }
 0x5a3   :  { %3430 = vadd.xlane.f32.xlu1 %v3429_v52  ;;  %3427 = vadd.xlane.f32.xlu0 %v3426_v0  ;;  %v3723_v13 = vsel %vm25_vm0, %v7805_v17, 0.0  ;;  %v3726_v2 = vsel %vm25_vm0, %v7810_v24, 0.0  ;;  %v7826_v59 = vld [vmem:[%s10844_s0 + $0x400] sm:$0xff]  ;;  %v3732_v1 = vsel %vm25_vm0, %v7821_v20, 0.0  ;;  %v7835_v0 = vld [vmem:[%s10844_s0 + $0x418] sm:$0xff] }
 0x5a4   :  { %11201 = vst [vmem:[#allocation201_spill] sm:$0xff] %v7791_v34  ;;  %11202 = vst [vmem:[#allocation202_spill] sm:$0xff] %v7794_v15  ;;  %v3395_v39 = vmul.f32 %v7791_v34, %v7791_v34  ;;  %v3394_v25 = vmul.f32 %v7794_v15, %v7794_v15  ;;  %v3729_v52 = vsel %vm25_vm0, %v7826_v59, 0.0  ;;  %v7868_v15 = vld [vmem:[%s10844_s0 + $0x430] sm:$0xff] }
 0x5a6   :  { %v3435_v56 = vsel %vm25_vm0, %v3395_v39, 0.0  ;;  %v3432_v9 = vsel %vm25_vm0, %v3394_v25, 0.0  ;;  %v7840_v39 = vld [vmem:[%s10844_s0 + $0x410] sm:$0xff]  ;;  %v3738_v25 = vsel %vm25_vm0, %v7835_v0, 0.0 }
 0x5a7   :  { %3436 = vadd.xlane.f32.xlu1 %v3435_v56  ;;  %3433 = vadd.xlane.f32.xlu0 %v3432_v9  ;;  %v3735_v56 = vsel %vm25_vm0, %v7840_v39, 0.0  ;;  %v7849_v9 = vld [vmem:[%s10844_s0 + $0x428] sm:$0xff] }
 0x5ab   :  { %3724 = vadd.xlane.f32.xlu1 %v3723_v13  ;;  %3727 = vadd.xlane.f32.xlu0 %v3726_v2  ;;  %v7854_v13 = vld [vmem:[%s10844_s0 + $0x420] sm:$0xff]  ;;  %v3744_v2 = vsel %vm25_vm0, %v7849_v9, 0.0 }
 0x5af   :  { %3733 = vadd.xlane.f32.xlu1 %v3732_v1  ;;  %3730 = vadd.xlane.f32.xlu0 %v3729_v52  ;;  %v3741_v1 = vsel %vm25_vm0, %v7854_v13, 0.0  ;;  %v7863_v52 = vld [vmem:[%s10844_s0 + $0x438] sm:$0xff] }
 0x5b3   :  { %3739 = vadd.xlane.f32.xlu1 %v3738_v25  ;;  %3736 = vadd.xlane.f32.xlu0 %v3735_v56  ;;  %v3750_v25 = vsel %vm25_vm0, %v7863_v52, 0.0  ;;  %v3747_v56 = vsel %vm25_vm0, %v7868_v15, 0.0 }
 0x5b7   :  { %3745 = vadd.xlane.f32.xlu1 %v3744_v2  ;;  %3742 = vadd.xlane.f32.xlu0 %v3741_v1  ;;  %v3756_v2 = vsel %vm25_vm0, %v7877_v31, 0.0  ;;  %v3753_v1 = vsel %vm25_vm0, %v7882_v43, 0.0 }
 0x5bb   :  { %3751 = vadd.xlane.f32.xlu1 %v3750_v25  ;;  %3748 = vadd.xlane.f32.xlu0 %v3747_v56  ;;  %v3762_v25 = vsel %vm25_vm0, %v7891_v4, 0.0  ;;  %v3759_v56 = vsel %vm25_vm0, %v7896_v61, 0.0 }
 0x5bf   :  { %3757 = vadd.xlane.f32.xlu1 %v3756_v2  ;;  %3754 = vadd.xlane.f32.xlu0 %v3753_v1 }
 0x5c3   :  { %3763 = vadd.xlane.f32.xlu1 %v3762_v25  ;;  %3760 = vadd.xlane.f32.xlu0 %v3759_v56 }
 0x61c   :  { %v7902_v47 = vpop.xlane.xlu1 %3400  ;;  %v7904_v34 = vpop.xlane.xlu0 %3397 }
 0x61d   :  { %11203 = vst [vmem:[#allocation203_spill] sm:$0xff] %v7902_v47  ;;  %11204 = vst [vmem:[#allocation204_spill] sm:$0xff] %v7904_v34 }
 0x620   :  { %v7906_v19 = vpop.xlane.xlu1 %3406  ;;  %v7908_v55 = vpop.xlane.xlu0 %3403 }
 0x621   :  { %11205 = vst [vmem:[#allocation205_spill] sm:$0xff] %v7906_v19  ;;  %11206 = vst [vmem:[#allocation206_spill] sm:$0xff] %v7908_v55 }
 0x624   :  { %v7910_v60 = vpop.xlane.xlu1 %3412  ;;  %v7912_v2 = vpop.xlane.xlu0 %3409 }
 0x625   :  { %11207 = vst [vmem:[#allocation207_spill] sm:$0xff] %v7910_v60  ;;  %11208 = vst [vmem:[#allocation208_spill] sm:$0xff] %v7912_v2 }
 0x628   :  { %v7914_v1 = vpop.xlane.xlu1 %3418  ;;  %v7916_v5 = vpop.xlane.xlu0 %3415 }
 0x629   :  { %11209 = vst [vmem:[#allocation209_spill] sm:$0xff] %v7914_v1  ;;  %11210 = vst [vmem:[#allocation210_spill] sm:$0xff] %v7916_v5 }
 0x62c   :  { %v7918_v11 = vpop.xlane.xlu1 %3424  ;;  %v7920_v25 = vpop.xlane.xlu0 %3421 }
 0x62d   :  { %11211 = vst [vmem:[#allocation211_spill] sm:$0xff] %v7918_v11  ;;  %11212 = vst [vmem:[#allocation212_spill] sm:$0xff] %v7920_v25 }
 0x630   :  { %v7922_v56 = vpop.xlane.xlu1 %3430  ;;  %v7924_v27 = vpop.xlane.xlu0 %3427 }
 0x631   :  { %11213 = vst [vmem:[#allocation213_spill] sm:$0xff] %v7922_v56  ;;  %11214 = vst [vmem:[#allocation214_spill] sm:$0xff] %v7924_v27 }
 0x634   :  { %v7926_v10 = vpop.xlane.xlu1 %3436  ;;  %v7928_v47 = vpop.xlane.xlu0 %3433 }
 0x635   :  { %11215 = vst [vmem:[#allocation215_spill] sm:$0xff] %v7926_v10  ;;  %11216 = vst [vmem:[#allocation216_spill] sm:$0xff] %v7928_v47 }
 0x638   :  { %v3725_v55 = vpop.xlane.xlu1 %3724  ;;  %v3728_v60 = vpop.xlane.xlu0 %3727 }
 0x639   :  { %v3765_v19 = vmul.f32 0.020408163, %v3725_v55  ;;  %v3766_v2 = vmul.f32 0.020408163, %v3728_v60 }
 0x63b   :  { %v7931_v1 = vsub.f32 %v7805_v17, %v3765_v19  ;;  %v7934_v5 = vsub.f32 %v7810_v24, %v3766_v2 }
 0x63c   :  { %v3734_v11 = vpop.xlane.xlu1 %3733  ;;  %v3731_v25 = vpop.xlane.xlu0 %3730 }
 0x63d   :  { %11217 = vst [vmem:[#allocation217_spill] sm:$0xff] %v7931_v1  ;;  %11218 = vst [vmem:[#allocation218_spill] sm:$0xff] %v7934_v5  ;;  %v3768_v34 = vmul.f32 0.020408163, %v3734_v11  ;;  %v3767_v56 = vmul.f32 0.020408163, %v3731_v25  ;;  %v3793_v27 = vmul.f32 %v7931_v1, %v7931_v1  ;;  %v3794_v47 = vmul.f32 %v7934_v5, %v7934_v5 }
 0x63f   :  { %v7941_v10 = vsub.f32 %v7821_v20, %v3768_v34  ;;  %v7944_v60 = vsub.f32 %v7826_v59, %v3767_v56  ;;  %v3807_v19 = vsel %vm25_vm0, %v3793_v27, 0.0  ;;  %v3810_v55 = vsel %vm25_vm0, %v3794_v47, 0.0 }
 0x640   :  { %v3740_v17 = vpop.xlane.xlu1 %3739  ;;  %3808 = vadd.xlane.f32.xlu0 %v3807_v19  ;;  %3811 = vadd.xlane.f32.xlu1 %v3810_v55  ;;  %v3737_v11 = vpop.xlane.xlu0 %3736 }
 0x641   :  { %11219 = vst [vmem:[#allocation219_spill] sm:$0xff] %v7941_v10  ;;  %11220 = vst [vmem:[#allocation220_spill] sm:$0xff] %v7944_v60  ;;  %v3770_v24 = vmul.f32 0.020408163, %v3740_v17  ;;  %v3769_v2 = vmul.f32 0.020408163, %v3737_v11  ;;  %v3796_v25 = vmul.f32 %v7941_v10, %v7941_v10  ;;  %v3795_v34 = vmul.f32 %v7944_v60, %v7944_v60 }
 0x643   :  { %v7953_v20 = vsub.f32 %v7835_v0, %v3770_v24  ;;  %v7956_v59 = vsub.f32 %v7840_v39, %v3769_v2  ;;  %v3816_v27 = vsel %vm25_vm0, %v3796_v25, 0.0  ;;  %v3813_v47 = vsel %vm25_vm0, %v3795_v34, 0.0 }
 0x644   :  { %v3746_v56 = vpop.xlane.xlu1 %3745  ;;  %3817 = vadd.xlane.f32.xlu1 %v3816_v27  ;;  %3814 = vadd.xlane.f32.xlu0 %v3813_v47  ;;  %v3743_v19 = vpop.xlane.xlu0 %3742 }
 0x645   :  { %11221 = vst [vmem:[#allocation221_spill] sm:$0xff] %v7953_v20  ;;  %11222 = vst [vmem:[#allocation222_spill] sm:$0xff] %v7956_v59  ;;  %v3772_v55 = vmul.f32 0.020408163, %v3746_v56  ;;  %v3771_v17 = vmul.f32 0.020408163, %v3743_v19  ;;  %v3798_v11 = vmul.f32 %v7953_v20, %v7953_v20  ;;  %v3797_v0 = vmul.f32 %v7956_v59, %v7956_v59 }
 0x646   :  { %v8106_v59 = vld [vmem:[%s10844_s0 + $0x4c0] sm:$0xff] }
 0x647   :  { %v7965_v24 = vsub.f32 %v7849_v9, %v3772_v55  ;;  %v7968_v39 = vsub.f32 %v7854_v13, %v3771_v17  ;;  %v3822_v2 = vsel %vm25_vm0, %v3798_v11, 0.0  ;;  %v3819_v25 = vsel %vm25_vm0, %v3797_v0, 0.0 }
 0x648   :  { %v3752_v34 = vpop.xlane.xlu1 %3751  ;;  %3823 = vadd.xlane.f32.xlu1 %v3822_v2  ;;  %3820 = vadd.xlane.f32.xlu0 %v3819_v25  ;;  %v3749_v27 = vpop.xlane.xlu0 %3748 }
 0x649   :  { %11223 = vst [vmem:[#allocation223_spill] sm:$0xff] %v7965_v24  ;;  %11224 = vst [vmem:[#allocation224_spill] sm:$0xff] %v7968_v39  ;;  %v3774_v47 = vmul.f32 0.020408163, %v3752_v34  ;;  %v3773_v56 = vmul.f32 0.020408163, %v3749_v27  ;;  %v3800_v19 = vmul.f32 %v7965_v24, %v7965_v24  ;;  %v3799_v9 = vmul.f32 %v7968_v39, %v7968_v39 }
 0x64a   :  { %v8101_v39 = vld [vmem:[%s10844_s0 + $0x4c8] sm:$0xff] }
 0x64b   :  { %v7977_v55 = vsub.f32 %v7863_v52, %v3774_v47  ;;  %v7980_v13 = vsub.f32 %v7868_v15, %v3773_v56  ;;  %v3828_v17 = vsel %vm25_vm0, %v3800_v19, 0.0  ;;  %v3825_v11 = vsel %vm25_vm0, %v3799_v9, 0.0 }
 0x64c   :  { %v3758_v0 = vpop.xlane.xlu1 %3757  ;;  %3829 = vadd.xlane.f32.xlu1 %v3828_v17  ;;  %3826 = vadd.xlane.f32.xlu0 %v3825_v11  ;;  %v3755_v2 = vpop.xlane.xlu0 %3754 }
 0x64d   :  { %11225 = vst [vmem:[#allocation225_spill] sm:$0xff] %v7977_v55  ;;  %11226 = vst [vmem:[#allocation226_spill] sm:$0xff] %v7980_v13  ;;  %v3776_v25 = vmul.f32 0.020408163, %v3758_v0  ;;  %v3775_v34 = vmul.f32 0.020408163, %v3755_v2  ;;  %v3802_v27 = vmul.f32 %v7977_v55, %v7977_v55  ;;  %v3801_v52 = vmul.f32 %v7980_v13, %v7980_v13 }
 0x64e   :  { %v8092_v13 = vld [vmem:[%s10844_s0 + $0x4b0] sm:$0xff] }
 0x64f   :  { %v7989_v47 = vsub.f32 %v7877_v31, %v3776_v25  ;;  %v7992_v15 = vsub.f32 %v7882_v43, %v3775_v34  ;;  %v3834_v56 = vsel %vm25_vm0, %v3802_v27, 0.0  ;;  %v3831_v19 = vsel %vm25_vm0, %v3801_v52, 0.0 }
 0x650   :  { %v3764_v9 = vpop.xlane.xlu1 %3763  ;;  %3835 = vadd.xlane.f32.xlu1 %v3834_v56  ;;  %3832 = vadd.xlane.f32.xlu0 %v3831_v19  ;;  %v3761_v17 = vpop.xlane.xlu0 %3760 }
 0x651   :  { %11227 = vst [vmem:[#allocation227_spill] sm:$0xff] %v7989_v47  ;;  %11228 = vst [vmem:[#allocation228_spill] sm:$0xff] %v7992_v15  ;;  %v3778_v11 = vmul.f32 0.020408163, %v3764_v9  ;;  %v3777_v0 = vmul.f32 0.020408163, %v3761_v17  ;;  %v3804_v2 = vmul.f32 %v7989_v47, %v7989_v47  ;;  %v3803_v31 = vmul.f32 %v7992_v15, %v7992_v15 }
 0x652   :  { %v8087_v15 = vld [vmem:[%s10844_s0 + $0x4b8] sm:$0xff] }
 0x653   :  { %v8001_v25 = vsub.f32 %v7891_v4, %v3778_v11  ;;  %v8004_v43 = vsub.f32 %v7896_v61, %v3777_v0  ;;  %v3840_v34 = vsel %vm25_vm0, %v3804_v2, 0.0  ;;  %v3837_v27 = vsel %vm25_vm0, %v3803_v31, 0.0  ;;  %v8015_v4 = vld [vmem:[%s10844_s0 + $0x460] sm:$0xff]  ;;  %v8020_v61 = vld [vmem:[%s10844_s0 + $0x468] sm:$0xff]  ;;  %v8031_v0 = vld [vmem:[%s10844_s0 + $0x478] sm:$0xff] }
 0x654   :  { %3841 = vadd.xlane.f32.xlu1 %v3840_v34  ;;  %3838 = vadd.xlane.f32.xlu0 %v3837_v27  ;;  %v4134_v17 = vsel %vm25_vm0, %v8015_v4, 0.0  ;;  %v4137_v11 = vsel %vm25_vm0, %v8020_v61, 0.0  ;;  %v8036_v2 = vld [vmem:[%s10844_s0 + $0x470] sm:$0xff]  ;;  %v4143_v31 = vsel %vm25_vm0, %v8031_v0, 0.0  ;;  %v8045_v27 = vld [vmem:[%s10844_s0 + $0x488] sm:$0xff] }
 0x655   :  { %11229 = vst [vmem:[#allocation229_spill] sm:$0xff] %v8001_v25  ;;  %11230 = vst [vmem:[#allocation230_spill] sm:$0xff] %v8004_v43  ;;  %v3806_v52 = vmul.f32 %v8001_v25, %v8001_v25  ;;  %v3805_v56 = vmul.f32 %v8004_v43, %v8004_v43  ;;  %v4140_v34 = vsel %vm25_vm0, %v8036_v2, 0.0  ;;  %v8078_v43 = vld [vmem:[%s10844_s0 + $0x4a0] sm:$0xff] }
 0x657   :  { %v3846_v19 = vsel %vm25_vm0, %v3806_v52, 0.0  ;;  %v3843_v9 = vsel %vm25_vm0, %v3805_v56, 0.0  ;;  %v8050_v52 = vld [vmem:[%s10844_s0 + $0x480] sm:$0xff]  ;;  %v4149_v56 = vsel %vm25_vm0, %v8045_v27, 0.0 }
 0x658   :  { %3847 = vadd.xlane.f32.xlu1 %v3846_v19  ;;  %3844 = vadd.xlane.f32.xlu0 %v3843_v9  ;;  %v4146_v19 = vsel %vm25_vm0, %v8050_v52, 0.0  ;;  %v8059_v9 = vld [vmem:[%s10844_s0 + $0x498] sm:$0xff] }
 0x65c   :  { %4135 = vadd.xlane.f32.xlu1 %v4134_v17  ;;  %4138 = vadd.xlane.f32.xlu0 %v4137_v11  ;;  %v8064_v17 = vld [vmem:[%s10844_s0 + $0x490] sm:$0xff]  ;;  %v4155_v11 = vsel %vm25_vm0, %v8059_v9, 0.0 }
 0x660   :  { %4144 = vadd.xlane.f32.xlu1 %v4143_v31  ;;  %4141 = vadd.xlane.f32.xlu0 %v4140_v34  ;;  %v4152_v31 = vsel %vm25_vm0, %v8064_v17, 0.0  ;;  %v8073_v34 = vld [vmem:[%s10844_s0 + $0x4a8] sm:$0xff] }
 0x664   :  { %4150 = vadd.xlane.f32.xlu1 %v4149_v56  ;;  %4147 = vadd.xlane.f32.xlu0 %v4146_v19  ;;  %v4161_v56 = vsel %vm25_vm0, %v8073_v34, 0.0  ;;  %v4158_v19 = vsel %vm25_vm0, %v8078_v43, 0.0 }
 0x668   :  { %4156 = vadd.xlane.f32.xlu1 %v4155_v11  ;;  %4153 = vadd.xlane.f32.xlu0 %v4152_v31  ;;  %v4167_v11 = vsel %vm25_vm0, %v8087_v15, 0.0  ;;  %v4164_v31 = vsel %vm25_vm0, %v8092_v13, 0.0 }
 0x66c   :  { %4162 = vadd.xlane.f32.xlu1 %v4161_v56  ;;  %4159 = vadd.xlane.f32.xlu0 %v4158_v19  ;;  %v4173_v56 = vsel %vm25_vm0, %v8101_v39, 0.0  ;;  %v4170_v19 = vsel %vm25_vm0, %v8106_v59, 0.0 }
 0x670   :  { %4168 = vadd.xlane.f32.xlu1 %v4167_v11  ;;  %4165 = vadd.xlane.f32.xlu0 %v4164_v31 }
 0x674   :  { %4174 = vadd.xlane.f32.xlu1 %v4173_v56  ;;  %4171 = vadd.xlane.f32.xlu0 %v4170_v19 }
 0x6cd   :  { %v8112_v60 = vpop.xlane.xlu1 %3811  ;;  %v8114_v25 = vpop.xlane.xlu0 %3808 }
 0x6ce   :  { %11231 = vst [vmem:[#allocation231_spill] sm:$0xff] %v8112_v60  ;;  %11232 = vst [vmem:[#allocation232_spill] sm:$0xff] %v8114_v25 }
 0x6d1   :  { %v8116_v1 = vpop.xlane.xlu1 %3817  ;;  %v8118_v47 = vpop.xlane.xlu0 %3814 }
 0x6d2   :  { %11233 = vst [vmem:[#allocation233_spill] sm:$0xff] %v8116_v1  ;;  %11234 = vst [vmem:[#allocation234_spill] sm:$0xff] %v8118_v47 }
 0x6d5   :  { %v8120_v55 = vpop.xlane.xlu1 %3823  ;;  %v8122_v11 = vpop.xlane.xlu0 %3820 }
 0x6d6   :  { %11235 = vst [vmem:[#allocation235_spill] sm:$0xff] %v8120_v55  ;;  %11236 = vst [vmem:[#allocation236_spill] sm:$0xff] %v8122_v11 }
 0x6d9   :  { %v8124_v31 = vpop.xlane.xlu1 %3829  ;;  %v8126_v24 = vpop.xlane.xlu0 %3826 }
 0x6da   :  { %11237 = vst [vmem:[#allocation237_spill] sm:$0xff] %v8124_v31  ;;  %11238 = vst [vmem:[#allocation238_spill] sm:$0xff] %v8126_v24 }
 0x6dd   :  { %v8128_v20 = vpop.xlane.xlu1 %3835  ;;  %v8130_v56 = vpop.xlane.xlu0 %3832 }
 0x6de   :  { %11239 = vst [vmem:[#allocation239_spill] sm:$0xff] %v8128_v20  ;;  %11240 = vst [vmem:[#allocation240_spill] sm:$0xff] %v8130_v56 }
 0x6e1   :  { %v8132_v19 = vpop.xlane.xlu1 %3841  ;;  %v8134_v10 = vpop.xlane.xlu0 %3838 }
 0x6e2   :  { %11241 = vst [vmem:[#allocation241_spill] sm:$0xff] %v8132_v19  ;;  %11242 = vst [vmem:[#allocation242_spill] sm:$0xff] %v8134_v10 }
 0x6e5   :  { %v8136_v5 = vpop.xlane.xlu1 %3847  ;;  %v8138_v60 = vpop.xlane.xlu0 %3844 }
 0x6e6   :  { %11243 = vst [vmem:[#allocation243_spill] sm:$0xff] %v8136_v5  ;;  %11244 = vst [vmem:[#allocation244_spill] sm:$0xff] %v8138_v60 }
 0x6e9   :  { %v4136_v47 = vpop.xlane.xlu1 %4135  ;;  %v4139_v55 = vpop.xlane.xlu0 %4138 }
 0x6ea   :  { %v4176_v1 = vmul.f32 0.020408163, %v4136_v47  ;;  %v4177_v11 = vmul.f32 0.020408163, %v4139_v55 }
 0x6ec   :  { %v8141_v31 = vsub.f32 %v8015_v4, %v4176_v1  ;;  %v8144_v24 = vsub.f32 %v8020_v61, %v4177_v11 }
 0x6ed   :  { %v4145_v20 = vpop.xlane.xlu1 %4144  ;;  %v4142_v56 = vpop.xlane.xlu0 %4141 }
 0x6ee   :  { %11245 = vst [vmem:[#allocation245_spill] sm:$0xff] %v8141_v31  ;;  %11246 = vst [vmem:[#allocation246_spill] sm:$0xff] %v8144_v24  ;;  %v4179_v25 = vmul.f32 0.020408163, %v4145_v20  ;;  %v4178_v19 = vmul.f32 0.020408163, %v4142_v56  ;;  %v4204_v10 = vmul.f32 %v8141_v31, %v8141_v31  ;;  %v4205_v60 = vmul.f32 %v8144_v24, %v8144_v24 }
 0x6f0   :  { %v8151_v5 = vsub.f32 %v8031_v0, %v4179_v25  ;;  %v8154_v55 = vsub.f32 %v8036_v2, %v4178_v19  ;;  %v4218_v1 = vsel %vm25_vm0, %v4204_v10, 0.0  ;;  %v4221_v47 = vsel %vm25_vm0, %v4205_v60, 0.0 }
 0x6f1   :  { %v4151_v4 = vpop.xlane.xlu1 %4150  ;;  %4219 = vadd.xlane.f32.xlu0 %v4218_v1  ;;  %4222 = vadd.xlane.f32.xlu1 %v4221_v47  ;;  %v4148_v20 = vpop.xlane.xlu0 %4147 }
 0x6f2   :  { %11247 = vst [vmem:[#allocation247_spill] sm:$0xff] %v8151_v5  ;;  %11248 = vst [vmem:[#allocation248_spill] sm:$0xff] %v8154_v55  ;;  %v4181_v61 = vmul.f32 0.020408163, %v4151_v4  ;;  %v4180_v11 = vmul.f32 0.020408163, %v4148_v20  ;;  %v4207_v56 = vmul.f32 %v8151_v5, %v8151_v5  ;;  %v4206_v25 = vmul.f32 %v8154_v55, %v8154_v55 }
 0x6f4   :  { %v8163_v0 = vsub.f32 %v8045_v27, %v4181_v61  ;;  %v8166_v2 = vsub.f32 %v8050_v52, %v4180_v11  ;;  %v4227_v10 = vsel %vm25_vm0, %v4207_v56, 0.0  ;;  %v4224_v60 = vsel %vm25_vm0, %v4206_v25, 0.0 }
 0x6f5   :  { %v4157_v19 = vpop.xlane.xlu1 %4156  ;;  %4228 = vadd.xlane.f32.xlu1 %v4227_v10  ;;  %4225 = vadd.xlane.f32.xlu0 %v4224_v60  ;;  %v4154_v1 = vpop.xlane.xlu0 %4153 }
 0x6f6   :  { %11249 = vst [vmem:[#allocation249_spill] sm:$0xff] %v8163_v0  ;;  %11250 = vst [vmem:[#allocation250_spill] sm:$0xff] %v8166_v2  ;;  %v4183_v47 = vmul.f32 0.020408163, %v4157_v19  ;;  %v4182_v4 = vmul.f32 0.020408163, %v4154_v1  ;;  %v4209_v20 = vmul.f32 %v8163_v0, %v8163_v0  ;;  %v4208_v27 = vmul.f32 %v8166_v2, %v8166_v2 }
 0x6f7   :  { %v5926_v2 = vmov 0  }
 0x6f8   :  { %v8175_v61 = vsub.f32 %v8059_v9, %v4183_v47  ;;  %v8178_v52 = vsub.f32 %v8064_v17, %v4182_v4  ;;  %v4233_v11 = vsel %vm25_vm0, %v4209_v20, 0.0  ;;  %v4230_v56 = vsel %vm25_vm0, %v4208_v27, 0.0  ;;  %5589 = vset.pattern.permute.xlu1 %v5926_v2  ;;  %5588 = vset.pattern.permute.xlu0 %v5926_v2 }
 0x6f9   :  { %v4163_v25 = vpop.xlane.xlu1 %4162  ;;  %4234 = vadd.xlane.f32.xlu1 %v4233_v11  ;;  %4231 = vadd.xlane.f32.xlu0 %v4230_v56  ;;  %v4160_v10 = vpop.xlane.xlu0 %4159 }
 0x6fa   :  { %11251 = vst [vmem:[#allocation251_spill] sm:$0xff] %v8175_v61  ;;  %11252 = vst [vmem:[#allocation252_spill] sm:$0xff] %v8178_v52  ;;  %v4185_v60 = vmul.f32 0.020408163, %v4163_v25  ;;  %v4184_v19 = vmul.f32 0.020408163, %v4160_v10  ;;  %v4211_v1 = vmul.f32 %v8175_v61, %v8175_v61  ;;  %v4210_v9 = vmul.f32 %v8178_v52, %v8178_v52 }
 0x6fb   :  { %v8311_v61 = vld [vmem:[%s10844_s0 + $0x528] sm:$0xff] }
 0x6fc   :  { %v8187_v47 = vsub.f32 %v8073_v34, %v4185_v60  ;;  %v8190_v17 = vsub.f32 %v8078_v43, %v4184_v19  ;;  %v4239_v4 = vsel %vm25_vm0, %v4211_v1, 0.0  ;;  %v4236_v20 = vsel %vm25_vm0, %v4210_v9, 0.0 }
 0x6fd   :  { %v4169_v27 = vpop.xlane.xlu1 %4168  ;;  %4240 = vadd.xlane.f32.xlu1 %v4239_v4  ;;  %4237 = vadd.xlane.f32.xlu0 %v4236_v20  ;;  %v4166_v11 = vpop.xlane.xlu0 %4165  ;;  %v4578_v0 = vsel %vm25_vm0, %v8311_v61, 0.0 }
 0x6fe   :  { %11253 = vst [vmem:[#allocation253_spill] sm:$0xff] %v8187_v47  ;;  %11254 = vst [vmem:[#allocation254_spill] sm:$0xff] %v8190_v17  ;;  %v4187_v56 = vmul.f32 0.020408163, %v4169_v27  ;;  %v4186_v25 = vmul.f32 0.020408163, %v4166_v11  ;;  %v4213_v10 = vmul.f32 %v8187_v47, %v8187_v47  ;;  %v4212_v34 = vmul.f32 %v8190_v17, %v8190_v17 }
 0x6ff   :  { %v8302_v17 = vld [vmem:[%s10844_s0 + $0x530] sm:$0xff] }
 0x700   :  { %v8199_v60 = vsub.f32 %v8087_v15, %v4187_v56  ;;  %v8202_v43 = vsub.f32 %v8092_v13, %v4186_v25  ;;  %v4245_v19 = vsel %vm25_vm0, %v4213_v10, 0.0  ;;  %v4242_v1 = vsel %vm25_vm0, %v4212_v34, 0.0 }
 0x701   :  { %v4175_v9 = vpop.xlane.xlu1 %4174  ;;  %4246 = vadd.xlane.f32.xlu1 %v4245_v19  ;;  %4243 = vadd.xlane.f32.xlu0 %v4242_v1  ;;  %v4172_v4 = vpop.xlane.xlu0 %4171 }
 0x702   :  { %11255 = vst [vmem:[#allocation255_spill] sm:$0xff] %v8199_v60  ;;  %11256 = vst [vmem:[#allocation256_spill] sm:$0xff] %v8202_v43  ;;  %v4189_v20 = vmul.f32 0.020408163, %v4175_v9  ;;  %v4188_v27 = vmul.f32 0.020408163, %v4172_v4  ;;  %v4215_v11 = vmul.f32 %v8199_v60, %v8199_v60  ;;  %v4214_v15 = vmul.f32 %v8202_v43, %v8202_v43 }
 0x703   :  { %v8297_v60 = vld [vmem:[%s10844_s0 + $0x518] sm:$0xff] }
 0x704   :  { %v8211_v56 = vsub.f32 %v8101_v39, %v4189_v20  ;;  %v8214_v13 = vsub.f32 %v8106_v59, %v4188_v27  ;;  %v4251_v25 = vsel %vm25_vm0, %v4215_v11, 0.0  ;;  %v4248_v10 = vsel %vm25_vm0, %v4214_v15, 0.0  ;;  %v8225_v39 = vld [vmem:[%s10844_s0 + $0x4d8] sm:$0xff]  ;;  %v8230_v59 = vld [vmem:[%s10844_s0 + $0x4d0] sm:$0xff]  ;;  %v8241_v27 = vld [vmem:[%s10844_s0 + $0x4e0] sm:$0xff] }
 0x705   :  { %4252 = vadd.xlane.f32.xlu1 %v4251_v25  ;;  %4249 = vadd.xlane.f32.xlu0 %v4248_v10  ;;  %v4548_v4 = vsel %vm25_vm0, %v8225_v39, 0.0  ;;  %v4545_v20 = vsel %vm25_vm0, %v8230_v59, 0.0  ;;  %v8246_v11 = vld [vmem:[%s10844_s0 + $0x4f0] sm:$0xff]  ;;  %v4551_v15 = vsel %vm25_vm0, %v8241_v27, 0.0  ;;  %v8255_v10 = vld [vmem:[%s10844_s0 + $0x4e8] sm:$0xff] }
 0x706   :  { %11257 = vst [vmem:[#allocation257_spill] sm:$0xff] %v8211_v56  ;;  %11258 = vst [vmem:[#allocation258_spill] sm:$0xff] %v8214_v13  ;;  %v4217_v34 = vmul.f32 %v8211_v56, %v8211_v56  ;;  %v4216_v19 = vmul.f32 %v8214_v13, %v8214_v13  ;;  %v4557_v25 = vsel %vm25_vm0, %v8246_v11, 0.0  ;;  %v8288_v13 = vld [vmem:[%s10844_s0 + $0x520] sm:$0xff] }
 0x708   :  { %v4257_v1 = vsel %vm25_vm0, %v4217_v34, 0.0  ;;  %v4254_v9 = vsel %vm25_vm0, %v4216_v19, 0.0  ;;  %v8260_v34 = vld [vmem:[%s10844_s0 + $0x500] sm:$0xff]  ;;  %v4554_v19 = vsel %vm25_vm0, %v8255_v10, 0.0 }
 0x709   :  { %4258 = vadd.xlane.f32.xlu1 %v4257_v1  ;;  %4255 = vadd.xlane.f32.xlu0 %v4254_v9  ;;  %v4563_v1 = vsel %vm25_vm0, %v8260_v34, 0.0  ;;  %v8269_v9 = vld [vmem:[%s10844_s0 + $0x4f8] sm:$0xff] }
 0x70d   :  { %4549 = vadd.xlane.f32.xlu1 %v4548_v4  ;;  %4546 = vadd.xlane.f32.xlu0 %v4545_v20  ;;  %v8274_v4 = vld [vmem:[%s10844_s0 + $0x510] sm:$0xff]  ;;  %v4560_v20 = vsel %vm25_vm0, %v8269_v9, 0.0 }
 0x711   :  { %4552 = vadd.xlane.f32.xlu0 %v4551_v15  ;;  %4558 = vadd.xlane.f32.xlu1 %v4557_v25  ;;  %v4569_v15 = vsel %vm25_vm0, %v8274_v4, 0.0  ;;  %v8283_v25 = vld [vmem:[%s10844_s0 + $0x508] sm:$0xff] }
 0x715   :  { %4555 = vadd.xlane.f32.xlu0 %v4554_v19  ;;  %4564 = vadd.xlane.f32.xlu1 %v4563_v1  ;;  %v4566_v19 = vsel %vm25_vm0, %v8283_v25, 0.0  ;;  %v4575_v1 = vsel %vm25_vm0, %v8288_v13, 0.0 }
 0x719   :  { %4561 = vadd.xlane.f32.xlu0 %v4560_v20  ;;  %4570 = vadd.xlane.f32.xlu1 %v4569_v15  ;;  %v4572_v20 = vsel %vm25_vm0, %v8297_v60, 0.0  ;;  %v4581_v15 = vsel %vm25_vm0, %v8302_v17, 0.0 }
 0x71d   :  { %4567 = vadd.xlane.f32.xlu0 %v4566_v19  ;;  %4576 = vadd.xlane.f32.xlu1 %v4575_v1  ;;  %v8318_v19 = vld [vmem:[%s10844_s0 + $0x538] sm:$0xff] }
 0x71e   :  { %v4584_v1 = vsel %vm25_vm0, %v8318_v19, 0.0 }
 0x721   :  { %4573 = vadd.xlane.f32.xlu0 %v4572_v20  ;;  %4582 = vadd.xlane.f32.xlu1 %v4581_v15 }
 0x725   :  { %4579 = vadd.xlane.f32.xlu0 %v4578_v0 }
 0x729   :  { %4585 = vadd.xlane.f32.xlu0 %v4584_v1 }
 0x77e   :  { %v8322_v55 = vpop.xlane.xlu1 %4222  ;;  %v8324_v20 = vpop.xlane.xlu0 %4219 }
 0x77f   :  { %11259 = vst [vmem:[#allocation259_spill] sm:$0xff] %v8322_v55  ;;  %11260 = vst [vmem:[#allocation260_spill] sm:$0xff] %v8324_v20 }
 0x782   :  { %v8326_v15 = vpop.xlane.xlu1 %4228  ;;  %v8328_v31 = vpop.xlane.xlu0 %4225 }
 0x783   :  { %11261 = vst [vmem:[#allocation261_spill] sm:$0xff] %v8326_v15  ;;  %11262 = vst [vmem:[#allocation262_spill] sm:$0xff] %v8328_v31 }
 0x786   :  { %v8330_v56 = vpop.xlane.xlu1 %4234  ;;  %v8332_v43 = vpop.xlane.xlu0 %4231 }
 0x787   :  { %11263 = vst [vmem:[#allocation263_spill] sm:$0xff] %v8330_v56  ;;  %11264 = vst [vmem:[#allocation264_spill] sm:$0xff] %v8332_v43 }
 0x78a   :  { %v8334_v0 = vpop.xlane.xlu1 %4240  ;;  %v8336_v47 = vpop.xlane.xlu0 %4237 }
 0x78b   :  { %11265 = vst [vmem:[#allocation265_spill] sm:$0xff] %v8334_v0  ;;  %11266 = vst [vmem:[#allocation266_spill] sm:$0xff] %v8336_v47 }
 0x78e   :  { %v8338_v1 = vpop.xlane.xlu1 %4246  ;;  %v8340_v52 = vpop.xlane.xlu0 %4243 }
 0x78f   :  { %11267 = vst [vmem:[#allocation267_spill] sm:$0xff] %v8338_v1  ;;  %11268 = vst [vmem:[#allocation268_spill] sm:$0xff] %v8340_v52 }
 0x792   :  { %v8342_v2 = vpop.xlane.xlu1 %4252  ;;  %v8344_v5 = vpop.xlane.xlu0 %4249 }
 0x793   :  { %11269 = vst [vmem:[#allocation269_spill] sm:$0xff] %v8342_v2  ;;  %11270 = vst [vmem:[#allocation270_spill] sm:$0xff] %v8344_v5 }
 0x796   :  { %v8346_v24 = vpop.xlane.xlu1 %4258  ;;  %v8348_v55 = vpop.xlane.xlu0 %4255 }
 0x797   :  { %11271 = vst [vmem:[#allocation271_spill] sm:$0xff] %v8346_v24  ;;  %11272 = vst [vmem:[#allocation272_spill] sm:$0xff] %v8348_v55 }
 0x79a   :  { %v4550_v31 = vpop.xlane.xlu1 %4549  ;;  %v4547_v56 = vpop.xlane.xlu0 %4546 }
 0x79b   :  { %v4588_v15 = vmul.f32 0.020408163, %v4550_v31  ;;  %v4587_v43 = vmul.f32 0.020408163, %v4547_v56 }
 0x79d   :  { %v8351_v0 = vsub.f32 %v8225_v39, %v4588_v15  ;;  %v8354_v47 = vsub.f32 %v8230_v59, %v4587_v43 }
 0x79e   :  { %v4553_v1 = vpop.xlane.xlu0 %4552  ;;  %v4559_v52 = vpop.xlane.xlu1 %4558 }
 0x79f   :  { %v4589_v20 = vmul.f32 0.020408163, %v4553_v1  ;;  %v4591_v2 = vmul.f32 0.020408163, %v4559_v52  ;;  %v4616_v5 = vmul.f32 %v8351_v0, %v8351_v0  ;;  %v4615_v55 = vmul.f32 %v8354_v47, %v8354_v47 }
 0x7a1   :  { %v8361_v24 = vsub.f32 %v8241_v27, %v4589_v20  ;;  %v8364_v31 = vsub.f32 %v8246_v11, %v4591_v2  ;;  %v4632_v56 = vsel %vm25_vm0, %v4616_v5, 0.0  ;;  %v4629_v43 = vsel %vm25_vm0, %v4615_v55, 0.0 }
 0x7a2   :  { %4633 = vadd.xlane.f32.xlu0 %v4632_v56  ;;  %4630 = vadd.xlane.f32.xlu1 %v4629_v43  ;;  %v4556_v39 = vpop.xlane.xlu0 %4555  ;;  %v4565_v52 = vpop.xlane.xlu1 %4564 }
 0x7a3   :  { %11273 = vst [vmem:[#allocation273_spill] sm:$0xff] %v8364_v31  ;;  %v4590_v59 = vmul.f32 0.020408163, %v4556_v39  ;;  %v4593_v15 = vmul.f32 0.020408163, %v4565_v52  ;;  %v4617_v1 = vmul.f32 %v8361_v24, %v8361_v24  ;;  %v4619_v27 = vmul.f32 %v8364_v31, %v8364_v31 }
 0x7a5   :  { %v8373_v20 = vsub.f32 %v8255_v10, %v4590_v59  ;;  %v8376_v11 = vsub.f32 %v8260_v34, %v4593_v15  ;;  %v4635_v5 = vsel %vm25_vm0, %v4617_v1, 0.0  ;;  %v4641_v56 = vsel %vm25_vm0, %v4619_v27, 0.0 }
 0x7a6   :  { %4636 = vadd.xlane.f32.xlu0 %v4635_v5  ;;  %v4562_v55 = vpop.xlane.xlu0 %4561  ;;  %v4571_v2 = vpop.xlane.xlu1 %4570 }
 0x7a7   :  { %v4592_v43 = vmul.f32 0.020408163, %v4562_v55  ;;  %v4595_v39 = vmul.f32 0.020408163, %v4571_v2  ;;  %v4618_v52 = vmul.f32 %v8373_v20, %v8373_v20  ;;  %v4621_v31 = vmul.f32 %v8376_v11, %v8376_v11 }
 0x7a9   :  { %v8385_v10 = vsub.f32 %v8269_v9, %v4592_v43  ;;  %v8388_v34 = vsub.f32 %v8274_v4, %v4595_v39  ;;  %v4638_v59 = vsel %vm25_vm0, %v4618_v52, 0.0  ;;  %v4647_v27 = vsel %vm25_vm0, %v4621_v31, 0.0 }
 0x7aa   :  { %4642 = vadd.xlane.f32.xlu0 %v4641_v56  ;;  %4639 = vadd.xlane.f32.xlu1 %v4638_v59  ;;  %v4568_v15 = vpop.xlane.xlu0 %4567  ;;  %v4577_v1 = vpop.xlane.xlu1 %4576 }
 0x7ab   :  { %v4594_v5 = vmul.f32 0.020408163, %v4568_v15  ;;  %v4597_v55 = vmul.f32 0.020408163, %v4577_v1  ;;  %v4620_v2 = vmul.f32 %v8385_v10, %v8385_v10  ;;  %v4623_v9 = vmul.f32 %v8388_v34, %v8388_v34 }
 0x7ad   :  { %v8397_v43 = vsub.f32 %v8283_v25, %v4594_v5  ;;  %v8400_v4 = vsub.f32 %v8288_v13, %v4597_v55  ;;  %v4644_v56 = vsel %vm25_vm0, %v4620_v2, 0.0  ;;  %v4653_v52 = vsel %vm25_vm0, %v4623_v9, 0.0 }
 0x7ae   :  { %4648 = vadd.xlane.f32.xlu0 %v4647_v27  ;;  %4645 = vadd.xlane.f32.xlu1 %v4644_v56  ;;  %v4574_v39 = vpop.xlane.xlu0 %4573  ;;  %v4583_v31 = vpop.xlane.xlu1 %4582 }
 0x7af   :  { %v4596_v59 = vmul.f32 0.020408163, %v4574_v39  ;;  %v4599_v15 = vmul.f32 0.020408163, %v4583_v31  ;;  %v4622_v1 = vmul.f32 %v8397_v43, %v8397_v43  ;;  %v4625_v25 = vmul.f32 %v8400_v4, %v8400_v4 }
 0x7b1   :  { %v8409_v5 = vsub.f32 %v8297_v60, %v4596_v59  ;;  %v8412_v13 = vsub.f32 %v8302_v17, %v4599_v15  ;;  %v4650_v27 = vsel %vm25_vm0, %v4622_v1, 0.0  ;;  %v4659_v9 = vsel %vm25_vm0, %v4625_v25, 0.0 }
 0x7b2   :  { %4654 = vadd.xlane.f32.xlu0 %v4653_v52  ;;  %4651 = vadd.xlane.f32.xlu1 %v4650_v27  ;;  %v4580_v55 = vpop.xlane.xlu0 %4579  ;;  %v153_v1 = vmul.f32 0.020408163, %v6406_v48  ;;  %v152_v25 = vmul.f32 0.020408163, %v6404_v58 }
 0x7b3   :  { %v4598_v2 = vmul.f32 0.020408163, %v4580_v55  ;;  %v4624_v56 = vmul.f32 %v8409_v5, %v8409_v5  ;;  %v4627_v39 = vmul.f32 %v8412_v13, %v8412_v13 }
 0x7b5   :  { %v8421_v60 = vsub.f32 %v8311_v61, %v4598_v2  ;;  %v4656_v17 = vsel %vm25_vm0, %v4624_v56, 0.0  ;;  %v4665_v59 = vsel %vm25_vm0, %v4627_v39, 0.0  ;;  %v167_v2 = vadd.f32 0.001, %v153_v1 }
 0x7b6   :  { %4660 = vadd.xlane.f32.xlu0 %v4659_v9  ;;  %4657 = vadd.xlane.f32.xlu1 %v4656_v17  ;;  %v4586_v31 = vpop.xlane.xlu0 %4585  ;;  %v154_v9 = vmul.f32 0.020408163, %v6408_v62  ;;  %v166_v56 = vadd.f32 0.001, %v152_v25  ;;  %v161_v39 = vmul.f32 0.020408163, %v6422_v14 }
 0x7b7   :  { %v4600_v52 = vmul.f32 0.020408163, %v4586_v31  ;;  %v4626_v15 = vmul.f32 %v8421_v60, %v8421_v60  ;;  %5590 = vrsqrt.f32 %v167_v2  ;;  %v163_v31 = vmul.f32 0.020408163, %v6426_v22 }
 0x7b8   :  { %v168_v58 = vadd.f32 0.001, %v154_v9  ;;  %5592 = vrsqrt.f32 %v166_v56  ;;  %v175_v17 = vadd.f32 0.001, %v161_v39  ;;  %v157_v14 = vmul.f32 0.020408163, %v6414_v16 }
 0x7b9   :  { %v8430_v27 = vsub.f32 %v8318_v19, %v4600_v52  ;;  %v4662_v61 = vsel %vm25_vm0, %v4626_v15, 0.0  ;;  %v155_v19 = vmul.f32 0.020408163, %v6410_v32  ;;  %v177_v62 = vadd.f32 0.001, %v163_v31  ;;  %v195_v32 = vld [vmem:[%s10845_s1 + $0x8] sm:$0xff] }
 0x7ba   :  { %4666 = vadd.xlane.f32.xlu0 %v4665_v59  ;;  %4663 = vadd.xlane.f32.xlu1 %v4662_v61  ;;  %5594 = vrsqrt.f32 %v168_v58  ;;  %v156_v59 = vmul.f32 0.020408163, %v6412_v3  ;;  %v165_v15 = vmul.f32 0.020408163, %v6430_v30  ;;  %v194_v3 = vld [vmem:[%s10845_s1] sm:$0xff]  ;;  %v196_v56 = vld [vmem:[%s10845_s1 + $0x10] sm:$0xff] }
 0x7bb   :  { %v4628_v55 = vmul.f32 %v8430_v27, %v8430_v27  ;;  %v169_v52 = vadd.f32 0.001, %v155_v19  ;;  %5596 = vrsqrt.f32 %v175_v17  ;;  %v158_v30 = vmul.f32 0.020408163, %v6416_v53 }
 0x7bc   :  { %v170_v1 = vadd.f32 0.001, %v156_v59  ;;  %v179_v25 = vadd.f32 0.001, %v165_v15  ;;  %v159_v58 = vmul.f32 0.020408163, %v6418_v6 }
 0x7bd   :  { %v4668_v48 = vsel %vm25_vm0, %v4628_v55, 0.0  ;;  %5598 = vrsqrt.f32 %v169_v52  ;;  %v171_v55 = vadd.f32 0.001, %v157_v14  ;;  %v172_v19 = vadd.f32 0.001, %v158_v30  ;;  %v197_v52 = vld [vmem:[%s10845_s1 + $0x18] sm:$0xff] }
 0x7be   :  { %4669 = vadd.xlane.f32.xlu1 %v4668_v48  ;;  %5600 = vrsqrt.f32 %v177_v62  ;;  %v203_v48 = vld [vmem:[%s10845_s1 + $0x48] sm:$0xff]  ;;  %v205_v62 = vld [vmem:[%s10845_s1 + $0x58] sm:$0xff]  ;;  %v173_v15 = vadd.f32 0.001, %v159_v58  ;;  %v160_v14 = vmul.f32 0.020408163, %v6420_v7 }
 0x7bf   :  { %5602 = vrsqrt.f32 %v170_v1  ;;  %v200_v58 = vld [vmem:[%s10845_s1 + $0x30] sm:$0xff] }
 0x7c0   :  { %5604 = vrsqrt.f32 %v179_v25 }
 0x7c1   :  { %v5591_v61 = vpop.eup %5590  ;;  %5606 = vrsqrt.f32 %v171_v55  ;;  %v162_v55 = vmul.f32 0.020408163, %v6424_v36 }
 0x7c2   :  { %v5593_v22 = vpop.eup %5592  ;;  %v225_v2 = vmul.f32 %v5591_v61, %v195_v32  ;;  %5608 = vrsqrt.f32 %v172_v19  ;;  %v198_v61 = vld [vmem:[%s10845_s1 + $0x20] sm:$0xff] }
 0x7c3   :  { %v224_v9 = vmul.f32 %v5593_v22, %v194_v3  ;;  %v207_v22 = vld [vmem:[%s10845_s1 + $0x68] sm:$0xff]  ;;  %5610 = vrsqrt.f32 %v173_v15  ;;  %v174_v3 = vadd.f32 0.001, %v160_v14  ;;  %v202_v14 = vld [vmem:[%s10845_s1 + $0x40] sm:$0xff] }
 0x7c4   :  { %v5595_v16 = vpop.eup %5594 }
 0x7c5   :  { %v5597_v39 = vpop.eup %5596  ;;  %v226_v53 = vmul.f32 %v5595_v16, %v196_v56  ;;  %v199_v16 = vld [vmem:[%s10845_s1 + $0x28] sm:$0xff]  ;;  %5612 = vrsqrt.f32 %v174_v3  ;;  %v164_v56 = vmul.f32 0.020408163, %v6428_v23  ;;  %v4960_v23 = vld [vmem:[%s10845_s1 + $0x558] sm:$0xff]  ;;  %v566_v3 = vmul.f32 0.020408163, %v6442_v54 }
 0x7c6   :  { %v233_v31 = vmul.f32 %v5597_v39, %v203_v48  ;;  %v4958_v48 = vld [vmem:[%s10845_s1 + $0x548] sm:$0xff]  ;;  %v4968_v54 = vld [vmem:[%s10845_s1 + $0x598] sm:$0xff] }
 0x7c7   :  { %v5599_v17 = vpop.eup %5598  ;;  %v178_v19 = vadd.f32 0.001, %v164_v56  ;;  %v4957_v56 = vld [vmem:[%s10845_s1 + $0x540] sm:$0xff] }
 0x7c8   :  { %v5601_v59 = vpop.eup %5600  ;;  %v227_v6 = vmul.f32 %v5599_v17, %v197_v52  ;;  %v561_v52 = vmul.f32 0.020408163, %v6432_v40  ;;  %v4964_v40 = vld [vmem:[%s10845_s1 + $0x578] sm:$0xff] }
 0x7c9   :  { %v5603_v1 = vpop.eup %5602  ;;  %v235_v25 = vmul.f32 %v5601_v59, %v205_v62  ;;  %v4962_v62 = vld [vmem:[%s10845_s1 + $0x568] sm:$0xff] }
 0x7ca   :  { %v5605_v32 = vpop.eup %5604  ;;  %v228_v7 = vmul.f32 %v5603_v1, %v198_v61  ;;  %v564_v1 = vmul.f32 0.020408163, %v6438_v46  ;;  %v4966_v46 = vld [vmem:[%s10845_s1 + $0x588] sm:$0xff] }
 0x7cb   :  { %v5607_v30 = vpop.eup %5606 }
 0x7cc   :  { %v229_v39 = vmul.f32 %v5607_v30, %v199_v16  ;;  %v5609_v36 = vpop.eup %5608  ;;  %v206_v30 = vld [vmem:[%s10845_s1 + $0x60] sm:$0xff]  ;;  %v568_v16 = vmul.f32 0.020408163, %v6446_v57 }
 0x7cd   :  { %v5611_v17 = vpop.eup %5610 }
 0x7cf   :  { %245 = vperm.xlu1 %5589, %v225_v2   ;;  %v237_v2 = vmul.f32 %v5605_v32, %v207_v22  ;;  %v5613_v15 = vpop.eup %5612  ;;  %v204_v32 = vld [vmem:[%s10845_s1 + $0x50] sm:$0xff]  ;;  %v578_v22 = vadd.f32 0.001, %v564_v1 }
 0x7d0   :  { %240 = vperm.xlu0 %5588, %v224_v9   ;;  %v176_v9 = vadd.f32 0.001, %v162_v55 }
 0x7d2   :  { %5614 = vrsqrt.f32 %v176_v9 }
 0x7d3   :  { %250 = vperm.xlu1 %5589, %v226_v53   ;;  %v230_v53 = vmul.f32 %v5609_v36, %v200_v58  ;;  %5616 = vrsqrt.f32 %v178_v19  ;;  %v4970_v36 = vld [vmem:[%s10845_s1 + $0x5a8] sm:$0xff]  ;;  %v4985_v58 = vld [vmem:[%s10845_s1 + $0x70] sm:$0xff] }
 0x7d4   :  { %285 = vperm.xlu0 %5588, %v233_v31   ;;  %v201_v31 = vld [vmem:[%s10845_s1 + $0x38] sm:$0xff]  ;;  %v4959_v19 = vld [vmem:[%s10845_s1 + $0x550] sm:$0xff] }
 0x7d5   :  { %v231_v59 = vmul.f32 %v5611_v17, %v201_v31  ;;  %v4988_v31 = vld [vmem:[%s10845_s1 + $0x88] sm:$0xff] }
 0x7d7   :  { %255 = vperm.xlu1 %5589, %v227_v6   ;;  %v575_v6 = vadd.f32 0.001, %v561_v52  ;;  %v562_v52 = vmul.f32 0.020408163, %v6434_v38  ;;  %v4963_v38 = vld [vmem:[%s10845_s1 + $0x570] sm:$0xff] }
 0x7d8   :  { %295 = vperm.xlu0 %5588, %v235_v25   ;;  %v232_v25 = vmul.f32 %v5613_v15, %v202_v14  ;;  %v574_v15 = vmul.f32 0.020408163, %v6458_v29  ;;  %v4992_v29 = vld [vmem:[%s10845_s1 + $0xa8] sm:$0xff] }
 0x7d9   :  { %5618 = vrsqrt.f32 %v575_v6  ;;  %v4990_v6 = vld [vmem:[%s10845_s1 + $0x98] sm:$0xff]  ;;  %v576_v1 = vadd.f32 0.001, %v562_v52 }
 0x7da   :  { %5620 = vrsqrt.f32 %v578_v22 }
 0x7db   :  { %260 = vperm.xlu1 %5589, %v228_v7  }
 0x7dc   :  { %305 = vperm.xlu0 %5588, %v237_v2   ;;  %v5615_v61 = vpop.eup %5614  ;;  %v580_v2 = vadd.f32 0.001, %v566_v3  ;;  %v565_v3 = vmul.f32 0.020408163, %v6440_v44  ;;  %v4967_v44 = vld [vmem:[%s10845_s1 + $0x590] sm:$0xff] }
 0x7dd   :  { %v234_v55 = vmul.f32 %v5615_v61, %v204_v32  ;;  %v5617_v7 = vpop.eup %5616 }
 0x7de   :  { %v236_v9 = vmul.f32 %v5617_v7, %v206_v30  ;;  %5622 = vrsqrt.f32 %v580_v2  ;;  %v4994_v7 = vld [vmem:[%s10845_s1 + $0xb8] sm:$0xff]  ;;  %v579_v30 = vadd.f32 0.001, %v565_v3  ;;  %v567_v2 = vmul.f32 0.020408163, %v6444_v12  ;;  %v4969_v12 = vld [vmem:[%s10845_s1 + $0x5a0] sm:$0xff] }
 0x7df   :  { %265 = vperm.xlu1 %5589, %v229_v39   ;;  %v582_v39 = vadd.f32 0.001, %v568_v16  ;;  %v975_v3 = vmul.f32 0.020408163, %v6646_v21  ;;  %v5008_v21 = vld [vmem:[%s10845_s1 + $0x5f8] sm:$0xff] }
 0x7e0   :  { %329 = vperm.xlu0 %5588, %v4958_v48   ;;  %v570_v48 = vmul.f32 0.020408163, %v6450_v45 }
 0x7e1   :  { %5624 = vrsqrt.f32 %v582_v39  ;;  %v569_v39 = vmul.f32 0.020408163, %v6448_v49  ;;  %v571_v49 = vmul.f32 0.020408163, %v6452_v41 }
 0x7e3   :  { %270 = vperm.xlu1 %5589, %v230_v53   ;;  %v5619_v57 = vpop.eup %5618  ;;  %v584_v53 = vadd.f32 0.001, %v570_v48  ;;  %v585_v52 = vadd.f32 0.001, %v571_v49 }
 0x7e4   :  { %339 = vperm.xlu0 %5588, %v4960_v23   ;;  %v572_v23 = vmul.f32 0.020408163, %v6454_v37  ;;  %v634_v45 = vmul.f32 %v5619_v57, %v4985_v58  ;;  %v5621_v17 = vpop.eup %5620  ;;  %v4986_v57 = vld [vmem:[%s10845_s1 + $0x78] sm:$0xff] }
 0x7e5   :  { %5626 = vrsqrt.f32 %v584_v53  ;;  %v637_v14 = vmul.f32 %v5621_v17, %v4988_v31  ;;  %v583_v53 = vadd.f32 0.001, %v569_v39  ;;  %v4987_v31 = vld [vmem:[%s10845_s1 + $0x80] sm:$0xff]  ;;  %v4999_v39 = vld [vmem:[%s10845_s1 + $0x5b0] sm:$0xff] }
 0x7e7   :  { %275 = vperm.xlu1 %5589, %v231_v59   ;;  %v4961_v59 = vld [vmem:[%s10845_s1 + $0x560] sm:$0xff] }
 0x7e8   :  { %349 = vperm.xlu0 %5588, %v4962_v62   ;;  %v586_v62 = vadd.f32 0.001, %v572_v23  ;;  %v5623_v37 = vpop.eup %5622 }
 0x7e9   :  { %v639_v61 = vmul.f32 %v5623_v37, %v4990_v6 }
 0x7ea   :  { %5628 = vrsqrt.f32 %v586_v62 }
 0x7eb   :  { %280 = vperm.xlu1 %5589, %v232_v25   ;;  %v563_v25 = vmul.f32 0.020408163, %v6436_v8  ;;  %v5625_v32 = vpop.eup %5624  ;;  %5630 = vrsqrt.f32 %v576_v1  ;;  %v4965_v8 = vld [vmem:[%s10845_s1 + $0x580] sm:$0xff] }
 0x7ec   :  { %359 = vperm.xlu0 %5588, %v4964_v40   ;;  %v588_v40 = vadd.f32 0.001, %v574_v15  ;;  %v5000_v15 = vld [vmem:[%s10845_s1 + $0x5b8] sm:$0xff] }
 0x7ed   :  { %v577_v22 = vadd.f32 0.001, %v563_v25  ;;  %v4991_v25 = vld [vmem:[%s10845_s1 + $0xa0] sm:$0xff] }
 0x7ee   :  { %5632 = vrsqrt.f32 %v588_v40 }
 0x7ef   :  { %290 = vperm.xlu1 %5589, %v234_v55   ;;  %v641_v55 = vmul.f32 %v5625_v32, %v4992_v29  ;;  %5634 = vrsqrt.f32 %v577_v22  ;;  %v4993_v29 = vld [vmem:[%s10845_s1 + $0xb0] sm:$0xff] }
 0x7f0   :  { %369 = vperm.xlu0 %5588, %v4966_v46   ;;  %v5627_v46 = vpop.eup %5626  ;;  %5636 = vrsqrt.f32 %v579_v30  ;;  %v977_v30 = vmul.f32 0.020408163, %v6650_v63  ;;  %v5010_v63 = vld [vmem:[%s10845_s1 + $0x608] sm:$0xff] }
 0x7f1   :  { %v643_v16 = vmul.f32 %v5627_v46, %v4994_v7  ;;  %v4995_v46 = vld [vmem:[%s10845_s1 + $0xc0] sm:$0xff]  ;;  %v989_v7 = vadd.f32 0.001, %v975_v3  ;;  %v5007_v3 = vld [vmem:[%s10845_s1 + $0x5f0] sm:$0xff] }
 0x7f3   :  { %300 = vperm.xlu1 %5589, %v236_v9  }
 0x7f4   :  { %379 = vperm.xlu0 %5588, %v4968_v54   ;;  %v5629_v9 = vpop.eup %5628  ;;  %v4996_v54 = vld [vmem:[%s10845_s1 + $0xc8] sm:$0xff] }
 0x7f5   :  { %v5631_v48 = vpop.eup %5630 }
 0x7f6   :  { %v635_v23 = vmul.f32 %v5631_v48, %v4986_v57  ;;  %v981_v48 = vmul.f32 0.020408163, %v6658_v18  ;;  %v983_v18 = vmul.f32 0.020408163, %v6662_v28 }
 0x7f7   :  { %324 = vperm.xlu1 %5589, %v4957_v56   ;;  %v581_v56 = vadd.f32 0.001, %v567_v2 }
 0x7f8   :  { %389 = vperm.xlu0 %5588, %v4970_v36   ;;  %v645_v36 = vmul.f32 %v5629_v9, %v4996_v54  ;;  %v5633_v58 = vpop.eup %5632  ;;  %v991_v9 = vadd.f32 0.001, %v977_v30  ;;  %v979_v54 = vmul.f32 0.020408163, %v6654_v42  ;;  %v997_v28 = vadd.f32 0.001, %v983_v18 }
 0x7f9   :  { %5638 = vrsqrt.f32 %v581_v56 }
 0x7fa   :  { %5640 = vrsqrt.f32 %v583_v53  ;;  %v995_v53 = vadd.f32 0.001, %v981_v48 }
 0x7fb   :  { %334 = vperm.xlu1 %5589, %v4959_v19   ;;  %v4998_v19 = vld [vmem:[%s10845_s1 + $0xd8] sm:$0xff]  ;;  %5642 = vrsqrt.f32 %v585_v52  ;;  %v973_v52 = vmul.f32 0.020408163, %v6642_v51  ;;  %v5046_v51 = vld [vmem:[%s10845_s1 + $0x108] sm:$0xff] }
 0x7fc   :  { %650 = vperm.xlu0 %5588, %v634_v45   ;;  %v5635_v45 = vpop.eup %5634  ;;  %v647_v17 = vmul.f32 %v5633_v58, %v4998_v19  ;;  %v5041_v58 = vld [vmem:[%s10845_s1 + $0xe0] sm:$0xff] }
 0x7fd   :  { %v636_v62 = vmul.f32 %v5635_v45, %v4987_v31  ;;  %v5637_v41 = vpop.eup %5636  ;;  %v5001_v19 = vld [vmem:[%s10845_s1 + $0x5c0] sm:$0xff]  ;;  %v5044_v31 = vld [vmem:[%s10845_s1 + $0xf8] sm:$0xff] }
 0x7ff   :  { %344 = vperm.xlu1 %5589, %v4961_v59   ;;  %v573_v59 = vmul.f32 0.020408163, %v6456_v33  ;;  %v5002_v33 = vld [vmem:[%s10845_s1 + $0x5c8] sm:$0xff] }
 0x800   :  { %665 = vperm.xlu0 %5588, %v637_v14   ;;  %v4989_v14 = vld [vmem:[%s10845_s1 + $0x90] sm:$0xff] }
 0x801   :  { %v587_v37 = vadd.f32 0.001, %v573_v59  ;;  %v638_v6 = vmul.f32 %v5637_v41, %v4989_v14  ;;  %v5003_v59 = vld [vmem:[%s10845_s1 + $0x5d0] sm:$0xff] }
 0x803   :  { %354 = vperm.xlu1 %5589, %v4963_v38   ;;  %v5639_v1 = vpop.eup %5638  ;;  %5644 = vrsqrt.f32 %v587_v37  ;;  %v972_v38 = vmul.f32 0.020408163, %v6644_v50  ;;  %v5006_v50 = vld [vmem:[%s10845_s1 + $0x5e8] sm:$0xff] }
 0x804   :  { %675 = vperm.xlu0 %5588, %v639_v61   ;;  %v640_v40 = vmul.f32 %v5639_v1, %v4991_v25  ;;  %v5004_v61 = vld [vmem:[%s10845_s1 + $0x5d8] sm:$0xff]  ;;  %v5641_v32 = vpop.eup %5640  ;;  %v5005_v1 = vld [vmem:[%s10845_s1 + $0x5e0] sm:$0xff] }
 0x805   :  { %v986_v22 = vadd.f32 0.001, %v972_v38 }
 0x807   :  { %364 = vperm.xlu1 %5589, %v4965_v8   ;;  %v642_v8 = vmul.f32 %v5641_v32, %v4993_v29  ;;  %5646 = vrsqrt.f32 %v986_v22  ;;  %v5048_v32 = vld [vmem:[%s10845_s1 + $0x118] sm:$0xff]  ;;  %v11274_v29 = vld [vmem:[#allocation44_spill] sm:$0xff] }
 0x808   :  { %685 = vperm.xlu0 %5588, %v641_v55   ;;  %v5643_v55 = vpop.eup %5642  ;;  %5648 = vrsqrt.f32 %v989_v7  ;;  %v976_v22 = vmul.f32 0.020408163, %v11274_v29  ;;  %v5050_v7 = vld [vmem:[%s10845_s1 + $0x128] sm:$0xff] }
 0x809   :  { %v644_v2 = vmul.f32 %v5643_v55, %v4995_v46  ;;  %5650 = vrsqrt.f32 %v991_v9 }
 0x80a   :  { %v990_v30 = vadd.f32 0.001, %v976_v22 }
 0x80b   :  { %374 = vperm.xlu1 %5589, %v4967_v44  }
 0x80c   :  { %695 = vperm.xlu0 %5588, %v643_v16   ;;  %v4997_v16 = vld [vmem:[%s10845_s1 + $0xd0] sm:$0xff] }
 0x80d   :  { %v5645_v44 = vpop.eup %5644 }
 0x80e   :  { %v646_v56 = vmul.f32 %v5645_v44, %v4997_v16  ;;  %v5009_v44 = vld [vmem:[%s10845_s1 + $0x600] sm:$0xff] }
 0x80f   :  { %384 = vperm.xlu1 %5589, %v4969_v12   ;;  %v993_v12 = vadd.f32 0.001, %v979_v54 }
 0x810   :  { %705 = vperm.xlu0 %5588, %v645_v36   ;;  %v5012_v36 = vld [vmem:[%s10845_s1 + $0x618] sm:$0xff] }
 0x811   :  { %v5647_v42 = vpop.eup %5646  ;;  %5652 = vrsqrt.f32 %v993_v12  ;;  %v11276_v12 = vld [vmem:[#allocation46_spill] sm:$0xff] }
 0x812   :  { %v1045_v49 = vmul.f32 %v5647_v42, %v5041_v58  ;;  %5654 = vrsqrt.f32 %v995_v53  ;;  %v980_v48 = vmul.f32 0.020408163, %v11276_v12 }
 0x813   :  { %655 = vperm.xlu1 %5589, %v635_v23   ;;  %v5649_v23 = vpop.eup %5648  ;;  %5656 = vrsqrt.f32 %v997_v28 }
 0x814   :  { %715 = vperm.xlu0 %5588, %v647_v17   ;;  %v5651_v41 = vpop.eup %5650 }
 0x815   :  { %v1050_v25 = vmul.f32 %v5651_v41, %v5046_v51  ;;  %v5043_v41 = vld [vmem:[%s10845_s1 + $0xf0] sm:$0xff] }
 0x817   :  { %660 = vperm.xlu1 %5589, %v636_v62   ;;  %v985_v62 = vmul.f32 0.020408163, %v6666_v26 }
 0x818   :  { %739 = vperm.xlu0 %5588, %v5000_v15   ;;  %v1048_v15 = vmul.f32 %v5649_v23, %v5044_v31  ;;  %v994_v23 = vadd.f32 0.001, %v980_v48  ;;  %v11277_v31 = vld [vmem:[#allocation47_spill] sm:$0xff] }
 0x819   :  { %v999_v26 = vadd.f32 0.001, %v985_v62 }
 0x81b   :  { %670 = vperm.xlu1 %5589, %v638_v6   ;;  %v987_v6 = vadd.f32 0.001, %v973_v52  ;;  %v5653_v38 = vpop.eup %5652  ;;  %v982_v52 = vmul.f32 0.020408163, %v11277_v31 }
 0x81c   :  { %749 = vperm.xlu0 %5588, %v5002_v33   ;;  %v974_v33 = vmul.f32 0.020408163, %v6648_v35 }
 0x81d   :  { %5658 = vrsqrt.f32 %v987_v6  ;;  %v996_v6 = vadd.f32 0.001, %v982_v52 }
 0x81e   :  { %v988_v35 = vadd.f32 0.001, %v974_v33  ;;  %5660 = vrsqrt.f32 %v999_v26  ;;  %v11278_v33 = vld [vmem:[#allocation48_spill] sm:$0xff] }
 0x81f   :  { %680 = vperm.xlu1 %5589, %v640_v40  }
 0x820   :  { %759 = vperm.xlu0 %5588, %v5004_v61   ;;  %5662 = vrsqrt.f32 %v988_v35 }
 0x821   :  { %5664 = vrsqrt.f32 %v990_v30 }
 0x823   :  { %690 = vperm.xlu1 %5589, %v642_v8   ;;  %v1052_v8 = vmul.f32 %v5653_v38, %v5048_v32  ;;  %v5045_v32 = vld [vmem:[%s10845_s1 + $0x100] sm:$0xff] }
 0x824   :  { %769 = vperm.xlu0 %5588, %v5006_v50   ;;  %v5655_v50 = vpop.eup %5654 }
 0x825   :  { %v1054_v16 = vmul.f32 %v5655_v50, %v5050_v7  ;;  %v5657_v9 = vpop.eup %5656  ;;  %v5047_v7 = vld [vmem:[%s10845_s1 + $0x110] sm:$0xff] }
 0x827   :  { %700 = vperm.xlu1 %5589, %v644_v2   ;;  %v11275_v2 = vld [vmem:[#allocation45_spill] sm:$0xff]  ;;  %v5659_v42 = vpop.eup %5658 }
 0x828   :  { %779 = vperm.xlu0 %5588, %v5008_v21   ;;  %v978_v21 = vmul.f32 0.020408163, %v11275_v2  ;;  %v5661_v53 = vpop.eup %5660 }
 0x82a   :  { %v5663_v62 = vpop.eup %5662 }
 0x82b   :  { %710 = vperm.xlu1 %5589, %v646_v56   ;;  %v1047_v26 = vmul.f32 %v5663_v62, %v5043_v41  ;;  %v5665_v38 = vpop.eup %5664  ;;  %v11281_v62 = vld [vmem:[#allocation67_spill] sm:$0xff] }
 0x82c   :  { %789 = vperm.xlu0 %5588, %v5010_v63   ;;  %v5052_v63 = vld [vmem:[%s10845_s1 + $0x138] sm:$0xff] }
 0x82d   :  { %v1056_v58 = vmul.f32 %v5657_v9, %v5052_v63  ;;  %v5060_v9 = vld [vmem:[%s10845_s1 + $0x648] sm:$0xff] }
 0x82f   :  { %734 = vperm.xlu1 %5589, %v4999_v39   ;;  %v8617_v57 = vpop.xlane.xlu0 %4633  ;;  %v8626_v45 = vpop.xlane.xlu1 %4630  ;;  %v992_v39 = vadd.f32 0.001, %v978_v21  ;;  %v11279_v21 = vld [vmem:[#allocation64_spill] sm:$0xff] }
 0x830   :  { %799 = vperm.xlu0 %5588, %v5012_v36   ;;  %v5011_v36 = vld [vmem:[%s10845_s1 + $0x610] sm:$0xff] }
 0x831   :  { %5666 = vrsqrt.f32 %v992_v39  ;;  %v5049_v39 = vld [vmem:[%s10845_s1 + $0x120] sm:$0xff] }
 0x832   :  { %5668 = vrsqrt.f32 %v994_v23  ;;  %v5051_v23 = vld [vmem:[%s10845_s1 + $0x130] sm:$0xff] }
 0x833   :  { %744 = vperm.xlu1 %5589, %v5001_v19   ;;  %v8628_v17 = vpop.xlane.xlu0 %4636  ;;  %v5042_v19 = vld [vmem:[%s10845_s1 + $0xe8] sm:$0xff]  ;;  %5670 = vrsqrt.f32 %v996_v6 }
 0x834   :  { %1061 = vperm.xlu0 %5588, %v1045_v49   ;;  %v5054_v49 = vld [vmem:[%s10845_s1 + $0x148] sm:$0xff] }
 0x835   :  { %v5064_v6 = vld [vmem:[%s10845_s1 + $0x668] sm:$0xff] }
 0x837   :  { %v8638_v14 = vpop.xlane.xlu1 %4639  ;;  %754 = vperm.xlu1 %5589, %v5003_v59   ;;  %v8640_v37 = vpop.xlane.xlu0 %4642  ;;  %v1046_v59 = vmul.f32 %v5659_v42, %v5042_v19  ;;  %v11280_v42 = vld [vmem:[#allocation65_spill] sm:$0xff] }
 0x838   :  { %1076 = vperm.xlu0 %5588, %v1048_v15   ;;  %v1058_v15 = vmul.f32 %v5661_v53, %v5054_v49  ;;  %v5062_v53 = vld [vmem:[%s10845_s1 + $0x658] sm:$0xff] }
 0x83b   :  { %v8649_v40 = vpop.xlane.xlu1 %4645  ;;  %764 = vperm.xlu1 %5589, %v5005_v1   ;;  %v8651_v61 = vpop.xlane.xlu0 %4648  ;;  %v984_v1 = vmul.f32 0.020408163, %v11278_v33 }
 0x83c   :  { %1086 = vperm.xlu0 %5588, %v1050_v25   ;;  %v5056_v25 = vld [vmem:[%s10845_s1 + $0x628] sm:$0xff]  ;;  %v5667_v50 = vpop.eup %5666 }
 0x83d   :  { %v998_v22 = vadd.f32 0.001, %v984_v1  ;;  %v5669_v63 = vpop.eup %5668  ;;  %v11282_v1 = vld [vmem:[#allocation4_spill] sm:$0xff] }
 0x83e   :  { %v1053_v19 = vmul.f32 %v5669_v63, %v5049_v39  ;;  %v5671_v49 = vpop.eup %5670  ;;  %v5055_v39 = vld [vmem:[%s10845_s1 + $0x620] sm:$0xff] }
 0x83f   :  { %v8660_v55 = vpop.xlane.xlu1 %4651  ;;  %774 = vperm.xlu1 %5589, %v5007_v3   ;;  %v8662_v46 = vpop.xlane.xlu0 %4654  ;;  %v1049_v3 = vmul.f32 %v5665_v38, %v5045_v32  ;;  %5672 = vrsqrt.f32 %v998_v22  ;;  %v1055_v41 = vmul.f32 %v5671_v49, %v5051_v23 }
 0x840   :  { %1096 = vperm.xlu0 %5588, %v1052_v8   ;;  %v5058_v8 = vld [vmem:[%s10845_s1 + $0x638] sm:$0xff] }
 0x843   :  { %v8671_v54 = vpop.xlane.xlu1 %4657  ;;  %784 = vperm.xlu1 %5589, %v5009_v44   ;;  %v8673_v56 = vpop.xlane.xlu0 %4660  ;;  %v1383_v44 = vmul.f32 0.020408163, %v11279_v21  ;;  %v5066_v21 = vld [vmem:[%s10845_s1 + $0x678] sm:$0xff] }
 0x844   :  { %1106 = vperm.xlu0 %5588, %v1054_v16   ;;  %v1051_v16 = vmul.f32 %v5667_v50, %v5047_v7 }
 0x847   :  { %v8685_v18 = vpop.xlane.xlu1 %4663  ;;  %794 = vperm.xlu1 %5589, %v5011_v36   ;;  %v8691_v28 = vpop.xlane.xlu0 %4666  ;;  %v1397_v36 = vadd.f32 0.001, %v1383_v44  ;;  %v11284_v44 = vld [vmem:[#allocation5_spill] sm:$0xff] }
 0x848   :  { %1116 = vperm.xlu0 %5588, %v1056_v58   ;;  %v1386_v58 = vmul.f32 0.020408163, %v11280_v42  ;;  %v11285_v42 = vld [vmem:[#allocation71_spill] sm:$0xff] }
 0x849   :  { %5674 = vrsqrt.f32 %v1397_v36  ;;  %v5673_v33 = vpop.eup %5672 }
 0x84b   :  { %1066 = vperm.xlu1 %5589, %v1046_v59   ;;  %v8696_v51 = vpop.xlane.xlu1 %4669  ;;  %v1400_v59 = vadd.f32 0.001, %v1386_v58  ;;  %v1392_v58 = vmul.f32 0.020408163, %v11285_v42 }
 0x84c   :  { %1126 = vperm.xlu0 %5588, %v1058_v15   ;;  %v1388_v15 = vmul.f32 0.020408163, %v11281_v62  ;;  %v5097_v62 = vld [vmem:[%s10845_s1 + $0x150] sm:$0xff] }
 0x84d   :  { %5676 = vrsqrt.f32 %v1400_v59 }
 0x84f   :  { %1071 = vperm.xlu1 %5589, %v1047_v26   ;;  %v246_v35 = vpop.permute.xlu1 %245  ;;  %v8705_v29 = vpop.permute.xlu0 %240 }
 0x850   :  { %1150 = vperm.xlu0 %5588, %v5056_v25   ;;  %v309_v26 = vmul.f32 %v246_v35, %v11282_v1  ;;  %v5053_v25 = vld [vmem:[%s10845_s1 + $0x140] sm:$0xff] }
 0x851   :  { %v1057_v7 = vmul.f32 %v5673_v33, %v5053_v25  ;;  %v11287_v33 = vld [vmem:[#allocation73_spill] sm:$0xff] }
 0x852   :  { %v1394_v1 = vmul.f32 0.020408163, %v11287_v33 }
 0x853   :  { %1081 = vperm.xlu1 %5589, %v1049_v3   ;;  %v8713_v30 = vpop.permute.xlu1 %250  ;;  %v8715_v2 = vpop.permute.xlu0 %285  ;;  %v1402_v3 = vadd.f32 0.001, %v1388_v15 }
 0x854   :  { %1160 = vperm.xlu0 %5588, %v5058_v8   ;;  %v11283_v8 = vld [vmem:[#allocation69_spill] sm:$0xff]  ;;  %v5675_v49 = vpop.eup %5674 }
 0x855   :  { %v1390_v50 = vmul.f32 0.020408163, %v11283_v8  ;;  %5678 = vrsqrt.f32 %v1402_v3  ;;  %v5100_v8 = vld [vmem:[%s10845_s1 + $0x168] sm:$0xff] }
 0x857   :  { %1091 = vperm.xlu1 %5589, %v1051_v16   ;;  %v256_v12 = vpop.permute.xlu1 %255  ;;  %v8724_v48 = vpop.permute.xlu0 %295  ;;  %v1404_v36 = vadd.f32 0.001, %v1390_v50  ;;  %v11289_v50 = vld [vmem:[#allocation63_spill] sm:$0xff] }
 0x858   :  { %1170 = vperm.xlu0 %5588, %v5060_v9   ;;  %v311_v35 = vmul.f32 %v256_v12, %v11284_v44  ;;  %v5068_v12 = vld [vmem:[%s10845_s1 + $0x688] sm:$0xff]  ;;  %v5059_v44 = vld [vmem:[%s10845_s1 + $0x640] sm:$0xff] }
 0x859   :  { %5680 = vrsqrt.f32 %v1404_v36 }
 0x85b   :  { %1101 = vperm.xlu1 %5589, %v1053_v19   ;;  %v8733_v31 = vpop.permute.xlu1 %260  ;;  %v8735_v52 = vpop.permute.xlu0 %305  ;;  %v11286_v19 = vld [vmem:[#allocation6_spill] sm:$0xff] }
 0x85c   :  { %1180 = vperm.xlu0 %5588, %v5062_v53  }
 0x85f   :  { %1111 = vperm.xlu1 %5589, %v1055_v41   ;;  %v266_v38 = vpop.permute.xlu1 %265  ;;  %v330_v32 = vpop.permute.xlu0 %329  ;;  %v5057_v41 = vld [vmem:[%s10845_s1 + $0x630] sm:$0xff] }
 0x860   :  { %v393_v22 = vadd.f32 %v330_v32, %v309_v26  ;;  %1190 = vperm.xlu0 %5588, %v5064_v6   ;;  %v313_v53 = vmul.f32 %v266_v38, %v11286_v19  ;;  %v1406_v6 = vadd.f32 0.001, %v1392_v58  ;;  %v11288_v26 = vld [vmem:[#allocation8_spill] sm:$0xff]  ;;  %v1456_v38 = vmul.f32 %v5675_v49, %v5097_v62  ;;  %v5677_v32 = vpop.eup %5676 }
 0x861   :  { %v1459_v42 = vmul.f32 %v5677_v32, %v5100_v8  ;;  %v5679_v58 = vpop.eup %5678  ;;  %v5104_v32 = vld [vmem:[%s10845_s1 + $0x188] sm:$0xff] }
 0x862   :  { %407 = vst.msk [vmem:[%s10846_s2 + $0x8] sm:$0xff] %vm25_vm0, %v393_v22  ;;  %5682 = vrsqrt.f32 %v1406_v6 }
 0x863   :  { %1121 = vperm.xlu1 %5589, %v1057_v7   ;;  %v8754_v16 = vpop.permute.xlu1 %270  ;;  %v340_v9 = vpop.permute.xlu0 %339  ;;  %v1384_v7 = vmul.f32 0.020408163, %v11289_v50  ;;  %v5063_v50 = vld [vmem:[%s10845_s1 + $0x660] sm:$0xff] }
 0x864   :  { %v395_v63 = vadd.f32 %v340_v9, %v311_v35  ;;  %1200 = vperm.xlu0 %5588, %v5066_v21   ;;  %v1408_v35 = vadd.f32 0.001, %v1394_v1  ;;  %v11290_v9 = vld [vmem:[#allocation75_spill] sm:$0xff]  ;;  %v5681_v1 = vpop.eup %5680 }
 0x866   :  { %409 = vst.msk [vmem:[%s10846_s2 + $0x18] sm:$0xff] %vm25_vm0, %v395_v63  ;;  %v1396_v63 = vmul.f32 0.020408163, %v11290_v9  ;;  %5684 = vrsqrt.f32 %v1408_v35  ;;  %v1463_v9 = vmul.f32 %v5681_v1, %v5104_v32 }
 0x867   :  { %1145 = vperm.xlu1 %5589, %v5055_v39   ;;  %v276_v23 = vpop.permute.xlu1 %275  ;;  %v350_v59 = vpop.permute.xlu0 %349  ;;  %v11291_v39 = vld [vmem:[#allocation10_spill] sm:$0xff] }
 0x868   :  { %v397_v15 = vadd.f32 %v350_v59, %v313_v53  ;;  %1210 = vperm.xlu0 %5588, %v5068_v12   ;;  %v315_v25 = vmul.f32 %v276_v23, %v11288_v26  ;;  %v317_v36 = vmul.f32 %v8715_v2, %v11291_v39  ;;  %v11292_v12 = vld [vmem:[#allocation66_spill] sm:$0xff]  ;;  %v5102_v23 = vld [vmem:[%s10845_s1 + $0x178] sm:$0xff]  ;;  %v1398_v59 = vadd.f32 0.001, %v1384_v7  ;;  %v5061_v2 = vld [vmem:[%s10845_s1 + $0x650] sm:$0xff] }
 0x869   :  { %v1385_v19 = vmul.f32 0.020408163, %v11292_v12  ;;  %v1461_v33 = vmul.f32 %v5679_v58, %v5102_v23  ;;  %v11295_v7 = vld [vmem:[#allocation2_spill] sm:$0xff]  ;;  %v11298_v23 = vld [vmem:[#allocation3_spill] sm:$0xff] }
 0x86a   :  { %411 = vst.msk [vmem:[%s10846_s2 + $0x28] sm:$0xff] %vm25_vm0, %v397_v15  ;;  %v1410_v15 = vadd.f32 0.001, %v1396_v63  ;;  %5686 = vrsqrt.f32 %v1398_v59  ;;  %v310_v59 = vmul.f32 %v8713_v30, %v11298_v23  ;;  %v5108_v30 = vld [vmem:[%s10845_s1 + $0x1a8] sm:$0xff] }
 0x86b   :  { %1155 = vperm.xlu1 %5589, %v5057_v41   ;;  %v8780_v22 = vpop.permute.xlu1 %280  ;;  %v360_v3 = vpop.permute.xlu0 %359  ;;  %v11293_v41 = vld [vmem:[#allocation12_spill] sm:$0xff]  ;;  %v1399_v26 = vadd.f32 0.001, %v1385_v19 }
 0x86c   :  { %v399_v21 = vadd.f32 %v360_v3, %v315_v25  ;;  %1472 = vperm.xlu0 %5588, %v1456_v38   ;;  %v319_v6 = vmul.f32 %v8724_v48, %v11293_v41  ;;  %v11294_v3 = vld [vmem:[#allocation68_spill] sm:$0xff]  ;;  %5688 = vrsqrt.f32 %v1410_v15  ;;  %v5683_v63 = vpop.eup %5682 }
 0x86d   :  { %v1387_v8 = vmul.f32 0.020408163, %v11294_v3  ;;  %5690 = vrsqrt.f32 %v1399_v26  ;;  %v11300_v3 = vld [vmem:[#allocation7_spill] sm:$0xff] }
 0x86e   :  { %413 = vst.msk [vmem:[%s10846_s2 + $0x38] sm:$0xff] %vm25_vm0, %v399_v21  ;;  %v308_v21 = vmul.f32 %v8705_v29, %v11295_v7  ;;  %v11297_v29 = vld [vmem:[#allocation70_spill] sm:$0xff] }
 0x86f   :  { %1165 = vperm.xlu1 %5589, %v5059_v44   ;;  %v8797_v53 = vpop.permute.xlu1 %290  ;;  %v370_v49 = vpop.permute.xlu0 %369  ;;  %v11296_v44 = vld [vmem:[#allocation14_spill] sm:$0xff]  ;;  %v1401_v58 = vadd.f32 0.001, %v1387_v8  ;;  %v1389_v12 = vmul.f32 0.020408163, %v11297_v29  ;;  %v312_v8 = vmul.f32 %v8733_v31, %v11300_v3 }
 0x870   :  { %v401_v62 = vadd.f32 %v370_v49, %v317_v36  ;;  %1487 = vperm.xlu0 %5588, %v1459_v42   ;;  %v321_v35 = vmul.f32 %v8735_v52, %v11296_v44  ;;  %v5106_v42 = vld [vmem:[%s10845_s1 + $0x198] sm:$0xff]  ;;  %v5065_v49 = vld [vmem:[%s10845_s1 + $0x670] sm:$0xff] }
 0x871   :  { %5692 = vrsqrt.f32 %v1401_v58  ;;  %v11302_v58 = vld [vmem:[#allocation9_spill] sm:$0xff] }
 0x872   :  { %415 = vst.msk [vmem:[%s10846_s2 + $0x48] sm:$0xff] %vm25_vm0, %v401_v62  ;;  %v1465_v62 = vmul.f32 %v5683_v63, %v5106_v42  ;;  %v314_v29 = vmul.f32 %v8754_v16, %v11302_v58  ;;  %v11307_v58 = vld [vmem:[#allocation15_spill] sm:$0xff] }
 0x873   :  { %1175 = vperm.xlu1 %5589, %v5061_v2   ;;  %v8811_v25 = vpop.permute.xlu1 %300  ;;  %v380_v38 = vpop.permute.xlu0 %379 }
 0x874   :  { %v403_v48 = vadd.f32 %v380_v38, %v319_v6  ;;  %1497 = vperm.xlu0 %5588, %v1461_v33   ;;  %v5685_v2 = vpop.eup %5684  ;;  %v1403_v6 = vadd.f32 0.001, %v1389_v12  ;;  %v11299_v33 = vld [vmem:[#allocation72_spill] sm:$0xff]  ;;  %v5067_v38 = vld [vmem:[%s10845_s1 + $0x680] sm:$0xff] }
 0x875   :  { %v1391_v1 = vmul.f32 0.020408163, %v11299_v33  ;;  %v5687_v32 = vpop.eup %5686 }
 0x876   :  { %417 = vst.msk [vmem:[%s10846_s2 + $0x58] sm:$0xff] %vm25_vm0, %v403_v48  ;;  %v1467_v48 = vmul.f32 %v5685_v2, %v5108_v30  ;;  %v5689_v7 = vpop.eup %5688  ;;  %5694 = vrsqrt.f32 %v1403_v6  ;;  %v11304_v6 = vld [vmem:[#allocation11_spill] sm:$0xff] }
 0x877   :  { %1185 = vperm.xlu1 %5589, %v5063_v50   ;;  %v325_v39 = vpop.permute.xlu1 %324  ;;  %v390_v36 = vpop.permute.xlu0 %389  ;;  %v5098_v50 = vld [vmem:[%s10845_s1 + $0x158] sm:$0xff]  ;;  %v1405_v31 = vadd.f32 0.001, %v1391_v1  ;;  %v316_v33 = vmul.f32 %v8780_v22, %v11304_v6  ;;  %v5101_v1 = vld [vmem:[%s10845_s1 + $0x170] sm:$0xff]  ;;  %v5114_v22 = vld [vmem:[%s10845_s1 + $0x6a8] sm:$0xff] }
 0x878   :  { %v392_v19 = vadd.f32 %v325_v39, %v308_v21  ;;  %v405_v52 = vadd.f32 %v390_v36, %v321_v35  ;;  %1507 = vperm.xlu0 %5588, %v1463_v9   ;;  %v5110_v35 = vld [vmem:[%s10845_s1 + $0x1b8] sm:$0xff]  ;;  %v11301_v9 = vld [vmem:[#allocation74_spill] sm:$0xff]  ;;  %v5691_v36 = vpop.eup %5690  ;;  %v1457_v42 = vmul.f32 %v5687_v32, %v5098_v50 }
 0x879   :  { %v1393_v63 = vmul.f32 0.020408163, %v11301_v9  ;;  %v1469_v12 = vmul.f32 %v5689_v7, %v5110_v35  ;;  %5696 = vrsqrt.f32 %v1405_v31  ;;  %v11305_v50 = vld [vmem:[#allocation13_spill] sm:$0xff] }
 0x87a   :  { %406 = vst.msk [vmem:[%s10846_s2] sm:$0xff] %vm25_vm0, %v392_v19  ;;  %419 = vst.msk [vmem:[%s10846_s2 + $0x68] sm:$0xff] %vm25_vm0, %v405_v52  ;;  %v5099_v19 = vld [vmem:[%s10845_s1 + $0x160] sm:$0xff]  ;;  %v318_v7 = vmul.f32 %v8797_v53, %v11305_v50  ;;  %v5116_v53 = vld [vmem:[%s10845_s1 + $0x6b8] sm:$0xff] }
 0x87b   :  { %1195 = vperm.xlu1 %5589, %v5065_v49   ;;  %v335_v15 = vpop.permute.xlu1 %334  ;;  %v8845_v41 = vpop.permute.xlu0 %650  ;;  %v1407_v23 = vadd.f32 0.001, %v1393_v63  ;;  %v1458_v16 = vmul.f32 %v5691_v36, %v5099_v19  ;;  %v11306_v63 = vld [vmem:[#allocation92_spill] sm:$0xff] }
 0x87c   :  { %v394_v26 = vadd.f32 %v335_v15, %v310_v59  ;;  %1517 = vperm.xlu0 %5588, %v1465_v62   ;;  %v11303_v59 = vld [vmem:[#allocation76_spill] sm:$0xff]  ;;  %v5112_v15 = vld [vmem:[%s10845_s1 + $0x698] sm:$0xff]  ;;  %v5693_v30 = vpop.eup %5692 }
 0x87d   :  { %v1395_v62 = vmul.f32 0.020408163, %v11303_v59  ;;  %5698 = vrsqrt.f32 %v1407_v23 }
 0x87e   :  { %408 = vst.msk [vmem:[%s10846_s2 + $0x10] sm:$0xff] %vm25_vm0, %v394_v26 }
 0x87f   :  { %1205 = vperm.xlu1 %5589, %v5067_v38   ;;  %v345_v21 = vpop.permute.xlu1 %344  ;;  %v8863_v44 = vpop.permute.xlu0 %665  ;;  %v1409_v32 = vadd.f32 0.001, %v1395_v62  ;;  %v11308_v62 = vld [vmem:[#allocation93_spill] sm:$0xff] }
 0x880   :  { %v396_v39 = vadd.f32 %v345_v21, %v312_v8  ;;  %1527 = vperm.xlu0 %5588, %v1467_v48   ;;  %v1460_v8 = vmul.f32 %v5693_v30, %v5101_v1  ;;  %v5695_v48 = vpop.eup %5694  ;;  %v5103_v21 = vld [vmem:[%s10845_s1 + $0x180] sm:$0xff] }
 0x881   :  { %5700 = vrsqrt.f32 %v1409_v32  ;;  %v1462_v36 = vmul.f32 %v5695_v48, %v5103_v21  ;;  %v5107_v30 = vld [vmem:[%s10845_s1 + $0x1a0] sm:$0xff]  ;;  %v11310_v48 = vld [vmem:[#allocation17_spill] sm:$0xff] }
 0x882   :  { %410 = vst.msk [vmem:[%s10846_s2 + $0x20] sm:$0xff] %vm25_vm0, %v396_v39  ;;  %v1794_v39 = vmul.f32 0.020408163, %v11306_v63 }
 0x883   :  { %1477 = vperm.xlu1 %5589, %v1457_v42   ;;  %v355_v52 = vpop.permute.xlu1 %354  ;;  %v8878_v49 = vpop.permute.xlu0 %675 }
 0x884   :  { %v398_v2 = vadd.f32 %v355_v52, %v314_v29  ;;  %1537 = vperm.xlu0 %5588, %v1469_v12   ;;  %v5697_v42 = vpop.eup %5696  ;;  %v320_v29 = vmul.f32 %v8811_v25, %v11307_v58  ;;  %v5105_v12 = vld [vmem:[%s10845_s1 + $0x190] sm:$0xff]  ;;  %v1808_v59 = vadd.f32 0.001, %v1794_v39  ;;  %v5118_v25 = vld [vmem:[%s10845_s1 + $0x6c8] sm:$0xff]  ;;  %v11311_v39 = vld [vmem:[#allocation97_spill] sm:$0xff] }
 0x885   :  { %v11312_v58 = vld [vmem:[#allocation18_spill] sm:$0xff] }
 0x886   :  { %412 = vst.msk [vmem:[%s10846_s2 + $0x30] sm:$0xff] %vm25_vm0, %v398_v2  ;;  %v1797_v2 = vmul.f32 0.020408163, %v11308_v62  ;;  %5702 = vrsqrt.f32 %v1808_v59  ;;  %v5111_v59 = vld [vmem:[%s10845_s1 + $0x690] sm:$0xff] }
 0x887   :  { %1482 = vperm.xlu1 %5589, %v1458_v16   ;;  %v365_v26 = vpop.permute.xlu1 %364  ;;  %v8893_v38 = vpop.permute.xlu0 %685  ;;  %v1464_v16 = vmul.f32 %v5697_v42, %v5105_v12  ;;  %v5122_v42 = vld [vmem:[%s10845_s1 + $0x6e8] sm:$0xff] }
 0x888   :  { %v400_v3 = vadd.f32 %v365_v26, %v316_v33  ;;  %1561 = vperm.xlu0 %5588, %v5112_v15   ;;  %v5699_v15 = vpop.eup %5698  ;;  %v1811_v1 = vadd.f32 0.001, %v1797_v2  ;;  %v11309_v26 = vld [vmem:[#allocation95_spill] sm:$0xff] }
 0x889   :  { %v1799_v32 = vmul.f32 0.020408163, %v11309_v26  ;;  %v11313_v2 = vld [vmem:[#allocation99_spill] sm:$0xff]  ;;  %v5153_v26 = vld [vmem:[%s10845_s1 + $0x1c0] sm:$0xff] }
 0x88a   :  { %414 = vst.msk [vmem:[%s10846_s2 + $0x40] sm:$0xff] %vm25_vm0, %v400_v3  ;;  %v1466_v3 = vmul.f32 %v5699_v15, %v5107_v30  ;;  %5704 = vrsqrt.f32 %v1811_v1 }
 0x88b   :  { %1492 = vperm.xlu1 %5589, %v1460_v8   ;;  %v375_v35 = vpop.permute.xlu1 %374  ;;  %v8907_v31 = vpop.permute.xlu0 %695  ;;  %v5120_v8 = vld [vmem:[%s10845_s1 + $0x6d8] sm:$0xff]  ;;  %v1813_v63 = vadd.f32 0.001, %v1799_v32 }
 0x88c   :  { %v402_v9 = vadd.f32 %v375_v35, %v318_v7  ;;  %1571 = vperm.xlu0 %5588, %v5114_v22   ;;  %v5701_v22 = vpop.eup %5700  ;;  %v5109_v7 = vld [vmem:[%s10845_s1 + $0x1b0] sm:$0xff] }
 0x88d   :  { %5706 = vrsqrt.f32 %v1813_v63 }
 0x88e   :  { %416 = vst.msk [vmem:[%s10846_s2 + $0x50] sm:$0xff] %vm25_vm0, %v402_v9 }
 0x88f   :  { %1502 = vperm.xlu1 %5589, %v1462_v36   ;;  %v385_v19 = vpop.permute.xlu1 %384  ;;  %v8922_v52 = vpop.permute.xlu0 %705  ;;  %v1801_v36 = vmul.f32 0.020408163, %v11311_v39  ;;  %v5156_v39 = vld [vmem:[%s10845_s1 + $0x1d8] sm:$0xff] }
 0x890   :  { %v404_v23 = vadd.f32 %v385_v19, %v320_v29  ;;  %1581 = vperm.xlu0 %5588, %v5116_v53   ;;  %v1468_v53 = vmul.f32 %v5701_v22, %v5109_v7  ;;  %v721_v29 = vmul.f32 %v8863_v44, %v11312_v58  ;;  %v5124_v44 = vld [vmem:[%s10845_s1 + $0x6f8] sm:$0xff]  ;;  %v5703_v30 = vpop.eup %5702 }
 0x891   :  { %v1815_v62 = vadd.f32 0.001, %v1801_v36  ;;  %v1867_v7 = vmul.f32 %v5703_v30, %v5153_v26  ;;  %v11317_v36 = vld [vmem:[#allocation91_spill] sm:$0xff] }
 0x892   :  { %418 = vst.msk [vmem:[%s10846_s2 + $0x60] sm:$0xff] %vm25_vm0, %v404_v23  ;;  %v5158_v30 = vld [vmem:[%s10845_s1 + $0x1e8] sm:$0xff] }
 0x893   :  { %1512 = vperm.xlu1 %5589, %v1464_v16   ;;  %v656_v6 = vpop.permute.xlu1 %655  ;;  %v8935_v33 = vpop.permute.xlu0 %715  ;;  %v1803_v16 = vmul.f32 0.020408163, %v11313_v2  ;;  %5708 = vrsqrt.f32 %v1815_v62 }
 0x894   :  { %1591 = vperm.xlu0 %5588, %v5118_v25   ;;  %v719_v50 = vmul.f32 %v656_v6, %v11310_v48  ;;  %v11314_v25 = vld [vmem:[#allocation20_spill] sm:$0xff]  ;;  %v11316_v48 = vld [vmem:[#allocation22_spill] sm:$0xff] }
 0x895   :  { %v723_v15 = vmul.f32 %v8878_v49, %v11314_v25  ;;  %v5113_v49 = vld [vmem:[%s10845_s1 + $0x6a0] sm:$0xff] }
 0x897   :  { %1522 = vperm.xlu1 %5589, %v1466_v3   ;;  %v8945_v21 = vpop.permute.xlu1 %660  ;;  %v740_v35 = vpop.permute.xlu0 %739  ;;  %v1817_v3 = vadd.f32 0.001, %v1803_v16  ;;  %v11320_v16 = vld [vmem:[#allocation94_spill] sm:$0xff] }
 0x898   :  { %v803_v9 = vadd.f32 %v740_v35, %v719_v50  ;;  %1601 = vperm.xlu0 %5588, %v5120_v8   ;;  %v11315_v8 = vld [vmem:[#allocation101_spill] sm:$0xff]  ;;  %v725_v50 = vmul.f32 %v8893_v38, %v11316_v48  ;;  %v5705_v35 = vpop.eup %5704  ;;  %v5115_v38 = vld [vmem:[%s10845_s1 + $0x6b0] sm:$0xff] }
 0x899   :  { %v1805_v22 = vmul.f32 0.020408163, %v11315_v8  ;;  %5710 = vrsqrt.f32 %v1817_v3  ;;  %v1870_v62 = vmul.f32 %v5705_v35, %v5156_v39  ;;  %v5707_v2 = vpop.eup %5706  ;;  %v5160_v35 = vld [vmem:[%s10845_s1 + $0x1f8] sm:$0xff] }
 0x89a   :  { %5014 = vst.msk [vmem:[%s10846_s2 + $0x78] sm:$0xff] %vm25_vm0, %v803_v9  ;;  %v1872_v8 = vmul.f32 %v5707_v2, %v5158_v30  ;;  %v11326_v30 = vld [vmem:[#allocation19_spill] sm:$0xff] }
 0x89b   :  { %1532 = vperm.xlu1 %5589, %v1468_v53   ;;  %v8957_v12 = vpop.permute.xlu1 %670  ;;  %v750_v19 = vpop.permute.xlu0 %749  ;;  %v1795_v53 = vmul.f32 0.020408163, %v11317_v36  ;;  %v1819_v58 = vadd.f32 0.001, %v1805_v22  ;;  %v5119_v36 = vld [vmem:[%s10845_s1 + $0x6d0] sm:$0xff] }
 0x89c   :  { %v805_v23 = vadd.f32 %v750_v19, %v721_v29  ;;  %1611 = vperm.xlu0 %5588, %v5122_v42   ;;  %v11318_v29 = vld [vmem:[#allocation103_spill] sm:$0xff] }
 0x89d   :  { %v1807_v19 = vmul.f32 0.020408163, %v11318_v29  ;;  %5712 = vrsqrt.f32 %v1819_v58  ;;  %v5709_v22 = vpop.eup %5708 }
 0x89e   :  { %5016 = vst.msk [vmem:[%s10846_s2 + $0x88] sm:$0xff] %vm25_vm0, %v805_v23  ;;  %v11319_v23 = vld [vmem:[#allocation24_spill] sm:$0xff]  ;;  %v1874_v29 = vmul.f32 %v5709_v22, %v5160_v35 }
 0x89f   :  { %1556 = vperm.xlu1 %5589, %v5111_v59   ;;  %v8972_v6 = vpop.permute.xlu1 %680  ;;  %v760_v1 = vpop.permute.xlu0 %759  ;;  %v727_v59 = vmul.f32 %v8907_v31, %v11319_v23  ;;  %v5117_v31 = vld [vmem:[%s10845_s1 + $0x6c0] sm:$0xff] }
 0x8a0   :  { %v807_v32 = vadd.f32 %v760_v1, %v723_v15  ;;  %1621 = vperm.xlu0 %5588, %v5124_v44   ;;  %v1796_v44 = vmul.f32 0.020408163, %v11320_v16  ;;  %v1809_v1 = vadd.f32 0.001, %v1795_v53  ;;  %v11323_v53 = vld [vmem:[#allocation16_spill] sm:$0xff] }
 0x8a2   :  { %5018 = vst.msk [vmem:[%s10846_s2 + $0x98] sm:$0xff] %vm25_vm0, %v807_v32  ;;  %v1821_v32 = vadd.f32 0.001, %v1807_v19  ;;  %v1810_v48 = vadd.f32 0.001, %v1796_v44  ;;  %5714 = vrsqrt.f32 %v1809_v1  ;;  %v720_v1 = vmul.f32 %v8945_v21, %v11326_v30  ;;  %v5164_v21 = vld [vmem:[%s10845_s1 + $0x218] sm:$0xff] }
 0x8a3   :  { %1566 = vperm.xlu1 %5589, %v5113_v49   ;;  %v8987_v9 = vpop.permute.xlu1 %690  ;;  %v770_v63 = vpop.permute.xlu0 %769  ;;  %v11321_v49 = vld [vmem:[#allocation26_spill] sm:$0xff] }
 0x8a4   :  { %v809_v42 = vadd.f32 %v770_v63, %v725_v50  ;;  %1883 = vperm.xlu0 %5588, %v1867_v7   ;;  %v729_v3 = vmul.f32 %v8922_v52, %v11321_v49  ;;  %v11322_v63 = vld [vmem:[#allocation96_spill] sm:$0xff]  ;;  %5716 = vrsqrt.f32 %v1821_v32  ;;  %v5711_v19 = vpop.eup %5710 }
 0x8a5   :  { %v1798_v39 = vmul.f32 0.020408163, %v11322_v63  ;;  %5718 = vrsqrt.f32 %v1810_v48  ;;  %v11328_v63 = vld [vmem:[#allocation21_spill] sm:$0xff] }
 0x8a6   :  { %5020 = vst.msk [vmem:[%s10846_s2 + $0xa8] sm:$0xff] %vm25_vm0, %v809_v42  ;;  %v718_v42 = vmul.f32 %v8845_v41, %v11323_v53  ;;  %v11325_v41 = vld [vmem:[#allocation98_spill] sm:$0xff] }
 0x8a7   :  { %1576 = vperm.xlu1 %5589, %v5115_v38   ;;  %v9004_v25 = vpop.permute.xlu1 %700  ;;  %v780_v15 = vpop.permute.xlu0 %779  ;;  %v11324_v38 = vld [vmem:[#allocation28_spill] sm:$0xff]  ;;  %v1812_v2 = vadd.f32 0.001, %v1798_v39  ;;  %v1800_v16 = vmul.f32 0.020408163, %v11325_v41  ;;  %v722_v39 = vmul.f32 %v8957_v12, %v11328_v63 }
 0x8a8   :  { %v811_v26 = vadd.f32 %v780_v15, %v727_v59  ;;  %1898 = vperm.xlu0 %5588, %v1870_v62   ;;  %v731_v58 = vmul.f32 %v8935_v33, %v11324_v38  ;;  %v5162_v62 = vld [vmem:[%s10845_s1 + $0x208] sm:$0xff]  ;;  %v5121_v15 = vld [vmem:[%s10845_s1 + $0x6e0] sm:$0xff] }
 0x8a9   :  { %5720 = vrsqrt.f32 %v1812_v2  ;;  %v11330_v2 = vld [vmem:[#allocation23_spill] sm:$0xff] }
 0x8aa   :  { %5022 = vst.msk [vmem:[%s10846_s2 + $0xb8] sm:$0xff] %vm25_vm0, %v811_v26  ;;  %v1876_v26 = vmul.f32 %v5711_v19, %v5162_v62  ;;  %v724_v41 = vmul.f32 %v8972_v6, %v11330_v2  ;;  %v11335_v2 = vld [vmem:[#allocation29_spill] sm:$0xff] }
 0x8ab   :  { %1586 = vperm.xlu1 %5589, %v5117_v31   ;;  %v9018_v50 = vpop.permute.xlu1 %710  ;;  %v790_v7 = vpop.permute.xlu0 %789 }
 0x8ac   :  { %v813_v52 = vadd.f32 %v790_v7, %v729_v3  ;;  %1908 = vperm.xlu0 %5588, %v1872_v8   ;;  %v5713_v31 = vpop.eup %5712  ;;  %v1814_v3 = vadd.f32 0.001, %v1800_v16  ;;  %v11327_v8 = vld [vmem:[#allocation100_spill] sm:$0xff] }
 0x8ad   :  { %v1802_v22 = vmul.f32 0.020408163, %v11327_v8  ;;  %v5123_v7 = vld [vmem:[%s10845_s1 + $0x6f0] sm:$0xff]  ;;  %v5715_v35 = vpop.eup %5714 }
 0x8ae   :  { %5024 = vst.msk [vmem:[%s10846_s2 + $0xc8] sm:$0xff] %vm25_vm0, %v813_v52  ;;  %v1878_v52 = vmul.f32 %v5713_v31, %v5164_v21  ;;  %v5717_v53 = vpop.eup %5716  ;;  %5722 = vrsqrt.f32 %v1814_v3  ;;  %v11332_v3 = vld [vmem:[#allocation25_spill] sm:$0xff] }
 0x8af   :  { %1596 = vperm.xlu1 %5589, %v5119_v36   ;;  %v735_v23 = vpop.permute.xlu1 %734  ;;  %v800_v59 = vpop.permute.xlu0 %799  ;;  %v5154_v36 = vld [vmem:[%s10845_s1 + $0x1c8] sm:$0xff]  ;;  %v1816_v12 = vadd.f32 0.001, %v1802_v22  ;;  %v726_v8 = vmul.f32 %v8987_v9, %v11332_v3  ;;  %v5157_v22 = vld [vmem:[%s10845_s1 + $0x1e0] sm:$0xff]  ;;  %v5170_v9 = vld [vmem:[%s10845_s1 + $0x718] sm:$0xff] }
 0x8b0   :  { %v802_v44 = vadd.f32 %v735_v23, %v718_v42  ;;  %v815_v33 = vadd.f32 %v800_v59, %v731_v58  ;;  %1918 = vperm.xlu0 %5588, %v1874_v29   ;;  %v5166_v58 = vld [vmem:[%s10845_s1 + $0x228] sm:$0xff]  ;;  %v11329_v29 = vld [vmem:[#allocation102_spill] sm:$0xff]  ;;  %v5719_v59 = vpop.eup %5718  ;;  %v1868_v62 = vmul.f32 %v5715_v35, %v5154_v36 }
 0x8b1   :  { %v1804_v19 = vmul.f32 0.020408163, %v11329_v29  ;;  %v1880_v16 = vmul.f32 %v5717_v53, %v5166_v58  ;;  %5724 = vrsqrt.f32 %v1816_v12  ;;  %v11333_v36 = vld [vmem:[#allocation27_spill] sm:$0xff] }
 0x8b2   :  { %5013 = vst.msk [vmem:[%s10846_s2 + $0x70] sm:$0xff] %vm25_vm0, %v802_v44  ;;  %5026 = vst.msk [vmem:[%s10846_s2 + $0xd8] sm:$0xff] %vm25_vm0, %v815_v33  ;;  %v5155_v44 = vld [vmem:[%s10845_s1 + $0x1d0] sm:$0xff]  ;;  %v728_v53 = vmul.f32 %v9004_v25, %v11333_v36  ;;  %v5172_v25 = vld [vmem:[%s10845_s1 + $0x728] sm:$0xff] }
 0x8b3   :  { %1606 = vperm.xlu1 %5589, %v5121_v15   ;;  %v745_v32 = vpop.permute.xlu1 %744  ;;  %v9052_v49 = vpop.permute.xlu0 %1061  ;;  %v1818_v30 = vadd.f32 0.001, %v1804_v19  ;;  %v1869_v6 = vmul.f32 %v5719_v59, %v5155_v44  ;;  %v11334_v19 = vld [vmem:[#allocation120_spill] sm:$0xff] }
 0x8b4   :  { %v804_v48 = vadd.f32 %v745_v32, %v720_v1  ;;  %1928 = vperm.xlu0 %5588, %v1876_v26   ;;  %v11331_v1 = vld [vmem:[#allocation104_spill] sm:$0xff]  ;;  %v5168_v32 = vld [vmem:[%s10845_s1 + $0x708] sm:$0xff]  ;;  %v5721_v21 = vpop.eup %5720 }
 0x8b5   :  { %v1806_v26 = vmul.f32 0.020408163, %v11331_v1  ;;  %5726 = vrsqrt.f32 %v1818_v30 }
 0x8b6   :  { %5015 = vst.msk [vmem:[%s10846_s2 + $0x80] sm:$0xff] %vm25_vm0, %v804_v48 }
 0x8b7   :  { %1616 = vperm.xlu1 %5589, %v5123_v7   ;;  %v755_v42 = vpop.permute.xlu1 %754  ;;  %v9070_v38 = vpop.permute.xlu0 %1076  ;;  %v1820_v35 = vadd.f32 0.001, %v1806_v26  ;;  %v11336_v26 = vld [vmem:[#allocation121_spill] sm:$0xff] }
 0x8b8   :  { %v806_v23 = vadd.f32 %v755_v42, %v722_v39  ;;  %1938 = vperm.xlu0 %5588, %v1878_v52   ;;  %v1871_v39 = vmul.f32 %v5721_v21, %v5157_v22  ;;  %v5723_v52 = vpop.eup %5722  ;;  %v5159_v42 = vld [vmem:[%s10845_s1 + $0x1f0] sm:$0xff] }
 0x8b9   :  { %5728 = vrsqrt.f32 %v1820_v35  ;;  %v1873_v59 = vmul.f32 %v5723_v52, %v5159_v42  ;;  %v5163_v21 = vld [vmem:[%s10845_s1 + $0x210] sm:$0xff]  ;;  %v11338_v52 = vld [vmem:[#allocation30_spill] sm:$0xff] }
 0x8ba   :  { %5017 = vst.msk [vmem:[%s10846_s2 + $0x90] sm:$0xff] %vm25_vm0, %v806_v23  ;;  %v2205_v23 = vmul.f32 0.020408163, %v11334_v19 }
 0x8bb   :  { %1888 = vperm.xlu1 %5589, %v1868_v62   ;;  %v765_v33 = vpop.permute.xlu1 %764  ;;  %v9085_v15 = vpop.permute.xlu0 %1086 }
 0x8bc   :  { %v808_v31 = vadd.f32 %v765_v33, %v724_v41  ;;  %1948 = vperm.xlu0 %5588, %v1880_v16   ;;  %v5725_v62 = vpop.eup %5724  ;;  %v730_v41 = vmul.f32 %v9018_v50, %v11335_v2  ;;  %v5161_v16 = vld [vmem:[%s10845_s1 + $0x200] sm:$0xff]  ;;  %v2219_v1 = vadd.f32 0.001, %v2205_v23  ;;  %v5174_v50 = vld [vmem:[%s10845_s1 + $0x738] sm:$0xff] }
 0x8bd   :  { %v11339_v23 = vld [vmem:[#allocation125_spill] sm:$0xff] }
 0x8be   :  { %5019 = vst.msk [vmem:[%s10846_s2 + $0xa0] sm:$0xff] %vm25_vm0, %v808_v31  ;;  %v2208_v31 = vmul.f32 0.020408163, %v11336_v26  ;;  %5730 = vrsqrt.f32 %v2219_v1  ;;  %v11340_v2 = vld [vmem:[#allocation33_spill] sm:$0xff]  ;;  %v5167_v1 = vld [vmem:[%s10845_s1 + $0x700] sm:$0xff] }
 0x8bf   :  { %1893 = vperm.xlu1 %5589, %v1869_v6   ;;  %v775_v48 = vpop.permute.xlu1 %774  ;;  %v9100_v7 = vpop.permute.xlu0 %1096  ;;  %v1875_v6 = vmul.f32 %v5725_v62, %v5161_v16  ;;  %v5178_v62 = vld [vmem:[%s10845_s1 + $0x758] sm:$0xff] }
 0x8c0   :  { %v810_v63 = vadd.f32 %v775_v48, %v726_v8  ;;  %1972 = vperm.xlu0 %5588, %v5168_v32   ;;  %v5727_v32 = vpop.eup %5726  ;;  %v2222_v22 = vadd.f32 0.001, %v2208_v31  ;;  %v11337_v48 = vld [vmem:[#allocation123_spill] sm:$0xff] }
 0x8c1   :  { %v2210_v35 = vmul.f32 0.020408163, %v11337_v48  ;;  %v11341_v31 = vld [vmem:[#allocation127_spill] sm:$0xff]  ;;  %v5209_v48 = vld [vmem:[%s10845_s1 + $0x230] sm:$0xff] }
 0x8c2   :  { %5021 = vst.msk [vmem:[%s10846_s2 + $0xb0] sm:$0xff] %vm25_vm0, %v810_v63  ;;  %v1877_v63 = vmul.f32 %v5727_v32, %v5163_v21  ;;  %5732 = vrsqrt.f32 %v2222_v22 }
 0x8c3   :  { %1903 = vperm.xlu1 %5589, %v1871_v39   ;;  %v785_v58 = vpop.permute.xlu1 %784  ;;  %v9114_v12 = vpop.permute.xlu0 %1106  ;;  %v5176_v39 = vld [vmem:[%s10845_s1 + $0x748] sm:$0xff]  ;;  %v2224_v19 = vadd.f32 0.001, %v2210_v35 }
 0x8c4   :  { %v812_v29 = vadd.f32 %v785_v58, %v728_v53  ;;  %1982 = vperm.xlu0 %5588, %v5170_v9   ;;  %v5729_v9 = vpop.eup %5728  ;;  %v5165_v53 = vld [vmem:[%s10845_s1 + $0x220] sm:$0xff] }
 0x8c5   :  { %5734 = vrsqrt.f32 %v2224_v19 }
 0x8c6   :  { %5023 = vst.msk [vmem:[%s10846_s2 + $0xc0] sm:$0xff] %vm25_vm0, %v812_v29 }
 0x8c7   :  { %1913 = vperm.xlu1 %5589, %v1873_v59   ;;  %v795_v44 = vpop.permute.xlu1 %794  ;;  %v9129_v33 = vpop.permute.xlu0 %1116  ;;  %v2212_v59 = vmul.f32 0.020408163, %v11339_v23  ;;  %v5212_v23 = vld [vmem:[%s10845_s1 + $0x248] sm:$0xff] }
 0x8c8   :  { %v814_v30 = vadd.f32 %v795_v44, %v730_v41  ;;  %1992 = vperm.xlu0 %5588, %v5172_v25   ;;  %v1879_v25 = vmul.f32 %v5729_v9, %v5165_v53  ;;  %v1132_v41 = vmul.f32 %v9070_v38, %v11340_v2  ;;  %v5180_v38 = vld [vmem:[%s10845_s1 + $0x768] sm:$0xff]  ;;  %v5731_v21 = vpop.eup %5730 }
 0x8c9   :  { %v2226_v26 = vadd.f32 0.001, %v2212_v59  ;;  %v2278_v53 = vmul.f32 %v5731_v21, %v5209_v48  ;;  %v11345_v59 = vld [vmem:[#allocation119_spill] sm:$0xff]  ;;  %v5214_v21 = vld [vmem:[%s10845_s1 + $0x258] sm:$0xff] }
 0x8ca   :  { %5025 = vst.msk [vmem:[%s10846_s2 + $0xd0] sm:$0xff] %vm25_vm0, %v814_v30 }
 0x8cb   :  { %1923 = vperm.xlu1 %5589, %v1875_v6   ;;  %v1067_v3 = vpop.permute.xlu1 %1066  ;;  %v9142_v8 = vpop.permute.xlu0 %1126  ;;  %v2214_v6 = vmul.f32 0.020408163, %v11341_v31  ;;  %5736 = vrsqrt.f32 %v2226_v26 }
 0x8cc   :  { %2002 = vperm.xlu0 %5588, %v5174_v50   ;;  %v1130_v36 = vmul.f32 %v1067_v3, %v11338_v52  ;;  %v11342_v50 = vld [vmem:[#allocation35_spill] sm:$0xff]  ;;  %v11344_v52 = vld [vmem:[#allocation37_spill] sm:$0xff] }
 0x8cd   :  { %v1134_v32 = vmul.f32 %v9085_v15, %v11342_v50  ;;  %v5169_v15 = vld [vmem:[%s10845_s1 + $0x710] sm:$0xff] }
 0x8cf   :  { %1933 = vperm.xlu1 %5589, %v1877_v63   ;;  %v9152_v42 = vpop.permute.xlu1 %1071  ;;  %v1151_v58 = vpop.permute.xlu0 %1150  ;;  %v2228_v63 = vadd.f32 0.001, %v2214_v6  ;;  %v11348_v6 = vld [vmem:[#allocation122_spill] sm:$0xff] }
 0x8d0   :  { %v1214_v29 = vadd.f32 %v1151_v58, %v1130_v36  ;;  %2012 = vperm.xlu0 %5588, %v5176_v39   ;;  %v11343_v39 = vld [vmem:[#allocation129_spill] sm:$0xff]  ;;  %v1136_v36 = vmul.f32 %v9100_v7, %v11344_v52  ;;  %v5733_v58 = vpop.eup %5732  ;;  %v5171_v7 = vld [vmem:[%s10845_s1 + $0x720] sm:$0xff] }
 0x8d1   :  { %v2216_v9 = vmul.f32 0.020408163, %v11343_v39  ;;  %5738 = vrsqrt.f32 %v2228_v63  ;;  %v2281_v26 = vmul.f32 %v5733_v58, %v5212_v23  ;;  %v5735_v31 = vpop.eup %5734  ;;  %v5216_v58 = vld [vmem:[%s10845_s1 + $0x268] sm:$0xff] }
 0x8d2   :  { %5070 = vst.msk [vmem:[%s10846_s2 + $0xe8] sm:$0xff] %vm25_vm0, %v1214_v29  ;;  %v2283_v39 = vmul.f32 %v5735_v31, %v5214_v21  ;;  %v11354_v21 = vld [vmem:[#allocation32_spill] sm:$0xff] }
 0x8d3   :  { %1943 = vperm.xlu1 %5589, %v1879_v25   ;;  %v9164_v16 = vpop.permute.xlu1 %1081  ;;  %v1161_v44 = vpop.permute.xlu0 %1160  ;;  %v2206_v25 = vmul.f32 0.020408163, %v11345_v59  ;;  %v2230_v2 = vadd.f32 0.001, %v2216_v9  ;;  %v5175_v59 = vld [vmem:[%s10845_s1 + $0x740] sm:$0xff] }
 0x8d4   :  { %v1216_v30 = vadd.f32 %v1161_v44, %v1132_v41  ;;  %2022 = vperm.xlu0 %5588, %v5178_v62   ;;  %v11346_v41 = vld [vmem:[#allocation131_spill] sm:$0xff] }
 0x8d5   :  { %v2218_v44 = vmul.f32 0.020408163, %v11346_v41  ;;  %5740 = vrsqrt.f32 %v2230_v2  ;;  %v5737_v9 = vpop.eup %5736 }
 0x8d6   :  { %5072 = vst.msk [vmem:[%s10846_s2 + $0xf8] sm:$0xff] %vm25_vm0, %v1216_v30  ;;  %v11347_v30 = vld [vmem:[#allocation39_spill] sm:$0xff]  ;;  %v2285_v41 = vmul.f32 %v5737_v9, %v5216_v58 }
 0x8d7   :  { %1967 = vperm.xlu1 %5589, %v5167_v1   ;;  %v9179_v3 = vpop.permute.xlu1 %1091  ;;  %v1171_v22 = vpop.permute.xlu0 %1170  ;;  %v1138_v1 = vmul.f32 %v9114_v12, %v11347_v30  ;;  %v5173_v12 = vld [vmem:[%s10845_s1 + $0x730] sm:$0xff] }
 0x8d8   :  { %v1218_v35 = vadd.f32 %v1171_v22, %v1134_v32  ;;  %2032 = vperm.xlu0 %5588, %v5180_v38   ;;  %v2207_v38 = vmul.f32 0.020408163, %v11348_v6  ;;  %v2220_v22 = vadd.f32 0.001, %v2206_v25  ;;  %v11351_v25 = vld [vmem:[#allocation31_spill] sm:$0xff] }
 0x8da   :  { %5074 = vst.msk [vmem:[%s10846_s2 + $0x108] sm:$0xff] %vm25_vm0, %v1218_v35  ;;  %v2232_v35 = vadd.f32 0.001, %v2218_v44  ;;  %v2221_v52 = vadd.f32 0.001, %v2207_v38  ;;  %5742 = vrsqrt.f32 %v2220_v22  ;;  %v1131_v22 = vmul.f32 %v9152_v42, %v11354_v21  ;;  %v5220_v42 = vld [vmem:[%s10845_s1 + $0x288] sm:$0xff] }
 0x8db   :  { %1977 = vperm.xlu1 %5589, %v5169_v15   ;;  %v9194_v29 = vpop.permute.xlu1 %1101  ;;  %v1181_v19 = vpop.permute.xlu0 %1180  ;;  %v11349_v15 = vld [vmem:[#allocation41_spill] sm:$0xff] }
 0x8dc   :  { %v1220_v62 = vadd.f32 %v1181_v19, %v1136_v36  ;;  %2294 = vperm.xlu0 %5588, %v2278_v53   ;;  %v1140_v63 = vmul.f32 %v9129_v33, %v11349_v15  ;;  %v11350_v19 = vld [vmem:[#allocation124_spill] sm:$0xff]  ;;  %5744 = vrsqrt.f32 %v2232_v35  ;;  %v5739_v44 = vpop.eup %5738 }
 0x8dd   :  { %v2209_v23 = vmul.f32 0.020408163, %v11350_v19  ;;  %5746 = vrsqrt.f32 %v2221_v52  ;;  %v11356_v19 = vld [vmem:[#allocation34_spill] sm:$0xff] }
 0x8de   :  { %5076 = vst.msk [vmem:[%s10846_s2 + $0x118] sm:$0xff] %vm25_vm0, %v1220_v62  ;;  %v1129_v62 = vmul.f32 %v9052_v49, %v11351_v25  ;;  %v11353_v49 = vld [vmem:[#allocation126_spill] sm:$0xff] }
 0x8df   :  { %1987 = vperm.xlu1 %5589, %v5171_v7   ;;  %v9211_v50 = vpop.permute.xlu1 %1111  ;;  %v1191_v32 = vpop.permute.xlu0 %1190  ;;  %v11352_v7 = vld [vmem:[#allocation43_spill] sm:$0xff]  ;;  %v2223_v31 = vadd.f32 0.001, %v2209_v23  ;;  %v2211_v6 = vmul.f32 0.020408163, %v11353_v49  ;;  %v1133_v23 = vmul.f32 %v9164_v16, %v11356_v19 }
 0x8e0   :  { %v1222_v48 = vadd.f32 %v1191_v32, %v1138_v1  ;;  %2309 = vperm.xlu0 %5588, %v2281_v26   ;;  %v1142_v2 = vmul.f32 %v9142_v8, %v11352_v7  ;;  %v5218_v26 = vld [vmem:[%s10845_s1 + $0x278] sm:$0xff]  ;;  %v5177_v32 = vld [vmem:[%s10845_s1 + $0x750] sm:$0xff] }
 0x8e1   :  { %5748 = vrsqrt.f32 %v2223_v31  ;;  %v11358_v31 = vld [vmem:[#allocation36_spill] sm:$0xff] }
 0x8e2   :  { %5078 = vst.msk [vmem:[%s10846_s2 + $0x128] sm:$0xff] %vm25_vm0, %v1222_v48  ;;  %v2287_v48 = vmul.f32 %v5739_v44, %v5218_v26  ;;  %v1135_v49 = vmul.f32 %v9179_v3, %v11358_v31  ;;  %v11363_v31 = vld [vmem:[#allocation42_spill] sm:$0xff] }
 0x8e3   :  { %1997 = vperm.xlu1 %5589, %v5173_v12   ;;  %v9225_v36 = vpop.permute.xlu1 %1121  ;;  %v1201_v53 = vpop.permute.xlu0 %1200 }
 0x8e4   :  { %v1224_v33 = vadd.f32 %v1201_v53, %v1140_v63  ;;  %2319 = vperm.xlu0 %5588, %v2283_v39   ;;  %v5741_v12 = vpop.eup %5740  ;;  %v2225_v63 = vadd.f32 0.001, %v2211_v6  ;;  %v11355_v39 = vld [vmem:[#allocation128_spill] sm:$0xff]  ;;  %v5179_v53 = vld [vmem:[%s10845_s1 + $0x760] sm:$0xff] }
 0x8e5   :  { %v2213_v9 = vmul.f32 0.020408163, %v11355_v39  ;;  %v5743_v58 = vpop.eup %5742 }
 0x8e6   :  { %5080 = vst.msk [vmem:[%s10846_s2 + $0x138] sm:$0xff] %vm25_vm0, %v1224_v33  ;;  %v2289_v33 = vmul.f32 %v5741_v12, %v5220_v42  ;;  %v5745_v25 = vpop.eup %5744  ;;  %5750 = vrsqrt.f32 %v2225_v63  ;;  %v11360_v63 = vld [vmem:[#allocation38_spill] sm:$0xff] }
 0x8e7   :  { %2007 = vperm.xlu1 %5589, %v5175_v59   ;;  %v1146_v30 = vpop.permute.xlu1 %1145  ;;  %v1211_v1 = vpop.permute.xlu0 %1210  ;;  %v5210_v59 = vld [vmem:[%s10845_s1 + $0x238] sm:$0xff]  ;;  %v2227_v16 = vadd.f32 0.001, %v2213_v9  ;;  %v1137_v39 = vmul.f32 %v9194_v29, %v11360_v63  ;;  %v5213_v9 = vld [vmem:[%s10845_s1 + $0x250] sm:$0xff]  ;;  %v5226_v29 = vld [vmem:[%s10845_s1 + $0x788] sm:$0xff] }
 0x8e8   :  { %v1213_v38 = vadd.f32 %v1146_v30, %v1129_v62  ;;  %v1226_v8 = vadd.f32 %v1211_v1, %v1142_v2  ;;  %2329 = vperm.xlu0 %5588, %v2285_v41   ;;  %v5222_v2 = vld [vmem:[%s10845_s1 + $0x298] sm:$0xff]  ;;  %v11357_v41 = vld [vmem:[#allocation130_spill] sm:$0xff]  ;;  %v5747_v1 = vpop.eup %5746  ;;  %v2279_v26 = vmul.f32 %v5743_v58, %v5210_v59  ;;  %v11361_v59 = vld [vmem:[#allocation40_spill] sm:$0xff] }
 0x8e9   :  { %v2215_v44 = vmul.f32 0.020408163, %v11357_v41  ;;  %v2291_v6 = vmul.f32 %v5745_v25, %v5222_v2  ;;  %5752 = vrsqrt.f32 %v2227_v16  ;;  %v1139_v25 = vmul.f32 %v9211_v50, %v11361_v59  ;;  %v5228_v50 = vld [vmem:[%s10845_s1 + $0x798] sm:$0xff] }
 0x8ea   :  { %5069 = vst.msk [vmem:[%s10846_s2 + $0xe0] sm:$0xff] %vm25_vm0, %v1213_v38  ;;  %5082 = vst.msk [vmem:[%s10846_s2 + $0x148] sm:$0xff] %vm25_vm0, %v1226_v8  ;;  %v5211_v38 = vld [vmem:[%s10845_s1 + $0x240] sm:$0xff] }
 0x8eb   :  { %2017 = vperm.xlu1 %5589, %v5177_v32   ;;  %v1156_v35 = vpop.permute.xlu1 %1155  ;;  %v9259_v15 = vpop.permute.xlu0 %1472  ;;  %v2229_v21 = vadd.f32 0.001, %v2215_v44  ;;  %v2280_v3 = vmul.f32 %v5747_v1, %v5211_v38  ;;  %v11362_v44 = vld [vmem:[#allocation148_spill] sm:$0xff] }
 0x8ec   :  { %v1215_v52 = vadd.f32 %v1156_v35, %v1131_v22  ;;  %2339 = vperm.xlu0 %5588, %v2287_v48   ;;  %v11359_v22 = vld [vmem:[#allocation132_spill] sm:$0xff]  ;;  %v5224_v35 = vld [vmem:[%s10845_s1 + $0x778] sm:$0xff]  ;;  %v5749_v42 = vpop.eup %5748 }
 0x8ed   :  { %v2217_v48 = vmul.f32 0.020408163, %v11359_v22  ;;  %5754 = vrsqrt.f32 %v2229_v21 }
 0x8ee   :  { %5071 = vst.msk [vmem:[%s10846_s2 + $0xf0] sm:$0xff] %vm25_vm0, %v1215_v52 }
 0x8ef   :  { %2027 = vperm.xlu1 %5589, %v5179_v53   ;;  %v1166_v62 = vpop.permute.xlu1 %1165  ;;  %v9277_v7 = vpop.permute.xlu0 %1487  ;;  %v2231_v58 = vadd.f32 0.001, %v2217_v48  ;;  %v11364_v48 = vld [vmem:[#allocation149_spill] sm:$0xff] }
 0x8f0   :  { %v1217_v30 = vadd.f32 %v1166_v62, %v1133_v23  ;;  %2349 = vperm.xlu0 %5588, %v2289_v33   ;;  %v2282_v23 = vmul.f32 %v5749_v42, %v5213_v9  ;;  %v5751_v33 = vpop.eup %5750  ;;  %v5215_v62 = vld [vmem:[%s10845_s1 + $0x260] sm:$0xff] }
 0x8f1   :  { %5756 = vrsqrt.f32 %v2231_v58  ;;  %v2284_v1 = vmul.f32 %v5751_v33, %v5215_v62  ;;  %v5219_v42 = vld [vmem:[%s10845_s1 + $0x280] sm:$0xff] }
 0x8f2   :  { %5073 = vst.msk [vmem:[%s10846_s2 + $0x100] sm:$0xff] %vm25_vm0, %v1217_v30  ;;  %v2616_v30 = vmul.f32 0.020408163, %v11362_v44  ;;  %v11366_v33 = vld [vmem:[#allocation50_spill] sm:$0xff] }
 0x8f3   :  { %2299 = vperm.xlu1 %5589, %v2279_v26   ;;  %v1176_v8 = vpop.permute.xlu1 %1175  ;;  %v9292_v32 = vpop.permute.xlu0 %1497 }
 0x8f4   :  { %v1219_v12 = vadd.f32 %v1176_v8, %v1135_v49  ;;  %2359 = vperm.xlu0 %5588, %v2291_v6   ;;  %v5753_v26 = vpop.eup %5752  ;;  %v1141_v49 = vmul.f32 %v9225_v36, %v11363_v31  ;;  %v5217_v6 = vld [vmem:[%s10845_s1 + $0x270] sm:$0xff]  ;;  %v2630_v22 = vadd.f32 0.001, %v2616_v30  ;;  %v5230_v36 = vld [vmem:[%s10845_s1 + $0x7a8] sm:$0xff]  ;;  %v11367_v30 = vld [vmem:[#allocation153_spill] sm:$0xff] }
 0x8f5   :  { %v11368_v31 = vld [vmem:[#allocation51_spill] sm:$0xff] }
 0x8f6   :  { %5075 = vst.msk [vmem:[%s10846_s2 + $0x110] sm:$0xff] %vm25_vm0, %v1219_v12  ;;  %v2619_v12 = vmul.f32 0.020408163, %v11364_v48  ;;  %5758 = vrsqrt.f32 %v2630_v22  ;;  %v5223_v22 = vld [vmem:[%s10845_s1 + $0x770] sm:$0xff] }
 0x8f7   :  { %2304 = vperm.xlu1 %5589, %v2280_v3   ;;  %v1186_v52 = vpop.permute.xlu1 %1185  ;;  %v9307_v53 = vpop.permute.xlu0 %1507  ;;  %v2286_v3 = vmul.f32 %v5753_v26, %v5217_v6  ;;  %v5234_v26 = vld [vmem:[%s10845_s1 + $0x7c8] sm:$0xff] }
 0x8f8   :  { %v1221_v19 = vadd.f32 %v1186_v52, %v1137_v39  ;;  %2383 = vperm.xlu0 %5588, %v5224_v35   ;;  %v5755_v35 = vpop.eup %5754  ;;  %v2633_v9 = vadd.f32 0.001, %v2619_v12  ;;  %v11365_v52 = vld [vmem:[#allocation151_spill] sm:$0xff] }
 0x8f9   :  { %v2621_v58 = vmul.f32 0.020408163, %v11365_v52  ;;  %v11369_v12 = vld [vmem:[#allocation155_spill] sm:$0xff]  ;;  %v5265_v52 = vld [vmem:[%s10845_s1 + $0x2a0] sm:$0xff] }
 0x8fa   :  { %5077 = vst.msk [vmem:[%s10846_s2 + $0x120] sm:$0xff] %vm25_vm0, %v1221_v19  ;;  %v2288_v19 = vmul.f32 %v5755_v35, %v5219_v42  ;;  %5760 = vrsqrt.f32 %v2633_v9 }
 0x8fb   :  { %2314 = vperm.xlu1 %5589, %v2282_v23   ;;  %v1196_v2 = vpop.permute.xlu1 %1195  ;;  %v9321_v16 = vpop.permute.xlu0 %1517  ;;  %v5232_v23 = vld [vmem:[%s10845_s1 + $0x7b8] sm:$0xff]  ;;  %v2635_v44 = vadd.f32 0.001, %v2621_v58 }
 0x8fc   :  { %v1223_v41 = vadd.f32 %v1196_v2, %v1139_v25  ;;  %2393 = vperm.xlu0 %5588, %v5226_v29   ;;  %v5757_v29 = vpop.eup %5756  ;;  %v5221_v25 = vld [vmem:[%s10845_s1 + $0x290] sm:$0xff] }
 0x8fd   :  { %5762 = vrsqrt.f32 %v2635_v44 }
 0x8fe   :  { %5079 = vst.msk [vmem:[%s10846_s2 + $0x130] sm:$0xff] %vm25_vm0, %v1223_v41 }
 0x8ff   :  { %2324 = vperm.xlu1 %5589, %v2284_v1   ;;  %v1206_v38 = vpop.permute.xlu1 %1205  ;;  %v9336_v8 = vpop.permute.xlu0 %1527  ;;  %v2623_v1 = vmul.f32 0.020408163, %v11367_v30  ;;  %v5268_v30 = vld [vmem:[%s10845_s1 + $0x2b8] sm:$0xff] }
 0x900   :  { %v1225_v21 = vadd.f32 %v1206_v38, %v1141_v49  ;;  %2403 = vperm.xlu0 %5588, %v5228_v50   ;;  %v2290_v50 = vmul.f32 %v5757_v29, %v5221_v25  ;;  %v1543_v49 = vmul.f32 %v9277_v7, %v11368_v31  ;;  %v5236_v7 = vld [vmem:[%s10845_s1 + $0x7d8] sm:$0xff]  ;;  %v5759_v42 = vpop.eup %5758 }
 0x901   :  { %v2637_v48 = vadd.f32 0.001, %v2623_v1  ;;  %v2689_v25 = vmul.f32 %v5759_v42, %v5265_v52  ;;  %v11373_v1 = vld [vmem:[#allocation147_spill] sm:$0xff] }
 0x902   :  { %5081 = vst.msk [vmem:[%s10846_s2 + $0x140] sm:$0xff] %vm25_vm0, %v1225_v21  ;;  %v5270_v42 = vld [vmem:[%s10845_s1 + $0x2c8] sm:$0xff] }
 0x903   :  { %2334 = vperm.xlu1 %5589, %v2286_v3   ;;  %v1478_v63 = vpop.permute.xlu1 %1477  ;;  %v9349_v39 = vpop.permute.xlu0 %1537  ;;  %v2625_v3 = vmul.f32 0.020408163, %v11369_v12  ;;  %5764 = vrsqrt.f32 %v2637_v48 }
 0x904   :  { %2413 = vperm.xlu0 %5588, %v5230_v36   ;;  %v1541_v59 = vmul.f32 %v1478_v63, %v11366_v33  ;;  %v11370_v36 = vld [vmem:[#allocation53_spill] sm:$0xff]  ;;  %v11372_v33 = vld [vmem:[#allocation55_spill] sm:$0xff] }
 0x905   :  { %v1545_v35 = vmul.f32 %v9292_v32, %v11370_v36  ;;  %v5225_v32 = vld [vmem:[%s10845_s1 + $0x780] sm:$0xff] }
 0x907   :  { %2344 = vperm.xlu1 %5589, %v2288_v19   ;;  %v9359_v62 = vpop.permute.xlu1 %1482  ;;  %v1562_v2 = vpop.permute.xlu0 %1561  ;;  %v2639_v19 = vadd.f32 0.001, %v2625_v3  ;;  %v11376_v3 = vld [vmem:[#allocation150_spill] sm:$0xff] }
 0x908   :  { %v1625_v41 = vadd.f32 %v1562_v2, %v1541_v59  ;;  %2423 = vperm.xlu0 %5588, %v5232_v23   ;;  %v11371_v23 = vld [vmem:[#allocation157_spill] sm:$0xff]  ;;  %v1547_v59 = vmul.f32 %v9307_v53, %v11372_v33  ;;  %v5761_v2 = vpop.eup %5760  ;;  %v5227_v53 = vld [vmem:[%s10845_s1 + $0x790] sm:$0xff] }
 0x909   :  { %v2627_v29 = vmul.f32 0.020408163, %v11371_v23  ;;  %5766 = vrsqrt.f32 %v2639_v19  ;;  %v2692_v48 = vmul.f32 %v5761_v2, %v5268_v30  ;;  %v5763_v12 = vpop.eup %5762  ;;  %v5272_v2 = vld [vmem:[%s10845_s1 + $0x2d8] sm:$0xff] }
 0x90a   :  { %5126 = vst.msk [vmem:[%s10846_s2 + $0x158] sm:$0xff] %vm25_vm0, %v1625_v41  ;;  %v2694_v23 = vmul.f32 %v5763_v12, %v5270_v42  ;;  %v11382_v42 = vld [vmem:[#allocation52_spill] sm:$0xff] }
 0x90b   :  { %2354 = vperm.xlu1 %5589, %v2290_v50   ;;  %v9371_v6 = vpop.permute.xlu1 %1492  ;;  %v1572_v38 = vpop.permute.xlu0 %1571  ;;  %v2617_v50 = vmul.f32 0.020408163, %v11373_v1  ;;  %v2641_v31 = vadd.f32 0.001, %v2627_v29  ;;  %v5231_v1 = vld [vmem:[%s10845_s1 + $0x7b0] sm:$0xff] }
 0x90c   :  { %v1627_v21 = vadd.f32 %v1572_v38, %v1543_v49  ;;  %2433 = vperm.xlu0 %5588, %v5234_v26   ;;  %v11374_v49 = vld [vmem:[#allocation159_spill] sm:$0xff] }
 0x90d   :  { %v2629_v38 = vmul.f32 0.020408163, %v11374_v49  ;;  %5768 = vrsqrt.f32 %v2641_v31  ;;  %v5765_v29 = vpop.eup %5764 }
 0x90e   :  { %5128 = vst.msk [vmem:[%s10846_s2 + $0x168] sm:$0xff] %vm25_vm0, %v1627_v21  ;;  %v11375_v21 = vld [vmem:[#allocation57_spill] sm:$0xff]  ;;  %v2696_v49 = vmul.f32 %v5765_v29, %v5272_v2 }
 0x90f   :  { %2378 = vperm.xlu1 %5589, %v5223_v22   ;;  %v9386_v63 = vpop.permute.xlu1 %1502  ;;  %v1582_v9 = vpop.permute.xlu0 %1581  ;;  %v1549_v22 = vmul.f32 %v9321_v16, %v11375_v21  ;;  %v5229_v16 = vld [vmem:[%s10845_s1 + $0x7a0] sm:$0xff] }
 0x910   :  { %v1629_v58 = vadd.f32 %v1582_v9, %v1545_v35  ;;  %2443 = vperm.xlu0 %5588, %v5236_v7   ;;  %v2618_v7 = vmul.f32 0.020408163, %v11376_v3  ;;  %v2631_v9 = vadd.f32 0.001, %v2617_v50  ;;  %v11379_v50 = vld [vmem:[#allocation49_spill] sm:$0xff] }
 0x912   :  { %5130 = vst.msk [vmem:[%s10846_s2 + $0x178] sm:$0xff] %vm25_vm0, %v1629_v58  ;;  %v2643_v58 = vadd.f32 0.001, %v2629_v38  ;;  %v2632_v33 = vadd.f32 0.001, %v2618_v7  ;;  %5770 = vrsqrt.f32 %v2631_v9  ;;  %v1542_v9 = vmul.f32 %v9359_v62, %v11382_v42  ;;  %v5276_v62 = vld [vmem:[%s10845_s1 + $0x2f8] sm:$0xff] }
 0x913   :  { %2388 = vperm.xlu1 %5589, %v5225_v32   ;;  %v9401_v41 = vpop.permute.xlu1 %1512  ;;  %v1592_v44 = vpop.permute.xlu0 %1591  ;;  %v11377_v32 = vld [vmem:[#allocation59_spill] sm:$0xff] }
 0x914   :  { %v1631_v26 = vadd.f32 %v1592_v44, %v1547_v59  ;;  %2705 = vperm.xlu0 %5588, %v2689_v25   ;;  %v1551_v19 = vmul.f32 %v9336_v8, %v11377_v32  ;;  %v11378_v44 = vld [vmem:[#allocation152_spill] sm:$0xff]  ;;  %5772 = vrsqrt.f32 %v2643_v58  ;;  %v5767_v38 = vpop.eup %5766 }
 0x915   :  { %v2620_v30 = vmul.f32 0.020408163, %v11378_v44  ;;  %5774 = vrsqrt.f32 %v2632_v33  ;;  %v11384_v44 = vld [vmem:[#allocation54_spill] sm:$0xff] }
 0x916   :  { %5132 = vst.msk [vmem:[%s10846_s2 + $0x188] sm:$0xff] %vm25_vm0, %v1631_v26  ;;  %v1540_v26 = vmul.f32 %v9259_v15, %v11379_v50  ;;  %v11381_v15 = vld [vmem:[#allocation154_spill] sm:$0xff] }
 0x917   :  { %2398 = vperm.xlu1 %5589, %v5227_v53   ;;  %v9418_v36 = vpop.permute.xlu1 %1522  ;;  %v1602_v35 = vpop.permute.xlu0 %1601  ;;  %v11380_v53 = vld [vmem:[#allocation61_spill] sm:$0xff]  ;;  %v2634_v12 = vadd.f32 0.001, %v2620_v30  ;;  %v2622_v3 = vmul.f32 0.020408163, %v11381_v15  ;;  %v1544_v30 = vmul.f32 %v9371_v6, %v11384_v44 }
 0x918   :  { %v1633_v52 = vadd.f32 %v1602_v35, %v1549_v22  ;;  %2720 = vperm.xlu0 %5588, %v2692_v48   ;;  %v1553_v31 = vmul.f32 %v9349_v39, %v11380_v53  ;;  %v5274_v48 = vld [vmem:[%s10845_s1 + $0x2e8] sm:$0xff]  ;;  %v5233_v35 = vld [vmem:[%s10845_s1 + $0x7c0] sm:$0xff] }
 0x919   :  { %5776 = vrsqrt.f32 %v2634_v12  ;;  %v11386_v12 = vld [vmem:[#allocation56_spill] sm:$0xff] }
 0x91a   :  { %5134 = vst.msk [vmem:[%s10846_s2 + $0x198] sm:$0xff] %vm25_vm0, %v1633_v52  ;;  %v2698_v52 = vmul.f32 %v5767_v38, %v5274_v48  ;;  %v1546_v15 = vmul.f32 %v9386_v63, %v11386_v12  ;;  %v11391_v12 = vld [vmem:[#allocation62_spill] sm:$0xff] }
 0x91b   :  { %2408 = vperm.xlu1 %5589, %v5229_v16   ;;  %v9432_v59 = vpop.permute.xlu1 %1532  ;;  %v1612_v25 = vpop.permute.xlu0 %1611 }
 0x91c   :  { %v1635_v8 = vadd.f32 %v1612_v25, %v1551_v19  ;;  %2730 = vperm.xlu0 %5588, %v2694_v23   ;;  %v5769_v16 = vpop.eup %5768  ;;  %v2636_v19 = vadd.f32 0.001, %v2622_v3  ;;  %v11383_v23 = vld [vmem:[#allocation156_spill] sm:$0xff] }
 0x91d   :  { %v2624_v29 = vmul.f32 0.020408163, %v11383_v23  ;;  %v5235_v25 = vld [vmem:[%s10845_s1 + $0x7d0] sm:$0xff]  ;;  %v5771_v2 = vpop.eup %5770 }
 0x91e   :  { %5136 = vst.msk [vmem:[%s10846_s2 + $0x1a8] sm:$0xff] %vm25_vm0, %v1635_v8  ;;  %v2700_v8 = vmul.f32 %v5769_v16, %v5276_v62  ;;  %v5773_v50 = vpop.eup %5772  ;;  %5778 = vrsqrt.f32 %v2636_v19  ;;  %v11388_v19 = vld [vmem:[#allocation58_spill] sm:$0xff] }
 0x91f   :  { %2418 = vperm.xlu1 %5589, %v5231_v1   ;;  %v1557_v21 = vpop.permute.xlu1 %1556  ;;  %v1622_v22 = vpop.permute.xlu0 %1621  ;;  %v5266_v1 = vld [vmem:[%s10845_s1 + $0x2a8] sm:$0xff]  ;;  %v2638_v6 = vadd.f32 0.001, %v2624_v29  ;;  %v1548_v23 = vmul.f32 %v9401_v41, %v11388_v19  ;;  %v5269_v29 = vld [vmem:[%s10845_s1 + $0x2c0] sm:$0xff]  ;;  %v5282_v41 = vld [vmem:[%s10845_s1 + $0x7f8] sm:$0xff] }
 0x920   :  { %v1624_v7 = vadd.f32 %v1557_v21, %v1540_v26  ;;  %v1637_v39 = vadd.f32 %v1622_v22, %v1553_v31  ;;  %2740 = vperm.xlu0 %5588, %v2696_v49   ;;  %v5278_v31 = vld [vmem:[%s10845_s1 + $0x308] sm:$0xff]  ;;  %v11385_v49 = vld [vmem:[#allocation158_spill] sm:$0xff]  ;;  %v5775_v22 = vpop.eup %5774  ;;  %v2690_v48 = vmul.f32 %v5771_v2, %v5266_v1  ;;  %v11389_v1 = vld [vmem:[#allocation60_spill] sm:$0xff] }
 0x921   :  { %v2626_v38 = vmul.f32 0.020408163, %v11385_v49  ;;  %v2702_v3 = vmul.f32 %v5773_v50, %v5278_v31  ;;  %5780 = vrsqrt.f32 %v2638_v6  ;;  %v1550_v50 = vmul.f32 %v9418_v36, %v11389_v1  ;;  %v5284_v36 = vld [vmem:[%s10845_s1 + $0x808] sm:$0xff] }
 0x922   :  { %5125 = vst.msk [vmem:[%s10846_s2 + $0x150] sm:$0xff] %vm25_vm0, %v1624_v7  ;;  %5138 = vst.msk [vmem:[%s10846_s2 + $0x1b8] sm:$0xff] %vm25_vm0, %v1637_v39  ;;  %v5267_v7 = vld [vmem:[%s10845_s1 + $0x2b0] sm:$0xff] }
 0x923   :  { %2428 = vperm.xlu1 %5589, %v5233_v35   ;;  %v1567_v58 = vpop.permute.xlu1 %1566  ;;  %v9466_v32 = vpop.permute.xlu0 %1883  ;;  %v2640_v42 = vadd.f32 0.001, %v2626_v38  ;;  %v2691_v63 = vmul.f32 %v5775_v22, %v5267_v7  ;;  %v11390_v38 = vld [vmem:[#allocation176_spill] sm:$0xff] }
 0x924   :  { %v1626_v33 = vadd.f32 %v1567_v58, %v1542_v9  ;;  %2750 = vperm.xlu0 %5588, %v2698_v52   ;;  %v11387_v9 = vld [vmem:[#allocation160_spill] sm:$0xff]  ;;  %v5280_v58 = vld [vmem:[%s10845_s1 + $0x7e8] sm:$0xff]  ;;  %v5777_v62 = vpop.eup %5776 }
 0x925   :  { %v2628_v52 = vmul.f32 0.020408163, %v11387_v9  ;;  %5782 = vrsqrt.f32 %v2640_v42 }
 0x926   :  { %5127 = vst.msk [vmem:[%s10846_s2 + $0x160] sm:$0xff] %vm25_vm0, %v1626_v33 }
 0x927   :  { %2438 = vperm.xlu1 %5589, %v5235_v25   ;;  %v1577_v26 = vpop.permute.xlu1 %1576  ;;  %v9484_v53 = vpop.permute.xlu0 %1898  ;;  %v2642_v2 = vadd.f32 0.001, %v2628_v52  ;;  %v11392_v52 = vld [vmem:[#allocation177_spill] sm:$0xff] }
 0x928   :  { %v1628_v21 = vadd.f32 %v1577_v26, %v1544_v30  ;;  %2760 = vperm.xlu0 %5588, %v2700_v8   ;;  %v2693_v30 = vmul.f32 %v5777_v62, %v5269_v29  ;;  %v5779_v8 = vpop.eup %5778  ;;  %v5271_v26 = vld [vmem:[%s10845_s1 + $0x2d0] sm:$0xff] }
 0x929   :  { %5784 = vrsqrt.f32 %v2642_v2  ;;  %v2695_v22 = vmul.f32 %v5779_v8, %v5271_v26  ;;  %v5275_v62 = vld [vmem:[%s10845_s1 + $0x2f0] sm:$0xff]  ;;  %v11394_v8 = vld [vmem:[#allocation78_spill] sm:$0xff] }
 0x92a   :  { %5129 = vst.msk [vmem:[%s10846_s2 + $0x170] sm:$0xff] %vm25_vm0, %v1628_v21  ;;  %v3027_v21 = vmul.f32 0.020408163, %v11390_v38 }
 0x92b   :  { %2710 = vperm.xlu1 %5589, %v2690_v48   ;;  %v1587_v39 = vpop.permute.xlu1 %1586  ;;  %v9499_v35 = vpop.permute.xlu0 %1908 }
 0x92c   :  { %v1630_v16 = vadd.f32 %v1587_v39, %v1546_v15  ;;  %2770 = vperm.xlu0 %5588, %v2702_v3   ;;  %v5781_v48 = vpop.eup %5780  ;;  %v1552_v15 = vmul.f32 %v9432_v59, %v11391_v12  ;;  %v5273_v3 = vld [vmem:[%s10845_s1 + $0x2e0] sm:$0xff]  ;;  %v3041_v9 = vadd.f32 0.001, %v3027_v21  ;;  %v5286_v59 = vld [vmem:[%s10845_s1 + $0x818] sm:$0xff]  ;;  %v11396_v12 = vld [vmem:[#allocation79_spill] sm:$0xff] }
 0x92d   :  { %v11395_v21 = vld [vmem:[#allocation181_spill] sm:$0xff] }
 0x92e   :  { %5131 = vst.msk [vmem:[%s10846_s2 + $0x180] sm:$0xff] %vm25_vm0, %v1630_v16  ;;  %v3030_v16 = vmul.f32 0.020408163, %v11392_v52  ;;  %5786 = vrsqrt.f32 %v3041_v9  ;;  %v5279_v9 = vld [vmem:[%s10845_s1 + $0x7e0] sm:$0xff] }
 0x92f   :  { %2715 = vperm.xlu1 %5589, %v2691_v63   ;;  %v1597_v33 = vpop.permute.xlu1 %1596  ;;  %v9514_v25 = vpop.permute.xlu0 %1918  ;;  %v2697_v63 = vmul.f32 %v5781_v48, %v5273_v3  ;;  %v5290_v48 = vld [vmem:[%s10845_s1 + $0x838] sm:$0xff] }
 0x930   :  { %v1632_v44 = vadd.f32 %v1597_v33, %v1548_v23  ;;  %2794 = vperm.xlu0 %5588, %v5280_v58   ;;  %v5783_v58 = vpop.eup %5782  ;;  %v3044_v29 = vadd.f32 0.001, %v3030_v16  ;;  %v11393_v33 = vld [vmem:[#allocation179_spill] sm:$0xff] }
 0x931   :  { %v3032_v2 = vmul.f32 0.020408163, %v11393_v33  ;;  %v11397_v16 = vld [vmem:[#allocation183_spill] sm:$0xff]  ;;  %v5321_v33 = vld [vmem:[%s10845_s1 + $0x310] sm:$0xff] }
 0x932   :  { %5133 = vst.msk [vmem:[%s10846_s2 + $0x190] sm:$0xff] %vm25_vm0, %v1632_v44  ;;  %v2699_v44 = vmul.f32 %v5783_v58, %v5275_v62  ;;  %5788 = vrsqrt.f32 %v3044_v29 }
 0x933   :  { %2725 = vperm.xlu1 %5589, %v2693_v30   ;;  %v1607_v31 = vpop.permute.xlu1 %1606  ;;  %v9528_v6 = vpop.permute.xlu0 %1928  ;;  %v5288_v30 = vld [vmem:[%s10845_s1 + $0x828] sm:$0xff]  ;;  %v3046_v38 = vadd.f32 0.001, %v3032_v2 }
 0x934   :  { %v1634_v49 = vadd.f32 %v1607_v31, %v1550_v50  ;;  %2804 = vperm.xlu0 %5588, %v5282_v41   ;;  %v5785_v41 = vpop.eup %5784  ;;  %v5277_v50 = vld [vmem:[%s10845_s1 + $0x300] sm:$0xff] }
 0x935   :  { %5790 = vrsqrt.f32 %v3046_v38 }
 0x936   :  { %5135 = vst.msk [vmem:[%s10846_s2 + $0x1a0] sm:$0xff] %vm25_vm0, %v1634_v49 }
 0x937   :  { %2735 = vperm.xlu1 %5589, %v2695_v22   ;;  %v1617_v7 = vpop.permute.xlu1 %1616  ;;  %v9543_v39 = vpop.permute.xlu0 %1938  ;;  %v3034_v22 = vmul.f32 0.020408163, %v11395_v21  ;;  %v5324_v21 = vld [vmem:[%s10845_s1 + $0x328] sm:$0xff] }
 0x938   :  { %v1636_v42 = vadd.f32 %v1617_v7, %v1552_v15  ;;  %2814 = vperm.xlu0 %5588, %v5284_v36   ;;  %v2701_v36 = vmul.f32 %v5785_v41, %v5277_v50  ;;  %v1954_v15 = vmul.f32 %v9484_v53, %v11396_v12  ;;  %v5292_v53 = vld [vmem:[%s10845_s1 + $0x848] sm:$0xff]  ;;  %v5787_v62 = vpop.eup %5786 }
 0x939   :  { %v3048_v52 = vadd.f32 0.001, %v3034_v22  ;;  %v3100_v50 = vmul.f32 %v5787_v62, %v5321_v33  ;;  %v11401_v22 = vld [vmem:[#allocation175_spill] sm:$0xff]  ;;  %v5326_v62 = vld [vmem:[%s10845_s1 + $0x338] sm:$0xff] }
 0x93a   :  { %5137 = vst.msk [vmem:[%s10846_s2 + $0x1b0] sm:$0xff] %vm25_vm0, %v1636_v42 }
 0x93b   :  { %2745 = vperm.xlu1 %5589, %v2697_v63   ;;  %v1889_v19 = vpop.permute.xlu1 %1888  ;;  %v9556_v23 = vpop.permute.xlu0 %1948  ;;  %v3036_v63 = vmul.f32 0.020408163, %v11397_v16  ;;  %5792 = vrsqrt.f32 %v3048_v52 }
 0x93c   :  { %2824 = vperm.xlu0 %5588, %v5286_v59   ;;  %v1952_v1 = vmul.f32 %v1889_v19, %v11394_v8  ;;  %v11398_v59 = vld [vmem:[#allocation81_spill] sm:$0xff]  ;;  %v11400_v8 = vld [vmem:[#allocation83_spill] sm:$0xff] }
 0x93d   :  { %v1956_v58 = vmul.f32 %v9499_v35, %v11398_v59  ;;  %v5281_v35 = vld [vmem:[%s10845_s1 + $0x7f0] sm:$0xff] }
 0x93f   :  { %2755 = vperm.xlu1 %5589, %v2699_v44   ;;  %v9566_v26 = vpop.permute.xlu1 %1893  ;;  %v1973_v31 = vpop.permute.xlu0 %1972  ;;  %v3050_v44 = vadd.f32 0.001, %v3036_v63  ;;  %v11404_v63 = vld [vmem:[#allocation178_spill] sm:$0xff] }
 0x940   :  { %v2036_v49 = vadd.f32 %v1973_v31, %v1952_v1  ;;  %2834 = vperm.xlu0 %5588, %v5288_v30   ;;  %v11399_v30 = vld [vmem:[#allocation185_spill] sm:$0xff]  ;;  %v1958_v1 = vmul.f32 %v9514_v25, %v11400_v8  ;;  %v5789_v31 = vpop.eup %5788  ;;  %v5283_v25 = vld [vmem:[%s10845_s1 + $0x800] sm:$0xff] }
 0x941   :  { %v3038_v41 = vmul.f32 0.020408163, %v11399_v30  ;;  %5794 = vrsqrt.f32 %v3050_v44  ;;  %v3103_v52 = vmul.f32 %v5789_v31, %v5324_v21  ;;  %v5791_v16 = vpop.eup %5790  ;;  %v5328_v31 = vld [vmem:[%s10845_s1 + $0x348] sm:$0xff] }
 0x942   :  { %5182 = vst.msk [vmem:[%s10846_s2 + $0x1c8] sm:$0xff] %vm25_vm0, %v2036_v49  ;;  %v3105_v30 = vmul.f32 %v5791_v16, %v5326_v62  ;;  %v11410_v62 = vld [vmem:[#allocation80_spill] sm:$0xff] }
 0x943   :  { %2765 = vperm.xlu1 %5589, %v2701_v36   ;;  %v9578_v3 = vpop.permute.xlu1 %1903  ;;  %v1983_v7 = vpop.permute.xlu0 %1982  ;;  %v3028_v36 = vmul.f32 0.020408163, %v11401_v22  ;;  %v3052_v12 = vadd.f32 0.001, %v3038_v41  ;;  %v5287_v22 = vld [vmem:[%s10845_s1 + $0x820] sm:$0xff] }
 0x944   :  { %v2038_v42 = vadd.f32 %v1983_v7, %v1954_v15  ;;  %2844 = vperm.xlu0 %5588, %v5290_v48   ;;  %v11402_v15 = vld [vmem:[#allocation187_spill] sm:$0xff] }
 0x945   :  { %v3040_v7 = vmul.f32 0.020408163, %v11402_v15  ;;  %5796 = vrsqrt.f32 %v3052_v12  ;;  %v5793_v41 = vpop.eup %5792 }
 0x946   :  { %5184 = vst.msk [vmem:[%s10846_s2 + $0x1d8] sm:$0xff] %vm25_vm0, %v2038_v42  ;;  %v11403_v42 = vld [vmem:[#allocation85_spill] sm:$0xff]  ;;  %v3107_v15 = vmul.f32 %v5793_v41, %v5328_v31 }
 0x947   :  { %2789 = vperm.xlu1 %5589, %v5279_v9   ;;  %v9593_v19 = vpop.permute.xlu1 %1913  ;;  %v1993_v29 = vpop.permute.xlu0 %1992  ;;  %v1960_v9 = vmul.f32 %v9528_v6, %v11403_v42  ;;  %v5285_v6 = vld [vmem:[%s10845_s1 + $0x810] sm:$0xff] }
 0x948   :  { %v2040_v2 = vadd.f32 %v1993_v29, %v1956_v58  ;;  %2854 = vperm.xlu0 %5588, %v5292_v53   ;;  %v3029_v53 = vmul.f32 0.020408163, %v11404_v63  ;;  %v3042_v29 = vadd.f32 0.001, %v3028_v36  ;;  %v11407_v36 = vld [vmem:[#allocation77_spill] sm:$0xff] }
 0x94a   :  { %5186 = vst.msk [vmem:[%s10846_s2 + $0x1e8] sm:$0xff] %vm25_vm0, %v2040_v2  ;;  %v3054_v2 = vadd.f32 0.001, %v3040_v7  ;;  %v3043_v8 = vadd.f32 0.001, %v3029_v53  ;;  %5798 = vrsqrt.f32 %v3042_v29  ;;  %v1953_v29 = vmul.f32 %v9566_v26, %v11410_v62  ;;  %v5332_v26 = vld [vmem:[%s10845_s1 + $0x368] sm:$0xff] }
 0x94b   :  { %2799 = vperm.xlu1 %5589, %v5281_v35   ;;  %v9608_v49 = vpop.permute.xlu1 %1923  ;;  %v2003_v38 = vpop.permute.xlu0 %2002  ;;  %v11405_v35 = vld [vmem:[#allocation87_spill] sm:$0xff] }
 0x94c   :  { %v2042_v48 = vadd.f32 %v2003_v38, %v1958_v1  ;;  %3116 = vperm.xlu0 %5588, %v3100_v50   ;;  %v1962_v44 = vmul.f32 %v9543_v39, %v11405_v35  ;;  %v11406_v38 = vld [vmem:[#allocation180_spill] sm:$0xff]  ;;  %5800 = vrsqrt.f32 %v3054_v2  ;;  %v5795_v7 = vpop.eup %5794 }
 0x94d   :  { %v3031_v21 = vmul.f32 0.020408163, %v11406_v38  ;;  %5802 = vrsqrt.f32 %v3043_v8  ;;  %v11412_v38 = vld [vmem:[#allocation82_spill] sm:$0xff] }
 0x94e   :  { %5188 = vst.msk [vmem:[%s10846_s2 + $0x1f8] sm:$0xff] %vm25_vm0, %v2042_v48  ;;  %v1951_v48 = vmul.f32 %v9466_v32, %v11407_v36  ;;  %v11409_v32 = vld [vmem:[#allocation182_spill] sm:$0xff] }
 0x94f   :  { %2809 = vperm.xlu1 %5589, %v5283_v25   ;;  %v9625_v59 = vpop.permute.xlu1 %1933  ;;  %v2013_v58 = vpop.permute.xlu0 %2012  ;;  %v11408_v25 = vld [vmem:[#allocation89_spill] sm:$0xff]  ;;  %v3045_v16 = vadd.f32 0.001, %v3031_v21  ;;  %v3033_v63 = vmul.f32 0.020408163, %v11409_v32  ;;  %v1955_v21 = vmul.f32 %v9578_v3, %v11412_v38 }
 0x950   :  { %v2044_v33 = vadd.f32 %v2013_v58, %v1960_v9  ;;  %3131 = vperm.xlu0 %5588, %v3103_v52   ;;  %v1964_v12 = vmul.f32 %v9556_v23, %v11408_v25  ;;  %v5330_v52 = vld [vmem:[%s10845_s1 + $0x358] sm:$0xff]  ;;  %v5289_v58 = vld [vmem:[%s10845_s1 + $0x830] sm:$0xff] }
 0x951   :  { %5804 = vrsqrt.f32 %v3045_v16  ;;  %v11414_v16 = vld [vmem:[#allocation84_spill] sm:$0xff] }
 0x952   :  { %5190 = vst.msk [vmem:[%s10846_s2 + $0x208] sm:$0xff] %vm25_vm0, %v2044_v33  ;;  %v3109_v33 = vmul.f32 %v5795_v7, %v5330_v52  ;;  %v1957_v32 = vmul.f32 %v9593_v19, %v11414_v16  ;;  %v11419_v16 = vld [vmem:[#allocation90_spill] sm:$0xff] }
 0x953   :  { %2819 = vperm.xlu1 %5589, %v5285_v6   ;;  %v9639_v1 = vpop.permute.xlu1 %1943  ;;  %v2023_v50 = vpop.permute.xlu0 %2022 }
 0x954   :  { %v2046_v39 = vadd.f32 %v2023_v50, %v1962_v44  ;;  %3141 = vperm.xlu0 %5588, %v3105_v30   ;;  %v5797_v6 = vpop.eup %5796  ;;  %v3047_v44 = vadd.f32 0.001, %v3033_v63  ;;  %v11411_v30 = vld [vmem:[#allocation184_spill] sm:$0xff]  ;;  %v5291_v50 = vld [vmem:[%s10845_s1 + $0x840] sm:$0xff] }
 0x955   :  { %v3035_v41 = vmul.f32 0.020408163, %v11411_v30  ;;  %v5799_v31 = vpop.eup %5798 }
 0x956   :  { %5192 = vst.msk [vmem:[%s10846_s2 + $0x218] sm:$0xff] %vm25_vm0, %v2046_v39  ;;  %v3111_v39 = vmul.f32 %v5797_v6, %v5332_v26  ;;  %v5801_v36 = vpop.eup %5800  ;;  %5806 = vrsqrt.f32 %v3047_v44  ;;  %v11416_v44 = vld [vmem:[#allocation86_spill] sm:$0xff] }
 0x957   :  { %2829 = vperm.xlu1 %5589, %v5287_v22   ;;  %v1968_v42 = vpop.permute.xlu1 %1967  ;;  %v2033_v9 = vpop.permute.xlu0 %2032  ;;  %v5322_v22 = vld [vmem:[%s10845_s1 + $0x318] sm:$0xff]  ;;  %v3049_v3 = vadd.f32 0.001, %v3035_v41  ;;  %v1959_v30 = vmul.f32 %v9608_v49, %v11416_v44  ;;  %v5325_v41 = vld [vmem:[%s10845_s1 + $0x330] sm:$0xff]  ;;  %v5338_v49 = vld [vmem:[%s10845_s1 + $0x868] sm:$0xff] }
 0x958   :  { %v2035_v53 = vadd.f32 %v1968_v42, %v1951_v48  ;;  %v2048_v23 = vadd.f32 %v2033_v9, %v1964_v12  ;;  %3151 = vperm.xlu0 %5588, %v3107_v15   ;;  %v5334_v12 = vld [vmem:[%s10845_s1 + $0x378] sm:$0xff]  ;;  %v11413_v15 = vld [vmem:[#allocation186_spill] sm:$0xff]  ;;  %v5803_v9 = vpop.eup %5802  ;;  %v3101_v52 = vmul.f32 %v5799_v31, %v5322_v22  ;;  %v11417_v22 = vld [vmem:[#allocation88_spill] sm:$0xff] }
 0x959   :  { %v3037_v7 = vmul.f32 0.020408163, %v11413_v15  ;;  %v3113_v63 = vmul.f32 %v5801_v36, %v5334_v12  ;;  %5808 = vrsqrt.f32 %v3049_v3  ;;  %v1961_v36 = vmul.f32 %v9625_v59, %v11417_v22  ;;  %v5340_v59 = vld [vmem:[%s10845_s1 + $0x878] sm:$0xff] }
 0x95a   :  { %5181 = vst.msk [vmem:[%s10846_s2 + $0x1c0] sm:$0xff] %vm25_vm0, %v2035_v53  ;;  %5194 = vst.msk [vmem:[%s10846_s2 + $0x228] sm:$0xff] %vm25_vm0, %v2048_v23  ;;  %v5323_v53 = vld [vmem:[%s10845_s1 + $0x320] sm:$0xff] }
 0x95b   :  { %2839 = vperm.xlu1 %5589, %v5289_v58   ;;  %v1978_v2 = vpop.permute.xlu1 %1977  ;;  %v9673_v35 = vpop.permute.xlu0 %2294  ;;  %v3051_v62 = vadd.f32 0.001, %v3037_v7  ;;  %v3102_v19 = vmul.f32 %v5803_v9, %v5323_v53  ;;  %v11418_v7 = vld [vmem:[#allocation204_spill] sm:$0xff] }
 0x95c   :  { %v2037_v8 = vadd.f32 %v1978_v2, %v1953_v29  ;;  %3161 = vperm.xlu0 %5588, %v3109_v33   ;;  %v11415_v29 = vld [vmem:[#allocation188_spill] sm:$0xff]  ;;  %v5336_v2 = vld [vmem:[%s10845_s1 + $0x858] sm:$0xff]  ;;  %v5805_v26 = vpop.eup %5804 }
 0x95d   :  { %v3039_v33 = vmul.f32 0.020408163, %v11415_v29  ;;  %5810 = vrsqrt.f32 %v3051_v62 }
 0x95e   :  { %5183 = vst.msk [vmem:[%s10846_s2 + $0x1d0] sm:$0xff] %vm25_vm0, %v2037_v8 }
 0x95f   :  { %2849 = vperm.xlu1 %5589, %v5291_v50   ;;  %v1988_v48 = vpop.permute.xlu1 %1987  ;;  %v9691_v25 = vpop.permute.xlu0 %2309  ;;  %v3053_v31 = vadd.f32 0.001, %v3039_v33  ;;  %v11420_v33 = vld [vmem:[#allocation205_spill] sm:$0xff] }
 0x960   :  { %v2039_v42 = vadd.f32 %v1988_v48, %v1955_v21  ;;  %3171 = vperm.xlu0 %5588, %v3111_v39   ;;  %v3104_v21 = vmul.f32 %v5805_v26, %v5325_v41  ;;  %v5807_v39 = vpop.eup %5806  ;;  %v5327_v48 = vld [vmem:[%s10845_s1 + $0x340] sm:$0xff] }
 0x961   :  { %5812 = vrsqrt.f32 %v3053_v31  ;;  %v3106_v9 = vmul.f32 %v5807_v39, %v5327_v48  ;;  %v5331_v26 = vld [vmem:[%s10845_s1 + $0x360] sm:$0xff] }
 0x962   :  { %5185 = vst.msk [vmem:[%s10846_s2 + $0x1e0] sm:$0xff] %vm25_vm0, %v2039_v42  ;;  %v3438_v42 = vmul.f32 0.020408163, %v11418_v7  ;;  %v11422_v39 = vld [vmem:[#allocation106_spill] sm:$0xff] }
 0x963   :  { %3121 = vperm.xlu1 %5589, %v3101_v52   ;;  %v1998_v23 = vpop.permute.xlu1 %1997  ;;  %v9706_v58 = vpop.permute.xlu0 %2319 }
 0x964   :  { %v2041_v6 = vadd.f32 %v1998_v23, %v1957_v32  ;;  %3181 = vperm.xlu0 %5588, %v3113_v63   ;;  %v5809_v52 = vpop.eup %5808  ;;  %v1963_v32 = vmul.f32 %v9639_v1, %v11419_v16  ;;  %v5329_v63 = vld [vmem:[%s10845_s1 + $0x350] sm:$0xff]  ;;  %v3452_v29 = vadd.f32 0.001, %v3438_v42  ;;  %v5342_v1 = vld [vmem:[%s10845_s1 + $0x888] sm:$0xff]  ;;  %v11423_v42 = vld [vmem:[#allocation209_spill] sm:$0xff] }
 0x965   :  { %v11424_v16 = vld [vmem:[#allocation107_spill] sm:$0xff] }
 0x966   :  { %5187 = vst.msk [vmem:[%s10846_s2 + $0x1f0] sm:$0xff] %vm25_vm0, %v2041_v6  ;;  %v3441_v6 = vmul.f32 0.020408163, %v11420_v33  ;;  %5814 = vrsqrt.f32 %v3452_v29  ;;  %v5335_v29 = vld [vmem:[%s10845_s1 + $0x850] sm:$0xff] }
 0x967   :  { %3126 = vperm.xlu1 %5589, %v3102_v19   ;;  %v2008_v8 = vpop.permute.xlu1 %2007  ;;  %v9721_v50 = vpop.permute.xlu0 %2329  ;;  %v3108_v19 = vmul.f32 %v5809_v52, %v5329_v63  ;;  %v5346_v52 = vld [vmem:[%s10845_s1 + $0x8a8] sm:$0xff] }
 0x968   :  { %v2043_v38 = vadd.f32 %v2008_v8, %v1959_v30  ;;  %3205 = vperm.xlu0 %5588, %v5336_v2   ;;  %v5811_v2 = vpop.eup %5810  ;;  %v3455_v41 = vadd.f32 0.001, %v3441_v6  ;;  %v11421_v8 = vld [vmem:[#allocation207_spill] sm:$0xff] }
 0x969   :  { %v3443_v31 = vmul.f32 0.020408163, %v11421_v8  ;;  %v11425_v6 = vld [vmem:[#allocation211_spill] sm:$0xff]  ;;  %v5377_v8 = vld [vmem:[%s10845_s1 + $0x380] sm:$0xff] }
 0x96a   :  { %5189 = vst.msk [vmem:[%s10846_s2 + $0x200] sm:$0xff] %vm25_vm0, %v2043_v38  ;;  %v3110_v38 = vmul.f32 %v5811_v2, %v5331_v26  ;;  %5816 = vrsqrt.f32 %v3455_v41 }
 0x96b   :  { %3136 = vperm.xlu1 %5589, %v3104_v21   ;;  %v2018_v12 = vpop.permute.xlu1 %2017  ;;  %v9735_v3 = vpop.permute.xlu0 %2339  ;;  %v5344_v21 = vld [vmem:[%s10845_s1 + $0x898] sm:$0xff]  ;;  %v3457_v7 = vadd.f32 0.001, %v3443_v31 }
 0x96c   :  { %v2045_v15 = vadd.f32 %v2018_v12, %v1961_v36  ;;  %3215 = vperm.xlu0 %5588, %v5338_v49   ;;  %v5813_v49 = vpop.eup %5812  ;;  %v5333_v36 = vld [vmem:[%s10845_s1 + $0x370] sm:$0xff] }
 0x96d   :  { %5818 = vrsqrt.f32 %v3457_v7 }
 0x96e   :  { %5191 = vst.msk [vmem:[%s10846_s2 + $0x210] sm:$0xff] %vm25_vm0, %v2045_v15 }
 0x96f   :  { %3146 = vperm.xlu1 %5589, %v3106_v9   ;;  %v2028_v53 = vpop.permute.xlu1 %2027  ;;  %v9750_v23 = vpop.permute.xlu0 %2349  ;;  %v3445_v9 = vmul.f32 0.020408163, %v11423_v42  ;;  %v5380_v42 = vld [vmem:[%s10845_s1 + $0x398] sm:$0xff] }
 0x970   :  { %v2047_v62 = vadd.f32 %v2028_v53, %v1963_v32  ;;  %3225 = vperm.xlu0 %5588, %v5340_v59   ;;  %v3112_v59 = vmul.f32 %v5813_v49, %v5333_v36  ;;  %v2365_v32 = vmul.f32 %v9691_v25, %v11424_v16  ;;  %v5348_v25 = vld [vmem:[%s10845_s1 + $0x8b8] sm:$0xff]  ;;  %v5815_v26 = vpop.eup %5814 }
 0x971   :  { %v3459_v33 = vadd.f32 0.001, %v3445_v9  ;;  %v3511_v36 = vmul.f32 %v5815_v26, %v5377_v8  ;;  %v11429_v9 = vld [vmem:[#allocation203_spill] sm:$0xff] }
 0x972   :  { %5193 = vst.msk [vmem:[%s10846_s2 + $0x220] sm:$0xff] %vm25_vm0, %v2047_v62  ;;  %v5382_v26 = vld [vmem:[%s10845_s1 + $0x3a8] sm:$0xff] }
 0x973   :  { %3156 = vperm.xlu1 %5589, %v3108_v19   ;;  %v2300_v44 = vpop.permute.xlu1 %2299  ;;  %v9763_v30 = vpop.permute.xlu0 %2359  ;;  %v3447_v19 = vmul.f32 0.020408163, %v11425_v6  ;;  %5820 = vrsqrt.f32 %v3459_v33 }
 0x974   :  { %3235 = vperm.xlu0 %5588, %v5342_v1   ;;  %v2363_v22 = vmul.f32 %v2300_v44, %v11422_v39  ;;  %v11426_v1 = vld [vmem:[#allocation109_spill] sm:$0xff]  ;;  %v11428_v39 = vld [vmem:[#allocation111_spill] sm:$0xff] }
 0x975   :  { %v2367_v2 = vmul.f32 %v9706_v58, %v11426_v1  ;;  %v5337_v58 = vld [vmem:[%s10845_s1 + $0x860] sm:$0xff] }
 0x977   :  { %3166 = vperm.xlu1 %5589, %v3110_v38   ;;  %v9773_v48 = vpop.permute.xlu1 %2304  ;;  %v2384_v12 = vpop.permute.xlu0 %2383  ;;  %v3461_v38 = vadd.f32 0.001, %v3447_v19  ;;  %v11432_v19 = vld [vmem:[#allocation206_spill] sm:$0xff] }
 0x978   :  { %v2447_v15 = vadd.f32 %v2384_v12, %v2363_v22  ;;  %3245 = vperm.xlu0 %5588, %v5344_v21   ;;  %v11427_v21 = vld [vmem:[#allocation213_spill] sm:$0xff]  ;;  %v2369_v22 = vmul.f32 %v9721_v50, %v11428_v39  ;;  %v5817_v12 = vpop.eup %5816  ;;  %v5339_v50 = vld [vmem:[%s10845_s1 + $0x870] sm:$0xff] }
 0x979   :  { %v3449_v49 = vmul.f32 0.020408163, %v11427_v21  ;;  %5822 = vrsqrt.f32 %v3461_v38  ;;  %v3514_v33 = vmul.f32 %v5817_v12, %v5380_v42  ;;  %v5819_v6 = vpop.eup %5818  ;;  %v5384_v12 = vld [vmem:[%s10845_s1 + $0x3b8] sm:$0xff] }
 0x97a   :  { %5238 = vst.msk [vmem:[%s10846_s2 + $0x238] sm:$0xff] %vm25_vm0, %v2447_v15  ;;  %v3516_v21 = vmul.f32 %v5819_v6, %v5382_v26  ;;  %v11438_v26 = vld [vmem:[#allocation108_spill] sm:$0xff] }
 0x97b   :  { %3176 = vperm.xlu1 %5589, %v3112_v59   ;;  %v9785_v63 = vpop.permute.xlu1 %2314  ;;  %v2394_v53 = vpop.permute.xlu0 %2393  ;;  %v3439_v59 = vmul.f32 0.020408163, %v11429_v9  ;;  %v3463_v16 = vadd.f32 0.001, %v3449_v49  ;;  %v5343_v9 = vld [vmem:[%s10845_s1 + $0x890] sm:$0xff] }
 0x97c   :  { %v2449_v62 = vadd.f32 %v2394_v53, %v2365_v32  ;;  %3255 = vperm.xlu0 %5588, %v5346_v52   ;;  %v11430_v32 = vld [vmem:[#allocation215_spill] sm:$0xff] }
 0x97d   :  { %v3451_v53 = vmul.f32 0.020408163, %v11430_v32  ;;  %5824 = vrsqrt.f32 %v3463_v16  ;;  %v5821_v49 = vpop.eup %5820 }
 0x97e   :  { %5240 = vst.msk [vmem:[%s10846_s2 + $0x248] sm:$0xff] %vm25_vm0, %v2449_v62  ;;  %v11431_v62 = vld [vmem:[#allocation113_spill] sm:$0xff]  ;;  %v3518_v32 = vmul.f32 %v5821_v49, %v5384_v12 }
 0x97f   :  { %3200 = vperm.xlu1 %5589, %v5335_v29   ;;  %v9800_v44 = vpop.permute.xlu1 %2324  ;;  %v2404_v41 = vpop.permute.xlu0 %2403  ;;  %v2371_v29 = vmul.f32 %v9735_v3, %v11431_v62  ;;  %v5341_v3 = vld [vmem:[%s10845_s1 + $0x880] sm:$0xff] }
 0x980   :  { %v2451_v31 = vadd.f32 %v2404_v41, %v2367_v2  ;;  %3265 = vperm.xlu0 %5588, %v5348_v25   ;;  %v3440_v25 = vmul.f32 0.020408163, %v11432_v19  ;;  %v3453_v41 = vadd.f32 0.001, %v3439_v59  ;;  %v11435_v59 = vld [vmem:[#allocation105_spill] sm:$0xff] }
 0x982   :  { %5242 = vst.msk [vmem:[%s10846_s2 + $0x258] sm:$0xff] %vm25_vm0, %v2451_v31  ;;  %v3465_v31 = vadd.f32 0.001, %v3451_v53  ;;  %v3454_v39 = vadd.f32 0.001, %v3440_v25  ;;  %5826 = vrsqrt.f32 %v3453_v41  ;;  %v2364_v41 = vmul.f32 %v9773_v48, %v11438_v26  ;;  %v5388_v48 = vld [vmem:[%s10845_s1 + $0x3d8] sm:$0xff] }
 0x983   :  { %3210 = vperm.xlu1 %5589, %v5337_v58   ;;  %v9815_v15 = vpop.permute.xlu1 %2334  ;;  %v2414_v7 = vpop.permute.xlu0 %2413  ;;  %v11433_v58 = vld [vmem:[#allocation115_spill] sm:$0xff] }
 0x984   :  { %v2453_v52 = vadd.f32 %v2414_v7, %v2369_v22  ;;  %3527 = vperm.xlu0 %5588, %v3511_v36   ;;  %v2373_v38 = vmul.f32 %v9750_v23, %v11433_v58  ;;  %v11434_v7 = vld [vmem:[#allocation208_spill] sm:$0xff]  ;;  %5828 = vrsqrt.f32 %v3465_v31  ;;  %v5823_v53 = vpop.eup %5822 }
 0x985   :  { %v3442_v42 = vmul.f32 0.020408163, %v11434_v7  ;;  %5830 = vrsqrt.f32 %v3454_v39  ;;  %v11440_v7 = vld [vmem:[#allocation110_spill] sm:$0xff] }
 0x986   :  { %5244 = vst.msk [vmem:[%s10846_s2 + $0x268] sm:$0xff] %vm25_vm0, %v2453_v52  ;;  %v2362_v52 = vmul.f32 %v9673_v35, %v11435_v59  ;;  %v11437_v35 = vld [vmem:[#allocation210_spill] sm:$0xff] }
 0x987   :  { %3220 = vperm.xlu1 %5589, %v5339_v50   ;;  %v9832_v1 = vpop.permute.xlu1 %2344  ;;  %v2424_v2 = vpop.permute.xlu0 %2423  ;;  %v11436_v50 = vld [vmem:[#allocation117_spill] sm:$0xff]  ;;  %v3456_v6 = vadd.f32 0.001, %v3442_v42  ;;  %v3444_v19 = vmul.f32 0.020408163, %v11437_v35  ;;  %v2366_v42 = vmul.f32 %v9785_v63, %v11440_v7 }
 0x988   :  { %v2455_v8 = vadd.f32 %v2424_v2, %v2371_v29  ;;  %3542 = vperm.xlu0 %5588, %v3514_v33   ;;  %v2375_v16 = vmul.f32 %v9763_v30, %v11436_v50  ;;  %v5386_v33 = vld [vmem:[%s10845_s1 + $0x3c8] sm:$0xff]  ;;  %v5345_v2 = vld [vmem:[%s10845_s1 + $0x8a0] sm:$0xff] }
 0x989   :  { %5832 = vrsqrt.f32 %v3456_v6  ;;  %v11442_v6 = vld [vmem:[#allocation112_spill] sm:$0xff] }
 0x98a   :  { %5246 = vst.msk [vmem:[%s10846_s2 + $0x278] sm:$0xff] %vm25_vm0, %v2455_v8  ;;  %v3520_v8 = vmul.f32 %v5823_v53, %v5386_v33  ;;  %v2368_v35 = vmul.f32 %v9800_v44, %v11442_v6  ;;  %v11447_v6 = vld [vmem:[#allocation118_spill] sm:$0xff] }
 0x98b   :  { %3230 = vperm.xlu1 %5589, %v5341_v3   ;;  %v9846_v22 = vpop.permute.xlu1 %2354  ;;  %v2434_v36 = vpop.permute.xlu0 %2433 }
 0x98c   :  { %v2457_v23 = vadd.f32 %v2434_v36, %v2373_v38  ;;  %3552 = vperm.xlu0 %5588, %v3516_v21   ;;  %v5825_v3 = vpop.eup %5824  ;;  %v3458_v38 = vadd.f32 0.001, %v3444_v19  ;;  %v11439_v21 = vld [vmem:[#allocation212_spill] sm:$0xff] }
 0x98d   :  { %v3446_v49 = vmul.f32 0.020408163, %v11439_v21  ;;  %v5347_v36 = vld [vmem:[%s10845_s1 + $0x8b0] sm:$0xff]  ;;  %v5827_v12 = vpop.eup %5826 }
 0x98e   :  { %5248 = vst.msk [vmem:[%s10846_s2 + $0x288] sm:$0xff] %vm25_vm0, %v2457_v23  ;;  %v3522_v23 = vmul.f32 %v5825_v3, %v5388_v48  ;;  %v5829_v59 = vpop.eup %5828  ;;  %5834 = vrsqrt.f32 %v3458_v38  ;;  %v11444_v38 = vld [vmem:[#allocation114_spill] sm:$0xff] }
 0x98f   :  { %3240 = vperm.xlu1 %5589, %v5343_v9   ;;  %v2379_v62 = vpop.permute.xlu1 %2378  ;;  %v2444_v29 = vpop.permute.xlu0 %2443  ;;  %v5378_v9 = vld [vmem:[%s10845_s1 + $0x388] sm:$0xff]  ;;  %v3460_v63 = vadd.f32 0.001, %v3446_v49  ;;  %v2370_v21 = vmul.f32 %v9815_v15, %v11444_v38  ;;  %v5381_v49 = vld [vmem:[%s10845_s1 + $0x3a0] sm:$0xff]  ;;  %v5394_v15 = vld [vmem:[%s10845_s1 + $0x8d8] sm:$0xff] }
 0x990   :  { %v2446_v25 = vadd.f32 %v2379_v62, %v2362_v52  ;;  %v2459_v30 = vadd.f32 %v2444_v29, %v2375_v16  ;;  %3562 = vperm.xlu0 %5588, %v3518_v32   ;;  %v5390_v16 = vld [vmem:[%s10845_s1 + $0x3e8] sm:$0xff]  ;;  %v11441_v32 = vld [vmem:[#allocation214_spill] sm:$0xff]  ;;  %v5831_v29 = vpop.eup %5830  ;;  %v3512_v33 = vmul.f32 %v5827_v12, %v5378_v9  ;;  %v11445_v9 = vld [vmem:[#allocation116_spill] sm:$0xff] }
 0x991   :  { %v3448_v53 = vmul.f32 0.020408163, %v11441_v32  ;;  %v3524_v19 = vmul.f32 %v5829_v59, %v5390_v16  ;;  %5836 = vrsqrt.f32 %v3460_v63  ;;  %v2372_v59 = vmul.f32 %v9832_v1, %v11445_v9  ;;  %v5396_v1 = vld [vmem:[%s10845_s1 + $0x8e8] sm:$0xff] }
 0x992   :  { %5237 = vst.msk [vmem:[%s10846_s2 + $0x230] sm:$0xff] %vm25_vm0, %v2446_v25  ;;  %5250 = vst.msk [vmem:[%s10846_s2 + $0x298] sm:$0xff] %vm25_vm0, %v2459_v30  ;;  %v5379_v25 = vld [vmem:[%s10845_s1 + $0x390] sm:$0xff] }
 0x993   :  { %3250 = vperm.xlu1 %5589, %v5345_v2   ;;  %v2389_v31 = vpop.permute.xlu1 %2388  ;;  %v9880_v58 = vpop.permute.xlu0 %2705  ;;  %v3462_v26 = vadd.f32 0.001, %v3448_v53  ;;  %v3513_v44 = vmul.f32 %v5831_v29, %v5379_v25  ;;  %v11446_v53 = vld [vmem:[#allocation232_spill] sm:$0xff] }
 0x994   :  { %v2448_v39 = vadd.f32 %v2389_v31, %v2364_v41  ;;  %3572 = vperm.xlu0 %5588, %v3520_v8   ;;  %v11443_v41 = vld [vmem:[#allocation216_spill] sm:$0xff]  ;;  %v5392_v31 = vld [vmem:[%s10845_s1 + $0x8c8] sm:$0xff]  ;;  %v5833_v48 = vpop.eup %5832 }
 0x995   :  { %v3450_v8 = vmul.f32 0.020408163, %v11443_v41  ;;  %5838 = vrsqrt.f32 %v3462_v26 }
 0x996   :  { %5239 = vst.msk [vmem:[%s10846_s2 + $0x240] sm:$0xff] %vm25_vm0, %v2448_v39 }
 0x997   :  { %3260 = vperm.xlu1 %5589, %v5347_v36   ;;  %v2399_v52 = vpop.permute.xlu1 %2398  ;;  %v9898_v50 = vpop.permute.xlu0 %2720  ;;  %v3464_v12 = vadd.f32 0.001, %v3450_v8  ;;  %v11448_v8 = vld [vmem:[#allocation233_spill] sm:$0xff] }
 0x998   :  { %v2450_v62 = vadd.f32 %v2399_v52, %v2366_v42  ;;  %3582 = vperm.xlu0 %5588, %v3522_v23   ;;  %v3515_v42 = vmul.f32 %v5833_v48, %v5381_v49  ;;  %v5835_v23 = vpop.eup %5834  ;;  %v5383_v52 = vld [vmem:[%s10845_s1 + $0x3b0] sm:$0xff] }
 0x999   :  { %5840 = vrsqrt.f32 %v3464_v12  ;;  %v3517_v29 = vmul.f32 %v5835_v23, %v5383_v52  ;;  %v5387_v48 = vld [vmem:[%s10845_s1 + $0x3d0] sm:$0xff]  ;;  %v11450_v23 = vld [vmem:[#allocation134_spill] sm:$0xff] }
 0x99a   :  { %5241 = vst.msk [vmem:[%s10846_s2 + $0x250] sm:$0xff] %vm25_vm0, %v2450_v62  ;;  %v3849_v62 = vmul.f32 0.020408163, %v11446_v53 }
 0x99b   :  { %3532 = vperm.xlu1 %5589, %v3512_v33   ;;  %v2409_v30 = vpop.permute.xlu1 %2408  ;;  %v9913_v2 = vpop.permute.xlu0 %2730 }
 0x99c   :  { %v2452_v3 = vadd.f32 %v2409_v30, %v2368_v35  ;;  %3592 = vperm.xlu0 %5588, %v3524_v19   ;;  %v5837_v33 = vpop.eup %5836  ;;  %v2374_v35 = vmul.f32 %v9846_v22, %v11447_v6  ;;  %v5385_v19 = vld [vmem:[%s10845_s1 + $0x3c0] sm:$0xff]  ;;  %v3863_v41 = vadd.f32 0.001, %v3849_v62  ;;  %v5398_v22 = vld [vmem:[%s10845_s1 + $0x8f8] sm:$0xff]  ;;  %v11452_v6 = vld [vmem:[#allocation135_spill] sm:$0xff] }
 0x99d   :  { %v11451_v62 = vld [vmem:[#allocation237_spill] sm:$0xff] }
 0x99e   :  { %5243 = vst.msk [vmem:[%s10846_s2 + $0x260] sm:$0xff] %vm25_vm0, %v2452_v3  ;;  %v3852_v3 = vmul.f32 0.020408163, %v11448_v8  ;;  %5842 = vrsqrt.f32 %v3863_v41  ;;  %v5391_v41 = vld [vmem:[%s10845_s1 + $0x8c0] sm:$0xff] }
 0x99f   :  { %3537 = vperm.xlu1 %5589, %v3513_v44   ;;  %v2419_v39 = vpop.permute.xlu1 %2418  ;;  %v9928_v36 = vpop.permute.xlu0 %2740  ;;  %v3519_v44 = vmul.f32 %v5837_v33, %v5385_v19  ;;  %v5402_v33 = vld [vmem:[%s10845_s1 + $0x918] sm:$0xff] }
 0x9a0   :  { %v2454_v7 = vadd.f32 %v2419_v39, %v2370_v21  ;;  %3616 = vperm.xlu0 %5588, %v5392_v31   ;;  %v5839_v31 = vpop.eup %5838  ;;  %v3866_v49 = vadd.f32 0.001, %v3852_v3  ;;  %v11449_v39 = vld [vmem:[#allocation235_spill] sm:$0xff] }
 0x9a1   :  { %v3854_v12 = vmul.f32 0.020408163, %v11449_v39  ;;  %v11453_v3 = vld [vmem:[#allocation239_spill] sm:$0xff]  ;;  %v5433_v39 = vld [vmem:[%s10845_s1 + $0x3f0] sm:$0xff] }
 0x9a2   :  { %5245 = vst.msk [vmem:[%s10846_s2 + $0x270] sm:$0xff] %vm25_vm0, %v2454_v7  ;;  %v3521_v7 = vmul.f32 %v5839_v31, %v5387_v48  ;;  %5844 = vrsqrt.f32 %v3866_v49 }
 0x9a3   :  { %3547 = vperm.xlu1 %5589, %v3515_v42   ;;  %v2429_v16 = vpop.permute.xlu1 %2428  ;;  %v9942_v63 = vpop.permute.xlu0 %2750  ;;  %v5400_v42 = vld [vmem:[%s10845_s1 + $0x908] sm:$0xff]  ;;  %v3868_v53 = vadd.f32 0.001, %v3854_v12 }
 0x9a4   :  { %v2456_v32 = vadd.f32 %v2429_v16, %v2372_v59  ;;  %3626 = vperm.xlu0 %5588, %v5394_v15   ;;  %v5841_v15 = vpop.eup %5840  ;;  %v5389_v59 = vld [vmem:[%s10845_s1 + $0x3e0] sm:$0xff] }
 0x9a5   :  { %5846 = vrsqrt.f32 %v3868_v53 }
 0x9a6   :  { %5247 = vst.msk [vmem:[%s10846_s2 + $0x280] sm:$0xff] %vm25_vm0, %v2456_v32 }
 0x9a7   :  { %3557 = vperm.xlu1 %5589, %v3517_v29   ;;  %v2439_v25 = vpop.permute.xlu1 %2438  ;;  %v9957_v30 = vpop.permute.xlu0 %2760  ;;  %v3856_v29 = vmul.f32 0.020408163, %v11451_v62  ;;  %v5436_v62 = vld [vmem:[%s10845_s1 + $0x408] sm:$0xff] }
 0x9a8   :  { %v2458_v26 = vadd.f32 %v2439_v25, %v2374_v35  ;;  %3636 = vperm.xlu0 %5588, %v5396_v1   ;;  %v3523_v1 = vmul.f32 %v5841_v15, %v5389_v59  ;;  %v2776_v35 = vmul.f32 %v9898_v50, %v11452_v6  ;;  %v5404_v50 = vld [vmem:[%s10845_s1 + $0x928] sm:$0xff]  ;;  %v5843_v48 = vpop.eup %5842 }
 0x9a9   :  { %v3870_v8 = vadd.f32 0.001, %v3856_v29  ;;  %v3922_v59 = vmul.f32 %v5843_v48, %v5433_v39  ;;  %v11457_v29 = vld [vmem:[#allocation231_spill] sm:$0xff]  ;;  %v5438_v48 = vld [vmem:[%s10845_s1 + $0x418] sm:$0xff] }
 0x9aa   :  { %5249 = vst.msk [vmem:[%s10846_s2 + $0x290] sm:$0xff] %vm25_vm0, %v2458_v26 }
 0x9ab   :  { %3567 = vperm.xlu1 %5589, %v3519_v44   ;;  %v2711_v38 = vpop.permute.xlu1 %2710  ;;  %v9970_v21 = vpop.permute.xlu0 %2770  ;;  %v3858_v44 = vmul.f32 0.020408163, %v11453_v3  ;;  %5848 = vrsqrt.f32 %v3870_v8 }
 0x9ac   :  { %3646 = vperm.xlu0 %5588, %v5398_v22   ;;  %v2774_v9 = vmul.f32 %v2711_v38, %v11450_v23  ;;  %v11454_v22 = vld [vmem:[#allocation137_spill] sm:$0xff]  ;;  %v11456_v23 = vld [vmem:[#allocation139_spill] sm:$0xff] }
 0x9ad   :  { %v2778_v31 = vmul.f32 %v9913_v2, %v11454_v22  ;;  %v5393_v2 = vld [vmem:[%s10845_s1 + $0x8d0] sm:$0xff] }
 0x9af   :  { %3577 = vperm.xlu1 %5589, %v3521_v7   ;;  %v9980_v52 = vpop.permute.xlu1 %2715  ;;  %v2795_v16 = vpop.permute.xlu0 %2794  ;;  %v3872_v7 = vadd.f32 0.001, %v3858_v44  ;;  %v11460_v44 = vld [vmem:[#allocation234_spill] sm:$0xff] }
 0x9b0   :  { %v2858_v32 = vadd.f32 %v2795_v16, %v2774_v9  ;;  %3656 = vperm.xlu0 %5588, %v5400_v42   ;;  %v11455_v42 = vld [vmem:[#allocation241_spill] sm:$0xff]  ;;  %v2780_v9 = vmul.f32 %v9928_v36, %v11456_v23  ;;  %v5845_v16 = vpop.eup %5844  ;;  %v5395_v36 = vld [vmem:[%s10845_s1 + $0x8e0] sm:$0xff] }
 0x9b1   :  { %v3860_v15 = vmul.f32 0.020408163, %v11455_v42  ;;  %5850 = vrsqrt.f32 %v3872_v7  ;;  %v3925_v8 = vmul.f32 %v5845_v16, %v5436_v62  ;;  %v5847_v3 = vpop.eup %5846  ;;  %v5440_v16 = vld [vmem:[%s10845_s1 + $0x428] sm:$0xff] }
 0x9b2   :  { %5294 = vst.msk [vmem:[%s10846_s2 + $0x2a8] sm:$0xff] %vm25_vm0, %v2858_v32  ;;  %v3927_v42 = vmul.f32 %v5847_v3, %v5438_v48  ;;  %v11466_v48 = vld [vmem:[#allocation136_spill] sm:$0xff] }
 0x9b3   :  { %3587 = vperm.xlu1 %5589, %v3523_v1   ;;  %v9992_v19 = vpop.permute.xlu1 %2725  ;;  %v2805_v25 = vpop.permute.xlu0 %2804  ;;  %v3850_v1 = vmul.f32 0.020408163, %v11457_v29  ;;  %v3874_v6 = vadd.f32 0.001, %v3860_v15  ;;  %v5399_v29 = vld [vmem:[%s10845_s1 + $0x900] sm:$0xff] }
 0x9b4   :  { %v2860_v26 = vadd.f32 %v2805_v25, %v2776_v35  ;;  %3666 = vperm.xlu0 %5588, %v5402_v33   ;;  %v11458_v35 = vld [vmem:[#allocation243_spill] sm:$0xff] }
 0x9b5   :  { %v3862_v25 = vmul.f32 0.020408163, %v11458_v35  ;;  %5852 = vrsqrt.f32 %v3874_v6  ;;  %v5849_v15 = vpop.eup %5848 }
 0x9b6   :  { %5296 = vst.msk [vmem:[%s10846_s2 + $0x2b8] sm:$0xff] %vm25_vm0, %v2860_v26  ;;  %v11459_v26 = vld [vmem:[#allocation141_spill] sm:$0xff]  ;;  %v3929_v35 = vmul.f32 %v5849_v15, %v5440_v16 }
 0x9b7   :  { %3611 = vperm.xlu1 %5589, %v5391_v41   ;;  %v10007_v38 = vpop.permute.xlu1 %2735  ;;  %v2815_v49 = vpop.permute.xlu0 %2814  ;;  %v2782_v41 = vmul.f32 %v9942_v63, %v11459_v26  ;;  %v5397_v63 = vld [vmem:[%s10845_s1 + $0x8f0] sm:$0xff] }
 0x9b8   :  { %v2862_v12 = vadd.f32 %v2815_v49, %v2778_v31  ;;  %3676 = vperm.xlu0 %5588, %v5404_v50   ;;  %v3851_v50 = vmul.f32 0.020408163, %v11460_v44  ;;  %v3864_v49 = vadd.f32 0.001, %v3850_v1  ;;  %v11463_v1 = vld [vmem:[#allocation133_spill] sm:$0xff] }
 0x9ba   :  { %5298 = vst.msk [vmem:[%s10846_s2 + $0x2c8] sm:$0xff] %vm25_vm0, %v2862_v12  ;;  %v3876_v12 = vadd.f32 0.001, %v3862_v25  ;;  %v3865_v23 = vadd.f32 0.001, %v3851_v50  ;;  %5854 = vrsqrt.f32 %v3864_v49  ;;  %v2775_v49 = vmul.f32 %v9980_v52, %v11466_v48  ;;  %v5444_v52 = vld [vmem:[%s10845_s1 + $0x448] sm:$0xff] }
 0x9bb   :  { %3621 = vperm.xlu1 %5589, %v5393_v2   ;;  %v10022_v32 = vpop.permute.xlu1 %2745  ;;  %v2825_v53 = vpop.permute.xlu0 %2824  ;;  %v11461_v2 = vld [vmem:[#allocation143_spill] sm:$0xff] }
 0x9bc   :  { %v2864_v33 = vadd.f32 %v2825_v53, %v2780_v9  ;;  %3938 = vperm.xlu0 %5588, %v3922_v59   ;;  %v2784_v7 = vmul.f32 %v9957_v30, %v11461_v2  ;;  %v11462_v53 = vld [vmem:[#allocation236_spill] sm:$0xff]  ;;  %5856 = vrsqrt.f32 %v3876_v12  ;;  %v5851_v25 = vpop.eup %5850 }
 0x9bd   :  { %v3853_v62 = vmul.f32 0.020408163, %v11462_v53  ;;  %5858 = vrsqrt.f32 %v3865_v23  ;;  %v11468_v53 = vld [vmem:[#allocation138_spill] sm:$0xff] }
 0x9be   :  { %5300 = vst.msk [vmem:[%s10846_s2 + $0x2d8] sm:$0xff] %vm25_vm0, %v2864_v33  ;;  %v2773_v33 = vmul.f32 %v9880_v58, %v11463_v1  ;;  %v11465_v58 = vld [vmem:[#allocation238_spill] sm:$0xff] }
 0x9bf   :  { %3631 = vperm.xlu1 %5589, %v5395_v36   ;;  %v10039_v22 = vpop.permute.xlu1 %2755  ;;  %v2835_v31 = vpop.permute.xlu0 %2834  ;;  %v11464_v36 = vld [vmem:[#allocation145_spill] sm:$0xff]  ;;  %v3867_v3 = vadd.f32 0.001, %v3853_v62  ;;  %v3855_v44 = vmul.f32 0.020408163, %v11465_v58  ;;  %v2777_v62 = vmul.f32 %v9992_v19, %v11468_v53 }
 0x9c0   :  { %v2866_v39 = vadd.f32 %v2835_v31, %v2782_v41  ;;  %3953 = vperm.xlu0 %5588, %v3925_v8   ;;  %v2786_v6 = vmul.f32 %v9970_v21, %v11464_v36  ;;  %v5442_v8 = vld [vmem:[%s10845_s1 + $0x438] sm:$0xff]  ;;  %v5401_v31 = vld [vmem:[%s10845_s1 + $0x910] sm:$0xff] }
 0x9c1   :  { %5860 = vrsqrt.f32 %v3867_v3  ;;  %v11470_v3 = vld [vmem:[#allocation140_spill] sm:$0xff] }
 0x9c2   :  { %5302 = vst.msk [vmem:[%s10846_s2 + $0x2e8] sm:$0xff] %vm25_vm0, %v2866_v39  ;;  %v3931_v39 = vmul.f32 %v5851_v25, %v5442_v8  ;;  %v2779_v58 = vmul.f32 %v10007_v38, %v11470_v3  ;;  %v11475_v3 = vld [vmem:[#allocation146_spill] sm:$0xff] }
 0x9c3   :  { %3641 = vperm.xlu1 %5589, %v5397_v63   ;;  %v10053_v9 = vpop.permute.xlu1 %2765  ;;  %v2845_v59 = vpop.permute.xlu0 %2844 }
 0x9c4   :  { %v2868_v30 = vadd.f32 %v2845_v59, %v2784_v7  ;;  %3963 = vperm.xlu0 %5588, %v3927_v42   ;;  %v5853_v63 = vpop.eup %5852  ;;  %v3869_v7 = vadd.f32 0.001, %v3855_v44  ;;  %v11467_v42 = vld [vmem:[#allocation240_spill] sm:$0xff]  ;;  %v5403_v59 = vld [vmem:[%s10845_s1 + $0x920] sm:$0xff] }
 0x9c5   :  { %v3857_v15 = vmul.f32 0.020408163, %v11467_v42  ;;  %v5855_v16 = vpop.eup %5854 }
 0x9c6   :  { %5304 = vst.msk [vmem:[%s10846_s2 + $0x2f8] sm:$0xff] %vm25_vm0, %v2868_v30  ;;  %v3933_v30 = vmul.f32 %v5853_v63, %v5444_v52  ;;  %v5857_v1 = vpop.eup %5856  ;;  %5862 = vrsqrt.f32 %v3869_v7  ;;  %v11472_v7 = vld [vmem:[#allocation142_spill] sm:$0xff] }
 0x9c7   :  { %3651 = vperm.xlu1 %5589, %v5399_v29   ;;  %v2790_v26 = vpop.permute.xlu1 %2789  ;;  %v2855_v41 = vpop.permute.xlu0 %2854  ;;  %v5434_v29 = vld [vmem:[%s10845_s1 + $0x3f8] sm:$0xff]  ;;  %v3871_v19 = vadd.f32 0.001, %v3857_v15  ;;  %v2781_v42 = vmul.f32 %v10022_v32, %v11472_v7  ;;  %v5437_v15 = vld [vmem:[%s10845_s1 + $0x410] sm:$0xff]  ;;  %v5450_v32 = vld [vmem:[%s10845_s1 + $0x948] sm:$0xff] }
 0x9c8   :  { %v2857_v50 = vadd.f32 %v2790_v26, %v2773_v33  ;;  %v2870_v21 = vadd.f32 %v2855_v41, %v2786_v6  ;;  %3973 = vperm.xlu0 %5588, %v3929_v35   ;;  %v5446_v6 = vld [vmem:[%s10845_s1 + $0x458] sm:$0xff]  ;;  %v11469_v35 = vld [vmem:[#allocation242_spill] sm:$0xff]  ;;  %v5859_v41 = vpop.eup %5858  ;;  %v3923_v8 = vmul.f32 %v5855_v16, %v5434_v29  ;;  %v11473_v29 = vld [vmem:[#allocation144_spill] sm:$0xff] }
 0x9c9   :  { %v3859_v25 = vmul.f32 0.020408163, %v11469_v35  ;;  %v3935_v44 = vmul.f32 %v5857_v1, %v5446_v6  ;;  %5864 = vrsqrt.f32 %v3871_v19  ;;  %v2783_v1 = vmul.f32 %v10039_v22, %v11473_v29  ;;  %v5452_v22 = vld [vmem:[%s10845_s1 + $0x958] sm:$0xff] }
 0x9ca   :  { %5293 = vst.msk [vmem:[%s10846_s2 + $0x2a0] sm:$0xff] %vm25_vm0, %v2857_v50  ;;  %5306 = vst.msk [vmem:[%s10846_s2 + $0x308] sm:$0xff] %vm25_vm0, %v2870_v21  ;;  %v5435_v50 = vld [vmem:[%s10845_s1 + $0x400] sm:$0xff] }
 0x9cb   :  { %3661 = vperm.xlu1 %5589, %v5401_v31   ;;  %v2800_v12 = vpop.permute.xlu1 %2799  ;;  %v10087_v2 = vpop.permute.xlu0 %3116  ;;  %v3873_v48 = vadd.f32 0.001, %v3859_v25  ;;  %v3924_v38 = vmul.f32 %v5859_v41, %v5435_v50  ;;  %v11474_v25 = vld [vmem:[#allocation260_spill] sm:$0xff] }
 0x9cc   :  { %v2859_v23 = vadd.f32 %v2800_v12, %v2775_v49  ;;  %3983 = vperm.xlu0 %5588, %v3931_v39   ;;  %v11471_v49 = vld [vmem:[#allocation244_spill] sm:$0xff]  ;;  %v5448_v12 = vld [vmem:[%s10845_s1 + $0x938] sm:$0xff]  ;;  %v5861_v52 = vpop.eup %5860 }
 0x9cd   :  { %v3861_v39 = vmul.f32 0.020408163, %v11471_v49  ;;  %5866 = vrsqrt.f32 %v3873_v48 }
 0x9ce   :  { %5295 = vst.msk [vmem:[%s10846_s2 + $0x2b0] sm:$0xff] %vm25_vm0, %v2859_v23 }
 0x9cf   :  { %3671 = vperm.xlu1 %5589, %v5403_v59   ;;  %v2810_v33 = vpop.permute.xlu1 %2809  ;;  %v10105_v36 = vpop.permute.xlu0 %3131  ;;  %v3875_v16 = vadd.f32 0.001, %v3861_v39  ;;  %v11476_v39 = vld [vmem:[#allocation261_spill] sm:$0xff] }
 0x9d0   :  { %v2861_v26 = vadd.f32 %v2810_v33, %v2777_v62  ;;  %3993 = vperm.xlu0 %5588, %v3933_v30   ;;  %v3926_v62 = vmul.f32 %v5861_v52, %v5437_v15  ;;  %v5863_v30 = vpop.eup %5862  ;;  %v5439_v33 = vld [vmem:[%s10845_s1 + $0x420] sm:$0xff] }
 0x9d1   :  { %5868 = vrsqrt.f32 %v3875_v16  ;;  %v3928_v41 = vmul.f32 %v5863_v30, %v5439_v33  ;;  %v5443_v52 = vld [vmem:[%s10845_s1 + $0x440] sm:$0xff] }
 0x9d2   :  { %5297 = vst.msk [vmem:[%s10846_s2 + $0x2c0] sm:$0xff] %vm25_vm0, %v2861_v26  ;;  %v4260_v26 = vmul.f32 0.020408163, %v11474_v25  ;;  %v11478_v30 = vld [vmem:[#allocation162_spill] sm:$0xff] }
 0x9d3   :  { %3943 = vperm.xlu1 %5589, %v3923_v8   ;;  %v2820_v21 = vpop.permute.xlu1 %2819  ;;  %v10120_v31 = vpop.permute.xlu0 %3141 }
 0x9d4   :  { %v2863_v63 = vadd.f32 %v2820_v21, %v2779_v58  ;;  %4003 = vperm.xlu0 %5588, %v3935_v44   ;;  %v5865_v8 = vpop.eup %5864  ;;  %v2785_v58 = vmul.f32 %v10053_v9, %v11475_v3  ;;  %v5441_v44 = vld [vmem:[%s10845_s1 + $0x430] sm:$0xff]  ;;  %v4274_v49 = vadd.f32 0.001, %v4260_v26  ;;  %v5454_v9 = vld [vmem:[%s10845_s1 + $0x968] sm:$0xff]  ;;  %v11479_v26 = vld [vmem:[#allocation265_spill] sm:$0xff] }
 0x9d5   :  { %v11480_v3 = vld [vmem:[#allocation163_spill] sm:$0xff] }
 0x9d6   :  { %5299 = vst.msk [vmem:[%s10846_s2 + $0x2d0] sm:$0xff] %vm25_vm0, %v2863_v63  ;;  %v4263_v63 = vmul.f32 0.020408163, %v11476_v39  ;;  %5870 = vrsqrt.f32 %v4274_v49  ;;  %v5447_v49 = vld [vmem:[%s10845_s1 + $0x930] sm:$0xff] }
 0x9d7   :  { %3948 = vperm.xlu1 %5589, %v3924_v38   ;;  %v2830_v23 = vpop.permute.xlu1 %2829  ;;  %v10135_v59 = vpop.permute.xlu0 %3151  ;;  %v3930_v38 = vmul.f32 %v5865_v8, %v5441_v44  ;;  %v5458_v8 = vld [vmem:[%s10845_s1 + $0x988] sm:$0xff] }
 0x9d8   :  { %v2865_v53 = vadd.f32 %v2830_v23, %v2781_v42  ;;  %4027 = vperm.xlu0 %5588, %v5448_v12   ;;  %v5867_v12 = vpop.eup %5866  ;;  %v4277_v15 = vadd.f32 0.001, %v4263_v63  ;;  %v11477_v23 = vld [vmem:[#allocation263_spill] sm:$0xff] }
 0x9d9   :  { %v4265_v16 = vmul.f32 0.020408163, %v11477_v23  ;;  %v11481_v63 = vld [vmem:[#allocation267_spill] sm:$0xff]  ;;  %v5489_v23 = vld [vmem:[%s10845_s1 + $0x460] sm:$0xff] }
 0x9da   :  { %5301 = vst.msk [vmem:[%s10846_s2 + $0x2e0] sm:$0xff] %vm25_vm0, %v2865_v53  ;;  %v3932_v53 = vmul.f32 %v5867_v12, %v5443_v52  ;;  %5872 = vrsqrt.f32 %v4277_v15 }
 0x9db   :  { %3958 = vperm.xlu1 %5589, %v3926_v62   ;;  %v2840_v6 = vpop.permute.xlu1 %2839  ;;  %v10149_v19 = vpop.permute.xlu0 %3161  ;;  %v5456_v62 = vld [vmem:[%s10845_s1 + $0x978] sm:$0xff]  ;;  %v4279_v25 = vadd.f32 0.001, %v4265_v16 }
 0x9dc   :  { %v2867_v35 = vadd.f32 %v2840_v6, %v2783_v1  ;;  %4037 = vperm.xlu0 %5588, %v5450_v32   ;;  %v5869_v32 = vpop.eup %5868  ;;  %v5445_v1 = vld [vmem:[%s10845_s1 + $0x450] sm:$0xff] }
 0x9dd   :  { %5874 = vrsqrt.f32 %v4279_v25 }
 0x9de   :  { %5303 = vst.msk [vmem:[%s10846_s2 + $0x2f0] sm:$0xff] %vm25_vm0, %v2867_v35 }
 0x9df   :  { %3968 = vperm.xlu1 %5589, %v3928_v41   ;;  %v2850_v50 = vpop.permute.xlu1 %2849  ;;  %v10164_v21 = vpop.permute.xlu0 %3171  ;;  %v4267_v41 = vmul.f32 0.020408163, %v11479_v26  ;;  %v5492_v26 = vld [vmem:[%s10845_s1 + $0x478] sm:$0xff] }
 0x9e0   :  { %v2869_v48 = vadd.f32 %v2850_v50, %v2785_v58  ;;  %4047 = vperm.xlu0 %5588, %v5452_v22   ;;  %v3934_v22 = vmul.f32 %v5869_v32, %v5445_v1  ;;  %v3187_v58 = vmul.f32 %v10105_v36, %v11480_v3  ;;  %v5460_v36 = vld [vmem:[%s10845_s1 + $0x998] sm:$0xff]  ;;  %v5871_v52 = vpop.eup %5870 }
 0x9e1   :  { %v4281_v39 = vadd.f32 0.001, %v4267_v41  ;;  %v4333_v1 = vmul.f32 %v5871_v52, %v5489_v23  ;;  %v11485_v41 = vld [vmem:[#allocation259_spill] sm:$0xff] }
 0x9e2   :  { %5305 = vst.msk [vmem:[%s10846_s2 + $0x300] sm:$0xff] %vm25_vm0, %v2869_v48  ;;  %v5494_v52 = vld [vmem:[%s10845_s1 + $0x488] sm:$0xff] }
 0x9e3   :  { %3978 = vperm.xlu1 %5589, %v3930_v38   ;;  %v3122_v7 = vpop.permute.xlu1 %3121  ;;  %v10177_v42 = vpop.permute.xlu0 %3181  ;;  %v4269_v38 = vmul.f32 0.020408163, %v11481_v63  ;;  %5876 = vrsqrt.f32 %v4281_v39 }
 0x9e4   :  { %4057 = vperm.xlu0 %5588, %v5454_v9   ;;  %v3185_v29 = vmul.f32 %v3122_v7, %v11478_v30  ;;  %v11482_v9 = vld [vmem:[#allocation165_spill] sm:$0xff]  ;;  %v11484_v30 = vld [vmem:[#allocation167_spill] sm:$0xff] }
 0x9e5   :  { %v3189_v12 = vmul.f32 %v10120_v31, %v11482_v9  ;;  %v5449_v31 = vld [vmem:[%s10845_s1 + $0x940] sm:$0xff] }
 0x9e7   :  { %3988 = vperm.xlu1 %5589, %v3932_v53   ;;  %v10187_v33 = vpop.permute.xlu1 %3126  ;;  %v3206_v6 = vpop.permute.xlu0 %3205  ;;  %v4283_v53 = vadd.f32 0.001, %v4269_v38  ;;  %v11488_v38 = vld [vmem:[#allocation262_spill] sm:$0xff] }
 0x9e8   :  { %v3269_v35 = vadd.f32 %v3206_v6, %v3185_v29  ;;  %4067 = vperm.xlu0 %5588, %v5456_v62   ;;  %v11483_v62 = vld [vmem:[#allocation269_spill] sm:$0xff]  ;;  %v3191_v29 = vmul.f32 %v10135_v59, %v11484_v30  ;;  %v5873_v6 = vpop.eup %5872  ;;  %v5451_v59 = vld [vmem:[%s10845_s1 + $0x950] sm:$0xff] }
 0x9e9   :  { %v4271_v32 = vmul.f32 0.020408163, %v11483_v62  ;;  %5878 = vrsqrt.f32 %v4283_v53  ;;  %v4336_v39 = vmul.f32 %v5873_v6, %v5492_v26  ;;  %v5875_v63 = vpop.eup %5874  ;;  %v5496_v6 = vld [vmem:[%s10845_s1 + $0x498] sm:$0xff] }
 0x9ea   :  { %5350 = vst.msk [vmem:[%s10846_s2 + $0x318] sm:$0xff] %vm25_vm0, %v3269_v35  ;;  %v4338_v62 = vmul.f32 %v5875_v63, %v5494_v52  ;;  %v11494_v52 = vld [vmem:[#allocation164_spill] sm:$0xff] }
 0x9eb   :  { %3998 = vperm.xlu1 %5589, %v3934_v22   ;;  %v10199_v44 = vpop.permute.xlu1 %3136  ;;  %v3216_v50 = vpop.permute.xlu0 %3215  ;;  %v4261_v22 = vmul.f32 0.020408163, %v11485_v41  ;;  %v4285_v3 = vadd.f32 0.001, %v4271_v32  ;;  %v5455_v41 = vld [vmem:[%s10845_s1 + $0x970] sm:$0xff] }
 0x9ec   :  { %v3271_v48 = vadd.f32 %v3216_v50, %v3187_v58  ;;  %4077 = vperm.xlu0 %5588, %v5458_v8   ;;  %v11486_v58 = vld [vmem:[#allocation271_spill] sm:$0xff] }
 0x9ed   :  { %v4273_v50 = vmul.f32 0.020408163, %v11486_v58  ;;  %5880 = vrsqrt.f32 %v4285_v3  ;;  %v5877_v32 = vpop.eup %5876 }
 0x9ee   :  { %5352 = vst.msk [vmem:[%s10846_s2 + $0x328] sm:$0xff] %vm25_vm0, %v3271_v48  ;;  %v11487_v48 = vld [vmem:[#allocation169_spill] sm:$0xff]  ;;  %v4340_v58 = vmul.f32 %v5877_v32, %v5496_v6 }
 0x9ef   :  { %4022 = vperm.xlu1 %5589, %v5447_v49   ;;  %v10214_v7 = vpop.permute.xlu1 %3146  ;;  %v3226_v15 = vpop.permute.xlu0 %3225  ;;  %v3193_v49 = vmul.f32 %v10149_v19, %v11487_v48  ;;  %v5453_v19 = vld [vmem:[%s10845_s1 + $0x960] sm:$0xff] }
 0x9f0   :  { %v3273_v16 = vadd.f32 %v3226_v15, %v3189_v12  ;;  %4087 = vperm.xlu0 %5588, %v5460_v36   ;;  %v4262_v36 = vmul.f32 0.020408163, %v11488_v38  ;;  %v4275_v15 = vadd.f32 0.001, %v4261_v22  ;;  %v11491_v22 = vld [vmem:[#allocation161_spill] sm:$0xff] }
 0x9f2   :  { %5354 = vst.msk [vmem:[%s10846_s2 + $0x338] sm:$0xff] %vm25_vm0, %v3273_v16  ;;  %v4287_v16 = vadd.f32 0.001, %v4273_v50  ;;  %v4276_v30 = vadd.f32 0.001, %v4262_v36  ;;  %5882 = vrsqrt.f32 %v4275_v15  ;;  %v3186_v15 = vmul.f32 %v10187_v33, %v11494_v52  ;;  %v5500_v33 = vld [vmem:[%s10845_s1 + $0x4b8] sm:$0xff] }
 0x9f3   :  { %4032 = vperm.xlu1 %5589, %v5449_v31   ;;  %v10229_v35 = vpop.permute.xlu1 %3156  ;;  %v3236_v25 = vpop.permute.xlu0 %3235  ;;  %v11489_v31 = vld [vmem:[#allocation171_spill] sm:$0xff] }
 0x9f4   :  { %v3275_v8 = vadd.f32 %v3236_v25, %v3191_v29  ;;  %4349 = vperm.xlu0 %5588, %v4333_v1   ;;  %v3195_v53 = vmul.f32 %v10164_v21, %v11489_v31  ;;  %v11490_v25 = vld [vmem:[#allocation264_spill] sm:$0xff]  ;;  %5884 = vrsqrt.f32 %v4287_v16  ;;  %v5879_v50 = vpop.eup %5878 }
 0x9f5   :  { %v4264_v26 = vmul.f32 0.020408163, %v11490_v25  ;;  %5886 = vrsqrt.f32 %v4276_v30  ;;  %v11496_v25 = vld [vmem:[#allocation166_spill] sm:$0xff] }
 0x9f6   :  { %5356 = vst.msk [vmem:[%s10846_s2 + $0x348] sm:$0xff] %vm25_vm0, %v3275_v8  ;;  %v3184_v8 = vmul.f32 %v10087_v2, %v11491_v22  ;;  %v11493_v2 = vld [vmem:[#allocation266_spill] sm:$0xff] }
 0x9f7   :  { %4042 = vperm.xlu1 %5589, %v5451_v59   ;;  %v10246_v9 = vpop.permute.xlu1 %3166  ;;  %v3246_v12 = vpop.permute.xlu0 %3245  ;;  %v11492_v59 = vld [vmem:[#allocation173_spill] sm:$0xff]  ;;  %v4278_v63 = vadd.f32 0.001, %v4264_v26  ;;  %v4266_v38 = vmul.f32 0.020408163, %v11493_v2  ;;  %v3188_v26 = vmul.f32 %v10199_v44, %v11496_v25 }
 0x9f8   :  { %v3277_v23 = vadd.f32 %v3246_v12, %v3193_v49  ;;  %4364 = vperm.xlu0 %5588, %v4336_v39   ;;  %v3197_v3 = vmul.f32 %v10177_v42, %v11492_v59  ;;  %v5498_v39 = vld [vmem:[%s10845_s1 + $0x4a8] sm:$0xff]  ;;  %v5457_v12 = vld [vmem:[%s10845_s1 + $0x980] sm:$0xff] }
 0x9f9   :  { %5888 = vrsqrt.f32 %v4278_v63  ;;  %v11498_v63 = vld [vmem:[#allocation168_spill] sm:$0xff] }
 0x9fa   :  { %5358 = vst.msk [vmem:[%s10846_s2 + $0x358] sm:$0xff] %vm25_vm0, %v3277_v23  ;;  %v4342_v23 = vmul.f32 %v5879_v50, %v5498_v39  ;;  %v3190_v2 = vmul.f32 %v10214_v7, %v11498_v63  ;;  %v11502_v63 = vld [vmem:[#allocation174_spill] sm:$0xff] }
 0x9fb   :  { %4052 = vperm.xlu1 %5589, %v5453_v19   ;;  %v10260_v29 = vpop.permute.xlu1 %3176  ;;  %v3256_v1 = vpop.permute.xlu0 %3255 }
 0x9fc   :  { %v3279_v21 = vadd.f32 %v3256_v1, %v3195_v53  ;;  %4374 = vperm.xlu0 %5588, %v4338_v62   ;;  %v5881_v19 = vpop.eup %5880  ;;  %v4280_v53 = vadd.f32 0.001, %v4266_v38  ;;  %v11495_v62 = vld [vmem:[#allocation268_spill] sm:$0xff] }
 0x9fd   :  { %v4268_v32 = vmul.f32 0.020408163, %v11495_v62  ;;  %v5459_v1 = vld [vmem:[%s10845_s1 + $0x990] sm:$0xff]  ;;  %v5883_v6 = vpop.eup %5882 }
 0x9fe   :  { %5360 = vst.msk [vmem:[%s10846_s2 + $0x368] sm:$0xff] %vm25_vm0, %v3279_v21  ;;  %v4344_v21 = vmul.f32 %v5881_v19, %v5500_v33  ;;  %v5885_v22 = vpop.eup %5884  ;;  %5890 = vrsqrt.f32 %v4280_v53  ;;  %v11500_v53 = vld [vmem:[#allocation170_spill] sm:$0xff] }
 0x9ff   :  { %4062 = vperm.xlu1 %5589, %v5455_v41   ;;  %v3201_v48 = vpop.permute.xlu1 %3200  ;;  %v3266_v49 = vpop.permute.xlu0 %3265  ;;  %v5490_v41 = vld [vmem:[%s10845_s1 + $0x468] sm:$0xff]  ;;  %v4282_v44 = vadd.f32 0.001, %v4268_v32  ;;  %v3192_v62 = vmul.f32 %v10229_v35, %v11500_v53  ;;  %v5493_v32 = vld [vmem:[%s10845_s1 + $0x480] sm:$0xff]  ;;  %v4678_v53 = vmul.f32 0.020408163, %v8660_v55 }
 0xa00   :  { %v3268_v36 = vadd.f32 %v3201_v48, %v3184_v8  ;;  %v3281_v42 = vadd.f32 %v3266_v49, %v3197_v3  ;;  %4384 = vperm.xlu0 %5588, %v4340_v58   ;;  %v5502_v3 = vld [vmem:[%s10845_s1 + $0x4c8] sm:$0xff]  ;;  %v11497_v58 = vld [vmem:[#allocation270_spill] sm:$0xff]  ;;  %v5887_v49 = vpop.eup %5886  ;;  %v4334_v39 = vmul.f32 %v5883_v6, %v5490_v41 }
 0xa01   :  { %v4270_v50 = vmul.f32 0.020408163, %v11497_v58  ;;  %v4346_v38 = vmul.f32 %v5885_v22, %v5502_v3  ;;  %5892 = vrsqrt.f32 %v4282_v44  ;;  %v11501_v22 = vld [vmem:[#allocation172_spill] sm:$0xff]  ;;  %v4692_v55 = vadd.f32 0.001, %v4678_v53 }
 0xa02   :  { %5349 = vst.msk [vmem:[%s10846_s2 + $0x310] sm:$0xff] %vm25_vm0, %v3268_v36  ;;  %5362 = vst.msk [vmem:[%s10846_s2 + $0x378] sm:$0xff] %vm25_vm0, %v3281_v42  ;;  %v5491_v36 = vld [vmem:[%s10845_s1 + $0x470] sm:$0xff] }
 0xa03   :  { %4072 = vperm.xlu1 %5589, %v5457_v12   ;;  %v3211_v16 = vpop.permute.xlu1 %3210  ;;  %v10294_v31 = vpop.permute.xlu0 %3527  ;;  %v4284_v52 = vadd.f32 0.001, %v4270_v50  ;;  %v4335_v7 = vmul.f32 %v5887_v49, %v5491_v36  ;;  %v5495_v3 = vld [vmem:[%s10845_s1 + $0x490] sm:$0xff] }
 0xa04   :  { %v3270_v30 = vadd.f32 %v3211_v16, %v3186_v15  ;;  %4394 = vperm.xlu0 %5588, %v4342_v23   ;;  %v11499_v15 = vld [vmem:[#allocation272_spill] sm:$0xff]  ;;  %v5504_v16 = vld [vmem:[%s10845_s1 + $0x9a8] sm:$0xff]  ;;  %v5889_v33 = vpop.eup %5888 }
 0xa05   :  { %v4272_v23 = vmul.f32 0.020408163, %v11499_v15  ;;  %5894 = vrsqrt.f32 %v4284_v52  ;;  %v4337_v35 = vmul.f32 %v5889_v33, %v5493_v32  ;;  %v5509_v49 = vld [vmem:[%s10845_s1 + $0x9d0] sm:$0xff]  ;;  %v4676_v15 = vmul.f32 0.020408163, %v8649_v40 }
 0xa06   :  { %5351 = vst.msk [vmem:[%s10846_s2 + $0x320] sm:$0xff] %vm25_vm0, %v3270_v30  ;;  %v5513_v32 = vld [vmem:[%s10845_s1 + $0x9f0] sm:$0xff] }
 0xa07   :  { %4082 = vperm.xlu1 %5589, %v5459_v1   ;;  %v3221_v8 = vpop.permute.xlu1 %3220  ;;  %v10312_v59 = vpop.permute.xlu0 %3542  ;;  %v4286_v6 = vadd.f32 0.001, %v4272_v23  ;;  %v5512_v23 = vld [vmem:[%s10845_s1 + $0x9e8] sm:$0xff]  ;;  %v4690_v40 = vadd.f32 0.001, %v4676_v15 }
 0xa08   :  { %v3272_v48 = vadd.f32 %v3221_v8, %v3188_v26  ;;  %4404 = vperm.xlu0 %5588, %v4344_v21   ;;  %v4672_v26 = vmul.f32 0.020408163, %v8617_v57  ;;  %v5506_v21 = vld [vmem:[%s10845_s1 + $0x9b8] sm:$0xff]  ;;  %v5891_v41 = vpop.eup %5890  ;;  %v3194_v8 = vmul.f32 %v10246_v9, %v11501_v22  ;;  %v4680_v22 = vmul.f32 0.020408163, %v8671_v54 }
 0xa09   :  { %5896 = vrsqrt.f32 %v4286_v6  ;;  %v4339_v9 = vmul.f32 %v5891_v41, %v5495_v3  ;;  %v11503_v6 = vld [vmem:[#allocation190_spill] sm:$0xff]  ;;  %v5516_v3 = vld [vmem:[%s10845_s1 + $0xa08] sm:$0xff]  ;;  %v5546_v54 = vld [vmem:[%s10845_s1 + $0x4d8] sm:$0xff] }
 0xa0a   :  { %5353 = vst.msk [vmem:[%s10846_s2 + $0x330] sm:$0xff] %vm25_vm0, %v3272_v48  ;;  %v4686_v50 = vadd.f32 0.001, %v4672_v26  ;;  %v4674_v48 = vmul.f32 0.020408163, %v8638_v14  ;;  %v5501_v26 = vld [vmem:[%s10845_s1 + $0x4c0] sm:$0xff] }
 0xa0b   :  { %4354 = vperm.xlu1 %5589, %v4334_v39   ;;  %v3231_v42 = vpop.permute.xlu1 %3230  ;;  %v10327_v12 = vpop.permute.xlu0 %3552 }
 0xa0c   :  { %v3274_v19 = vadd.f32 %v3231_v42, %v3190_v2  ;;  %4414 = vperm.xlu0 %5588, %v4346_v38   ;;  %v5893_v39 = vpop.eup %5892  ;;  %v3196_v2 = vmul.f32 %v10260_v29, %v11502_v63  ;;  %v5497_v38 = vld [vmem:[%s10845_s1 + $0x4a0] sm:$0xff]  ;;  %5898 = vrsqrt.f32 %v4686_v50  ;;  %v4688_v52 = vadd.f32 0.001, %v4674_v48 }
 0xa0d   :  { %v4341_v29 = vmul.f32 %v5893_v39, %v5497_v38  ;;  %v4694_v39 = vadd.f32 0.001, %v4680_v22  ;;  %v4682_v63 = vmul.f32 0.020408163, %v8685_v18  ;;  %v5505_v18 = vld [vmem:[%s10845_s1 + $0x9b0] sm:$0xff] }
 0xa0e   :  { %5355 = vst.msk [vmem:[%s10846_s2 + $0x340] sm:$0xff] %vm25_vm0, %v3274_v19  ;;  %5900 = vrsqrt.f32 %v4688_v52 }
 0xa0f   :  { %4359 = vperm.xlu1 %5589, %v4335_v7   ;;  %v3241_v30 = vpop.permute.xlu1 %3240  ;;  %v10342_v1 = vpop.permute.xlu0 %3562  ;;  %v5499_v7 = vld [vmem:[%s10845_s1 + $0x4b0] sm:$0xff]  ;;  %5902 = vrsqrt.f32 %v4690_v40 }
 0xa10   :  { %v3276_v25 = vadd.f32 %v3241_v30, %v3192_v62  ;;  %4438 = vperm.xlu0 %5588, %v5504_v16   ;;  %v5895_v19 = vpop.eup %5894  ;;  %5904 = vrsqrt.f32 %v4692_v55  ;;  %v4671_v55 = vmul.f32 0.020408163, %v8626_v45 }
 0xa11   :  { %v4343_v62 = vmul.f32 %v5895_v19, %v5499_v7  ;;  %5906 = vrsqrt.f32 %v4694_v39  ;;  %v4684_v19 = vmul.f32 0.020408163, %v8696_v51  ;;  %v11506_v7 = vld [vmem:[#allocation195_spill] sm:$0xff]  ;;  %v5507_v51 = vld [vmem:[%s10845_s1 + $0x9c0] sm:$0xff]  ;;  %v5554_v39 = vld [vmem:[%s10845_s1 + $0x518] sm:$0xff] }
 0xa12   :  { %5357 = vst.msk [vmem:[%s10846_s2 + $0x350] sm:$0xff] %vm25_vm0, %v3276_v25 }
 0xa13   :  { %4369 = vperm.xlu1 %5589, %v4337_v35   ;;  %v3251_v57 = vpop.permute.xlu1 %3250  ;;  %v10357_v44 = vpop.permute.xlu0 %3572 }
 0xa14   :  { %v3278_v58 = vadd.f32 %v3251_v57, %v3194_v8  ;;  %4448 = vperm.xlu0 %5588, %v5506_v21   ;;  %v5897_v30 = vpop.eup %5896  ;;  %v11504_v57 = vld [vmem:[#allocation191_spill] sm:$0xff] }
 0xa15   :  { %v4345_v8 = vmul.f32 %v5897_v30, %v5501_v26  ;;  %v5550_v30 = vld [vmem:[%s10845_s1 + $0x4f8] sm:$0xff] }
 0xa16   :  { %5359 = vst.msk [vmem:[%s10846_s2 + $0x360] sm:$0xff] %vm25_vm0, %v3278_v58  ;;  %v3598_v58 = vmul.f32 %v10312_v59, %v11504_v57  ;;  %v5899_v50 = vpop.eup %5898  ;;  %v5503_v59 = vld [vmem:[%s10845_s1 + $0x9a0] sm:$0xff] }
 0xa17   :  { %4379 = vperm.xlu1 %5589, %v4339_v9   ;;  %v3261_v14 = vpop.permute.xlu1 %3260  ;;  %v10372_v36 = vpop.permute.xlu0 %3582 }
 0xa18   :  { %v3280_v42 = vadd.f32 %v3261_v14, %v3196_v2  ;;  %4463 = vperm.xlu0 %5588, %v5509_v49   ;;  %v11505_v2 = vld [vmem:[#allocation193_spill] sm:$0xff]  ;;  %v4745_v14 = vmul.f32 %v5899_v50, %v5546_v54  ;;  %v4685_v54 = vadd.f32 0.001, %v4671_v55 }
 0xa19   :  { %v3600_v38 = vmul.f32 %v10327_v12, %v11505_v2  ;;  %v4696_v12 = vadd.f32 0.001, %v4682_v63  ;;  %v4673_v63 = vmul.f32 0.020408163, %v8628_v17 }
 0xa1a   :  { %5361 = vst.msk [vmem:[%s10846_s2 + $0x370] sm:$0xff] %vm25_vm0, %v3280_v42  ;;  %v5901_v42 = vpop.eup %5900 }
 0xa1b   :  { %4389 = vperm.xlu1 %5589, %v4341_v29   ;;  %v3533_v16 = vpop.permute.xlu1 %3532  ;;  %v10385_v33 = vpop.permute.xlu0 %3592  ;;  %v5548_v29 = vld [vmem:[%s10845_s1 + $0x4e8] sm:$0xff]  ;;  %5908 = vrsqrt.f32 %v4696_v12 }
 0xa1c   :  { %4478 = vperm.xlu0 %5588, %v5512_v23   ;;  %v3596_v25 = vmul.f32 %v3533_v16, %v11503_v6  ;;  %v3602_v16 = vmul.f32 %v10342_v1, %v11506_v7  ;;  %v4747_v40 = vmul.f32 %v5901_v42, %v5548_v29  ;;  %v5903_v53 = vpop.eup %5902  ;;  %v4698_v1 = vadd.f32 0.001, %v4684_v19  ;;  %v11510_v42 = vld [vmem:[#allocation201_spill] sm:$0xff]  ;;  %v5556_v12 = vld [vmem:[%s10845_s1 + $0x528] sm:$0xff] }
 0xa1d   :  { %v4687_v19 = vadd.f32 0.001, %v4673_v63  ;;  %v4681_v63 = vmul.f32 0.020408163, %v8673_v56  ;;  %v5547_v56 = vld [vmem:[%s10845_s1 + $0x4e0] sm:$0xff] }
 0xa1e   :  { %5910 = vrsqrt.f32 %v4698_v1  ;;  %v4677_v1 = vmul.f32 0.020408163, %v8651_v61 }
 0xa1f   :  { %4399 = vperm.xlu1 %5589, %v4343_v62   ;;  %v10395_v35 = vpop.permute.xlu1 %3537  ;;  %v3617_v21 = vpop.permute.xlu0 %3616  ;;  %5912 = vrsqrt.f32 %v4685_v54 }
 0xa20   :  { %v3680_v41 = vadd.f32 %v3617_v21, %v3596_v25  ;;  %4483 = vperm.xlu0 %5588, %v5513_v32   ;;  %v11507_v25 = vld [vmem:[#allocation197_spill] sm:$0xff]  ;;  %v4749_v21 = vmul.f32 %v5903_v53, %v5550_v30  ;;  %5914 = vrsqrt.f32 %v4687_v19  ;;  %v4691_v61 = vadd.f32 0.001, %v4677_v1 }
 0xa21   :  { %v3604_v26 = vmul.f32 %v10357_v44, %v11507_v25  ;;  %v5508_v44 = vld [vmem:[%s10845_s1 + $0x9c8] sm:$0xff] }
 0xa22   :  { %5406 = vst.msk [vmem:[%s10846_s2 + $0x388] sm:$0xff] %vm25_vm0, %v3680_v41  ;;  %v5905_v41 = vpop.eup %5904 }
 0xa23   :  { %4409 = vperm.xlu1 %5589, %v4345_v8   ;;  %v10407_v48 = vpop.permute.xlu1 %3547  ;;  %v3627_v9 = vpop.permute.xlu0 %3626 }
 0xa24   :  { %v3682_v49 = vadd.f32 %v3627_v9, %v3598_v58  ;;  %4498 = vperm.xlu0 %5588, %v5516_v3   ;;  %v5552_v3 = vld [vmem:[%s10845_s1 + $0x508] sm:$0xff]  ;;  %v5907_v9 = vpop.eup %5906 }
 0xa25   :  { %v11508_v58 = vld [vmem:[#allocation199_spill] sm:$0xff]  ;;  %v4751_v45 = vmul.f32 %v5905_v41, %v5552_v3  ;;  %v4753_v29 = vmul.f32 %v5907_v9, %v5554_v39 }
 0xa26   :  { %5408 = vst.msk [vmem:[%s10846_s2 + $0x398] sm:$0xff] %vm25_vm0, %v3682_v49  ;;  %v3606_v50 = vmul.f32 %v10372_v36, %v11508_v58  ;;  %v5510_v36 = vld [vmem:[%s10845_s1 + $0x9d8] sm:$0xff] }
 0xa27   :  { %4433 = vperm.xlu1 %5589, %v5503_v59   ;;  %v10422_v52 = vpop.permute.xlu1 %3557  ;;  %v3637_v15 = vpop.permute.xlu0 %3636 }
 0xa28   :  { %v3684_v23 = vadd.f32 %v3637_v15, %v3600_v38  ;;  %4765 = vperm.xlu0 %5588, %v4745_v14   ;;  %v11509_v38 = vld [vmem:[#allocation189_spill] sm:$0xff]  ;;  %v3608_v15 = vmul.f32 %v10385_v33, %v11510_v42 }
 0xa29   :  { %v3595_v14 = vmul.f32 %v10294_v31, %v11509_v38  ;;  %v4675_v31 = vmul.f32 0.020408163, %v8640_v37 }
 0xa2a   :  { %5410 = vst.msk [vmem:[%s10846_s2 + $0x3a8] sm:$0xff] %vm25_vm0, %v3684_v23  ;;  %v5909_v23 = vpop.eup %5908 }
 0xa2b   :  { %4443 = vperm.xlu1 %5589, %v5505_v18   ;;  %v10437_v62 = vpop.permute.xlu1 %3567  ;;  %v3647_v32 = vpop.permute.xlu0 %3646  ;;  %v4755_v37 = vmul.f32 %v5909_v23, %v5556_v12  ;;  %v4695_v23 = vadd.f32 0.001, %v4681_v63  ;;  %v5564_v12 = vld [vmem:[%s10845_s1 + $0xa38] sm:$0xff] }
 0xa2c   :  { %v3686_v6 = vadd.f32 %v3647_v32, %v3602_v16  ;;  %4775 = vperm.xlu0 %5588, %v4747_v40   ;;  %v5511_v16 = vld [vmem:[%s10845_s1 + $0x9e0] sm:$0xff]  ;;  %v11511_v40 = vld [vmem:[#allocation192_spill] sm:$0xff]  ;;  %v5911_v32 = vpop.eup %5910  ;;  %v5572_v63 = vld [vmem:[%s10845_s1 + $0xa78] sm:$0xff] }
 0xa2d   :  { %v3597_v53 = vmul.f32 %v10395_v35, %v11511_v40  ;;  %v5558_v35 = vld [vmem:[%s10845_s1 + $0x538] sm:$0xff]  ;;  %v5913_v58 = vpop.eup %5912 }
 0xa2e   :  { %5412 = vst.msk [vmem:[%s10846_s2 + $0x3b8] sm:$0xff] %vm25_vm0, %v3686_v6  ;;  %v4757_v55 = vmul.f32 %v5911_v32, %v5558_v35  ;;  %v5915_v38 = vpop.eup %5914 }
 0xa2f   :  { %4453 = vperm.xlu1 %5589, %v5507_v51   ;;  %v10452_v22 = vpop.permute.xlu1 %3577  ;;  %v3657_v8 = vpop.permute.xlu0 %3656  ;;  %v4689_v51 = vadd.f32 0.001, %v4675_v31  ;;  %v11515_v31 = vld [vmem:[#allocation200_spill] sm:$0xff] }
 0xa30   :  { %v3688_v57 = vadd.f32 %v3657_v8, %v3604_v26  ;;  %4785 = vperm.xlu0 %5588, %v4749_v21   ;;  %v5514_v26 = vld [vmem:[%s10845_s1 + $0x9f8] sm:$0xff]  ;;  %v11512_v21 = vld [vmem:[#allocation194_spill] sm:$0xff] }
 0xa31   :  { %v3599_v41 = vmul.f32 %v10407_v48, %v11512_v21  ;;  %5916 = vrsqrt.f32 %v4689_v51  ;;  %v5515_v48 = vld [vmem:[%s10845_s1 + $0xa00] sm:$0xff] }
 0xa32   :  { %5414 = vst.msk [vmem:[%s10846_s2 + $0x3c8] sm:$0xff] %vm25_vm0, %v3688_v57  ;;  %v4679_v57 = vmul.f32 0.020408163, %v8662_v46  ;;  %v5545_v46 = vld [vmem:[%s10845_s1 + $0x4d0] sm:$0xff]  ;;  %5918 = vrsqrt.f32 %v4691_v61  ;;  %v5551_v51 = vld [vmem:[%s10845_s1 + $0x500] sm:$0xff] }
 0xa33   :  { %4458 = vperm.xlu1 %5589, %v5508_v44   ;;  %v10466_v49 = vpop.permute.xlu1 %3587  ;;  %v3667_v59 = vpop.permute.xlu0 %3666 }
 0xa34   :  { %v3690_v2 = vadd.f32 %v3667_v59, %v3606_v50  ;;  %4795 = vperm.xlu0 %5588, %v4751_v45   ;;  %v5560_v50 = vld [vmem:[%s10845_s1 + $0xa18] sm:$0xff]  ;;  %v11513_v45 = vld [vmem:[#allocation196_spill] sm:$0xff]  ;;  %v4693_v39 = vadd.f32 0.001, %v4679_v57 }
 0xa35   :  { %v3601_v9 = vmul.f32 %v10422_v52, %v11513_v45  ;;  %v4744_v52 = vmul.f32 %v5913_v58, %v5545_v46  ;;  %v11517_v58 = vld [vmem:[#allocation218_spill] sm:$0xff] }
 0xa36   :  { %5416 = vst.msk [vmem:[%s10846_s2 + $0x3d8] sm:$0xff] %vm25_vm0, %v3690_v2  ;;  %5920 = vrsqrt.f32 %v4693_v39  ;;  %v5555_v45 = vld [vmem:[%s10845_s1 + $0x520] sm:$0xff] }
 0xa37   :  { %4468 = vperm.xlu1 %5589, %v5510_v36   ;;  %v3612_v17 = vpop.permute.xlu1 %3611  ;;  %v3677_v18 = vpop.permute.xlu0 %3676  ;;  %v5562_v36 = vld [vmem:[%s10845_s1 + $0xa28] sm:$0xff]  ;;  %5922 = vrsqrt.f32 %v4695_v23  ;;  %v11519_v23 = vld [vmem:[#allocation221_spill] sm:$0xff] }
 0xa38   :  { %v3679_v7 = vadd.f32 %v3612_v17, %v3595_v14  ;;  %v3692_v33 = vadd.f32 %v3677_v18, %v3608_v15  ;;  %4805 = vperm.xlu0 %5588, %v4753_v29   ;;  %v11514_v14 = vld [vmem:[#allocation198_spill] sm:$0xff]  ;;  %v4683_v17 = vmul.f32 0.020408163, %v8691_v28  ;;  %v5549_v28 = vld [vmem:[%s10845_s1 + $0x4f0] sm:$0xff] }
 0xa39   :  { %v3603_v42 = vmul.f32 %v10437_v62, %v11514_v14  ;;  %v4746_v62 = vmul.f32 %v5915_v38, %v5547_v56  ;;  %v5557_v38 = vld [vmem:[%s10845_s1 + $0x530] sm:$0xff] }
 0xa3a   :  { %5405 = vst.msk [vmem:[%s10846_s2 + $0x380] sm:$0xff] %vm25_vm0, %v3679_v7  ;;  %5418 = vst.msk [vmem:[%s10846_s2 + $0x3e8] sm:$0xff] %vm25_vm0, %v3692_v33  ;;  %v3605_v7 = vmul.f32 %v10452_v22, %v11515_v31  ;;  %v4697_v40 = vadd.f32 0.001, %v4683_v17  ;;  %v5566_v22 = vld [vmem:[%s10845_s1 + $0xa48] sm:$0xff] }
 0xa3b   :  { %4473 = vperm.xlu1 %5589, %v5511_v16   ;;  %v3622_v30 = vpop.permute.xlu1 %3621  ;;  %v10500_v6 = vpop.permute.xlu0 %3938 }
 0xa3c   :  { %v3681_v25 = vadd.f32 %v3622_v30, %v3597_v53  ;;  %4815 = vperm.xlu0 %5588, %v4755_v37   ;;  %v5917_v19 = vpop.eup %5916  ;;  %v11516_v30 = vld [vmem:[#allocation202_spill] sm:$0xff]  ;;  %5924 = vrsqrt.f32 %v4697_v40  ;;  %v11521_v40 = vld [vmem:[#allocation225_spill] sm:$0xff] }
 0xa3d   :  { %v4748_v37 = vmul.f32 %v5917_v19, %v5549_v28  ;;  %v5919_v32 = vpop.eup %5918  ;;  %v3607_v35 = vmul.f32 %v10466_v49, %v11516_v30  ;;  %v5568_v49 = vld [vmem:[%s10845_s1 + $0xa58] sm:$0xff]  ;;  %v11520_v19 = vld [vmem:[#allocation223_spill] sm:$0xff] }
 0xa3e   :  { %5407 = vst.msk [vmem:[%s10846_s2 + $0x390] sm:$0xff] %vm25_vm0, %v3681_v25  ;;  %v4750_v21 = vmul.f32 %v5919_v32, %v5551_v51  ;;  %v5563_v32 = vld [vmem:[%s10845_s1 + $0xa30] sm:$0xff]  ;;  %v11522_v30 = vld [vmem:[#allocation227_spill] sm:$0xff] }
 0xa3f   :  { %4488 = vperm.xlu1 %5589, %v5514_v26   ;;  %v3632_v8 = vpop.permute.xlu1 %3631  ;;  %v10515_v3 = vpop.permute.xlu0 %3953 }
 0xa40   :  { %v3683_v44 = vadd.f32 %v3632_v8, %v3599_v41  ;;  %4825 = vperm.xlu0 %5588, %v4757_v55   ;;  %v5921_v41 = vpop.eup %5920  ;;  %v5553_v55 = vld [vmem:[%s10845_s1 + $0x510] sm:$0xff] }
 0xa41   :  { %v4752_v57 = vmul.f32 %v5921_v41, %v5553_v55  ;;  %v11524_v41 = vld [vmem:[#allocation229_spill] sm:$0xff] }
 0xa42   :  { %5409 = vst.msk [vmem:[%s10846_s2 + $0x3a0] sm:$0xff] %vm25_vm0, %v3683_v44  ;;  %v5570_v44 = vld [vmem:[%s10845_s1 + $0xa68] sm:$0xff] }
 0xa43   :  { %4493 = vperm.xlu1 %5589, %v5515_v48   ;;  %v3642_v54 = vpop.permute.xlu1 %3641  ;;  %v10533_v59 = vpop.permute.xlu0 %3963 }
 0xa44   :  { %v3685_v2 = vadd.f32 %v3642_v54, %v3601_v9  ;;  %4849 = vperm.xlu0 %5588, %v5560_v50   ;;  %v5923_v48 = vpop.eup %5922  ;;  %v4011_v17 = vmul.f32 %v10533_v59, %v11519_v23 }
 0xa45   :  { %v4754_v39 = vmul.f32 %v5923_v48, %v5555_v45  ;;  %v5567_v48 = vld [vmem:[%s10845_s1 + $0xa50] sm:$0xff] }
 0xa46   :  { %5411 = vst.msk [vmem:[%s10846_s2 + $0x3b0] sm:$0xff] %vm25_vm0, %v3685_v2  ;;  %v5925_v2 = vpop.eup %5924 }
 0xa47   :  { %4760 = vperm.xlu1 %5589, %v4744_v52   ;;  %v3652_v15 = vpop.permute.xlu1 %3651  ;;  %v10548_v29 = vpop.permute.xlu0 %3973  ;;  %v11518_v52 = vld [vmem:[#allocation219_spill] sm:$0xff] }
 0xa48   :  { %v3687_v18 = vadd.f32 %v3652_v15, %v3603_v42  ;;  %4859 = vperm.xlu0 %5588, %v5562_v36   ;;  %v4009_v36 = vmul.f32 %v10515_v3, %v11518_v52  ;;  %v4756_v15 = vmul.f32 %v5925_v2, %v5557_v38  ;;  %v4013_v31 = vmul.f32 %v10548_v29, %v11520_v19  ;;  %v5571_v52 = vld [vmem:[%s10845_s1 + $0xa70] sm:$0xff] }
 0xa4a   :  { %5413 = vst.msk [vmem:[%s10846_s2 + $0x3c0] sm:$0xff] %vm25_vm0, %v3687_v18 }
 0xa4b   :  { %v3662_v33 = vpop.permute.xlu1 %3661  ;;  %4770 = vperm.xlu1 %5589, %v4746_v62   ;;  %v3984_v16 = vpop.permute.xlu0 %3983 }
 0xa4c   :  { %v3689_v53 = vadd.f32 %v3662_v33, %v3605_v7  ;;  %4869 = vperm.xlu0 %5588, %v5564_v12   ;;  %v5559_v12 = vld [vmem:[%s10845_s1 + $0xa10] sm:$0xff]  ;;  %v5561_v33 = vld [vmem:[%s10845_s1 + $0xa20] sm:$0xff] }
 0xa4e   :  { %5415 = vst.msk [vmem:[%s10846_s2 + $0x3d0] sm:$0xff] %vm25_vm0, %v3689_v53  ;;  %v4015_v53 = vmul.f32 %v3984_v16, %v11521_v40 }
 0xa4f   :  { %v3672_v1 = vpop.permute.xlu1 %3671  ;;  %4780 = vperm.xlu1 %5589, %v4748_v37   ;;  %v3994_v25 = vpop.permute.xlu0 %3993 }
 0xa50   :  { %v3691_v26 = vadd.f32 %v3672_v1, %v3607_v35  ;;  %4879 = vperm.xlu0 %5588, %v5566_v22   ;;  %v4017_v35 = vmul.f32 %v3994_v25, %v11522_v30 }
 0xa52   :  { %5417 = vst.msk [vmem:[%s10846_s2 + $0x3e0] sm:$0xff] %vm25_vm0, %v3691_v26  ;;  %v5565_v26 = vld [vmem:[%s10845_s1 + $0xa40] sm:$0xff] }
 0xa53   :  { %v3944_v8 = vpop.permute.xlu1 %3943  ;;  %4790 = vperm.xlu1 %5589, %v4750_v21   ;;  %v4004_v61 = vpop.permute.xlu0 %4003  ;;  %v11523_v21 = vld [vmem:[#allocation217_spill] sm:$0xff] }
 0xa54   :  { %4889 = vperm.xlu0 %5588, %v5568_v49   ;;  %v4007_v50 = vmul.f32 %v3944_v8, %v11517_v58  ;;  %v4006_v49 = vmul.f32 %v10500_v6, %v11523_v21  ;;  %v4019_v55 = vmul.f32 %v4004_v61, %v11524_v41  ;;  %v11525_v58 = vld [vmem:[#allocation220_spill] sm:$0xff] }
 0xa57   :  { %v3949_v9 = vpop.permute.xlu1 %3948  ;;  %4800 = vperm.xlu1 %5589, %v4752_v57   ;;  %v4028_v46 = vpop.permute.xlu0 %4027 }
 0xa58   :  { %v4091_v54 = vadd.f32 %v4028_v46, %v4007_v50  ;;  %4899 = vperm.xlu0 %5588, %v5570_v44   ;;  %v4008_v50 = vmul.f32 %v3949_v9, %v11525_v58  ;;  %v5569_v46 = vld [vmem:[%s10845_s1 + $0xa60] sm:$0xff] }
 0xa59   :  { %v11526_v9 = vld [vmem:[#allocation222_spill] sm:$0xff] }
 0xa5a   :  { %5462 = vst.msk [vmem:[%s10846_s2 + $0x3f8] sm:$0xff] %vm25_vm0, %v4091_v54 }
 0xa5b   :  { %v3959_v14 = vpop.permute.xlu1 %3958  ;;  %4810 = vperm.xlu1 %5589, %v4754_v39   ;;  %v4038_v42 = vpop.permute.xlu0 %4037 }
 0xa5c   :  { %v4093_v56 = vadd.f32 %v4038_v42, %v4009_v36  ;;  %4909 = vperm.xlu0 %5588, %v5572_v63   ;;  %v4010_v54 = vmul.f32 %v3959_v14, %v11526_v9  ;;  %v11527_v36 = vld [vmem:[#allocation224_spill] sm:$0xff] }
 0xa5d   :  { %v11535_v9 = vld [vmem:[#allocation256_spill] sm:$0xff] }
 0xa5e   :  { %5464 = vst.msk [vmem:[%s10846_s2 + $0x408] sm:$0xff] %vm25_vm0, %v4093_v56 }
 0xa5f   :  { %v3969_v3 = vpop.permute.xlu1 %3968  ;;  %4820 = vperm.xlu1 %5589, %v4756_v15   ;;  %v4048_v18 = vpop.permute.xlu0 %4047  ;;  %v11528_v15 = vld [vmem:[#allocation226_spill] sm:$0xff] }
 0xa60   :  { %v4095_v62 = vadd.f32 %v4048_v18, %v4011_v17  ;;  %v4012_v38 = vmul.f32 %v3969_v3, %v11527_v36 }
 0xa62   :  { %5466 = vst.msk [vmem:[%s10846_s2 + $0x418] sm:$0xff] %vm25_vm0, %v4095_v62  ;;  %v11529_v62 = vld [vmem:[#allocation228_spill] sm:$0xff] }
 0xa63   :  { %v3979_v59 = vpop.permute.xlu1 %3978  ;;  %4844 = vperm.xlu1 %5589, %v5559_v12   ;;  %v4058_v7 = vpop.permute.xlu0 %4057 }
 0xa64   :  { %v4097_v28 = vadd.f32 %v4058_v7, %v4013_v31  ;;  %v4014_v23 = vmul.f32 %v3979_v59, %v11528_v15  ;;  %v11530_v59 = vld [vmem:[#allocation230_spill] sm:$0xff] }
 0xa66   :  { %5468 = vst.msk [vmem:[%s10846_s2 + $0x428] sm:$0xff] %vm25_vm0, %v4097_v28 }
 0xa67   :  { %v3989_v29 = vpop.permute.xlu1 %3988  ;;  %4854 = vperm.xlu1 %5589, %v5561_v33   ;;  %v4068_v37 = vpop.permute.xlu0 %4067 }
 0xa68   :  { %v4099_v22 = vadd.f32 %v4068_v37, %v4015_v53  ;;  %v4016_v12 = vmul.f32 %v3989_v29, %v11529_v62 }
 0xa6a   :  { %5470 = vst.msk [vmem:[%s10846_s2 + $0x438] sm:$0xff] %vm25_vm0, %v4099_v22  ;;  %v11531_v22 = vld [vmem:[#allocation246_spill] sm:$0xff] }
 0xa6b   :  { %v3999_v16 = vpop.permute.xlu1 %3998  ;;  %4864 = vperm.xlu1 %5589, %v5563_v32   ;;  %v4078_v51 = vpop.permute.xlu0 %4077 }
 0xa6c   :  { %v4101_v1 = vadd.f32 %v4078_v51, %v4017_v35  ;;  %v4018_v28 = vmul.f32 %v3999_v16, %v11530_v59  ;;  %v11532_v51 = vld [vmem:[#allocation247_spill] sm:$0xff] }
 0xa6e   :  { %5472 = vst.msk [vmem:[%s10846_s2 + $0x448] sm:$0xff] %vm25_vm0, %v4101_v1 }
 0xa6f   :  { %v4023_v25 = vpop.permute.xlu1 %4022  ;;  %4874 = vperm.xlu1 %5589, %v5565_v26   ;;  %v4088_v8 = vpop.permute.xlu0 %4087 }
 0xa70   :  { %v4090_v57 = vadd.f32 %v4023_v25, %v4006_v49  ;;  %v4103_v44 = vadd.f32 %v4088_v8, %v4019_v55  ;;  %v11533_v25 = vld [vmem:[#allocation252_spill] sm:$0xff] }
 0xa72   :  { %5461 = vst.msk [vmem:[%s10846_s2 + $0x3f0] sm:$0xff] %vm25_vm0, %v4090_v57  ;;  %5474 = vst.msk [vmem:[%s10846_s2 + $0x458] sm:$0xff] %vm25_vm0, %v4103_v44  ;;  %v11534_v57 = vld [vmem:[#allocation253_spill] sm:$0xff] }
 0xa73   :  { %v4033_v6 = vpop.permute.xlu1 %4032  ;;  %4884 = vperm.xlu1 %5589, %v5567_v48   ;;  %v10657_v61 = vpop.permute.xlu0 %4349 }
 0xa74   :  { %v4092_v45 = vadd.f32 %v4033_v6, %v4008_v50 }
 0xa76   :  { %5463 = vst.msk [vmem:[%s10846_s2 + $0x400] sm:$0xff] %vm25_vm0, %v4092_v45 }
 0xa77   :  { %v4043_v39 = vpop.permute.xlu1 %4042  ;;  %4894 = vperm.xlu1 %5589, %v5569_v46   ;;  %v4365_v63 = vpop.permute.xlu0 %4364 }
 0xa78   :  { %v4094_v2 = vadd.f32 %v4043_v39, %v4010_v54  ;;  %v4420_v1 = vmul.f32 %v4365_v63, %v11532_v51  ;;  %v11536_v39 = vld [vmem:[#allocation257_spill] sm:$0xff] }
 0xa7a   :  { %5465 = vst.msk [vmem:[%s10846_s2 + $0x410] sm:$0xff] %vm25_vm0, %v4094_v2 }
 0xa7b   :  { %v4053_v14 = vpop.permute.xlu1 %4052  ;;  %4904 = vperm.xlu1 %5589, %v5571_v52   ;;  %v10675_v42 = vpop.permute.xlu0 %4374 }
 0xa7c   :  { %v4096_v56 = vadd.f32 %v4053_v14, %v4012_v38  ;;  %v11537_v14 = vld [vmem:[#allocation245_spill] sm:$0xff] }
 0xa7e   :  { %5467 = vst.msk [vmem:[%s10846_s2 + $0x420] sm:$0xff] %vm25_vm0, %v4096_v56  ;;  %v4417_v56 = vmul.f32 %v10657_v61, %v11537_v14 }
 0xa7f   :  { %v4063_v17 = vpop.permute.xlu1 %4062  ;;  %v10682_v18 = vpop.permute.xlu0 %4384 }
 0xa80   :  { %v4098_v3 = vadd.f32 %v4063_v17, %v4014_v23 }
 0xa82   :  { %5469 = vst.msk [vmem:[%s10846_s2 + $0x430] sm:$0xff] %vm25_vm0, %v4098_v3  ;;  %v11538_v3 = vld [vmem:[#allocation248_spill] sm:$0xff] }
 0xa83   :  { %v4073_v19 = vpop.permute.xlu1 %4072  ;;  %v4395_v31 = vpop.permute.xlu0 %4394 }
 0xa84   :  { %v4100_v7 = vadd.f32 %v4073_v19, %v4016_v12  ;;  %v4426_v44 = vmul.f32 %v4395_v31, %v11534_v57 }
 0xa86   :  { %5471 = vst.msk [vmem:[%s10846_s2 + $0x440] sm:$0xff] %vm25_vm0, %v4100_v7  ;;  %v11539_v7 = vld [vmem:[#allocation250_spill] sm:$0xff] }
 0xa87   :  { %v4083_v33 = vpop.permute.xlu1 %4082  ;;  %v10694_v40 = vpop.permute.xlu0 %4404 }
 0xa88   :  { %v4102_v53 = vadd.f32 %v4083_v33, %v4018_v28 }
 0xa8a   :  { %5473 = vst.msk [vmem:[%s10846_s2 + $0x450] sm:$0xff] %vm25_vm0, %v4102_v53  ;;  %v11540_v53 = vld [vmem:[#allocation249_spill] sm:$0xff] }
 0xa8b   :  { %v4355_v29 = vpop.permute.xlu1 %4354  ;;  %v4415_v37 = vpop.permute.xlu0 %4414 }
 0xa8c   :  { %v4418_v32 = vmul.f32 %v4355_v29, %v11531_v22  ;;  %v4430_v63 = vmul.f32 %v4415_v37, %v11536_v39  ;;  %v4422_v29 = vmul.f32 %v10675_v42, %v11540_v53  ;;  %v11542_v42 = vld [vmem:[#allocation254_spill] sm:$0xff]  ;;  %v11545_v53 = vld [vmem:[#allocation273_spill] sm:$0xff] }
 0xa8f   :  { %v4360_v30 = vpop.permute.xlu1 %4359  ;;  %v4439_v35 = vpop.permute.xlu0 %4438 }
 0xa90   :  { %v4502_v16 = vadd.f32 %v4439_v35, %v4418_v32  ;;  %v4419_v62 = vmul.f32 %v4360_v30, %v11538_v3  ;;  %v11541_v30 = vld [vmem:[#allocation251_spill] sm:$0xff] }
 0xa91   :  { %v4424_v35 = vmul.f32 %v10682_v18, %v11541_v30 }
 0xa92   :  { %5518 = vst.msk [vmem:[%s10846_s2 + $0x468] sm:$0xff] %vm25_vm0, %v4502_v16 }
 0xa93   :  { %v4370_v26 = vpop.permute.xlu1 %4369  ;;  %v4449_v21 = vpop.permute.xlu0 %4448 }
 0xa94   :  { %v4504_v49 = vadd.f32 %v4449_v21, %v4420_v1  ;;  %v4421_v61 = vmul.f32 %v4370_v26, %v11539_v7 }
 0xa96   :  { %5520 = vst.msk [vmem:[%s10846_s2 + $0x478] sm:$0xff] %vm25_vm0, %v4504_v49 }
 0xa97   :  { %v4380_v41 = vpop.permute.xlu1 %4379  ;;  %v4464_v55 = vpop.permute.xlu0 %4463 }
 0xa98   :  { %v4423_v8 = vmul.f32 %v4380_v41, %v11533_v25 }
 0xa9a   :  { %v4507_v48 = vadd.f32 %v4464_v55, %v4423_v8  ;;  %v11543_v55 = vld [vmem:[#allocation255_spill] sm:$0xff] }
 0xa9b   :  { %v4390_v58 = vpop.permute.xlu1 %4389  ;;  %v4479_v50 = vpop.permute.xlu0 %4478  ;;  %v4428_v18 = vmul.f32 %v10694_v40, %v11543_v55 }
 0xa9c   :  { %5523 = vst.msk [vmem:[%s10846_s2 + $0x490] sm:$0xff] %vm25_vm0, %v4507_v48  ;;  %v4510_v6 = vadd.f32 %v4479_v50, %v4426_v44  ;;  %v4425_v26 = vmul.f32 %v4390_v58, %v11542_v42  ;;  %v11544_v44 = vld [vmem:[#allocation258_spill] sm:$0xff] }
 0xa9e   :  { %5526 = vst.msk [vmem:[%s10846_s2 + $0x4a8] sm:$0xff] %vm25_vm0, %v4510_v6 }
 0xa9f   :  { %v4400_v45 = vpop.permute.xlu1 %4399  ;;  %v4484_v46 = vpop.permute.xlu0 %4483 }
 0xaa0   :  { %v4427_v54 = vmul.f32 %v4400_v45, %v11535_v9 }
 0xaa2   :  { %v4511_v2 = vadd.f32 %v4484_v46, %v4427_v54 }
 0xaa3   :  { %v4410_v52 = vpop.permute.xlu1 %4409  ;;  %v4499_v36 = vpop.permute.xlu0 %4498 }
 0xaa4   :  { %5527 = vst.msk [vmem:[%s10846_s2 + $0x4b0] sm:$0xff] %vm25_vm0, %v4511_v2  ;;  %v4514_v38 = vadd.f32 %v4499_v36, %v4430_v63  ;;  %v4429_v48 = vmul.f32 %v4410_v52, %v11544_v44 }
 0xaa6   :  { %5530 = vst.msk [vmem:[%s10846_s2 + $0x4c8] sm:$0xff] %vm25_vm0, %v4514_v38 }
 0xaa7   :  { %v4434_v15 = vpop.permute.xlu1 %4433  ;;  %v4766_v23 = vpop.permute.xlu0 %4765 }
 0xaa8   :  { %v4501_v17 = vadd.f32 %v4434_v15, %v4417_v56  ;;  %v4829_v58 = vmul.f32 %v4766_v23, %v8351_v0 }
 0xaaa   :  { %5517 = vst.msk [vmem:[%s10846_s2 + $0x460] sm:$0xff] %vm25_vm0, %v4501_v17 }
 0xaab   :  { %v4444_v12 = vpop.permute.xlu1 %4443  ;;  %v4776_v19 = vpop.permute.xlu0 %4775 }
 0xaac   :  { %v4503_v31 = vadd.f32 %v4444_v12, %v4419_v62  ;;  %v4831_v46 = vmul.f32 %v4776_v19, %v8373_v20 }
 0xaae   :  { %5519 = vst.msk [vmem:[%s10846_s2 + $0x470] sm:$0xff] %vm25_vm0, %v4503_v31 }
 0xaaf   :  { %v4454_v59 = vpop.permute.xlu1 %4453  ;;  %v4786_v28 = vpop.permute.xlu0 %4785 }
 0xab0   :  { %v4505_v33 = vadd.f32 %v4454_v59, %v4421_v61  ;;  %v4833_v39 = vmul.f32 %v4786_v28, %v8385_v10 }
 0xab2   :  { %5521 = vst.msk [vmem:[%s10846_s2 + $0x480] sm:$0xff] %vm25_vm0, %v4505_v33 }
 0xab3   :  { %v4459_v37 = vpop.permute.xlu1 %4458  ;;  %v4796_v22 = vpop.permute.xlu0 %4795 }
 0xab4   :  { %v4506_v32 = vadd.f32 %v4459_v37, %v4422_v29  ;;  %v4835_v52 = vmul.f32 %v4796_v22, %v8397_v43 }
 0xab6   :  { %5522 = vst.msk [vmem:[%s10846_s2 + $0x488] sm:$0xff] %vm25_vm0, %v4506_v32 }
 0xab7   :  { %v4469_v16 = vpop.permute.xlu1 %4468  ;;  %v4806_v51 = vpop.permute.xlu0 %4805 }
 0xab8   :  { %v4508_v1 = vadd.f32 %v4469_v16, %v4424_v35  ;;  %v4837_v10 = vmul.f32 %v4806_v51, %v8409_v5 }
 0xaba   :  { %5524 = vst.msk [vmem:[%s10846_s2 + $0x498] sm:$0xff] %vm25_vm0, %v4508_v1 }
 0xabb   :  { %v4474_v21 = vpop.permute.xlu1 %4473  ;;  %v4816_v49 = vpop.permute.xlu0 %4815 }
 0xabc   :  { %v4509_v41 = vadd.f32 %v4474_v21, %v4425_v26  ;;  %v4839_v43 = vmul.f32 %v4816_v49, %v8421_v60 }
 0xabe   :  { %5525 = vst.msk [vmem:[%s10846_s2 + $0x4a0] sm:$0xff] %vm25_vm0, %v4509_v41 }
 0xabf   :  { %v4489_v25 = vpop.permute.xlu1 %4488  ;;  %v4826_v8 = vpop.permute.xlu0 %4825 }
 0xac0   :  { %v4512_v57 = vadd.f32 %v4489_v25, %v4428_v18  ;;  %v4841_v5 = vmul.f32 %v4826_v8, %v8430_v27 }
 0xac2   :  { %5528 = vst.msk [vmem:[%s10846_s2 + $0x4b8] sm:$0xff] %vm25_vm0, %v4512_v57 }
 0xac3   :  { %v4494_v50 = vpop.permute.xlu1 %4493  ;;  %v4850_v6 = vpop.permute.xlu0 %4849 }
 0xac4   :  { %v4513_v40 = vadd.f32 %v4494_v50, %v4429_v48  ;;  %v4913_v45 = vadd.f32 %v4850_v6, %v4829_v58 }
 0xac6   :  { %5529 = vst.msk [vmem:[%s10846_s2 + $0x4c0] sm:$0xff] %vm25_vm0, %v4513_v40  ;;  %5574 = vst.msk [vmem:[%s10846_s2 + $0x4d8] sm:$0xff] %vm25_vm0, %v4913_v45 }
 0xac7   :  { %v4761_v0 = vpop.permute.xlu1 %4760  ;;  %v4860_v9 = vpop.permute.xlu0 %4859 }
 0xac8   :  { %v4915_v54 = vadd.f32 %v4860_v9, %v4831_v46  ;;  %v4828_v7 = vmul.f32 %v4761_v0, %v8354_v47 }
 0xaca   :  { %5576 = vst.msk [vmem:[%s10846_s2 + $0x4e8] sm:$0xff] %vm25_vm0, %v4915_v54 }
 0xacb   :  { %v4771_v20 = vpop.permute.xlu1 %4770  ;;  %v4870_v63 = vpop.permute.xlu0 %4869 }
 0xacc   :  { %v4917_v2 = vadd.f32 %v4870_v63, %v4833_v39  ;;  %v4830_v27 = vmul.f32 %v4771_v20, %v8361_v24 }
 0xace   :  { %5578 = vst.msk [vmem:[%s10846_s2 + $0x4f8] sm:$0xff] %vm25_vm0, %v4917_v2 }
 0xacf   :  { %v4781_v36 = vpop.permute.xlu1 %4780  ;;  %v4880_v38 = vpop.permute.xlu0 %4879 }
 0xad0   :  { %v4919_v14 = vadd.f32 %v4880_v38, %v4835_v52  ;;  %v4832_v29 = vmul.f32 %v4781_v36, %v11545_v53 }
 0xad2   :  { %5580 = vst.msk [vmem:[%s10846_s2 + $0x508] sm:$0xff] %vm25_vm0, %v4919_v14 }
 0xad3   :  { %v4791_v56 = vpop.permute.xlu1 %4790  ;;  %v4890_v15 = vpop.permute.xlu0 %4889 }
 0xad4   :  { %v4921_v23 = vadd.f32 %v4890_v15, %v4837_v10  ;;  %v4834_v22 = vmul.f32 %v4791_v56, %v8376_v11 }
 0xad6   :  { %5582 = vst.msk [vmem:[%s10846_s2 + $0x518] sm:$0xff] %vm25_vm0, %v4921_v23 }
 0xad7   :  { %v4801_v17 = vpop.permute.xlu1 %4800  ;;  %v4900_v3 = vpop.permute.xlu0 %4899 }
 0xad8   :  { %v4923_v62 = vadd.f32 %v4900_v3, %v4839_v43  ;;  %v4836_v30 = vmul.f32 %v4801_v17, %v8388_v34 }
 0xada   :  { %5584 = vst.msk [vmem:[%s10846_s2 + $0x528] sm:$0xff] %vm25_vm0, %v4923_v62 }
 0xadb   :  { %v4811_v12 = vpop.permute.xlu1 %4810  ;;  %v4910_v19 = vpop.permute.xlu0 %4909 }
 0xadc   :  { %v4925_v31 = vadd.f32 %v4910_v19, %v4841_v5  ;;  %v4838_v51 = vmul.f32 %v4811_v12, %v8400_v4 }
 0xade   :  { %5586 = vst.msk [vmem:[%s10846_s2 + $0x538] sm:$0xff] %vm25_vm0, %v4925_v31 }
 0xadf   :  { %v4821_v60 = vpop.permute.xlu1 %4820 }
 0xae0   :  { %v4840_v42 = vmul.f32 %v4821_v60, %v8412_v13 }
 0xae3   :  { %v4845_v61 = vpop.permute.xlu1 %4844 }
 0xae4   :  { %v4912_v59 = vadd.f32 %v4845_v61, %v4828_v7 }
 0xae6   :  { %5573 = vst.msk [vmem:[%s10846_s2 + $0x4d0] sm:$0xff] %vm25_vm0, %v4912_v59 }
 0xae7   :  { %v4855_v28 = vpop.permute.xlu1 %4854 }
 0xae8   :  { %v4914_v33 = vadd.f32 %v4855_v28, %v4830_v27 }
 0xaea   :  { %5575 = vst.msk [vmem:[%s10846_s2 + $0x4e0] sm:$0xff] %vm25_vm0, %v4914_v33 }
 0xaeb   :  { %v4865_v37 = vpop.permute.xlu1 %4864 }
 0xaec   :  { %v4916_v47 = vadd.f32 %v4865_v37, %v4832_v29 }
 0xaee   :  { %5577 = vst.msk [vmem:[%s10846_s2 + $0x4f0] sm:$0xff] %vm25_vm0, %v4916_v47 }
 0xaef   :  { %v4875_v24 = vpop.permute.xlu1 %4874 }
 0xaf0   :  { %v4918_v32 = vadd.f32 %v4875_v24, %v4834_v22 }
 0xaf2   :  { %5579 = vst.msk [vmem:[%s10846_s2 + $0x500] sm:$0xff] %vm25_vm0, %v4918_v32 }
 0xaf3   :  { %v4885_v35 = vpop.permute.xlu1 %4884 }
 0xaf4   :  { %v4920_v16 = vadd.f32 %v4885_v35, %v4836_v30 }
 0xaf6   :  { %5581 = vst.msk [vmem:[%s10846_s2 + $0x510] sm:$0xff] %vm25_vm0, %v4920_v16 }
 0xaf7   :  { %v4895_v11 = vpop.permute.xlu1 %4894 }
 0xaf8   :  { %v4922_v1 = vadd.f32 %v4895_v11, %v4838_v51 }
 0xafa   :  { %5583 = vst.msk [vmem:[%s10846_s2 + $0x520] sm:$0xff] %vm25_vm0, %v4922_v1 }
 0xafb   :  { %v4905_v34 = vpop.permute.xlu1 %4904 }
 0xafc   :  { %v4924_v26 = vadd.f32 %v4905_v34, %v4840_v42 }
 0xafe   :  { %5585 = vst.msk [vmem:[%s10846_s2 + $0x530] sm:$0xff] %vm25_vm0, %v4924_v26 }

</bundles_post_ra>
